<compile_context>
chip_gen: v5e
topology: v5e:2x2
jax: 0.10.0
libtpu: 0.0.40
codegen_flags: <defaults>
</compile_context>

<pallas_src>
import functools

import jax
import jax.numpy as jnp
from jax import lax
from jax.experimental import pallas as pl
from jax.experimental.pallas import tpu as pltpu


def _ru(x, m):
    return (x + m - 1) // m * m


# ---------------------------------------------------------------------------
# Fused conv-as-GEMM + BatchNorm(train mode) + LeakyReLU kernel
# ---------------------------------------------------------------------------
def _conv_bn_lrelu_kernel(cols_ref, w_ref, g_ref, b_ref, o32_ref, o16_ref,
                          *, m_rows, eps, slope):
    # cols_ref: [Mp, Kp] bf16 (zero-padded rows/cols), w_ref: [Kp, TN] bf16
    # g_ref/b_ref: [1, TN] f32 (gamma/beta, zero on padded channels)
    x = jnp.dot(cols_ref[...], w_ref[...], preferred_element_type=jnp.float32)

    inv_m = 1.0 / m_rows                               # static python float
    mean = jnp.sum(x, axis=0, keepdims=True) * inv_m
    d = x - mean
    var = jnp.sum(d * d, axis=0, keepdims=True) * inv_m
    n_pad_rows = x.shape[0] - m_rows                   # static python int
    if n_pad_rows:
        # padded rows of `cols` are zero -> those x rows are zero -> each
        # contributed mean^2 to the centered sum; remove that bias.
        var = var - (n_pad_rows * inv_m) * mean * mean

    inv_std = lax.rsqrt(var + eps)                     # EUP
    scale = g_ref[...] * inv_std                       # per-channel, once
    shift = b_ref[...] - mean * scale
    y = x * scale + shift                              # 1 mul + 1 add / elem
    y = jnp.where(y >= 0, y, slope * y)                # LeakyReLU

    o32_ref[...] = y
    o16_ref[...] = y.astype(jnp.bfloat16)


def conv_bn_lrelu(cols, w, gamma, beta, m_rows, *, eps=1e-5, slope=0.2):
    """cols: [Mp, Kp] bf16, w: [Kp, Np] bf16, gamma/beta: [1, Np] f32.

    Returns (f32 activation [Mp, Np], bf16 activation [Mp, Np]).
    """
    Mp, Kp = cols.shape
    Kp2, Np = w.shape
    assert Kp == Kp2 and Mp % 8 == 0 and Np % 128 == 0
    TN = 128                                           # Cout tile -> parallel axis
    assert Np % TN == 0

    kernel = functools.partial(_conv_bn_lrelu_kernel,
                               m_rows=m_rows, eps=eps, slope=slope)
    # NOTE(v7x): the full-M block keeps batch stats in one pass; at much larger
    # batch*H*W this block must be re-tiled (two-pass stats) to fit 64 MiB VMEM.
    out32, out16 = pl.pallas_call(
        kernel,
        out_shape=(jax.ShapeDtypeStruct((Mp, Np), jnp.float32),
                   jax.ShapeDtypeStruct((Mp, Np), jnp.bfloat16)),
        grid=(Np // TN,),
        in_specs=[
            pl.BlockSpec((Mp, Kp), lambda j: (0, 0)),
            pl.BlockSpec((Kp, TN), lambda j: (0, j)),
            pl.BlockSpec((1, TN), lambda j: (0, j)),
            pl.BlockSpec((1, TN), lambda j: (0, j)),
        ],
        out_specs=(pl.BlockSpec((Mp, TN), lambda j: (0, j)),
                   pl.BlockSpec((Mp, TN), lambda j: (0, j))),
        compiler_params=pltpu.CompilerParams(dimension_semantics=("parallel",)),
    )(cols, w, gamma, beta)
    return out32, out16


# ---------------------------------------------------------------------------
# Fused global-average-pool + merged (fc_mu | fc_log_var) GEMM kernel
# ---------------------------------------------------------------------------
def _avgpool_fc_kernel(x_ref, w_ref, b_ref, o_ref, *, hw):
    # x_ref: [Np, HWp, C] f32 (zero-padded), w_ref: [C, 2C] bf16, b_ref: [1, 2C]
    z = jnp.sum(x_ref[...], axis=1) * (1.0 / hw)       # global average pool
    o_ref[...] = (
        jnp.dot(z.astype(jnp.bfloat16), w_ref[...],
                preferred_element_type=jnp.float32)
        + b_ref[...]
    )


def avgpool_fc(x, w, b):
    """x: [N, HW, C] f32 -> [N, Nout] f32 with Nout = w.shape[1]."""
    N, HW, C = x.shape
    C2, Nout = w.shape
    assert C == C2 and C % 128 == 0
    Np_, HWp = _ru(N, 8), _ru(HW, 8)
    if (Np_, HWp) != (N, HW):
        x = jnp.pad(x, ((0, Np_ - N), (0, HWp - HW), (0, 0)))
    kernel = functools.partial(_avgpool_fc_kernel, hw=float(HW))
    out = pl.pallas_call(
        kernel,
        out_shape=jax.ShapeDtypeStruct((Np_, Nout), jnp.float32),
        grid=(1,),
        in_specs=[
            pl.BlockSpec((Np_, HWp, C), lambda i: (0, 0, 0)),
            pl.BlockSpec((C, Nout), lambda i: (0, 0)),
            pl.BlockSpec((1, Nout), lambda i: (0, 0)),
        ],
        out_specs=pl.BlockSpec((Np_, Nout), lambda i: (0, 0)),
    )(x, w, b)
    return out[:N]


# ---------------------------------------------------------------------------
# Glue: im2col patch extraction (3x3, pad=1, arbitrary stride), NHWC
# ---------------------------------------------------------------------------
def im2col_3x3(x, stride):
    N, H, W, C = x.shape
    Ho = (H + 2 - 3) // stride + 1
    Wo = (W + 2 - 3) // stride + 1
    xp = jnp.pad(x, ((0, 0), (1, 1), (1, 1), (0, 0)))
    cols = []
    for dy in range(3):
        for dx in range(3):
            sl = xp[
                :,
                dy: dy + (Ho - 1) * stride + 1: stride,
                dx: dx + (Wo - 1) * stride + 1: stride,
                :,
            ]
            cols.append(sl)
    cols = jnp.stack(cols, axis=3)                     # [N, Ho, Wo, 9, C]
    return cols.reshape(N * Ho * Wo, 9 * C), (N, Ho, Wo)


# ---------------------------------------------------------------------------
# Parameters: deterministic synthetic init, pre-padded / pre-cast for the
# kernels (done once, NOT per forward pass).
# ---------------------------------------------------------------------------
def init_params(key, in_features=3, conv_dim=32):
    dims = [
        in_features,
        conv_dim, conv_dim * 2, conv_dim * 2, conv_dim * 4,
        conv_dim * 4, conv_dim * 8, conv_dim * 8,
    ]
    params = {}
    for i in range(7):
        cin, cout = dims[i], dims[i + 1]
        key, k1, k2, k3, k4 = jax.random.split(key, 5)
        w = 0.1 * jax.random.normal(k1, (3, 3, cin, cout), jnp.float32)
        _bias = 0.1 * jax.random.normal(k2, (cout,), jnp.float32)
        # conv bias is a provable no-op under training-mode BatchNorm (it is
        # subtracted back out with the batch mean), so it is folded/ignored.
        del _bias
        gamma = 1.0 + 0.1 * jax.random.normal(k3, (cout,), jnp.float32)
        beta = 0.1 * jax.random.normal(k4, (cout,), jnp.float32)

        cout_p = _ru(cout, 128)
        if i == 0:
            # Layer 1 consumes the raw (unpadded-channel) image: cols K = 9*cin,
            # zero-padding appended up to the next multiple of 128.
            w2d = w.reshape(9 * cin, cout)
            kp = _ru(9 * cin, 128)
            w2d = jnp.pad(w2d, ((0, kp - 9 * cin), (0, cout_p - cout)))
        else:
            # Later layers consume channel-padded activations; the channel
            # padding is interleaved per kernel tap, so pad cin BEFORE flatten.
            cin_p = _ru(cin, 128)
            w4 = jnp.pad(w, ((0, 0), (0, 0),
                             (0, cin_p - cin), (0, cout_p - cout)))
            w2d = w4.reshape(9 * cin_p, cout_p)
        params[f"conv{i+1}"] = (
            w2d.astype(jnp.bfloat16),
            jnp.pad(gamma.reshape(1, cout), ((0, 0), (0, cout_p - cout))),
            jnp.pad(beta.reshape(1, cout), ((0, 0), (0, cout_p - cout))),
        )

    # fc_mu and fc_log_var merged into one GEMM along the output dim.
    d = conv_dim * 8
    key, k1, k2, k3, k4 = jax.random.split(key, 5)
    w_mu = 0.1 * jax.random.normal(k1, (d, d), jnp.float32)   # stored [in, out]
    b_mu = 0.1 * jax.random.normal(k2, (d,), jnp.float32)
    w_lv = 0.1 * jax.random.normal(k3, (d, d), jnp.float32)
    b_lv = 0.1 * jax.random.normal(k4, (d,), jnp.float32)
    d_p = _ru(d, 128)
    w_cat = jnp.concatenate([w_mu, w_lv], axis=1)              # [d, 2d]
    w_cat = jnp.pad(w_cat, ((0, d_p - d), (0, 0))).astype(jnp.bfloat16)
    b_cat = jnp.concatenate([b_mu, b_lv]).reshape(1, 2 * d)
    params["fc_cat"] = (w_cat, b_cat)
    # NOTE: self.fc is defined in the PyTorch __init__ but never used in
    # forward -> omitted.
    out_channels = tuple(dims[1:])
    return params, out_channels


# ---------------------------------------------------------------------------
# Forward pass:  (fms [NCHW list of 7], z_mu, z_log_var)
# ---------------------------------------------------------------------------
def convnet_forward(x_nchw, params, *, out_channels, leaky=0.2):
    strides = (1, 2, 1, 2, 1, 2, 1)
    # NCHW -> NHWC; bf16 copy feeds the first GEMM.
    h16 = jnp.transpose(x_nchw, (0, 2, 3, 1)).astype(jnp.bfloat16)
    fms = []
    h32 = None
    for i in range(7):
        w, gamma, beta = params[f"conv{i+1}"]
        cols, (N, Ho, Wo) = im2col_3x3(h16, strides[i])
        M, K = cols.shape
        Kp = w.shape[0]
        Mp = _ru(M, 8)
        if (Mp, Kp) != (M, K):                         # only layer 1 pads (27->128)
            cols = jnp.pad(cols, ((0, Mp - M), (0, Kp - K)))

        h32_flat, h16_flat = conv_bn_lrelu(cols, w, gamma, beta, M, slope=leaky)
        if Mp != M:
            h32_flat = h32_flat[:M]
            h16_flat = h16_flat[:M]

        Cp = w.shape[1]
        C = out_channels[i]
        h32 = h32_flat.reshape(N, Ho, Wo, Cp)          # channel-padded, f32
        h16 = h16_flat.reshape(N, Ho, Wo, Cp)          # channel-padded, bf16
        fms.append(jnp.transpose(h32[..., :C], (0, 3, 1, 2)))  # NCHW output

    # Fused global average pool + merged fc_mu/fc_log_var GEMM.
    N, Ho, Wo, Cp = h32.shape
    w_cat, b_cat = params["fc_cat"]
    zcat = avgpool_fc(h32.reshape(N, Ho * Wo, Cp), w_cat, b_cat)
    D = out_channels[-1]
    z_mu = zcat[:, :D]
    z_log_var = zcat[:, D:2 * D]
    return fms, z_mu, z_log_var


if __name__ == "__main__":
    key = jax.random.PRNGKey(0)
    kx, kp = jax.random.split(key)
    x = jax.random.normal(kx, (2, 3, 16, 16), jnp.float32)     # NCHW like PyTorch
    params, out_channels = init_params(kp, in_features=3, conv_dim=32)

    fwd = jax.jit(functools.partial(convnet_forward,
                                    out_channels=out_channels, leaky=0.2))
    fms, z_mu, z_log_var = fwd(x, params)
    jax.block_until_ready((fms, z_mu, z_log_var))

    expected = [
        (2, 32, 16, 16),
        (2, 64, 8, 8),
        (2, 64, 8, 8),
        (2, 128, 4, 4),
        (2, 128, 4, 4),
        (2, 256, 2, 2),
        (2, 256, 2, 2),
    ]
    assert [tuple(f.shape) for f in fms] == expected
    assert z_mu.shape == (2, 256) and z_log_var.shape == (2, 256)
    assert all(bool(jnp.all(jnp.isfinite(f))) for f in fms)
    print("KERNEL_OK")
</pallas_src>

<mosaic_0001>
module attributes {stable_mosaic.version = 11 : i64} {
  func.func @_conv_bn_lrelu_kernel(%arg0: i32, %arg1: memref<512x128xbf16, #tpu.memory_space<vmem>>, %arg2: memref<128x128xbf16, #tpu.memory_space<vmem>>, %arg3: memref<1x128xf32, #tpu.memory_space<vmem>>, %arg4: memref<1x128xf32, #tpu.memory_space<vmem>>, %arg5: memref<512x128xf32, #tpu.memory_space<vmem>>, %arg6: memref<512x128xbf16, #tpu.memory_space<vmem>>) attributes {dimension_semantics = [#tpu.dimension_semantics<parallel>], iteration_bounds = array<i64: 1>, scalar_prefetch = 0 : i64, scratch_operands = 0 : i64, tpu.core_type = #tpu.core_type<tc>, window_params = [{pipeline_mode = #tpu.pipeline_mode<synchronous>, transform_indices = @transform_0, window_bounds = array<i64: 512, 128>}, {transform_indices = @transform_1, window_bounds = array<i64: 128, 128>}, {transform_indices = @transform_2, window_bounds = array<i64: 1, 128>}, {transform_indices = @transform_3, window_bounds = array<i64: 1, 128>}, {transform_indices = @transform_4, window_bounds = array<i64: 512, 128>}, {transform_indices = @transform_5, window_bounds = array<i64: 512, 128>}]} {
    %c0 = arith.constant 0 : index
    %c0_0 = arith.constant 0 : index
    %0 = vector.load %arg1[%c0, %c0_0] : memref<512x128xbf16, #tpu.memory_space<vmem>>, vector<512x128xbf16>
    %c0_1 = arith.constant 0 : index
    %c0_2 = arith.constant 0 : index
    %1 = vector.load %arg2[%c0_1, %c0_2] : memref<128x128xbf16, #tpu.memory_space<vmem>>, vector<128x128xbf16>
    %cst = arith.constant dense<0.000000e+00> : vector<512x128xf32>
    %2 = tpu.matmul %0, %1, %cst {dimension_numbers = #tpu.dot_dimension_numbers<[1], [0], [0], [1], [0, 0, 1, 1], [], []>} : vector<512x128xbf16>, vector<128x128xbf16>, vector<512x128xf32> -> vector<512x128xf32>
    %cst_3 = arith.constant dense<0.000000e+00> : vector<128xf32>
    %3 = vector.multi_reduction <add>, %2, %cst_3 [0] : vector<512x128xf32> to vector<128xf32>
    %4 = vector.shape_cast %3 : vector<128xf32> to vector<1x128xf32>
    %cst_4 = arith.constant 0.001953125 : f32
    %5 = vector.broadcast %cst_4 : f32 to vector<1x128xf32>
    %6 = arith.mulf %4, %5 : vector<1x128xf32>
    %7 = vector.broadcast %6 : vector<1x128xf32> to vector<512x128xf32>
    %8 = arith.subf %2, %7 : vector<512x128xf32>
    %9 = arith.mulf %8, %8 : vector<512x128xf32>
    %cst_5 = arith.constant dense<0.000000e+00> : vector<128xf32>
    %10 = vector.multi_reduction <add>, %9, %cst_5 [0] : vector<512x128xf32> to vector<128xf32>
    %11 = vector.shape_cast %10 : vector<128xf32> to vector<1x128xf32>
    %cst_6 = arith.constant 0.001953125 : f32
    %12 = vector.broadcast %cst_6 : f32 to vector<1x128xf32>
    %13 = arith.mulf %11, %12 : vector<1x128xf32>
    %cst_7 = arith.constant 9.99999974E-6 : f32
    %14 = vector.broadcast %cst_7 : f32 to vector<1x128xf32>
    %15 = arith.addf %13, %14 : vector<1x128xf32>
    %16 = math.rsqrt %15 : vector<1x128xf32>
    %c0_8 = arith.constant 0 : index
    %c0_9 = arith.constant 0 : index
    %17 = vector.load %arg3[%c0_8, %c0_9] : memref<1x128xf32, #tpu.memory_space<vmem>>, vector<1x128xf32>
    %18 = arith.mulf %17, %16 : vector<1x128xf32>
    %c0_10 = arith.constant 0 : index
    %c0_11 = arith.constant 0 : index
    %19 = vector.load %arg4[%c0_10, %c0_11] : memref<1x128xf32, #tpu.memory_space<vmem>>, vector<1x128xf32>
    %20 = arith.mulf %6, %18 : vector<1x128xf32>
    %21 = arith.subf %19, %20 : vector<1x128xf32>
    %22 = vector.broadcast %18 : vector<1x128xf32> to vector<512x128xf32>
    %23 = arith.mulf %2, %22 : vector<512x128xf32>
    %24 = vector.broadcast %21 : vector<1x128xf32> to vector<512x128xf32>
    %25 = arith.addf %23, %24 : vector<512x128xf32>
    %cst_12 = arith.constant 0.000000e+00 : f32
    %26 = vector.broadcast %cst_12 : f32 to vector<512x128xf32>
    %27 = arith.cmpf oge, %25, %26 : vector<512x128xf32>
    %cst_13 = arith.constant 2.000000e-01 : f32
    %28 = vector.broadcast %cst_13 : f32 to vector<512x128xf32>
    %29 = arith.mulf %28, %25 : vector<512x128xf32>
    %30 = arith.select %27, %25, %29 : vector<512x128xi1>, vector<512x128xf32>
    %c0_14 = arith.constant 0 : index
    %c0_15 = arith.constant 0 : index
    %31 = vector.load %arg5[%c0_14, %c0_15] : memref<512x128xf32, #tpu.memory_space<vmem>>, vector<512x128xf32>
    tpu.vector_store %arg5[%c0_14, %c0_15], %30 {strides = array<i32>} : memref<512x128xf32, #tpu.memory_space<vmem>>, vector<512x128xf32>,
    %32 = arith.truncf %30 : vector<512x128xf32> to vector<512x128xbf16>
    %c0_16 = arith.constant 0 : index
    %c0_17 = arith.constant 0 : index
    %33 = vector.load %arg6[%c0_16, %c0_17] : memref<512x128xbf16, #tpu.memory_space<vmem>>, vector<512x128xbf16>
    tpu.vector_store %arg6[%c0_16, %c0_17], %32 {strides = array<i32>} : memref<512x128xbf16, #tpu.memory_space<vmem>>, vector<512x128xbf16>,
    return
  }
  func.func @transform_0(%arg0: i32) -> (i32, i32) {
    %c0_i32 = arith.constant 0 : i32
    %c0_i32_0 = arith.constant 0 : i32
    %c0_i32_1 = arith.constant 0 : i32
    return %c0_i32, %c0_i32_0 : i32, i32
  }
  func.func @transform_1(%arg0: i32) -> (i32, i32) {
    %c0_i32 = arith.constant 0 : i32
    %c0_i32_0 = arith.constant 0 : i32
    return %c0_i32, %arg0 : i32, i32
  }
  func.func @transform_2(%arg0: i32) -> (i32, i32) {
    %c0_i32 = arith.constant 0 : i32
    %c0_i32_0 = arith.constant 0 : i32
    return %c0_i32, %arg0 : i32, i32
  }
  func.func @transform_3(%arg0: i32) -> (i32, i32) {
    %c0_i32 = arith.constant 0 : i32
    %c0_i32_0 = arith.constant 0 : i32
    return %c0_i32, %arg0 : i32, i32
  }
  func.func @transform_4(%arg0: i32) -> (i32, i32) {
    %c0_i32 = arith.constant 0 : i32
    %c0_i32_0 = arith.constant 0 : i32
    return %c0_i32, %arg0 : i32, i32
  }
  func.func @transform_5(%arg0: i32) -> (i32, i32) {
    %c0_i32 = arith.constant 0 : i32
    %c0_i32_0 = arith.constant 0 : i32
    return %c0_i32, %arg0 : i32, i32
  }
}

module attributes {stable_mosaic.version = 11 : i64} {
  func.func @_conv_bn_lrelu_kernel(%arg0: i32, %arg1: memref<128x1152xbf16, #tpu.memory_space<vmem>>, %arg2: memref<1152x128xbf16, #tpu.memory_space<vmem>>, %arg3: memref<1x128xf32, #tpu.memory_space<vmem>>, %arg4: memref<1x128xf32, #tpu.memory_space<vmem>>, %arg5: memref<128x128xf32, #tpu.memory_space<vmem>>, %arg6: memref<128x128xbf16, #tpu.memory_space<vmem>>) attributes {dimension_semantics = [#tpu.dimension_semantics<parallel>], iteration_bounds = array<i64: 1>, scalar_prefetch = 0 : i64, scratch_operands = 0 : i64, tpu.core_type = #tpu.core_type<tc>, window_params = [{pipeline_mode = #tpu.pipeline_mode<synchronous>, transform_indices = @transform_0, window_bounds = array<i64: 128, 1152>}, {transform_indices = @transform_1, window_bounds = array<i64: 1152, 128>}, {transform_indices = @transform_2, window_bounds = array<i64: 1, 128>}, {transform_indices = @transform_3, window_bounds = array<i64: 1, 128>}, {transform_indices = @transform_4, window_bounds = array<i64: 128, 128>}, {transform_indices = @transform_5, window_bounds = array<i64: 128, 128>}]} {
    %c0 = arith.constant 0 : index
    %c0_0 = arith.constant 0 : index
    %0 = vector.load %arg1[%c0, %c0_0] : memref<128x1152xbf16, #tpu.memory_space<vmem>>, vector<128x1152xbf16>
    %c0_1 = arith.constant 0 : index
    %c0_2 = arith.constant 0 : index
    %1 = vector.load %arg2[%c0_1, %c0_2] : memref<1152x128xbf16, #tpu.memory_space<vmem>>, vector<1152x128xbf16>
    %cst = arith.constant dense<0.000000e+00> : vector<128x128xf32>
    %2 = tpu.matmul %0, %1, %cst {dimension_numbers = #tpu.dot_dimension_numbers<[1], [0], [0], [1], [0, 0, 1, 1], [], []>} : vector<128x1152xbf16>, vector<1152x128xbf16>, vector<128x128xf32> -> vector<128x128xf32>
    %cst_3 = arith.constant dense<0.000000e+00> : vector<128xf32>
    %3 = vector.multi_reduction <add>, %2, %cst_3 [0] : vector<128x128xf32> to vector<128xf32>
    %4 = vector.shape_cast %3 : vector<128xf32> to vector<1x128xf32>
    %cst_4 = arith.constant 7.812500e-03 : f32
    %5 = vector.broadcast %cst_4 : f32 to vector<1x128xf32>
    %6 = arith.mulf %4, %5 : vector<1x128xf32>
    %7 = vector.broadcast %6 : vector<1x128xf32> to vector<128x128xf32>
    %8 = arith.subf %2, %7 : vector<128x128xf32>
    %9 = arith.mulf %8, %8 : vector<128x128xf32>
    %cst_5 = arith.constant dense<0.000000e+00> : vector<128xf32>
    %10 = vector.multi_reduction <add>, %9, %cst_5 [0] : vector<128x128xf32> to vector<128xf32>
    %11 = vector.shape_cast %10 : vector<128xf32> to vector<1x128xf32>
    %cst_6 = arith.constant 7.812500e-03 : f32
    %12 = vector.broadcast %cst_6 : f32 to vector<1x128xf32>
    %13 = arith.mulf %11, %12 : vector<1x128xf32>
    %cst_7 = arith.constant 9.99999974E-6 : f32
    %14 = vector.broadcast %cst_7 : f32 to vector<1x128xf32>
    %15 = arith.addf %13, %14 : vector<1x128xf32>
    %16 = math.rsqrt %15 : vector<1x128xf32>
    %c0_8 = arith.constant 0 : index
    %c0_9 = arith.constant 0 : index
    %17 = vector.load %arg3[%c0_8, %c0_9] : memref<1x128xf32, #tpu.memory_space<vmem>>, vector<1x128xf32>
    %18 = arith.mulf %17, %16 : vector<1x128xf32>
    %c0_10 = arith.constant 0 : index
    %c0_11 = arith.constant 0 : index
    %19 = vector.load %arg4[%c0_10, %c0_11] : memref<1x128xf32, #tpu.memory_space<vmem>>, vector<1x128xf32>
    %20 = arith.mulf %6, %18 : vector<1x128xf32>
    %21 = arith.subf %19, %20 : vector<1x128xf32>
    %22 = vector.broadcast %18 : vector<1x128xf32> to vector<128x128xf32>
    %23 = arith.mulf %2, %22 : vector<128x128xf32>
    %24 = vector.broadcast %21 : vector<1x128xf32> to vector<128x128xf32>
    %25 = arith.addf %23, %24 : vector<128x128xf32>
    %cst_12 = arith.constant 0.000000e+00 : f32
    %26 = vector.broadcast %cst_12 : f32 to vector<128x128xf32>
    %27 = arith.cmpf oge, %25, %26 : vector<128x128xf32>
    %cst_13 = arith.constant 2.000000e-01 : f32
    %28 = vector.broadcast %cst_13 : f32 to vector<128x128xf32>
    %29 = arith.mulf %28, %25 : vector<128x128xf32>
    %30 = arith.select %27, %25, %29 : vector<128x128xi1>, vector<128x128xf32>
    %c0_14 = arith.constant 0 : index
    %c0_15 = arith.constant 0 : index
    %31 = vector.load %arg5[%c0_14, %c0_15] : memref<128x128xf32, #tpu.memory_space<vmem>>, vector<128x128xf32>
    tpu.vector_store %arg5[%c0_14, %c0_15], %30 {strides = array<i32>} : memref<128x128xf32, #tpu.memory_space<vmem>>, vector<128x128xf32>,
    %32 = arith.truncf %30 : vector<128x128xf32> to vector<128x128xbf16>
    %c0_16 = arith.constant 0 : index
    %c0_17 = arith.constant 0 : index
    %33 = vector.load %arg6[%c0_16, %c0_17] : memref<128x128xbf16, #tpu.memory_space<vmem>>, vector<128x128xbf16>
    tpu.vector_store %arg6[%c0_16, %c0_17], %32 {strides = array<i32>} : memref<128x128xbf16, #tpu.memory_space<vmem>>, vector<128x128xbf16>,
    return
  }
  func.func @transform_0(%arg0: i32) -> (i32, i32) {
    %c0_i32 = arith.constant 0 : i32
    %c0_i32_0 = arith.constant 0 : i32
    %c0_i32_1 = arith.constant 0 : i32
    return %c0_i32, %c0_i32_0 : i32, i32
  }
  func.func @transform_1(%arg0: i32) -> (i32, i32) {
    %c0_i32 = arith.constant 0 : i32
    %c0_i32_0 = arith.constant 0 : i32
    return %c0_i32, %arg0 : i32, i32
  }
  func.func @transform_2(%arg0: i32) -> (i32, i32) {
    %c0_i32 = arith.constant 0 : i32
    %c0_i32_0 = arith.constant 0 : i32
    return %c0_i32, %arg0 : i32, i32
  }
  func.func @transform_3(%arg0: i32) -> (i32, i32) {
    %c0_i32 = arith.constant 0 : i32
    %c0_i32_0 = arith.constant 0 : i32
    return %c0_i32, %arg0 : i32, i32
  }
  func.func @transform_4(%arg0: i32) -> (i32, i32) {
    %c0_i32 = arith.constant 0 : i32
    %c0_i32_0 = arith.constant 0 : i32
    return %c0_i32, %arg0 : i32, i32
  }
  func.func @transform_5(%arg0: i32) -> (i32, i32) {
    %c0_i32 = arith.constant 0 : i32
    %c0_i32_0 = arith.constant 0 : i32
    return %c0_i32, %arg0 : i32, i32
  }
}

module attributes {stable_mosaic.version = 11 : i64} {
  func.func @_conv_bn_lrelu_kernel(%arg0: i32, %arg1: memref<32x1152xbf16, #tpu.memory_space<vmem>>, %arg2: memref<1152x128xbf16, #tpu.memory_space<vmem>>, %arg3: memref<1x128xf32, #tpu.memory_space<vmem>>, %arg4: memref<1x128xf32, #tpu.memory_space<vmem>>, %arg5: memref<32x128xf32, #tpu.memory_space<vmem>>, %arg6: memref<32x128xbf16, #tpu.memory_space<vmem>>) attributes {dimension_semantics = [#tpu.dimension_semantics<parallel>], iteration_bounds = array<i64: 1>, scalar_prefetch = 0 : i64, scratch_operands = 0 : i64, tpu.core_type = #tpu.core_type<tc>, window_params = [{pipeline_mode = #tpu.pipeline_mode<synchronous>, transform_indices = @transform_0, window_bounds = array<i64: 32, 1152>}, {transform_indices = @transform_1, window_bounds = array<i64: 1152, 128>}, {transform_indices = @transform_2, window_bounds = array<i64: 1, 128>}, {transform_indices = @transform_3, window_bounds = array<i64: 1, 128>}, {transform_indices = @transform_4, window_bounds = array<i64: 32, 128>}, {transform_indices = @transform_5, window_bounds = array<i64: 32, 128>}]} {
    %c0 = arith.constant 0 : index
    %c0_0 = arith.constant 0 : index
    %0 = vector.load %arg1[%c0, %c0_0] : memref<32x1152xbf16, #tpu.memory_space<vmem>>, vector<32x1152xbf16>
    %c0_1 = arith.constant 0 : index
    %c0_2 = arith.constant 0 : index
    %1 = vector.load %arg2[%c0_1, %c0_2] : memref<1152x128xbf16, #tpu.memory_space<vmem>>, vector<1152x128xbf16>
    %cst = arith.constant dense<0.000000e+00> : vector<32x128xf32>
    %2 = tpu.matmul %0, %1, %cst {dimension_numbers = #tpu.dot_dimension_numbers<[1], [0], [0], [1], [0, 0, 1, 1], [], []>} : vector<32x1152xbf16>, vector<1152x128xbf16>, vector<32x128xf32> -> vector<32x128xf32>
    %cst_3 = arith.constant dense<0.000000e+00> : vector<128xf32>
    %3 = vector.multi_reduction <add>, %2, %cst_3 [0] : vector<32x128xf32> to vector<128xf32>
    %4 = vector.shape_cast %3 : vector<128xf32> to vector<1x128xf32>
    %cst_4 = arith.constant 3.125000e-02 : f32
    %5 = vector.broadcast %cst_4 : f32 to vector<1x128xf32>
    %6 = arith.mulf %4, %5 : vector<1x128xf32>
    %7 = vector.broadcast %6 : vector<1x128xf32> to vector<32x128xf32>
    %8 = arith.subf %2, %7 : vector<32x128xf32>
    %9 = arith.mulf %8, %8 : vector<32x128xf32>
    %cst_5 = arith.constant dense<0.000000e+00> : vector<128xf32>
    %10 = vector.multi_reduction <add>, %9, %cst_5 [0] : vector<32x128xf32> to vector<128xf32>
    %11 = vector.shape_cast %10 : vector<128xf32> to vector<1x128xf32>
    %cst_6 = arith.constant 3.125000e-02 : f32
    %12 = vector.broadcast %cst_6 : f32 to vector<1x128xf32>
    %13 = arith.mulf %11, %12 : vector<1x128xf32>
    %cst_7 = arith.constant 9.99999974E-6 : f32
    %14 = vector.broadcast %cst_7 : f32 to vector<1x128xf32>
    %15 = arith.addf %13, %14 : vector<1x128xf32>
    %16 = math.rsqrt %15 : vector<1x128xf32>
    %c0_8 = arith.constant 0 : index
    %c0_9 = arith.constant 0 : index
    %17 = vector.load %arg3[%c0_8, %c0_9] : memref<1x128xf32, #tpu.memory_space<vmem>>, vector<1x128xf32>
    %18 = arith.mulf %17, %16 : vector<1x128xf32>
    %c0_10 = arith.constant 0 : index
    %c0_11 = arith.constant 0 : index
    %19 = vector.load %arg4[%c0_10, %c0_11] : memref<1x128xf32, #tpu.memory_space<vmem>>, vector<1x128xf32>
    %20 = arith.mulf %6, %18 : vector<1x128xf32>
    %21 = arith.subf %19, %20 : vector<1x128xf32>
    %22 = vector.broadcast %18 : vector<1x128xf32> to vector<32x128xf32>
    %23 = arith.mulf %2, %22 : vector<32x128xf32>
    %24 = vector.broadcast %21 : vector<1x128xf32> to vector<32x128xf32>
    %25 = arith.addf %23, %24 : vector<32x128xf32>
    %cst_12 = arith.constant 0.000000e+00 : f32
    %26 = vector.broadcast %cst_12 : f32 to vector<32x128xf32>
    %27 = arith.cmpf oge, %25, %26 : vector<32x128xf32>
    %cst_13 = arith.constant 2.000000e-01 : f32
    %28 = vector.broadcast %cst_13 : f32 to vector<32x128xf32>
    %29 = arith.mulf %28, %25 : vector<32x128xf32>
    %30 = arith.select %27, %25, %29 : vector<32x128xi1>, vector<32x128xf32>
    %c0_14 = arith.constant 0 : index
    %c0_15 = arith.constant 0 : index
    %31 = vector.load %arg5[%c0_14, %c0_15] : memref<32x128xf32, #tpu.memory_space<vmem>>, vector<32x128xf32>
    tpu.vector_store %arg5[%c0_14, %c0_15], %30 {strides = array<i32>} : memref<32x128xf32, #tpu.memory_space<vmem>>, vector<32x128xf32>,
    %32 = arith.truncf %30 : vector<32x128xf32> to vector<32x128xbf16>
    %c0_16 = arith.constant 0 : index
    %c0_17 = arith.constant 0 : index
    %33 = vector.load %arg6[%c0_16, %c0_17] : memref<32x128xbf16, #tpu.memory_space<vmem>>, vector<32x128xbf16>
    tpu.vector_store %arg6[%c0_16, %c0_17], %32 {strides = array<i32>} : memref<32x128xbf16, #tpu.memory_space<vmem>>, vector<32x128xbf16>,
    return
  }
  func.func @transform_0(%arg0: i32) -> (i32, i32) {
    %c0_i32 = arith.constant 0 : i32
    %c0_i32_0 = arith.constant 0 : i32
    %c0_i32_1 = arith.constant 0 : i32
    return %c0_i32, %c0_i32_0 : i32, i32
  }
  func.func @transform_1(%arg0: i32) -> (i32, i32) {
    %c0_i32 = arith.constant 0 : i32
    %c0_i32_0 = arith.constant 0 : i32
    return %c0_i32, %arg0 : i32, i32
  }
  func.func @transform_2(%arg0: i32) -> (i32, i32) {
    %c0_i32 = arith.constant 0 : i32
    %c0_i32_0 = arith.constant 0 : i32
    return %c0_i32, %arg0 : i32, i32
  }
  func.func @transform_3(%arg0: i32) -> (i32, i32) {
    %c0_i32 = arith.constant 0 : i32
    %c0_i32_0 = arith.constant 0 : i32
    return %c0_i32, %arg0 : i32, i32
  }
  func.func @transform_4(%arg0: i32) -> (i32, i32) {
    %c0_i32 = arith.constant 0 : i32
    %c0_i32_0 = arith.constant 0 : i32
    return %c0_i32, %arg0 : i32, i32
  }
  func.func @transform_5(%arg0: i32) -> (i32, i32) {
    %c0_i32 = arith.constant 0 : i32
    %c0_i32_0 = arith.constant 0 : i32
    return %c0_i32, %arg0 : i32, i32
  }
}

module attributes {stable_mosaic.version = 11 : i64} {
  func.func @_conv_bn_lrelu_kernel(%arg0: i32, %arg1: memref<8x1152xbf16, #tpu.memory_space<vmem>>, %arg2: memref<1152x128xbf16, #tpu.memory_space<vmem>>, %arg3: memref<1x128xf32, #tpu.memory_space<vmem>>, %arg4: memref<1x128xf32, #tpu.memory_space<vmem>>, %arg5: memref<8x128xf32, #tpu.memory_space<vmem>>, %arg6: memref<8x128xbf16, #tpu.memory_space<vmem>>) attributes {dimension_semantics = [#tpu.dimension_semantics<parallel>], iteration_bounds = array<i64: 2>, scalar_prefetch = 0 : i64, scratch_operands = 0 : i64, tpu.core_type = #tpu.core_type<tc>, window_params = [{pipeline_mode = #tpu.pipeline_mode<synchronous>, transform_indices = @transform_0, window_bounds = array<i64: 8, 1152>}, {transform_indices = @transform_1, window_bounds = array<i64: 1152, 128>}, {transform_indices = @transform_2, window_bounds = array<i64: 1, 128>}, {transform_indices = @transform_3, window_bounds = array<i64: 1, 128>}, {transform_indices = @transform_4, window_bounds = array<i64: 8, 128>}, {transform_indices = @transform_5, window_bounds = array<i64: 8, 128>}]} {
    %c0 = arith.constant 0 : index
    %c0_0 = arith.constant 0 : index
    %0 = vector.load %arg1[%c0, %c0_0] : memref<8x1152xbf16, #tpu.memory_space<vmem>>, vector<8x1152xbf16>
    %c0_1 = arith.constant 0 : index
    %c0_2 = arith.constant 0 : index
    %1 = vector.load %arg2[%c0_1, %c0_2] : memref<1152x128xbf16, #tpu.memory_space<vmem>>, vector<1152x128xbf16>
    %cst = arith.constant dense<0.000000e+00> : vector<8x128xf32>
    %2 = tpu.matmul %0, %1, %cst {dimension_numbers = #tpu.dot_dimension_numbers<[1], [0], [0], [1], [0, 0, 1, 1], [], []>} : vector<8x1152xbf16>, vector<1152x128xbf16>, vector<8x128xf32> -> vector<8x128xf32>
    %cst_3 = arith.constant dense<0.000000e+00> : vector<128xf32>
    %3 = vector.multi_reduction <add>, %2, %cst_3 [0] : vector<8x128xf32> to vector<128xf32>
    %4 = vector.shape_cast %3 : vector<128xf32> to vector<1x128xf32>
    %cst_4 = arith.constant 1.250000e-01 : f32
    %5 = vector.broadcast %cst_4 : f32 to vector<1x128xf32>
    %6 = arith.mulf %4, %5 : vector<1x128xf32>
    %7 = vector.broadcast %6 : vector<1x128xf32> to vector<8x128xf32>
    %8 = arith.subf %2, %7 : vector<8x128xf32>
    %9 = arith.mulf %8, %8 : vector<8x128xf32>
    %cst_5 = arith.constant dense<0.000000e+00> : vector<128xf32>
    %10 = vector.multi_reduction <add>, %9, %cst_5 [0] : vector<8x128xf32> to vector<128xf32>
    %11 = vector.shape_cast %10 : vector<128xf32> to vector<1x128xf32>
    %cst_6 = arith.constant 1.250000e-01 : f32
    %12 = vector.broadcast %cst_6 : f32 to vector<1x128xf32>
    %13 = arith.mulf %11, %12 : vector<1x128xf32>
    %cst_7 = arith.constant 9.99999974E-6 : f32
    %14 = vector.broadcast %cst_7 : f32 to vector<1x128xf32>
    %15 = arith.addf %13, %14 : vector<1x128xf32>
    %16 = math.rsqrt %15 : vector<1x128xf32>
    %c0_8 = arith.constant 0 : index
    %c0_9 = arith.constant 0 : index
    %17 = vector.load %arg3[%c0_8, %c0_9] : memref<1x128xf32, #tpu.memory_space<vmem>>, vector<1x128xf32>
    %18 = arith.mulf %17, %16 : vector<1x128xf32>
    %c0_10 = arith.constant 0 : index
    %c0_11 = arith.constant 0 : index
    %19 = vector.load %arg4[%c0_10, %c0_11] : memref<1x128xf32, #tpu.memory_space<vmem>>, vector<1x128xf32>
    %20 = arith.mulf %6, %18 : vector<1x128xf32>
    %21 = arith.subf %19, %20 : vector<1x128xf32>
    %22 = vector.broadcast %18 : vector<1x128xf32> to vector<8x128xf32>
    %23 = arith.mulf %2, %22 : vector<8x128xf32>
    %24 = vector.broadcast %21 : vector<1x128xf32> to vector<8x128xf32>
    %25 = arith.addf %23, %24 : vector<8x128xf32>
    %cst_12 = arith.constant 0.000000e+00 : f32
    %26 = vector.broadcast %cst_12 : f32 to vector<8x128xf32>
    %27 = arith.cmpf oge, %25, %26 : vector<8x128xf32>
    %cst_13 = arith.constant 2.000000e-01 : f32
    %28 = vector.broadcast %cst_13 : f32 to vector<8x128xf32>
    %29 = arith.mulf %28, %25 : vector<8x128xf32>
    %30 = arith.select %27, %25, %29 : vector<8x128xi1>, vector<8x128xf32>
    %c0_14 = arith.constant 0 : index
    %c0_15 = arith.constant 0 : index
    %31 = vector.load %arg5[%c0_14, %c0_15] : memref<8x128xf32, #tpu.memory_space<vmem>>, vector<8x128xf32>
    tpu.vector_store %arg5[%c0_14, %c0_15], %30 {strides = array<i32>} : memref<8x128xf32, #tpu.memory_space<vmem>>, vector<8x128xf32>,
    %32 = arith.truncf %30 : vector<8x128xf32> to vector<8x128xbf16>
    %c0_16 = arith.constant 0 : index
    %c0_17 = arith.constant 0 : index
    %33 = vector.load %arg6[%c0_16, %c0_17] : memref<8x128xbf16, #tpu.memory_space<vmem>>, vector<8x128xbf16>
    tpu.vector_store %arg6[%c0_16, %c0_17], %32 {strides = array<i32>} : memref<8x128xbf16, #tpu.memory_space<vmem>>, vector<8x128xbf16>,
    return
  }
  func.func @transform_0(%arg0: i32) -> (i32, i32) {
    %c0_i32 = arith.constant 0 : i32
    %c0_i32_0 = arith.constant 0 : i32
    %c0_i32_1 = arith.constant 0 : i32
    return %c0_i32, %c0_i32_0 : i32, i32
  }
  func.func @transform_1(%arg0: i32) -> (i32, i32) {
    %c0_i32 = arith.constant 0 : i32
    %c0_i32_0 = arith.constant 0 : i32
    return %c0_i32, %arg0 : i32, i32
  }
  func.func @transform_2(%arg0: i32) -> (i32, i32) {
    %c0_i32 = arith.constant 0 : i32
    %c0_i32_0 = arith.constant 0 : i32
    return %c0_i32, %arg0 : i32, i32
  }
  func.func @transform_3(%arg0: i32) -> (i32, i32) {
    %c0_i32 = arith.constant 0 : i32
    %c0_i32_0 = arith.constant 0 : i32
    return %c0_i32, %arg0 : i32, i32
  }
  func.func @transform_4(%arg0: i32) -> (i32, i32) {
    %c0_i32 = arith.constant 0 : i32
    %c0_i32_0 = arith.constant 0 : i32
    return %c0_i32, %arg0 : i32, i32
  }
  func.func @transform_5(%arg0: i32) -> (i32, i32) {
    %c0_i32 = arith.constant 0 : i32
    %c0_i32_0 = arith.constant 0 : i32
    return %c0_i32, %arg0 : i32, i32
  }
}

module attributes {stable_mosaic.version = 11 : i64} {
  func.func @_conv_bn_lrelu_kernel(%arg0: i32, %arg1: memref<8x2304xbf16, #tpu.memory_space<vmem>>, %arg2: memref<2304x128xbf16, #tpu.memory_space<vmem>>, %arg3: memref<1x128xf32, #tpu.memory_space<vmem>>, %arg4: memref<1x128xf32, #tpu.memory_space<vmem>>, %arg5: memref<8x128xf32, #tpu.memory_space<vmem>>, %arg6: memref<8x128xbf16, #tpu.memory_space<vmem>>) attributes {dimension_semantics = [#tpu.dimension_semantics<parallel>], iteration_bounds = array<i64: 2>, scalar_prefetch = 0 : i64, scratch_operands = 0 : i64, tpu.core_type = #tpu.core_type<tc>, window_params = [{pipeline_mode = #tpu.pipeline_mode<synchronous>, transform_indices = @transform_0, window_bounds = array<i64: 8, 2304>}, {transform_indices = @transform_1, window_bounds = array<i64: 2304, 128>}, {transform_indices = @transform_2, window_bounds = array<i64: 1, 128>}, {transform_indices = @transform_3, window_bounds = array<i64: 1, 128>}, {transform_indices = @transform_4, window_bounds = array<i64: 8, 128>}, {transform_indices = @transform_5, window_bounds = array<i64: 8, 128>}]} {
    %c0 = arith.constant 0 : index
    %c0_0 = arith.constant 0 : index
    %0 = vector.load %arg1[%c0, %c0_0] : memref<8x2304xbf16, #tpu.memory_space<vmem>>, vector<8x2304xbf16>
    %c0_1 = arith.constant 0 : index
    %c0_2 = arith.constant 0 : index
    %1 = vector.load %arg2[%c0_1, %c0_2] : memref<2304x128xbf16, #tpu.memory_space<vmem>>, vector<2304x128xbf16>
    %cst = arith.constant dense<0.000000e+00> : vector<8x128xf32>
    %2 = tpu.matmul %0, %1, %cst {dimension_numbers = #tpu.dot_dimension_numbers<[1], [0], [0], [1], [0, 0, 1, 1], [], []>} : vector<8x2304xbf16>, vector<2304x128xbf16>, vector<8x128xf32> -> vector<8x128xf32>
    %cst_3 = arith.constant dense<0.000000e+00> : vector<128xf32>
    %3 = vector.multi_reduction <add>, %2, %cst_3 [0] : vector<8x128xf32> to vector<128xf32>
    %4 = vector.shape_cast %3 : vector<128xf32> to vector<1x128xf32>
    %cst_4 = arith.constant 1.250000e-01 : f32
    %5 = vector.broadcast %cst_4 : f32 to vector<1x128xf32>
    %6 = arith.mulf %4, %5 : vector<1x128xf32>
    %7 = vector.broadcast %6 : vector<1x128xf32> to vector<8x128xf32>
    %8 = arith.subf %2, %7 : vector<8x128xf32>
    %9 = arith.mulf %8, %8 : vector<8x128xf32>
    %cst_5 = arith.constant dense<0.000000e+00> : vector<128xf32>
    %10 = vector.multi_reduction <add>, %9, %cst_5 [0] : vector<8x128xf32> to vector<128xf32>
    %11 = vector.shape_cast %10 : vector<128xf32> to vector<1x128xf32>
    %cst_6 = arith.constant 1.250000e-01 : f32
    %12 = vector.broadcast %cst_6 : f32 to vector<1x128xf32>
    %13 = arith.mulf %11, %12 : vector<1x128xf32>
    %cst_7 = arith.constant 9.99999974E-6 : f32
    %14 = vector.broadcast %cst_7 : f32 to vector<1x128xf32>
    %15 = arith.addf %13, %14 : vector<1x128xf32>
    %16 = math.rsqrt %15 : vector<1x128xf32>
    %c0_8 = arith.constant 0 : index
    %c0_9 = arith.constant 0 : index
    %17 = vector.load %arg3[%c0_8, %c0_9] : memref<1x128xf32, #tpu.memory_space<vmem>>, vector<1x128xf32>
    %18 = arith.mulf %17, %16 : vector<1x128xf32>
    %c0_10 = arith.constant 0 : index
    %c0_11 = arith.constant 0 : index
    %19 = vector.load %arg4[%c0_10, %c0_11] : memref<1x128xf32, #tpu.memory_space<vmem>>, vector<1x128xf32>
    %20 = arith.mulf %6, %18 : vector<1x128xf32>
    %21 = arith.subf %19, %20 : vector<1x128xf32>
    %22 = vector.broadcast %18 : vector<1x128xf32> to vector<8x128xf32>
    %23 = arith.mulf %2, %22 : vector<8x128xf32>
    %24 = vector.broadcast %21 : vector<1x128xf32> to vector<8x128xf32>
    %25 = arith.addf %23, %24 : vector<8x128xf32>
    %cst_12 = arith.constant 0.000000e+00 : f32
    %26 = vector.broadcast %cst_12 : f32 to vector<8x128xf32>
    %27 = arith.cmpf oge, %25, %26 : vector<8x128xf32>
    %cst_13 = arith.constant 2.000000e-01 : f32
    %28 = vector.broadcast %cst_13 : f32 to vector<8x128xf32>
    %29 = arith.mulf %28, %25 : vector<8x128xf32>
    %30 = arith.select %27, %25, %29 : vector<8x128xi1>, vector<8x128xf32>
    %c0_14 = arith.constant 0 : index
    %c0_15 = arith.constant 0 : index
    %31 = vector.load %arg5[%c0_14, %c0_15] : memref<8x128xf32, #tpu.memory_space<vmem>>, vector<8x128xf32>
    tpu.vector_store %arg5[%c0_14, %c0_15], %30 {strides = array<i32>} : memref<8x128xf32, #tpu.memory_space<vmem>>, vector<8x128xf32>,
    %32 = arith.truncf %30 : vector<8x128xf32> to vector<8x128xbf16>
    %c0_16 = arith.constant 0 : index
    %c0_17 = arith.constant 0 : index
    %33 = vector.load %arg6[%c0_16, %c0_17] : memref<8x128xbf16, #tpu.memory_space<vmem>>, vector<8x128xbf16>
    tpu.vector_store %arg6[%c0_16, %c0_17], %32 {strides = array<i32>} : memref<8x128xbf16, #tpu.memory_space<vmem>>, vector<8x128xbf16>,
    return
  }
  func.func @transform_0(%arg0: i32) -> (i32, i32) {
    %c0_i32 = arith.constant 0 : i32
    %c0_i32_0 = arith.constant 0 : i32
    %c0_i32_1 = arith.constant 0 : i32
    return %c0_i32, %c0_i32_0 : i32, i32
  }
  func.func @transform_1(%arg0: i32) -> (i32, i32) {
    %c0_i32 = arith.constant 0 : i32
    %c0_i32_0 = arith.constant 0 : i32
    return %c0_i32, %arg0 : i32, i32
  }
  func.func @transform_2(%arg0: i32) -> (i32, i32) {
    %c0_i32 = arith.constant 0 : i32
    %c0_i32_0 = arith.constant 0 : i32
    return %c0_i32, %arg0 : i32, i32
  }
  func.func @transform_3(%arg0: i32) -> (i32, i32) {
    %c0_i32 = arith.constant 0 : i32
    %c0_i32_0 = arith.constant 0 : i32
    return %c0_i32, %arg0 : i32, i32
  }
  func.func @transform_4(%arg0: i32) -> (i32, i32) {
    %c0_i32 = arith.constant 0 : i32
    %c0_i32_0 = arith.constant 0 : i32
    return %c0_i32, %arg0 : i32, i32
  }
  func.func @transform_5(%arg0: i32) -> (i32, i32) {
    %c0_i32 = arith.constant 0 : i32
    %c0_i32_0 = arith.constant 0 : i32
    return %c0_i32, %arg0 : i32, i32
  }
}

module attributes {stable_mosaic.version = 11 : i64} {
  func.func @_avgpool_fc_kernel(%arg0: i32, %arg1: memref<8x8x256xf32, #tpu.memory_space<vmem>>, %arg2: memref<256x512xbf16, #tpu.memory_space<vmem>>, %arg3: memref<1x512xf32, #tpu.memory_space<vmem>>, %arg4: memref<8x512xf32, #tpu.memory_space<vmem>>) attributes {dimension_semantics = [#tpu.dimension_semantics<arbitrary>], iteration_bounds = array<i64: 1>, scalar_prefetch = 0 : i64, scratch_operands = 0 : i64, tpu.core_type = #tpu.core_type<tc>, window_params = [{pipeline_mode = #tpu.pipeline_mode<synchronous>, transform_indices = @transform_0, window_bounds = array<i64: 8, 8, 256>}, {pipeline_mode = #tpu.pipeline_mode<synchronous>, transform_indices = @transform_1, window_bounds = array<i64: 256, 512>}, {pipeline_mode = #tpu.pipeline_mode<synchronous>, transform_indices = @transform_2, window_bounds = array<i64: 1, 512>}, {pipeline_mode = #tpu.pipeline_mode<synchronous>, transform_indices = @transform_3, window_bounds = array<i64: 8, 512>}]} {
    %c0 = arith.constant 0 : index
    %c0_0 = arith.constant 0 : index
    %c0_1 = arith.constant 0 : index
    %0 = vector.load %arg1[%c0, %c0_0, %c0_1] : memref<8x8x256xf32, #tpu.memory_space<vmem>>, vector<8x8x256xf32>
    %cst = arith.constant dense<0.000000e+00> : vector<8x256xf32>
    %1 = vector.multi_reduction <add>, %0, %cst [1] : vector<8x8x256xf32> to vector<8x256xf32>
    %cst_2 = arith.constant 2.500000e-01 : f32
    %2 = vector.broadcast %cst_2 : f32 to vector<8x256xf32>
    %3 = arith.mulf %1, %2 : vector<8x256xf32>
    %4 = arith.truncf %3 : vector<8x256xf32> to vector<8x256xbf16>
    %c0_3 = arith.constant 0 : index
    %c0_4 = arith.constant 0 : index
    %5 = vector.load %arg2[%c0_3, %c0_4] : memref<256x512xbf16, #tpu.memory_space<vmem>>, vector<256x512xbf16>
    %cst_5 = arith.constant dense<0.000000e+00> : vector<8x512xf32>
    %6 = tpu.matmul %4, %5, %cst_5 {dimension_numbers = #tpu.dot_dimension_numbers<[1], [0], [0], [1], [0, 0, 1, 1], [], []>} : vector<8x256xbf16>, vector<256x512xbf16>, vector<8x512xf32> -> vector<8x512xf32>
    %c0_6 = arith.constant 0 : index
    %c0_7 = arith.constant 0 : index
    %7 = vector.load %arg3[%c0_6, %c0_7] : memref<1x512xf32, #tpu.memory_space<vmem>>, vector<1x512xf32>
    %8 = vector.broadcast %7 : vector<1x512xf32> to vector<8x512xf32>
    %9 = arith.addf %6, %8 : vector<8x512xf32>
    %c0_8 = arith.constant 0 : index
    %c0_9 = arith.constant 0 : index
    %10 = vector.load %arg4[%c0_8, %c0_9] : memref<8x512xf32, #tpu.memory_space<vmem>>, vector<8x512xf32>
    tpu.vector_store %arg4[%c0_8, %c0_9], %9 {strides = array<i32>} : memref<8x512xf32, #tpu.memory_space<vmem>>, vector<8x512xf32>,
    return
  }
  func.func @transform_0(%arg0: i32) -> (i32, i32, i32) {
    %c0_i32 = arith.constant 0 : i32
    %c0_i32_0 = arith.constant 0 : i32
    %c0_i32_1 = arith.constant 0 : i32
    %c0_i32_2 = arith.constant 0 : i32
    return %c0_i32, %c0_i32_0, %c0_i32_1 : i32, i32, i32
  }
  func.func @transform_1(%arg0: i32) -> (i32, i32) {
    %c0_i32 = arith.constant 0 : i32
    %c0_i32_0 = arith.constant 0 : i32
    %c0_i32_1 = arith.constant 0 : i32
    return %c0_i32, %c0_i32_0 : i32, i32
  }
  func.func @transform_2(%arg0: i32) -> (i32, i32) {
    %c0_i32 = arith.constant 0 : i32
    %c0_i32_0 = arith.constant 0 : i32
    %c0_i32_1 = arith.constant 0 : i32
    return %c0_i32, %c0_i32_0 : i32, i32
  }
  func.func @transform_3(%arg0: i32) -> (i32, i32) {
    %c0_i32 = arith.constant 0 : i32
    %c0_i32_0 = arith.constant 0 : i32
    %c0_i32_1 = arith.constant 0 : i32
    return %c0_i32, %c0_i32_0 : i32, i32
  }
}

</mosaic_0001>

<bundles_post_ra>
// kernel: convnet_forward.8
= control target key start
LH: loop header
LB: loop body
LE: loop exit
PB: predicated region body
PF: predicated region fallthrough
CT: control target
= control target key end

     0   :  { %s3213_s1 = inlined_call_operand.vmem [shape: bf16[128,128], index: 1, kind: input, shape index: {}]   ;;  %s3214_s0 = inlined_call_operand.vmem [shape: bf16[512,128], index: 0, kind: input, shape index: {}]   ;;  %s3215_s2 = inlined_call_operand.vmem [shape: f32[1,128], index: 2, kind: input, shape index: {}]   ;;  %s3216_s3 = inlined_call_operand.vmem [shape: f32[1,128], index: 3, kind: input, shape index: {}]   ;;  %s3217_s4 = inlined_call_operand.vmem [shape: f32[512,128], index: 4, kind: output, shape index: {0}]   ;;  %s3218_s5 = inlined_call_operand.vmem [shape: bf16[512,128], index: 5, kind: output, shape index: {1}]  }
   0x1   :  { %v1517_v0 = vld [vmem:[%s3213_s1 + $0x38] sm:$0xff]  ;;  %v1516_v1 = vld [vmem:[%s3213_s1 + $0x30] sm:$0xff]  ;;  %v1515_v2 = vld [vmem:[%s3213_s1 + $0x28] sm:$0xff] }
   0x2   :  { %339 = vmatpush.bf16.msra.mxu0 %v1517_v0  ;;  %1709 = vmatpush.bf16.msra.mxu1 %v1517_v0  ;;  %v1514_v3 = vld [vmem:[%s3213_s1 + $0x20] sm:$0xff]  ;;  %v1513_v4 = vld [vmem:[%s3213_s1 + $0x18] sm:$0xff]  ;;  %v1512_v5 = vld [vmem:[%s3213_s1 + $0x10] sm:$0xff] }
   0x3   :  { %1710 = vmatpush.bf16.msra.mxu2 %v1517_v0  ;;  %1711 = vmatpush.bf16.msra.mxu3 %v1517_v0  ;;  %v1511_v6 = vld [vmem:[%s3213_s1 + $0x8] sm:$0xff]  ;;  %v1510_v7 = vld [vmem:[%s3213_s1] sm:$0xff]  ;;  %v1480_v13 = vld [vmem:[%s3214_s0 + $0x10] sm:$0xff] }
   0x4   :  { %v1478_v8 = vld [vmem:[%s3214_s0] sm:$0xff]  ;;  %v1479_v10 = vld [vmem:[%s3214_s0 + $0x8] sm:$0xff]  ;;  %v1488_v14 = vld [vmem:[%s3214_s0 + $0x50] sm:$0xff] }
   0x5   :  { %v1486_v9 = vld [vmem:[%s3214_s0 + $0x40] sm:$0xff]  ;;  %v1487_v11 = vld [vmem:[%s3214_s0 + $0x48] sm:$0xff]  ;;  %v1481_v16 = vld [vmem:[%s3214_s0 + $0x18] sm:$0xff] }
   0x6   :  { %340 = vmatpush.bf16.msra.mxu0 %v1516_v1  ;;  %1712 = vmatpush.bf16.msra.mxu1 %v1516_v1  ;;  %v1494_v12 = vld [vmem:[%s3214_s0 + $0x80] sm:$0xff]  ;;  %v1495_v15 = vld [vmem:[%s3214_s0 + $0x88] sm:$0xff]  ;;  %v1489_v17 = vld [vmem:[%s3214_s0 + $0x58] sm:$0xff] }
   0x7   :  { %1713 = vmatpush.bf16.msra.mxu2 %v1516_v1  ;;  %1714 = vmatpush.bf16.msra.mxu3 %v1516_v1  ;;  %v1496_v18 = vld [vmem:[%s3214_s0 + $0x90] sm:$0xff]  ;;  %v1502_v19 = vld [vmem:[%s3214_s0 + $0xc0] sm:$0xff]  ;;  %v1497_v22 = vld [vmem:[%s3214_s0 + $0x98] sm:$0xff] }
   0x8   :  { %v1482_v20 = vld [vmem:[%s3214_s0 + $0x20] sm:$0xff]  ;;  %v1503_v23 = vld [vmem:[%s3214_s0 + $0xc8] sm:$0xff]  ;;  %v1504_v27 = vld [vmem:[%s3214_s0 + $0xd0] sm:$0xff] }
   0x9   :  { %v1490_v21 = vld [vmem:[%s3214_s0 + $0x60] sm:$0xff]  ;;  %v1483_v24 = vld [vmem:[%s3214_s0 + $0x28] sm:$0xff]  ;;  %v1484_v28 = vld [vmem:[%s3214_s0 + $0x30] sm:$0xff] }
   0xa   :  { %341 = vmatpush.bf16.msra.mxu0 %v1515_v2  ;;  %1715 = vmatpush.bf16.msra.mxu1 %v1515_v2  ;;  %v1491_v25 = vld [vmem:[%s3214_s0 + $0x68] sm:$0xff]  ;;  %v1498_v26 = vld [vmem:[%s3214_s0 + $0xa0] sm:$0xff]  ;;  %v1492_v29 = vld [vmem:[%s3214_s0 + $0x70] sm:$0xff] }
   0xb   :  { %1716 = vmatpush.bf16.msra.mxu2 %v1515_v2  ;;  %1717 = vmatpush.bf16.msra.mxu3 %v1515_v2  ;;  %v1499_v30 = vld [vmem:[%s3214_s0 + $0xa8] sm:$0xff]  ;;  %v1505_v31 = vld [vmem:[%s3214_s0 + $0xd8] sm:$0xff]  ;;  %v1500_v34 = vld [vmem:[%s3214_s0 + $0xb0] sm:$0xff] }
   0xc   :  { %v1485_v32 = vld [vmem:[%s3214_s0 + $0x38] sm:$0xff]  ;;  %v1506_v35 = vld [vmem:[%s3214_s0 + $0xe0] sm:$0xff]  ;;  %v1507_v38 = vld [vmem:[%s3214_s0 + $0xe8] sm:$0xff] }
   0xd   :  { %v1493_v33 = vld [vmem:[%s3214_s0 + $0x78] sm:$0xff]  ;;  %v1508_v43 = vld [vmem:[%s3214_s0 + $0xf0] sm:$0xff] }
   0xe   :  { %342 = vmatpush.bf16.msra.mxu0 %v1514_v3  ;;  %1718 = vmatpush.bf16.msra.mxu1 %v1514_v3  ;;  %v1501_v37 = vld [vmem:[%s3214_s0 + $0xb8] sm:$0xff] }
   0xf   :  { %1719 = vmatpush.bf16.msra.mxu2 %v1514_v3  ;;  %1720 = vmatpush.bf16.msra.mxu3 %v1514_v3  ;;  %v1509_v49 = vld [vmem:[%s3214_s0 + $0xf8] sm:$0xff] }
  0x12   :  { %343 = vmatpush.bf16.msra.mxu0 %v1513_v4  ;;  %1721 = vmatpush.bf16.msra.mxu1 %v1513_v4 }
  0x13   :  { %1722 = vmatpush.bf16.msra.mxu2 %v1513_v4  ;;  %1723 = vmatpush.bf16.msra.mxu3 %v1513_v4 }
  0x16   :  { %344 = vmatpush.bf16.msra.mxu0 %v1512_v5  ;;  %1724 = vmatpush.bf16.msra.mxu1 %v1512_v5 }
  0x17   :  { %1725 = vmatpush.bf16.msra.mxu2 %v1512_v5  ;;  %1726 = vmatpush.bf16.msra.mxu3 %v1512_v5 }
  0x1a   :  { %345 = vmatpush.bf16.msra.mxu0 %v1511_v6  ;;  %1727 = vmatpush.bf16.msra.mxu1 %v1511_v6 }
  0x1b   :  { %1728 = vmatpush.bf16.msra.mxu2 %v1511_v6  ;;  %1729 = vmatpush.bf16.msra.mxu3 %v1511_v6 }
  0x1e   :  { %346 = vmatpush.bf16.msra.mxu0 %v1510_v7  ;;  %1730 = vmatpush.bf16.msra.mxu1 %v1510_v7 }
  0x1f   :  { %1731 = vmatpush.bf16.msra.mxu2 %v1510_v7  ;;  %1732 = vmatpush.bf16.msra.mxu3 %v1510_v7 }
  0x21   :  { %347 = vmatmul.bf16.vlgmr.msra.gmra.mxu0 %v1478_v8  ;;  %387 = vmatmul.bf16.vlgmr.msra.gmra.mxu1 %v1486_v9 }
  0x22   :  { %427 = vmatmul.bf16.vlgmr.msra.gmra.mxu2 %v1494_v12  ;;  %467 = vmatmul.bf16.vlgmr.msra.gmra.mxu3 %v1502_v19 }
  0x31   :  { %352 = vmatmul.bf16.gmra.mxu0 %v1479_v10  ;;  %392 = vmatmul.bf16.gmra.mxu1 %v1487_v11 }
  0x32   :  { %432 = vmatmul.bf16.gmra.mxu2 %v1495_v15  ;;  %472 = vmatmul.bf16.gmra.mxu3 %v1503_v23 }
  0x41   :  { %357 = vmatmul.bf16.gmra.mxu0 %v1480_v13  ;;  %397 = vmatmul.bf16.gmra.mxu1 %v1488_v14 }
  0x42   :  { %437 = vmatmul.bf16.gmra.mxu2 %v1496_v18  ;;  %477 = vmatmul.bf16.gmra.mxu3 %v1504_v27 }
  0x51   :  { %362 = vmatmul.bf16.gmra.mxu0 %v1481_v16  ;;  %402 = vmatmul.bf16.gmra.mxu1 %v1489_v17 }
  0x52   :  { %442 = vmatmul.bf16.gmra.mxu2 %v1497_v22  ;;  %482 = vmatmul.bf16.gmra.mxu3 %v1505_v31 }
  0x61   :  { %367 = vmatmul.bf16.gmra.mxu0 %v1482_v20  ;;  %407 = vmatmul.bf16.gmra.mxu1 %v1490_v21 }
  0x62   :  { %447 = vmatmul.bf16.gmra.mxu2 %v1498_v26  ;;  %487 = vmatmul.bf16.gmra.mxu3 %v1506_v35 }
  0x71   :  { %372 = vmatmul.bf16.gmra.mxu0 %v1483_v24  ;;  %412 = vmatmul.bf16.gmra.mxu1 %v1491_v25 }
  0x72   :  { %452 = vmatmul.bf16.gmra.mxu2 %v1499_v30  ;;  %492 = vmatmul.bf16.gmra.mxu3 %v1507_v38 }
  0x81   :  { %377 = vmatmul.bf16.gmra.mxu0 %v1484_v28  ;;  %417 = vmatmul.bf16.gmra.mxu1 %v1492_v29 }
  0x82   :  { %457 = vmatmul.bf16.gmra.mxu2 %v1500_v34  ;;  %497 = vmatmul.bf16.gmra.mxu3 %v1508_v43 }
  0x91   :  { %382 = vmatmul.bf16.gmra.mxu0 %v1485_v32  ;;  %422 = vmatmul.bf16.gmra.mxu1 %v1493_v33 }
  0x92   :  { %462 = vmatmul.bf16.gmra.mxu2 %v1501_v37  ;;  %502 = vmatmul.bf16.gmra.mxu3 %v1509_v49 }
  0x9e   :  { %v1873_v36 = vpop.f32.mrf.mxu0  ;;  %v1881_v39 = vpop.f32.mrf.mxu1 }
  0xa5   :  { %v1900_v48 = vpop.f32.mrf.mxu2  ;;  %v1931_v63 = vpop.f32.mrf.mxu3 }
  0xa6   :  { %v1883_v40 = vpop.f32.mrf.mxu0  ;;  %v1885_v41 = vpop.f32.mrf.mxu1  ;;  %3297 = vst [vmem:[#allocation6_spill] sm:$0xff] %v1900_v48 }
  0xa7   :  { %3293 = vst [vmem:[#allocation2_spill] sm:$0xff] %v1883_v40  ;;  %v508_v6 = vadd.f32 %v1883_v40, %v1873_v36 }
  0xad   :  { %v1909_v52 = vpop.f32.mrf.mxu2  ;;  %v1939_v3 = vpop.f32.mrf.mxu3 }
  0xae   :  { %v1887_v42 = vpop.f32.mrf.mxu0  ;;  %v1892_v44 = vpop.f32.mrf.mxu1  ;;  %3298 = vst [vmem:[#allocation7_spill] sm:$0xff] %v1909_v52 }
  0xaf   :  { %3294 = vst [vmem:[#allocation3_spill] sm:$0xff] %v1887_v42  ;;  %v509_v9 = vadd.f32 %v508_v6, %v1887_v42 }
  0xb5   :  { %v1915_v55 = vpop.f32.mrf.mxu2  ;;  %v1949_v8 = vpop.f32.mrf.mxu3 }
  0xb6   :  { %v1894_v45 = vpop.f32.mrf.mxu0  ;;  %v1898_v47 = vpop.f32.mrf.mxu1  ;;  %3299 = vst [vmem:[#allocation8_spill] sm:$0xff] %v1915_v55 }
  0xb7   :  { %3295 = vst [vmem:[#allocation4_spill] sm:$0xff] %v1894_v45  ;;  %v510_v11 = vadd.f32 %v509_v9, %v1894_v45 }
  0xbd   :  { %v1921_v58 = vpop.f32.mrf.mxu2  ;;  %v1964_v18 = vpop.f32.mrf.mxu3 }
  0xbe   :  { %v1896_v46 = vpop.f32.mrf.mxu0  ;;  %v1907_v51 = vpop.f32.mrf.mxu1  ;;  %3300 = vst [vmem:[#allocation9_spill] sm:$0xff] %v1921_v58 }
  0xbf   :  { %3296 = vst [vmem:[#allocation5_spill] sm:$0xff] %v1896_v46  ;;  %v511_v12 = vadd.f32 %v510_v11, %v1896_v46 }
  0xc0   :  { %3307 = vst [vmem:[#allocation16_spill] sm:$0xff] %v1964_v18 }
  0xc5   :  { %v1929_v62 = vpop.f32.mrf.mxu2  ;;  %v1977_v27 = vpop.f32.mrf.mxu3 }
  0xc6   :  { %v1905_v50 = vpop.f32.mrf.mxu0  ;;  %v1913_v54 = vpop.f32.mrf.mxu1  ;;  %3301 = vst [vmem:[#allocation10_spill] sm:$0xff] %v1929_v62 }
  0xc7   :  { %v512_v13 = vadd.f32 %v511_v12, %v1905_v50 }
  0xcd   :  { %v1937_v2 = vpop.f32.mrf.mxu2  ;;  %v1990_v37 = vpop.f32.mrf.mxu3 }
  0xce   :  { %v1911_v53 = vpop.f32.mrf.mxu0  ;;  %v1919_v57 = vpop.f32.mrf.mxu1  ;;  %3302 = vst [vmem:[#allocation11_spill] sm:$0xff] %v1937_v2 }
  0xcf   :  { %v513_v15 = vadd.f32 %v512_v13, %v1911_v53 }
  0xd5   :  { %v1947_v7 = vpop.f32.mrf.mxu2  ;;  %v2001_v13 = vpop.f32.mrf.mxu3 }
  0xd6   :  { %v1917_v56 = vpop.f32.mrf.mxu0  ;;  %v1927_v61 = vpop.f32.mrf.mxu1  ;;  %3304 = vst [vmem:[#allocation13_spill] sm:$0xff] %v1947_v7 }
  0xd7   :  { %v514_v19 = vadd.f32 %v513_v15, %v1917_v56 }
  0xdd   :  { %v1960_v16 = vpop.f32.mrf.mxu2 }
  0xde   :  { %v1923_v59 = vpop.f32.mrf.mxu0  ;;  %v1935_v1 = vpop.f32.mrf.mxu1  ;;  %3306 = vst [vmem:[#allocation15_spill] sm:$0xff] %v1960_v16 }
  0xdf   :  { %v515_v20 = vadd.f32 %v514_v19, %v1923_v59 }
  0xe5   :  { %v1975_v26 = vpop.f32.mrf.mxu2 }
  0xe6   :  { %v1925_v60 = vpop.f32.mrf.mxu0  ;;  %v1943_v5 = vpop.f32.mrf.mxu1  ;;  %3309 = vst [vmem:[#allocation18_spill] sm:$0xff] %v1975_v26 }
  0xe7   :  { %3303 = vst [vmem:[#allocation12_spill] sm:$0xff] %v1943_v5  ;;  %v516_v21 = vadd.f32 %v515_v20, %v1925_v60 }
  0xed   :  { %v1988_v35 = vpop.f32.mrf.mxu2 }
  0xee   :  { %v1933_v0 = vpop.f32.mrf.mxu0  ;;  %v1957_v14 = vpop.f32.mrf.mxu1  ;;  %3311 = vst [vmem:[#allocation20_spill] sm:$0xff] %v1988_v35 }
  0xef   :  { %3305 = vst [vmem:[#allocation14_spill] sm:$0xff] %v1957_v14  ;;  %v517_v22 = vadd.f32 %v516_v21, %v1933_v0 }
  0xf5   :  { %v1999_v12 = vpop.f32.mrf.mxu2 }
  0xf6   :  { %v1941_v4 = vpop.f32.mrf.mxu0  ;;  %v1972_v24 = vpop.f32.mrf.mxu1  ;;  %3313 = vst [vmem:[#allocation22_spill] sm:$0xff] %v1999_v12 }
  0xf7   :  { %3308 = vst [vmem:[#allocation17_spill] sm:$0xff] %v1972_v24  ;;  %v518_v25 = vadd.f32 %v517_v22, %v1941_v4 }
  0xfe   :  { %v1952_v10 = vpop.f32.mrf.mxu0  ;;  %v1985_v33 = vpop.f32.mrf.mxu1 }
  0xff   :  { %v519_v28 = vadd.f32 %v518_v25, %v1952_v10  ;;  %3310 = vst [vmem:[#allocation19_spill] sm:$0xff] %v1985_v33 }
 0x106   :  { %v1962_v17 = vpop.f32.mrf.mxu0  ;;  %v1996_v9 = vpop.f32.mrf.mxu1 }
 0x107   :  { %v520_v29 = vadd.f32 %v519_v28, %v1962_v17  ;;  %3312 = vst [vmem:[#allocation21_spill] sm:$0xff] %v1996_v9  ;;  %v2010_v28 = vpop.f32.mrf.mxu2 }
 0x108   :  { %3315 = vst [vmem:[#allocation24_spill] sm:$0xff] %v2010_v28 }
 0x10e   :  { %v1970_v23 = vpop.f32.mrf.mxu0  ;;  %v2007_v22 = vpop.f32.mrf.mxu1 }
 0x10f   :  { %v521_v30 = vadd.f32 %v520_v29, %v1970_v23  ;;  %3314 = vst [vmem:[#allocation23_spill] sm:$0xff] %v2007_v22  ;;  %v2012_v29 = vpop.f32.mrf.mxu3 }
 0x110   :  { %3316 = vst [vmem:[#allocation25_spill] sm:$0xff] %v2012_v29 }
 0x116   :  { %v1982_v31 = vpop.f32.mrf.mxu0 }
 0x117   :  { %v522_v32 = vadd.f32 %v521_v30, %v1982_v31 }
 0x119   :  { %v523_v34 = vadd.f32 %v522_v32, %v1881_v39 }
 0x11b   :  { %v524_v38 = vadd.f32 %v523_v34, %v1885_v41 }
 0x11d   :  { %v525_v43 = vadd.f32 %v524_v38, %v1892_v44 }
 0x11f   :  { %v526_v49 = vadd.f32 %v525_v43, %v1898_v47  ;;  %v2018_v43 = vpop.f32.mrf.mxu1 }
 0x120   :  { %3317 = vst [vmem:[#allocation26_spill] sm:$0xff] %v2018_v43 }
 0x121   :  { %v527_v6 = vadd.f32 %v526_v49, %v1907_v51 }
 0x123   :  { %v528_v11 = vadd.f32 %v527_v6, %v1913_v54  ;;  %v2021_v6 = vpop.f32.mrf.mxu2 }
 0x124   :  { %3318 = vst [vmem:[#allocation27_spill] sm:$0xff] %v2021_v6 }
 0x125   :  { %v529_v15 = vadd.f32 %v528_v11, %v1919_v57  ;;  %v2023_v11 = vpop.f32.mrf.mxu3 }
 0x126   :  { %3319 = vst [vmem:[#allocation28_spill] sm:$0xff] %v2023_v11 }
 0x127   :  { %v530_v19 = vadd.f32 %v529_v15, %v1927_v61 }
 0x129   :  { %v531_v20 = vadd.f32 %v530_v19, %v1935_v1 }
 0x12b   :  { %v532_v21 = vadd.f32 %v531_v20, %v1943_v5 }
 0x12d   :  { %v533_v25 = vadd.f32 %v532_v21, %v1957_v14 }
 0x12f   :  { %v534_v30 = vadd.f32 %v533_v25, %v1972_v24 }
 0x131   :  { %v535_v32 = vadd.f32 %v534_v30, %v1985_v33  ;;  %v2030_v30 = vpop.f32.mrf.mxu2 }
 0x132   :  { %3320 = vst [vmem:[#allocation29_spill] sm:$0xff] %v2030_v30 }
 0x133   :  { %v536_v34 = vadd.f32 %v535_v32, %v1996_v9  ;;  %v2032_v32 = vpop.f32.mrf.mxu3 }
 0x134   :  { %3321 = vst [vmem:[#allocation30_spill] sm:$0xff] %v2032_v32 }
 0x135   :  { %v537_v38 = vadd.f32 %v536_v34, %v2007_v22 }
 0x137   :  { %v538_v49 = vadd.f32 %v537_v38, %v2018_v43 }
 0x139   :  { %v539_v15 = vadd.f32 %v538_v49, %v1900_v48 }
 0x13b   :  { %v540_v19 = vadd.f32 %v539_v15, %v1909_v52  ;;  %v2039_v52 = vpop.f32.mrf.mxu2 }
 0x13c   :  { %3322 = vst [vmem:[#allocation31_spill] sm:$0xff] %v2039_v52 }
 0x13d   :  { %v541_v20 = vadd.f32 %v540_v19, %v1915_v55  ;;  %v2041_v19 = vpop.f32.mrf.mxu3 }
 0x13e   :  { %3323 = vst [vmem:[#allocation32_spill] sm:$0xff] %v2041_v19 }
 0x13f   :  { %v542_v21 = vadd.f32 %v541_v20, %v1921_v58 }
 0x141   :  { %v543_v25 = vadd.f32 %v542_v21, %v1929_v62 }
 0x143   :  { %v544_v34 = vadd.f32 %v543_v25, %v1937_v2 }
 0x145   :  { %v545_v38 = vadd.f32 %v544_v34, %v1947_v7  ;;  %v2048_v7 = vpop.f32.mrf.mxu2 }
 0x146   :  { %3324 = vst [vmem:[#allocation33_spill] sm:$0xff] %v2048_v7 }
 0x147   :  { %v546_v43 = vadd.f32 %v545_v38, %v1960_v16  ;;  %v2050_v38 = vpop.f32.mrf.mxu3 }
 0x149   :  { %v547_v49 = vadd.f32 %v546_v43, %v1975_v26 }
 0x14b   :  { %v548_v15 = vadd.f32 %v547_v49, %v1988_v35 }
 0x14d   :  { %v549_v20 = vadd.f32 %v548_v15, %v1999_v12 }
 0x14f   :  { %v550_v21 = vadd.f32 %v549_v20, %v2010_v28  ;;  %v2057_v28 = vpop.f32.mrf.mxu3 }
 0x151   :  { %v551_v62 = vadd.f32 %v550_v21, %v2021_v6 }
 0x153   :  { %v552_v25 = vadd.f32 %v551_v62, %v2030_v30 }
 0x155   :  { %v553_v34 = vadd.f32 %v552_v25, %v2039_v52 }
 0x157   :  { %v554_v43 = vadd.f32 %v553_v34, %v2048_v7  ;;  %v2064_v7 = vpop.f32.mrf.mxu3 }
 0x159   :  { %v555_v49 = vadd.f32 %v554_v43, %v1931_v63 }
 0x15b   :  { %v556_v35 = vadd.f32 %v555_v49, %v1939_v3 }
 0x15d   :  { %v557_v15 = vadd.f32 %v556_v35, %v1949_v8 }
 0x15f   :  { %v558_v20 = vadd.f32 %v557_v15, %v1964_v18  ;;  %v2070_v18 = vpop.f32.mrf.mxu3 }
 0x160   :  { %3325 = vst [vmem:[#allocation34_spill] sm:$0xff] %v2070_v18 }
 0x161   :  { %v559_v62 = vadd.f32 %v558_v20, %v1977_v27 }
 0x163   :  { %v560_v21 = vadd.f32 %v559_v62, %v1990_v37 }
 0x165   :  { %v561_v25 = vadd.f32 %v560_v21, %v2001_v13 }
 0x167   :  { %v562_v52 = vadd.f32 %v561_v25, %v2012_v29  ;;  %v2074_v21 = vpop.f32.mrf.mxu3 }
 0x169   :  { %v563_v34 = vadd.f32 %v562_v52, %v2023_v11 }
 0x16b   :  { %v564_v43 = vadd.f32 %v563_v34, %v2032_v32 }
 0x16d   :  { %v565_v35 = vadd.f32 %v564_v43, %v2041_v19 }
 0x16f   :  { %v566_v49 = vadd.f32 %v565_v35, %v2050_v38 }
 0x171   :  { %v567_v15 = vadd.f32 %v566_v49, %v2057_v28 }
 0x173   :  { %v568_v20 = vadd.f32 %v567_v15, %v2064_v7 }
 0x175   :  { %v569_v62 = vadd.f32 %v568_v20, %v2070_v18 }
 0x177   :  { %v570_v52 = vadd.f32 %v569_v62, %v2074_v21 }
 0x179   :  { %v571_v25 = vrot.slane %v570_v52, 4 }
 0x17b   :  { %v572_v11 = vadd.f32 %v571_v25, %v570_v52 }
 0x17d   :  { %v573_v29 = vrot.slane %v572_v11, 2 }
 0x17f   :  { %v574_v34 = vadd.f32 %v573_v29, %v572_v11 }
 0x181   :  { %v575_v32 = vrot.slane %v574_v34, 1 }
 0x183   :  { %v576_v43 = vadd.f32 %v575_v32, %v574_v34 }
 0x185   :  { %v2077_v19 = vmul.f32 0.001953125, %v576_v43 }
 0x187   :  { %v578_v35 = vsub.f32 %v1873_v36, %v2077_v19  ;;  %v579_v49 = vsub.f32 %v1883_v40, %v2077_v19  ;;  %v580_v15 = vsub.f32 %v1887_v42, %v2077_v19  ;;  %v581_v62 = vsub.f32 %v1894_v45, %v2077_v19 }
 0x188   :  { %v582_v29 = vsub.f32 %v1896_v46, %v2077_v19  ;;  %v583_v52 = vsub.f32 %v1905_v50, %v2077_v19  ;;  %v584_v43 = vsub.f32 %v1911_v53, %v2077_v19  ;;  %v586_v46 = vsub.f32 %v1923_v59, %v2077_v19 }
 0x189   :  { %v642_v20 = vmul.f32 %v578_v35, %v578_v35  ;;  %v643_v18 = vmul.f32 %v579_v49, %v579_v49  ;;  %v644_v11 = vmul.f32 %v580_v15, %v580_v15  ;;  %v645_v25 = vmul.f32 %v581_v62, %v581_v62 }
 0x18a   :  { %v646_v40 = vmul.f32 %v582_v29, %v582_v29  ;;  %v585_v35 = vsub.f32 %v1917_v56, %v2077_v19  ;;  %v647_v49 = vmul.f32 %v583_v52, %v583_v52  ;;  %v648_v15 = vmul.f32 %v584_v43, %v584_v43 }
 0x18b   :  { %v706_v32 = vadd.f32 %v643_v18, %v642_v20  ;;  %v587_v20 = vsub.f32 %v1925_v60, %v2077_v19  ;;  %v650_v29 = vmul.f32 %v586_v46, %v586_v46 }
 0x18c   :  { %v649_v62 = vmul.f32 %v585_v35, %v585_v35 }
 0x18d   :  { %v707_v34 = vadd.f32 %v706_v32, %v644_v11  ;;  %v588_v32 = vsub.f32 %v1933_v0, %v2077_v19  ;;  %v651_v52 = vmul.f32 %v587_v20, %v587_v20 }
 0x18f   :  { %v708_v42 = vadd.f32 %v707_v34, %v645_v25  ;;  %v589_v34 = vsub.f32 %v1941_v4, %v2077_v19  ;;  %v652_v43 = vmul.f32 %v588_v32, %v588_v32 }
 0x191   :  { %v709_v45 = vadd.f32 %v708_v42, %v646_v40  ;;  %v590_v42 = vsub.f32 %v1952_v10, %v2077_v19  ;;  %v653_v35 = vmul.f32 %v589_v34, %v589_v34 }
 0x193   :  { %v710_v18 = vadd.f32 %v709_v45, %v647_v49  ;;  %v591_v49 = vsub.f32 %v1962_v17, %v2077_v19  ;;  %v654_v46 = vmul.f32 %v590_v42, %v590_v42 }
 0x195   :  { %v711_v11 = vadd.f32 %v710_v18, %v648_v15  ;;  %v592_v18 = vsub.f32 %v1970_v23, %v2077_v19  ;;  %v655_v20 = vmul.f32 %v591_v49, %v591_v49 }
 0x197   :  { %v712_v25 = vadd.f32 %v711_v11, %v649_v62  ;;  %v593_v11 = vsub.f32 %v1982_v31, %v2077_v19  ;;  %v656_v32 = vmul.f32 %v592_v18, %v592_v18 }
 0x199   :  { %v713_v40 = vadd.f32 %v712_v25, %v650_v29  ;;  %v594_v25 = vsub.f32 %v1881_v39, %v2077_v19  ;;  %v657_v34 = vmul.f32 %v593_v11, %v593_v11 }
 0x19b   :  { %v714_v45 = vadd.f32 %v713_v40, %v651_v52  ;;  %v595_v40 = vsub.f32 %v1885_v41, %v2077_v19  ;;  %v658_v42 = vmul.f32 %v594_v25, %v594_v25 }
 0x19d   :  { %v715_v15 = vadd.f32 %v714_v45, %v652_v43  ;;  %v596_v45 = vsub.f32 %v1892_v44, %v2077_v19  ;;  %v659_v49 = vmul.f32 %v595_v40, %v595_v40 }
 0x19f   :  { %v716_v62 = vadd.f32 %v715_v15, %v653_v35  ;;  %v597_v15 = vsub.f32 %v1898_v47, %v2077_v19  ;;  %v660_v18 = vmul.f32 %v596_v45, %v596_v45 }
 0x1a1   :  { %v717_v29 = vadd.f32 %v716_v62, %v654_v46  ;;  %v598_v62 = vsub.f32 %v1907_v51, %v2077_v19  ;;  %v661_v11 = vmul.f32 %v597_v15, %v597_v15 }
 0x1a3   :  { %v718_v52 = vadd.f32 %v717_v29, %v655_v20  ;;  %v599_v29 = vsub.f32 %v1913_v54, %v2077_v19  ;;  %v662_v25 = vmul.f32 %v598_v62, %v598_v62 }
 0x1a5   :  { %v719_v43 = vadd.f32 %v718_v52, %v656_v32  ;;  %v600_v52 = vsub.f32 %v1919_v57, %v2077_v19  ;;  %v663_v40 = vmul.f32 %v599_v29, %v599_v29 }
 0x1a7   :  { %v720_v35 = vadd.f32 %v719_v43, %v657_v34  ;;  %v601_v43 = vsub.f32 %v1927_v61, %v2077_v19  ;;  %v664_v45 = vmul.f32 %v600_v52, %v600_v52 }
 0x1a9   :  { %v721_v46 = vadd.f32 %v720_v35, %v658_v42  ;;  %v602_v35 = vsub.f32 %v1935_v1, %v2077_v19  ;;  %v665_v15 = vmul.f32 %v601_v43, %v601_v43 }
 0x1ab   :  { %v722_v20 = vadd.f32 %v721_v46, %v659_v49  ;;  %v603_v46 = vsub.f32 %v1943_v5, %v2077_v19  ;;  %v666_v62 = vmul.f32 %v602_v35, %v602_v35 }
 0x1ad   :  { %v723_v32 = vadd.f32 %v722_v20, %v660_v18  ;;  %v604_v20 = vsub.f32 %v1957_v14, %v2077_v19  ;;  %v667_v29 = vmul.f32 %v603_v46, %v603_v46 }
 0x1af   :  { %v724_v34 = vadd.f32 %v723_v32, %v661_v11  ;;  %v605_v32 = vsub.f32 %v1972_v24, %v2077_v19  ;;  %v668_v52 = vmul.f32 %v604_v20, %v604_v20 }
 0x1b1   :  { %v725_v42 = vadd.f32 %v724_v34, %v662_v25  ;;  %v606_v34 = vsub.f32 %v1985_v33, %v2077_v19  ;;  %v669_v43 = vmul.f32 %v605_v32, %v605_v32 }
 0x1b3   :  { %v726_v49 = vadd.f32 %v725_v42, %v663_v40  ;;  %v607_v42 = vsub.f32 %v1996_v9, %v2077_v19  ;;  %v670_v35 = vmul.f32 %v606_v34, %v606_v34 }
 0x1b5   :  { %v727_v18 = vadd.f32 %v726_v49, %v664_v45  ;;  %v608_v49 = vsub.f32 %v2007_v22, %v2077_v19  ;;  %v671_v46 = vmul.f32 %v607_v42, %v607_v42 }
 0x1b7   :  { %v728_v11 = vadd.f32 %v727_v18, %v665_v15  ;;  %v3326_v18 = vld [vmem:[#allocation26_spill] sm:$0xff]  ;;  %v672_v20 = vmul.f32 %v608_v49, %v608_v49 }
 0x1b8   :  { %v609_v24 = vsub.f32 %v3326_v18, %v2077_v19 }
 0x1b9   :  { %v729_v25 = vadd.f32 %v728_v11, %v666_v62  ;;  %v610_v11 = vsub.f32 %v1900_v48, %v2077_v19 }
 0x1ba   :  { %v673_v32 = vmul.f32 %v609_v24, %v609_v24 }
 0x1bb   :  { %v730_v40 = vadd.f32 %v729_v25, %v667_v29  ;;  %v3327_v25 = vld [vmem:[#allocation7_spill] sm:$0xff]  ;;  %v674_v34 = vmul.f32 %v610_v11, %v610_v11 }
 0x1bc   :  { %v611_v9 = vsub.f32 %v3327_v25, %v2077_v19 }
 0x1bd   :  { %v731_v45 = vadd.f32 %v730_v40, %v668_v52  ;;  %v612_v40 = vsub.f32 %v1915_v55, %v2077_v19 }
 0x1be   :  { %v675_v42 = vmul.f32 %v611_v9, %v611_v9 }
 0x1bf   :  { %v732_v15 = vadd.f32 %v731_v45, %v669_v43  ;;  %v613_v45 = vsub.f32 %v1921_v58, %v2077_v19  ;;  %v676_v49 = vmul.f32 %v612_v40, %v612_v40 }
 0x1c1   :  { %v733_v62 = vadd.f32 %v732_v15, %v670_v35  ;;  %v3328_v15 = vld [vmem:[#allocation10_spill] sm:$0xff]  ;;  %v677_v24 = vmul.f32 %v613_v45, %v613_v45 }
 0x1c2   :  { %v614_v48 = vsub.f32 %v3328_v15, %v2077_v19 }
 0x1c3   :  { %v734_v29 = vadd.f32 %v733_v62, %v671_v46  ;;  %v615_v62 = vsub.f32 %v1937_v2, %v2077_v19 }
 0x1c4   :  { %v678_v11 = vmul.f32 %v614_v48, %v614_v48 }
 0x1c5   :  { %v735_v52 = vadd.f32 %v734_v29, %v672_v20  ;;  %v3329_v29 = vld [vmem:[#allocation13_spill] sm:$0xff]  ;;  %v679_v9 = vmul.f32 %v615_v62, %v615_v62 }
 0x1c6   :  { %v616_v55 = vsub.f32 %v3329_v29, %v2077_v19 }
 0x1c7   :  { %v736_v43 = vadd.f32 %v735_v52, %v673_v32  ;;  %v617_v52 = vsub.f32 %v1960_v16, %v2077_v19 }
 0x1c8   :  { %v680_v40 = vmul.f32 %v616_v55, %v616_v55 }
 0x1c9   :  { %v737_v35 = vadd.f32 %v736_v43, %v674_v34  ;;  %v618_v43 = vsub.f32 %v1975_v26, %v2077_v19  ;;  %v681_v45 = vmul.f32 %v617_v52, %v617_v52 }
 0x1cb   :  { %v738_v46 = vadd.f32 %v737_v35, %v675_v42  ;;  %v3330_v35 = vld [vmem:[#allocation20_spill] sm:$0xff]  ;;  %v682_v48 = vmul.f32 %v618_v43, %v618_v43 }
 0x1cc   :  { %v619_v2 = vsub.f32 %v3330_v35, %v2077_v19 }
 0x1cd   :  { %v739_v20 = vadd.f32 %v738_v46, %v676_v49  ;;  %v620_v46 = vsub.f32 %v1999_v12, %v2077_v19 }
 0x1ce   :  { %v683_v62 = vmul.f32 %v619_v2, %v619_v2 }
 0x1cf   :  { %v740_v32 = vadd.f32 %v739_v20, %v677_v24  ;;  %v3331_v20 = vld [vmem:[#allocation24_spill] sm:$0xff]  ;;  %v684_v55 = vmul.f32 %v620_v46, %v620_v46 }
 0x1d0   :  { %v621_v16 = vsub.f32 %v3331_v20, %v2077_v19 }
 0x1d1   :  { %v741_v34 = vadd.f32 %v740_v32, %v678_v11  ;;  %v622_v32 = vsub.f32 %v2021_v6, %v2077_v19 }
 0x1d2   :  { %v685_v52 = vmul.f32 %v621_v16, %v621_v16 }
 0x1d3   :  { %v742_v42 = vadd.f32 %v741_v34, %v679_v9  ;;  %v623_v34 = vsub.f32 %v2030_v30, %v2077_v19  ;;  %v686_v43 = vmul.f32 %v622_v32, %v622_v32 }
 0x1d5   :  { %v743_v49 = vadd.f32 %v742_v42, %v680_v40  ;;  %v3332_v42 = vld [vmem:[#allocation31_spill] sm:$0xff]  ;;  %v687_v2 = vmul.f32 %v623_v34, %v623_v34 }
 0x1d6   :  { %v624_v12 = vsub.f32 %v3332_v42, %v2077_v19 }
 0x1d7   :  { %v744_v24 = vadd.f32 %v743_v49, %v681_v45  ;;  %v3333_v49 = vld [vmem:[#allocation33_spill] sm:$0xff] }
 0x1d8   :  { %v625_v20 = vsub.f32 %v3333_v49, %v2077_v19  ;;  %v688_v46 = vmul.f32 %v624_v12, %v624_v12 }
 0x1d9   :  { %v745_v11 = vadd.f32 %v744_v24, %v682_v48  ;;  %v626_v24 = vsub.f32 %v1931_v63, %v2077_v19 }
 0x1da   :  { %v689_v16 = vmul.f32 %v625_v20, %v625_v20 }
 0x1db   :  { %v746_v9 = vadd.f32 %v745_v11, %v683_v62  ;;  %v627_v11 = vsub.f32 %v1939_v3, %v2077_v19  ;;  %v690_v32 = vmul.f32 %v626_v24, %v626_v24 }
 0x1dd   :  { %v747_v40 = vadd.f32 %v746_v9, %v684_v55  ;;  %v628_v9 = vsub.f32 %v1949_v8, %v2077_v19  ;;  %v691_v34 = vmul.f32 %v627_v11, %v627_v11 }
 0x1df   :  { %v748_v45 = vadd.f32 %v747_v40, %v685_v52  ;;  %v3334_v40 = vld [vmem:[#allocation16_spill] sm:$0xff]  ;;  %v692_v12 = vmul.f32 %v628_v9, %v628_v9 }
 0x1e0   :  { %v629_v30 = vsub.f32 %v3334_v40, %v2077_v19 }
 0x1e1   :  { %v749_v48 = vadd.f32 %v748_v45, %v686_v43  ;;  %v630_v45 = vsub.f32 %v1977_v27, %v2077_v19 }
 0x1e2   :  { %v693_v20 = vmul.f32 %v629_v30, %v629_v30 }
 0x1e3   :  { %v750_v62 = vadd.f32 %v749_v48, %v687_v2  ;;  %v631_v48 = vsub.f32 %v1990_v37, %v2077_v19  ;;  %v694_v24 = vmul.f32 %v630_v45, %v630_v45 }
 0x1e5   :  { %v751_v55 = vadd.f32 %v750_v62, %v688_v46  ;;  %v632_v62 = vsub.f32 %v2001_v13, %v2077_v19  ;;  %v695_v11 = vmul.f32 %v631_v48, %v631_v48 }
 0x1e7   :  { %v752_v52 = vadd.f32 %v751_v55, %v689_v16  ;;  %v3335_v55 = vld [vmem:[#allocation25_spill] sm:$0xff]  ;;  %v696_v9 = vmul.f32 %v632_v62, %v632_v62 }
 0x1e8   :  { %v633_v6 = vsub.f32 %v3335_v55, %v2077_v19 }
 0x1e9   :  { %v753_v43 = vadd.f32 %v752_v52, %v690_v32  ;;  %v3336_v52 = vld [vmem:[#allocation28_spill] sm:$0xff] }
 0x1ea   :  { %v634_v35 = vsub.f32 %v3336_v52, %v2077_v19  ;;  %v697_v30 = vmul.f32 %v633_v6, %v633_v6 }
 0x1eb   :  { %v754_v2 = vadd.f32 %v753_v43, %v691_v34  ;;  %v3337_v43 = vld [vmem:[#allocation30_spill] sm:$0xff] }
 0x1ec   :  { %v635_v26 = vsub.f32 %v3337_v43, %v2077_v19  ;;  %v698_v45 = vmul.f32 %v634_v35, %v634_v35 }
 0x1ed   :  { %v755_v46 = vadd.f32 %v754_v2, %v692_v12  ;;  %v3338_v2 = vld [vmem:[#allocation32_spill] sm:$0xff] }
 0x1ee   :  { %v636_v29 = vsub.f32 %v3338_v2, %v2077_v19  ;;  %v699_v48 = vmul.f32 %v635_v26, %v635_v26 }
 0x1ef   :  { %v756_v16 = vadd.f32 %v755_v46, %v693_v20  ;;  %v637_v46 = vsub.f32 %v2050_v38, %v2077_v19 }
 0x1f0   :  { %v700_v62 = vmul.f32 %v636_v29, %v636_v29 }
 0x1f1   :  { %v757_v32 = vadd.f32 %v756_v16, %v694_v24  ;;  %v638_v16 = vsub.f32 %v2057_v28, %v2077_v19  ;;  %v701_v6 = vmul.f32 %v637_v46, %v637_v46 }
 0x1f3   :  { %v758_v34 = vadd.f32 %v757_v32, %v695_v11  ;;  %v639_v32 = vsub.f32 %v2064_v7, %v2077_v19  ;;  %v702_v35 = vmul.f32 %v638_v16, %v638_v16 }
 0x1f5   :  { %v759_v12 = vadd.f32 %v758_v34, %v696_v9  ;;  %v3339_v34 = vld [vmem:[#allocation34_spill] sm:$0xff]  ;;  %v703_v26 = vmul.f32 %v639_v32, %v639_v32 }
 0x1f6   :  { %v640_v15 = vsub.f32 %v3339_v34, %v2077_v19 }
 0x1f7   :  { %v760_v20 = vadd.f32 %v759_v12, %v697_v30  ;;  %v641_v12 = vsub.f32 %v2074_v21, %v2077_v19 }
 0x1f9   :  { %v761_v24 = vadd.f32 %v760_v20, %v698_v45  ;;  %v704_v20 = vmul.f32 %v640_v15, %v640_v15  ;;  %v705_v25 = vmul.f32 %v641_v12, %v641_v12 }
 0x1fb   :  { %v762_v11 = vadd.f32 %v761_v24, %v699_v48 }
 0x1fd   :  { %v763_v9 = vadd.f32 %v762_v11, %v700_v62 }
 0x1ff   :  { %v764_v30 = vadd.f32 %v763_v9, %v701_v6 }
 0x201   :  { %v765_v45 = vadd.f32 %v764_v30, %v702_v35 }
 0x203   :  { %v766_v58 = vadd.f32 %v765_v45, %v703_v26 }
 0x205   :  { %v767_v29 = vadd.f32 %v766_v58, %v704_v20 }
 0x207   :  { %v768_v48 = vadd.f32 %v767_v29, %v705_v25  ;;  %v787_v25 = vld [vmem:[%s3215_s2] sm:$0x1] }
 0x209   :  { %v769_v24 = vrot.slane %v768_v48, 4 }
 0x20b   :  { %v770_v18 = vadd.f32 %v769_v24, %v768_v48 }
 0x20d   :  { %v771_v22 = vrot.slane %v770_v18, 2 }
 0x20f   :  { %v772_v46 = vadd.f32 %v771_v22, %v770_v18 }
 0x211   :  { %v773_v62 = vrot.slane %v772_v46, 1 }
 0x213   :  { %v774_v11 = vadd.f32 %v773_v62, %v772_v46 }
 0x215   :  { %v775_v33 = vmul.f32 0.001953125, %v774_v11 }
 0x217   :  { %v776_v14 = vadd.f32 1e-05, %v775_v33  ;;  %v789_v33 = vld [vmem:[%s3216_s3] sm:$0x1] }
 0x219   :  { %1733 = vrsqrt.f32 %v776_v14  ;;  %vm783_vm1 = vweird.f32 %v776_v14 }
 0x21f   :  { %v1734_v16 = vpop.eup %1733 }
 0x220   :  { %v778_v6 = vmul.f32 %v1734_v16, %v776_v14  ;;  %vm784_vm0 = vweird.f32 %v1734_v16 }
 0x221   :  { %vm785_vm2 = vmor %vm783_vm1, %vm784_vm0 }
 0x222   :  { %v779_v9 = vmul.f32 %v1734_v16, %v778_v6 }
 0x224   :  { %v780_v5 = vmul.f32 0.5, %v779_v9 }
 0x226   :  { %v781_v32 = vsub.f32 1.5, %v780_v5 }
 0x228   :  { %v782_v35 = vmul.f32 %v1734_v16, %v781_v32 }
 0x22a   :  { %v786_v58 = vsel %vm785_vm2, %v1734_v16, %v782_v35 }
 0x22b   :  { %v788_v22 = vmul.f32 %v787_v25, %v786_v58 }
 0x22d   :  { %v790_v18 = vmul.f32 %v788_v22, %v2077_v19  ;;  %v2214_v15 = vperm.slane %v788_v22, 0 }
 0x22f   :  { %v791_v30 = vsub.f32 %v789_v33, %v790_v18  ;;  %v841_v5 = vmul.f32 %v2214_v15, %v3332_v42  ;;  %v842_v14 = vmul.f32 %v2214_v15, %v3333_v49  ;;  %v843_v12 = vmul.f32 %v2214_v15, %v1931_v63 }
 0x230   :  { %v844_v26 = vmul.f32 %v2214_v15, %v1939_v3  ;;  %v845_v45 = vmul.f32 %v2214_v15, %v1949_v8  ;;  %v846_v20 = vmul.f32 %v2214_v15, %v3334_v40  ;;  %v847_v42 = vmul.f32 %v2214_v15, %v1977_v27 }
 0x231   :  { %v2224_v19 = vperm.slane %v791_v30, 0  ;;  %v848_v49 = vmul.f32 %v2214_v15, %v1990_v37  ;;  %v849_v63 = vmul.f32 %v2214_v15, %v2001_v13  ;;  %v850_v3 = vmul.f32 %v2214_v15, %v3335_v55  ;;  %v3356_v30 = vld [vmem:[#allocation2_spill] sm:$0xff] }
 0x232   :  { %v851_v29 = vmul.f32 %v2214_v15, %v3336_v52  ;;  %v852_v8 = vmul.f32 %v2214_v15, %v3337_v43  ;;  %v853_v40 = vmul.f32 %v2214_v15, %v3338_v2  ;;  %v854_v27 = vmul.f32 %v2214_v15, %v2050_v38 }
 0x233   :  { %v855_v37 = vmul.f32 %v2214_v15, %v2057_v28  ;;  %v856_v13 = vmul.f32 %v2214_v15, %v2064_v7  ;;  %v857_v55 = vmul.f32 %v2214_v15, %v3339_v34  ;;  %v858_v52 = vmul.f32 %v2214_v15, %v2074_v21 }
 0x234   :  { %v2255_v43 = vadd.f32 %v2224_v19, %v841_v5  ;;  %v2258_v2 = vadd.f32 %v2224_v19, %v842_v14  ;;  %v2261_v38 = vadd.f32 %v2224_v19, %v843_v12  ;;  %v2264_v28 = vadd.f32 %v2224_v19, %v844_v26  ;;  %v3357_v14 = vld [vmem:[#allocation3_spill] sm:$0xff]  ;;  %v3358_v26 = vld [vmem:[#allocation4_spill] sm:$0xff] }
 0x235   :  { %v2267_v7 = vadd.f32 %v2224_v19, %v845_v45  ;;  %v2270_v34 = vadd.f32 %v2224_v19, %v846_v20  ;;  %v2273_v21 = vadd.f32 %v2224_v19, %v847_v42  ;;  %v2276_v48 = vadd.f32 %v2224_v19, %v848_v49  ;;  %v3359_v20 = vld [vmem:[#allocation5_spill] sm:$0xff] }
 0x236   :  { %3340 = vst [vmem:[#allocation31_spill] sm:$0xff] %v2264_v28  ;;  %v2279_v24 = vadd.f32 %v2224_v19, %v849_v63  ;;  %v2282_v46 = vadd.f32 %v2224_v19, %v850_v3  ;;  %v2285_v62 = vadd.f32 %v2224_v19, %v851_v29  ;;  %v2288_v11 = vadd.f32 %v2224_v19, %v852_v8 }
 0x237   :  { %3341 = vst [vmem:[#allocation33_spill] sm:$0xff] %v2267_v7  ;;  %v2291_v16 = vadd.f32 %v2224_v19, %v853_v40  ;;  %v2294_v6 = vadd.f32 %v2224_v19, %v854_v27  ;;  %v2297_v9 = vadd.f32 %v2224_v19, %v855_v37  ;;  %v2300_v32 = vadd.f32 %v2224_v19, %v856_v13  ;;  %v3362_v27 = vld [vmem:[#allocation17_spill] sm:$0xff]  ;;  %v3363_v37 = vld [vmem:[#allocation19_spill] sm:$0xff] }
 0x238   :  { %3342 = vst [vmem:[#allocation16_spill] sm:$0xff] %v2270_v34  ;;  %v2303_v35 = vadd.f32 %v2224_v19, %v857_v55  ;;  %v2306_v58 = vadd.f32 %v2224_v19, %v858_v52  ;;  %v795_v25 = vmul.f32 %v2214_v15, %v1873_v36  ;;  %v796_v5 = vmul.f32 %v2214_v15, %v3356_v30  ;;  %v3364_v13 = vld [vmem:[#allocation21_spill] sm:$0xff]  ;;  %v3365_v55 = vld [vmem:[#allocation23_spill] sm:$0xff]  ;;  %v3367_v30 = vld [vmem:[#allocation6_spill] sm:$0xff] }
 0x239   :  { %3343 = vst [vmem:[#allocation25_spill] sm:$0xff] %v2273_v21  ;;  %v797_v12 = vmul.f32 %v2214_v15, %v3357_v14  ;;  %v798_v45 = vmul.f32 %v2214_v15, %v3358_v26  ;;  %v799_v42 = vmul.f32 %v2214_v15, %v3359_v20  ;;  %v800_v36 = vmul.f32 %v2214_v15, %v1905_v50  ;;  %v3368_v26 = vld [vmem:[#allocation7_spill] sm:$0xff] }
 0x23a   :  { %3344 = vst [vmem:[#allocation28_spill] sm:$0xff] %v2276_v48  ;;  %v862_v22 = vadd.f32 %v2224_v19, %v795_v25  ;;  %v801_v49 = vmul.f32 %v2214_v15, %v1911_v53  ;;  %v802_v63 = vmul.f32 %v2214_v15, %v1917_v56  ;;  %v803_v3 = vmul.f32 %v2214_v15, %v1923_v59  ;;  %v3366_v25 = vld [vmem:[#allocation26_spill] sm:$0xff] }
 0x23b   :  { %3345 = vst [vmem:[#allocation30_spill] sm:$0xff] %v2279_v24  ;;  %v804_v29 = vmul.f32 %v2214_v15, %v1925_v60  ;;  %v805_v8 = vmul.f32 %v2214_v15, %v1933_v0  ;;  %v806_v40 = vmul.f32 %v2214_v15, %v1941_v4  ;;  %v807_v50 = vmul.f32 %v2214_v15, %v1952_v10 }
 0x23c   :  { %3346 = vst [vmem:[#allocation32_spill] sm:$0xff] %v2282_v46  ;;  %vm926_vm3 = vcmp.ge.f32.partialorder %v862_v22, 0.0  ;;  %v990_v18 = vmul.f32 0.2, %v862_v22  ;;  %v2343_v53 = vmul.f32 %v2214_v15, %v1962_v17  ;;  %v2347_v56 = vmul.f32 %v2214_v15, %v1970_v23  ;;  %v3360_v23 = vld [vmem:[#allocation12_spill] sm:$0xff]  ;;  %v3380_v46 = vld [vmem:[#allocation29_spill] sm:$0xff] }
 0x23d   :  { %3347 = vst [vmem:[#allocation34_spill] sm:$0xff] %v2285_v62  ;;  %v2351_v59 = vmul.f32 %v2214_v15, %v1982_v31  ;;  %v2355_v60 = vmul.f32 %v2214_v15, %v1881_v39  ;;  %v2359_v0 = vmul.f32 %v2214_v15, %v1885_v41  ;;  %v2363_v4 = vmul.f32 %v2214_v15, %v1892_v44  ;;  %v3361_v31 = vld [vmem:[#allocation14_spill] sm:$0xff] }
 0x23e   :  { %3348 = vst [vmem:[#allocation35_spill] sm:$0xff] %v2288_v11  ;;  %v2311_v33 = vsel %vm926_vm3, %v862_v22, %v990_v18  ;;  %v2367_v10 = vmul.f32 %v2214_v15, %v1898_v47  ;;  %v2371_v17 = vmul.f32 %v2214_v15, %v1907_v51  ;;  %v2375_v39 = vmul.f32 %v2214_v15, %v1913_v54 }
 0x23f   :  { %3349 = vst [vmem:[#allocation36_spill] sm:$0xff] %v2291_v16  ;;  %v2379_v41 = vmul.f32 %v2214_v15, %v1919_v57  ;;  %v2383_v44 = vmul.f32 %v2214_v15, %v1927_v61  ;;  %v2387_v47 = vmul.f32 %v2214_v15, %v1935_v1  ;;  %v2391_v51 = vmul.f32 %v2214_v15, %v3360_v23  ;;  %v3369_v23 = vld [vmem:[#allocation8_spill] sm:$0xff] }
 0x240   :  { %3350 = vst [vmem:[#allocation37_spill] sm:$0xff] %v2294_v6  ;;  %v2395_v54 = vmul.f32 %v2214_v15, %v3361_v31  ;;  %v2399_v57 = vmul.f32 %v2214_v15, %v3362_v27  ;;  %v2403_v61 = vmul.f32 %v2214_v15, %v3363_v37  ;;  %v2407_v1 = vmul.f32 %v2214_v15, %v3364_v13  ;;  %v3370_v37 = vld [vmem:[#allocation9_spill] sm:$0xff]  ;;  %v3378_v16 = vld [vmem:[#allocation24_spill] sm:$0xff] }
 0x241   :  { %3351 = vst [vmem:[#allocation38_spill] sm:$0xff] %v2297_v9  ;;  %v2411_v52 = vmul.f32 %v2214_v15, %v3365_v55  ;;  %v2415_v22 = vmul.f32 %v2214_v15, %v3366_v25  ;;  %v863_v18 = vadd.f32 %v2224_v19, %v796_v5  ;;  %v2420_v14 = vmul.f32 %v2214_v15, %v3367_v30  ;;  %v3371_v55 = vld [vmem:[#allocation10_spill] sm:$0xff]  ;;  %v3372_v25 = vld [vmem:[#allocation11_spill] sm:$0xff] }
 0x242   :  { %3352 = vst [vmem:[#allocation39_spill] sm:$0xff] %v2300_v32  ;;  %v2424_v20 = vmul.f32 %v2214_v15, %v3368_v26  ;;  %v2428_v31 = vmul.f32 %v2214_v15, %v3369_v23  ;;  %v864_v27 = vadd.f32 %v2224_v19, %v797_v12  ;;  %v2433_v13 = vmul.f32 %v2214_v15, %v3370_v37  ;;  %v3375_v37 = vld [vmem:[#allocation18_spill] sm:$0xff]  ;;  %v3376_v32 = vld [vmem:[#allocation20_spill] sm:$0xff] }
 0x243   :  { %3353 = vst [vmem:[#allocation40_spill] sm:$0xff] %v2303_v35  ;;  %v2437_v5 = vmul.f32 %v2214_v15, %v3371_v55  ;;  %v2441_v30 = vmul.f32 %v2214_v15, %v3372_v25  ;;  %v865_v26 = vadd.f32 %v2224_v19, %v798_v45  ;;  %v2454_v35 = vmul.f32 %v2214_v15, %v3375_v37  ;;  %v3377_v9 = vld [vmem:[#allocation22_spill] sm:$0xff] }
 0x244   :  { %3354 = vst [vmem:[#allocation41_spill] sm:$0xff] %v2306_v58  ;;  %v3374_v58 = vld [vmem:[#allocation15_spill] sm:$0xff]  ;;  %v866_v55 = vadd.f32 %v2224_v19, %v799_v42  ;;  %v2459_v25 = vmul.f32 %v2214_v15, %v3376_v32  ;;  %v2463_v45 = vmul.f32 %v2214_v15, %v3377_v9  ;;  %v991_v6 = vmul.f32 0.2, %v863_v18 }
 0x245   :  { %3355 = vst [vmem:[#allocation42_spill] sm:$0xff] %v2311_v33  ;;  %v2450_v12 = vmul.f32 %v2214_v15, %v3374_v58  ;;  %v2468_v58 = vmul.f32 %v2214_v15, %v3378_v16  ;;  %v868_v37 = vadd.f32 %v2224_v19, %v801_v49  ;;  %vm927_vm4 = vcmp.ge.f32.partialorder %v863_v18, 0.0  ;;  %v3379_v42 = vld [vmem:[#allocation27_spill] sm:$0xff] }
 0x246   :  { %1118 = vst [vmem:[%s3217_s4] sm:$0xff] %v2311_v33  ;;  %v3373_v33 = vld [vmem:[#allocation13_spill] sm:$0xff]  ;;  %v992_v11 = vmul.f32 0.2, %v864_v27  ;;  %v2473_v62 = vmul.f32 %v2214_v15, %v3379_v42  ;;  %v869_v32 = vadd.f32 %v2224_v19, %v802_v63  ;;  %vm928_vm5 = vcmp.ge.f32.partialorder %v864_v27, 0.0 }
 0x247   :  { %v2446_v23 = vmul.f32 %v2214_v15, %v3373_v33  ;;  %v867_v33 = vadd.f32 %v2224_v19, %v800_v36  ;;  %v993_v9 = vmul.f32 0.2, %v865_v26  ;;  %v2478_v36 = vmul.f32 %v2214_v15, %v3380_v46 }
 0x248   :  { %v870_v24 = vadd.f32 %v2224_v19, %v803_v3  ;;  %vm929_vm6 = vcmp.ge.f32.partialorder %v865_v26, 0.0  ;;  %v994_v16 = vmul.f32 0.2, %v866_v55  ;;  %v871_v49 = vadd.f32 %v2224_v19, %v804_v29 }
 0x249   :  { %vm930_vm7 = vcmp.ge.f32.partialorder %v866_v55, 0.0  ;;  %v995_v48 = vmul.f32 0.2, %v867_v33  ;;  %v2482_v21 = vsel %vm927_vm4, %v863_v18, %v991_v6  ;;  %v872_v42 = vadd.f32 %v2224_v19, %v805_v8 }
 0x24a   :  { %vm931_vm8 = vcmp.ge.f32.partialorder %v867_v33, 0.0  ;;  %v996_v63 = vmul.f32 0.2, %v868_v37  ;;  %v2485_v34 = vsel %vm928_vm5, %v864_v27, %v992_v11  ;;  %v873_v7 = vadd.f32 %v2224_v19, %v806_v40  ;;  %1119 = vst [vmem:[%s3217_s4 + $0x8] sm:$0xff] %v2482_v21 }
 0x24b   :  { %vm932_vm9 = vcmp.ge.f32.partialorder %v868_v37, 0.0  ;;  %v997_v15 = vmul.f32 0.2, %v869_v32  ;;  %v2488_v46 = vsel %vm929_vm6, %v865_v26, %v993_v9  ;;  %v874_v3 = vadd.f32 %v2224_v19, %v807_v50  ;;  %1120 = vst [vmem:[%s3217_s4 + $0x10] sm:$0xff] %v2485_v34 }
 0x24c   :  { %vm933_vm10 = vcmp.ge.f32.partialorder %v869_v32, 0.0  ;;  %v998_v29 = vmul.f32 0.2, %v870_v24  ;;  %v2491_v28 = vsel %vm930_vm7, %v866_v55, %v994_v16  ;;  %v875_v11 = vadd.f32 %v2224_v19, %v2343_v53  ;;  %1121 = vst [vmem:[%s3217_s4 + $0x18] sm:$0xff] %v2488_v46 }
 0x24d   :  { %vm934_vm11 = vcmp.ge.f32.partialorder %v870_v24, 0.0  ;;  %v999_v6 = vmul.f32 0.2, %v871_v49  ;;  %v2499_v8 = vsel %vm931_vm8, %v867_v33, %v995_v48  ;;  %v876_v40 = vadd.f32 %v2224_v19, %v2347_v56  ;;  %1122 = vst [vmem:[%s3217_s4 + $0x20] sm:$0xff] %v2491_v28 }
 0x24e   :  { %vm935_vm12 = vcmp.ge.f32.partialorder %v871_v49, 0.0  ;;  %v1000_v50 = vmul.f32 0.2, %v872_v42  ;;  %v2508_v18 = vsel %vm932_vm9, %v868_v37, %v996_v63  ;;  %v877_v48 = vadd.f32 %v2224_v19, %v2351_v59  ;;  %1123 = vst [vmem:[%s3217_s4 + $0x28] sm:$0xff] %v2499_v8 }
 0x24f   :  { %vm936_vm13 = vcmp.ge.f32.partialorder %v872_v42, 0.0  ;;  %v1001_v53 = vmul.f32 0.2, %v873_v7  ;;  %v2517_v27 = vsel %vm933_vm10, %v869_v32, %v997_v15  ;;  %v878_v56 = vadd.f32 %v2224_v19, %v2355_v60  ;;  %1124 = vst [vmem:[%s3217_s4 + $0x30] sm:$0xff] %v2508_v18 }
 0x250   :  { %vm937_vm14 = vcmp.ge.f32.partialorder %v873_v7, 0.0  ;;  %v1002_v26 = vmul.f32 0.2, %v874_v3  ;;  %v2526_v55 = vsel %vm934_vm11, %v870_v24, %v998_v29  ;;  %v879_v59 = vadd.f32 %v2224_v19, %v2359_v0  ;;  %1125 = vst [vmem:[%s3217_s4 + $0x38] sm:$0xff] %v2517_v27 }
 0x251   :  { %vm938_vm15 = vcmp.ge.f32.partialorder %v874_v3, 0.0  ;;  %v1003_v33 = vmul.f32 0.2, %v875_v11  ;;  %v2535_v37 = vsel %vm935_vm12, %v871_v49, %v999_v6  ;;  %v880_v24 = vadd.f32 %v2224_v19, %v2363_v4  ;;  %1126 = vst [vmem:[%s3217_s4 + $0x40] sm:$0xff] %v2526_v55 }
 0x252   :  { %vm939_vm0 = vcmp.ge.f32.partialorder %v875_v11, 0.0  ;;  %v1004_v60 = vmul.f32 0.2, %v876_v40  ;;  %v2544_v32 = vsel %vm936_vm13, %v872_v42, %v1000_v50  ;;  %v881_v0 = vadd.f32 %v2224_v19, %v2367_v10  ;;  %1127 = vst [vmem:[%s3217_s4 + $0x48] sm:$0xff] %v2535_v37 }
 0x253   :  { %vm940_vm1 = vcmp.ge.f32.partialorder %v876_v40, 0.0  ;;  %v1005_v9 = vmul.f32 0.2, %v877_v48  ;;  %v2553_v16 = vsel %vm937_vm14, %v873_v7, %v1001_v53  ;;  %v882_v4 = vadd.f32 %v2224_v19, %v2371_v17  ;;  %1128 = vst [vmem:[%s3217_s4 + $0x50] sm:$0xff] %v2544_v32 }
 0x254   :  { %vm941_vm2 = vcmp.ge.f32.partialorder %v877_v48, 0.0  ;;  %v1006_v49 = vmul.f32 0.2, %v878_v56  ;;  %v2562_v42 = vsel %vm938_vm15, %v874_v3, %v1002_v26  ;;  %v883_v7 = vadd.f32 %v2224_v19, %v2375_v39  ;;  %1129 = vst [vmem:[%s3217_s4 + $0x58] sm:$0xff] %v2553_v16 }
 0x255   :  { %vm942_vm3 = vcmp.ge.f32.partialorder %v878_v56, 0.0  ;;  %v1007_v10 = vmul.f32 0.2, %v879_v59  ;;  %v2571_v63 = vsel %vm939_vm0, %v875_v11, %v1003_v33  ;;  %v884_v17 = vadd.f32 %v2224_v19, %v2379_v41  ;;  %1130 = vst [vmem:[%s3217_s4 + $0x60] sm:$0xff] %v2562_v42 }
 0x256   :  { %vm943_vm4 = vcmp.ge.f32.partialorder %v879_v59, 0.0  ;;  %v1008_v15 = vmul.f32 0.2, %v880_v24  ;;  %v2580_v3 = vsel %vm940_vm1, %v876_v40, %v1004_v60  ;;  %v885_v39 = vadd.f32 %v2224_v19, %v2383_v44  ;;  %1131 = vst [vmem:[%s3217_s4 + $0x68] sm:$0xff] %v2571_v63 }
 0x257   :  { %vm944_vm5 = vcmp.ge.f32.partialorder %v880_v24, 0.0  ;;  %v1009_v29 = vmul.f32 0.2, %v881_v0  ;;  %v2589_v11 = vsel %vm941_vm2, %v877_v48, %v1005_v9  ;;  %v886_v41 = vadd.f32 %v2224_v19, %v2387_v47  ;;  %1132 = vst [vmem:[%s3217_s4 + $0x70] sm:$0xff] %v2580_v3 }
 0x258   :  { %vm945_vm6 = vcmp.ge.f32.partialorder %v881_v0, 0.0  ;;  %v1010_v6 = vmul.f32 0.2, %v882_v4  ;;  %v2598_v40 = vsel %vm942_vm3, %v878_v56, %v1006_v49  ;;  %v887_v44 = vadd.f32 %v2224_v19, %v2391_v51  ;;  %1133 = vst [vmem:[%s3217_s4 + $0x78] sm:$0xff] %v2589_v11 }
 0x259   :  { %vm946_vm7 = vcmp.ge.f32.partialorder %v882_v4, 0.0  ;;  %v1011_v50 = vmul.f32 0.2, %v883_v7  ;;  %v2607_v48 = vsel %vm943_vm4, %v879_v59, %v1007_v10  ;;  %v888_v47 = vadd.f32 %v2224_v19, %v2395_v54  ;;  %1134 = vst [vmem:[%s3217_s4 + $0x80] sm:$0xff] %v2598_v40 }
 0x25a   :  { %vm947_vm8 = vcmp.ge.f32.partialorder %v883_v7, 0.0  ;;  %v1012_v53 = vmul.f32 0.2, %v884_v17  ;;  %v2616_v56 = vsel %vm944_vm5, %v880_v24, %v1008_v15  ;;  %v889_v51 = vadd.f32 %v2224_v19, %v2399_v57  ;;  %1135 = vst [vmem:[%s3217_s4 + $0x88] sm:$0xff] %v2607_v48 }
 0x25b   :  { %vm948_vm9 = vcmp.ge.f32.partialorder %v884_v17, 0.0  ;;  %v1013_v26 = vmul.f32 0.2, %v885_v39  ;;  %v2625_v59 = vsel %vm945_vm6, %v881_v0, %v1009_v29  ;;  %v890_v54 = vadd.f32 %v2224_v19, %v2403_v61  ;;  %1136 = vst [vmem:[%s3217_s4 + $0x90] sm:$0xff] %v2616_v56 }
 0x25c   :  { %vm949_vm10 = vcmp.ge.f32.partialorder %v885_v39, 0.0  ;;  %v1014_v33 = vmul.f32 0.2, %v886_v41  ;;  %v2634_v24 = vsel %vm946_vm7, %v882_v4, %v1010_v6  ;;  %v891_v57 = vadd.f32 %v2224_v19, %v2407_v1  ;;  %1137 = vst [vmem:[%s3217_s4 + $0x98] sm:$0xff] %v2625_v59 }
 0x25d   :  { %vm950_vm11 = vcmp.ge.f32.partialorder %v886_v41, 0.0  ;;  %v1015_v60 = vmul.f32 0.2, %v887_v44  ;;  %v2643_v0 = vsel %vm947_vm8, %v883_v7, %v1011_v50  ;;  %v892_v61 = vadd.f32 %v2224_v19, %v2411_v52  ;;  %1138 = vst [vmem:[%s3217_s4 + $0xa0] sm:$0xff] %v2634_v24 }
 0x25e   :  { %vm951_vm12 = vcmp.ge.f32.partialorder %v887_v44, 0.0  ;;  %v1016_v9 = vmul.f32 0.2, %v888_v47  ;;  %v2652_v4 = vsel %vm948_vm9, %v884_v17, %v1012_v53  ;;  %v893_v1 = vadd.f32 %v2224_v19, %v2415_v22  ;;  %1139 = vst [vmem:[%s3217_s4 + $0xa8] sm:$0xff] %v2643_v0 }
 0x25f   :  { %vm952_vm13 = vcmp.ge.f32.partialorder %v888_v47, 0.0  ;;  %v1017_v49 = vmul.f32 0.2, %v889_v51  ;;  %v2661_v7 = vsel %vm949_vm10, %v885_v39, %v1013_v26  ;;  %v894_v52 = vadd.f32 %v2224_v19, %v2420_v14  ;;  %1140 = vst [vmem:[%s3217_s4 + $0xb0] sm:$0xff] %v2652_v4 }
 0x260   :  { %vm953_vm14 = vcmp.ge.f32.partialorder %v889_v51, 0.0  ;;  %v1018_v10 = vmul.f32 0.2, %v890_v54  ;;  %v2670_v17 = vsel %vm950_vm11, %v886_v41, %v1014_v33  ;;  %v895_v22 = vadd.f32 %v2224_v19, %v2424_v20  ;;  %1141 = vst [vmem:[%s3217_s4 + $0xb8] sm:$0xff] %v2661_v7 }
 0x261   :  { %vm954_vm15 = vcmp.ge.f32.partialorder %v890_v54, 0.0  ;;  %v1019_v15 = vmul.f32 0.2, %v891_v57  ;;  %v2679_v39 = vsel %vm951_vm12, %v887_v44, %v1015_v60  ;;  %v896_v14 = vadd.f32 %v2224_v19, %v2428_v31  ;;  %1142 = vst [vmem:[%s3217_s4 + $0xc0] sm:$0xff] %v2670_v17 }
 0x262   :  { %vm955_vm0 = vcmp.ge.f32.partialorder %v891_v57, 0.0  ;;  %v1020_v29 = vmul.f32 0.2, %v892_v61  ;;  %v2688_v41 = vsel %vm952_vm13, %v888_v47, %v1016_v9  ;;  %v897_v20 = vadd.f32 %v2224_v19, %v2433_v13  ;;  %1143 = vst [vmem:[%s3217_s4 + $0xc8] sm:$0xff] %v2679_v39 }
 0x263   :  { %vm956_vm1 = vcmp.ge.f32.partialorder %v892_v61, 0.0  ;;  %v1021_v6 = vmul.f32 0.2, %v893_v1  ;;  %v2697_v44 = vsel %vm953_vm14, %v889_v51, %v1017_v49  ;;  %v898_v31 = vadd.f32 %v2224_v19, %v2437_v5  ;;  %1144 = vst [vmem:[%s3217_s4 + $0xd0] sm:$0xff] %v2688_v41 }
 0x264   :  { %vm957_vm2 = vcmp.ge.f32.partialorder %v893_v1, 0.0  ;;  %v1022_v50 = vmul.f32 0.2, %v894_v52  ;;  %v2706_v47 = vsel %vm954_vm15, %v890_v54, %v1018_v10  ;;  %v899_v13 = vadd.f32 %v2224_v19, %v2441_v30  ;;  %1145 = vst [vmem:[%s3217_s4 + $0xd8] sm:$0xff] %v2697_v44 }
 0x265   :  { %vm958_vm3 = vcmp.ge.f32.partialorder %v894_v52, 0.0  ;;  %v1023_v53 = vmul.f32 0.2, %v895_v22  ;;  %v2715_v51 = vsel %vm955_vm0, %v891_v57, %v1019_v15  ;;  %v900_v5 = vadd.f32 %v2224_v19, %v2446_v23  ;;  %1146 = vst [vmem:[%s3217_s4 + $0xe0] sm:$0xff] %v2706_v47 }
 0x266   :  { %vm959_vm4 = vcmp.ge.f32.partialorder %v895_v22, 0.0  ;;  %v1024_v26 = vmul.f32 0.2, %v896_v14  ;;  %v2724_v54 = vsel %vm956_vm1, %v892_v61, %v1020_v29  ;;  %v901_v30 = vadd.f32 %v2224_v19, %v2450_v12  ;;  %1147 = vst [vmem:[%s3217_s4 + $0xe8] sm:$0xff] %v2715_v51 }
 0x267   :  { %vm960_vm5 = vcmp.ge.f32.partialorder %v896_v14, 0.0  ;;  %v1025_v33 = vmul.f32 0.2, %v897_v20  ;;  %v2733_v57 = vsel %vm957_vm2, %v893_v1, %v1021_v6  ;;  %v902_v23 = vadd.f32 %v2224_v19, %v2454_v35  ;;  %1148 = vst [vmem:[%s3217_s4 + $0xf0] sm:$0xff] %v2724_v54 }
 0x268   :  { %vm961_vm6 = vcmp.ge.f32.partialorder %v897_v20, 0.0  ;;  %v1026_v60 = vmul.f32 0.2, %v898_v31  ;;  %v2742_v61 = vsel %vm958_vm3, %v894_v52, %v1022_v50  ;;  %v903_v12 = vadd.f32 %v2224_v19, %v2459_v25  ;;  %1149 = vst [vmem:[%s3217_s4 + $0xf8] sm:$0xff] %v2733_v57 }
 0x269   :  { %vm962_vm7 = vcmp.ge.f32.partialorder %v898_v31, 0.0  ;;  %v1027_v9 = vmul.f32 0.2, %v899_v13  ;;  %v2751_v1 = vsel %vm959_vm4, %v895_v22, %v1023_v53  ;;  %v904_v35 = vadd.f32 %v2224_v19, %v2463_v45  ;;  %1150 = vst [vmem:[%s3217_s4 + $0x100] sm:$0xff] %v2742_v61 }
 0x26a   :  { %vm963_vm8 = vcmp.ge.f32.partialorder %v899_v13, 0.0  ;;  %v1028_v49 = vmul.f32 0.2, %v900_v5  ;;  %v2760_v52 = vsel %vm960_vm5, %v896_v14, %v1024_v26  ;;  %v905_v25 = vadd.f32 %v2224_v19, %v2468_v58  ;;  %1151 = vst [vmem:[%s3217_s4 + $0x108] sm:$0xff] %v2751_v1 }
 0x26b   :  { %vm964_vm9 = vcmp.ge.f32.partialorder %v900_v5, 0.0  ;;  %v1029_v10 = vmul.f32 0.2, %v901_v30  ;;  %v2769_v22 = vsel %vm961_vm6, %v897_v20, %v1025_v33  ;;  %v906_v45 = vadd.f32 %v2224_v19, %v2473_v62  ;;  %1152 = vst [vmem:[%s3217_s4 + $0x110] sm:$0xff] %v2760_v52 }
 0x26c   :  { %3381 = vst [vmem:[#allocation2_spill] sm:$0xff] %v2769_v22  ;;  %vm965_vm10 = vcmp.ge.f32.partialorder %v901_v30, 0.0  ;;  %v1030_v15 = vmul.f32 0.2, %v902_v23  ;;  %v2778_v14 = vsel %vm962_vm7, %v898_v31, %v1026_v60  ;;  %v907_v58 = vadd.f32 %v2224_v19, %v2478_v36 }
 0x26d   :  { %3382 = vst [vmem:[#allocation3_spill] sm:$0xff] %v2778_v14  ;;  %vm966_vm11 = vcmp.ge.f32.partialorder %v902_v23, 0.0  ;;  %v1031_v29 = vmul.f32 0.2, %v903_v12  ;;  %v2787_v20 = vsel %vm963_vm8, %v899_v13, %v1027_v9  ;;  %vm967_vm12 = vcmp.ge.f32.partialorder %v903_v12, 0.0 }
 0x26e   :  { %3383 = vst [vmem:[#allocation4_spill] sm:$0xff] %v2787_v20  ;;  %v1032_v62 = vmul.f32 0.2, %v904_v35  ;;  %v2794_v6 = vsel %vm964_vm9, %v900_v5, %v1028_v49  ;;  %vm968_vm13 = vcmp.ge.f32.partialorder %v904_v35, 0.0  ;;  %v1033_v19 = vmul.f32 0.2, %v905_v25 }
 0x26f   :  { %3384 = vst [vmem:[#allocation5_spill] sm:$0xff] %v2794_v6  ;;  %v2800_v36 = vsel %vm965_vm10, %v901_v30, %v1029_v10  ;;  %vm969_vm14 = vcmp.ge.f32.partialorder %v905_v25, 0.0  ;;  %v1034_v31 = vmul.f32 0.2, %v906_v45  ;;  %v2806_v50 = vsel %vm966_vm11, %v902_v23, %v1030_v15  ;;  %v3393_v49 = vld [vmem:[#allocation33_spill] sm:$0xff] }
 0x270   :  { %1153 = vst [vmem:[%s3217_s4 + $0x118] sm:$0xff] %v2769_v22  ;;  %vm970_vm15 = vcmp.ge.f32.partialorder %v906_v45, 0.0  ;;  %v1035_v13 = vmul.f32 0.2, %v907_v58  ;;  %v2812_v53 = vsel %vm967_vm12, %v903_v12, %v1031_v29  ;;  %vm971_vm0 = vcmp.ge.f32.partialorder %v907_v58, 0.0  ;;  %v3391_v12 = vld [vmem:[#allocation31_spill] sm:$0xff] }
 0x271   :  { %3385 = vst [vmem:[#allocation12_spill] sm:$0xff] %v2800_v36  ;;  %v1036_v5 = vmul.f32 0.2, %v2255_v43  ;;  %v2819_v26 = vsel %vm968_vm13, %v904_v35, %v1032_v62  ;;  %vm972_vm1 = vcmp.ge.f32.partialorder %v2255_v43, 0.0  ;;  %v1037_v30 = vmul.f32 0.2, %v2258_v2 }
 0x272   :  { %1154 = vst [vmem:[%s3217_s4 + $0x120] sm:$0xff] %v2778_v14  ;;  %v2827_v33 = vsel %vm969_vm14, %v905_v25, %v1033_v19  ;;  %vm973_vm2 = vcmp.ge.f32.partialorder %v2258_v2, 0.0  ;;  %v1038_v23 = vmul.f32 0.2, %v2261_v38  ;;  %v2835_v60 = vsel %vm970_vm15, %v906_v45, %v1034_v31  ;;  %v3394_v45 = vld [vmem:[#allocation16_spill] sm:$0xff] }
 0x273   :  { %3386 = vst [vmem:[#allocation14_spill] sm:$0xff] %v2806_v50  ;;  %vm974_vm3 = vcmp.ge.f32.partialorder %v2261_v38, 0.0  ;;  %v1039_v9 = vmul.f32 0.2, %v3391_v12  ;;  %v2843_v35 = vsel %vm971_vm0, %v907_v58, %v1035_v13  ;;  %vm975_vm4 = vcmp.ge.f32.partialorder %v3391_v12, 0.0 }
 0x274   :  { %1155 = vst [vmem:[%s3217_s4 + $0x128] sm:$0xff] %v2787_v20  ;;  %v1040_v25 = vmul.f32 0.2, %v3393_v49  ;;  %v2852_v10 = vsel %vm972_vm1, %v2255_v43, %v1036_v5  ;;  %vm976_vm5 = vcmp.ge.f32.partialorder %v3393_v49, 0.0  ;;  %v1041_v15 = vmul.f32 0.2, %v3394_v45 }
 0x275   :  { %3387 = vst [vmem:[#allocation17_spill] sm:$0xff] %v2812_v53  ;;  %v2861_v58 = vsel %vm973_vm2, %v2258_v2, %v1037_v30  ;;  %vm977_vm6 = vcmp.ge.f32.partialorder %v3394_v45, 0.0  ;;  %v3395_v43 = vld [vmem:[#allocation25_spill] sm:$0xff]  ;;  %v2870_v62 = vsel %vm974_vm3, %v2261_v38, %v1038_v23  ;;  %v3396_v2 = vld [vmem:[#allocation28_spill] sm:$0xff]  ;;  %v2879_v31 = vsel %vm975_vm4, %v3391_v12, %v1039_v9  ;;  %v3397_v38 = vld [vmem:[#allocation30_spill] sm:$0xff] }
 0x276   :  { %1156 = vst [vmem:[%s3217_s4 + $0x130] sm:$0xff] %v2794_v6  ;;  %v1042_v29 = vmul.f32 0.2, %v3395_v43  ;;  %vm978_vm7 = vcmp.ge.f32.partialorder %v3395_v43, 0.0  ;;  %v1043_v19 = vmul.f32 0.2, %v3396_v2  ;;  %v2889_v5 = vsel %vm976_vm5, %v3393_v49, %v1040_v25 }
 0x277   :  { %3388 = vst [vmem:[#allocation19_spill] sm:$0xff] %v2819_v26  ;;  %vm979_vm8 = vcmp.ge.f32.partialorder %v3396_v2, 0.0  ;;  %vm980_vm9 = vcmp.ge.f32.partialorder %v3397_v38, 0.0  ;;  %v1044_v13 = vmul.f32 0.2, %v3397_v38  ;;  %v3398_v30 = vld [vmem:[#allocation32_spill] sm:$0xff]  ;;  %v2901_v9 = vsel %vm977_vm6, %v3394_v45, %v1041_v15 }
 0x278   :  { %1157 = vst [vmem:[%s3217_s4 + $0x138] sm:$0xff] %v2800_v36  ;;  %vm981_vm10 = vcmp.ge.f32.partialorder %v3398_v30, 0.0  ;;  %v3399_v23 = vld [vmem:[#allocation34_spill] sm:$0xff]  ;;  %v1045_v12 = vmul.f32 0.2, %v3398_v30  ;;  %v3400_v49 = vld [vmem:[#allocation35_spill] sm:$0xff] }
 0x279   :  { %3389 = vst [vmem:[#allocation21_spill] sm:$0xff] %v2827_v33  ;;  %vm982_vm11 = vcmp.ge.f32.partialorder %v3399_v23, 0.0  ;;  %vm983_vm12 = vcmp.ge.f32.partialorder %v3400_v49, 0.0  ;;  %v3401_v25 = vld [vmem:[#allocation36_spill] sm:$0xff]  ;;  %v3402_v45 = vld [vmem:[#allocation37_spill] sm:$0xff]  ;;  %v3403_v15 = vld [vmem:[#allocation38_spill] sm:$0xff] }
 0x27a   :  { %1158 = vst [vmem:[%s3217_s4 + $0x140] sm:$0xff] %v2806_v50  ;;  %vm984_vm13 = vcmp.ge.f32.partialorder %v3401_v25, 0.0  ;;  %vm985_vm14 = vcmp.ge.f32.partialorder %v3402_v45, 0.0  ;;  %vm986_vm15 = vcmp.ge.f32.partialorder %v3403_v15, 0.0  ;;  %v2937_v50 = vsel %vm980_vm9, %v3397_v38, %v1044_v13  ;;  %v3405_v13 = vld [vmem:[#allocation40_spill] sm:$0xff]  ;;  %v3406_v20 = vld [vmem:[#allocation41_spill] sm:$0xff] }
 0x27b   :  { %3390 = vst [vmem:[#allocation23_spill] sm:$0xff] %v2835_v60  ;;  %v2948_v36 = vsel %vm981_vm10, %v3398_v30, %v1045_v12  ;;  %v1636_v38 = vpack.c.bf16 %v2861_v58, %v2852_v10  ;;  %v1052_v6 = vmul.f32 0.2, %v3405_v13  ;;  %v1053_v14 = vmul.f32 0.2, %v3406_v20 }
 0x27c   :  { %1159 = vst [vmem:[%s3217_s4 + $0x148] sm:$0xff] %v2812_v53  ;;  %v1049_v53 = vmul.f32 0.2, %v3402_v45  ;;  %vm988_vm1 = vcmp.ge.f32.partialorder %v3405_v13, 0.0  ;;  %vm989_vm2 = vcmp.ge.f32.partialorder %v3406_v20, 0.0 }
 0x27d   :  { %3392 = vst [vmem:[#allocation26_spill] sm:$0xff] %v2843_v35 }
 0x27e   :  { %1160 = vst [vmem:[%s3217_s4 + $0x150] sm:$0xff] %v2819_v26  ;;  %v2925_v26 = vsel %vm979_vm8, %v3396_v2, %v1043_v19  ;;  %v1050_v2 = vmul.f32 0.2, %v3403_v15  ;;  %v2990_v30 = vsel %vm985_vm14, %v3402_v45, %v1049_v53  ;;  %v1656_v53 = vpack.c.bf16 %v2948_v36, %v2937_v50 }
 0x27f   :  { %1161 = vst [vmem:[%s3217_s4 + $0x158] sm:$0xff] %v2827_v33  ;;  %v1047_v33 = vmul.f32 0.2, %v3400_v49  ;;  %v3015_v45 = vsel %vm988_vm1, %v3405_v13, %v1052_v6 }
 0x280   :  { %1162 = vst [vmem:[%s3217_s4 + $0x160] sm:$0xff] %v2835_v60  ;;  %v2913_v60 = vsel %vm978_vm7, %v3395_v43, %v1042_v29  ;;  %v3404_v43 = vld [vmem:[#allocation39_spill] sm:$0xff]  ;;  %v1048_v29 = vmul.f32 0.2, %v3401_v25 }
 0x281   :  { %1163 = vst [vmem:[%s3217_s4 + $0x168] sm:$0xff] %v2843_v35  ;;  %v1046_v35 = vmul.f32 0.2, %v3399_v23  ;;  %vm987_vm0 = vcmp.ge.f32.partialorder %v3404_v43, 0.0  ;;  %v1051_v19 = vmul.f32 0.2, %v3404_v43  ;;  %v2974_v12 = vsel %vm983_vm12, %v3400_v49, %v1047_v33 }
 0x282   :  { %1164 = vst [vmem:[%s3217_s4 + $0x170] sm:$0xff] %v2852_v10  ;;  %v1651_v33 = vpack.c.bf16 %v2925_v26, %v2913_v60  ;;  %v3001_v49 = vsel %vm986_vm15, %v3403_v15, %v1050_v2  ;;  %v1526_v2 = vpack.c.bf16 %v2488_v46, %v2485_v34  ;;  %v1541_v34 = vpack.c.bf16 %v2535_v37, %v2526_v55 }
 0x283   :  { %1165 = vst [vmem:[%s3217_s4 + $0x178] sm:$0xff] %v2861_v58  ;;  %v2961_v22 = vsel %vm982_vm11, %v3399_v23, %v1046_v35  ;;  %v1646_v35 = vpack.c.bf16 %v2901_v9, %v2889_v5  ;;  %v2985_v23 = vsel %vm984_vm13, %v3401_v25, %v1048_v29  ;;  %v3006_v25 = vsel %vm987_vm0, %v3404_v43, %v1051_v19 }
 0x284   :  { %1166 = vst [vmem:[%s3217_s4 + $0x180] sm:$0xff] %v2870_v62  ;;  %v3018_v29 = vsel %vm989_vm2, %v3406_v20, %v1053_v14  ;;  %v1661_v15 = vpack.c.bf16 %v2974_v12, %v2961_v22  ;;  %v1666_v6 = vpack.c.bf16 %v2990_v30, %v2985_v23  ;;  %v1671_v14 = vpack.c.bf16 %v3006_v25, %v3001_v49 }
 0x285   :  { %1167 = vst [vmem:[%s3217_s4 + $0x188] sm:$0xff] %v2879_v31  ;;  %v1676_v43 = vpack.c.bf16 %v3018_v29, %v3015_v45  ;;  %v1531_v19 = vpack.c.bf16 %v2499_v8, %v2491_v28  ;;  %v1546_v28 = vpack.c.bf16 %v2553_v16, %v2544_v32  ;;  %v1551_v46 = vpack.c.bf16 %v2571_v63, %v2562_v42 }
 0x286   :  { %1168 = vst [vmem:[%s3217_s4 + $0x190] sm:$0xff] %v2889_v5  ;;  %v1556_v8 = vpack.c.bf16 %v2589_v11, %v2580_v3  ;;  %v1571_v55 = vpack.c.bf16 %v2643_v0, %v2634_v24  ;;  %v1576_v37 = vpack.c.bf16 %v2661_v7, %v2652_v4  ;;  %v1581_v32 = vpack.c.bf16 %v2679_v39, %v2670_v17  ;;  %v3408_v11 = vld [vmem:[#allocation2_spill] sm:$0xff]  ;;  %v3411_v24 = vld [vmem:[#allocation5_spill] sm:$0xff]  ;;  %v3412_v0 = vld [vmem:[#allocation12_spill] sm:$0xff] }
 0x287   :  { %1169 = vst [vmem:[%s3217_s4 + $0x198] sm:$0xff] %v2901_v9  ;;  %v1586_v16 = vpack.c.bf16 %v2697_v44, %v2688_v41  ;;  %v1591_v42 = vpack.c.bf16 %v2715_v51, %v2706_v47  ;;  %v1596_v63 = vpack.c.bf16 %v2733_v57, %v2724_v54  ;;  %v1601_v3 = vpack.c.bf16 %v2751_v1, %v2742_v61  ;;  %v3413_v7 = vld [vmem:[#allocation14_spill] sm:$0xff]  ;;  %v3414_v17 = vld [vmem:[#allocation17_spill] sm:$0xff]  ;;  %v3415_v41 = vld [vmem:[#allocation19_spill] sm:$0xff] }
 0x288   :  { %1170 = vst [vmem:[%s3217_s4 + $0x1a0] sm:$0xff] %v2913_v60  ;;  %v1616_v4 = vpack.c.bf16 %v3412_v0, %v3411_v24  ;;  %v1621_v39 = vpack.c.bf16 %v3414_v17, %v3413_v7  ;;  %v3416_v44 = vld [vmem:[#allocation21_spill] sm:$0xff]  ;;  %v3417_v51 = vld [vmem:[#allocation23_spill] sm:$0xff]  ;;  %v3418_v54 = vld [vmem:[#allocation26_spill] sm:$0xff]  ;;  %v3419_v61 = vpack.c.bf16 %v2879_v31, %v2870_v62 }
 0x289   :  { %1171 = vst [vmem:[%s3217_s4 + $0x1a8] sm:$0xff] %v2925_v26  ;;  %v1626_v47 = vpack.c.bf16 %v3416_v44, %v3415_v41  ;;  %v1631_v57 = vpack.c.bf16 %v3418_v54, %v3417_v51 }
 0x28a   :  { %1172 = vst [vmem:[%s3217_s4 + $0x1b0] sm:$0xff] %v2937_v50 }
 0x28b   :  { %1173 = vst [vmem:[%s3217_s4 + $0x1b8] sm:$0xff] %v2948_v36 }
 0x28c   :  { %1174 = vst [vmem:[%s3217_s4 + $0x1c0] sm:$0xff] %v2961_v22  ;;  %v3407_v22 = vld [vmem:[#allocation42_spill] sm:$0xff] }
 0x28d   :  { %1175 = vst [vmem:[%s3217_s4 + $0x1c8] sm:$0xff] %v2974_v12  ;;  %v1521_v20 = vpack.c.bf16 %v2482_v21, %v3407_v22  ;;  %v1536_v21 = vpack.c.bf16 %v2517_v27, %v2508_v18  ;;  %v1561_v18 = vpack.c.bf16 %v2607_v48, %v2598_v40  ;;  %v1566_v27 = vpack.c.bf16 %v2625_v59, %v2616_v56  ;;  %v3409_v48 = vld [vmem:[#allocation3_spill] sm:$0xff]  ;;  %v3410_v56 = vld [vmem:[#allocation4_spill] sm:$0xff] }
 0x28e   :  { %1176 = vst [vmem:[%s3217_s4 + $0x1d0] sm:$0xff] %v2985_v23  ;;  %v1606_v40 = vpack.c.bf16 %v3408_v11, %v2760_v52  ;;  %v1611_v59 = vpack.c.bf16 %v3410_v56, %v3409_v48 }
 0x28f   :  { %1177 = vst [vmem:[%s3217_s4 + $0x1d8] sm:$0xff] %v2990_v30 }
 0x290   :  { %1178 = vst [vmem:[%s3217_s4 + $0x1e0] sm:$0xff] %v3001_v49 }
 0x291   :  { %1179 = vst [vmem:[%s3217_s4 + $0x1e8] sm:$0xff] %v3006_v25 }
 0x292   :  { %1180 = vst [vmem:[%s3217_s4 + $0x1f0] sm:$0xff] %v3015_v45 }
 0x293   :  { %1181 = vst [vmem:[%s3217_s4 + $0x1f8] sm:$0xff] %v3018_v29 }
 0x294   :  { %1522 = vst [vmem:[%s3218_s5] sm:$0xff] %v1521_v20  }
 0x295   :  { %1678 = vst [vmem:[%s3218_s5 + $0x8] sm:$0xff] %v1526_v2  }
 0x296   :  { %1679 = vst [vmem:[%s3218_s5 + $0x10] sm:$0xff] %v1531_v19  }
 0x297   :  { %1680 = vst [vmem:[%s3218_s5 + $0x18] sm:$0xff] %v1536_v21  }
 0x298   :  { %1681 = vst [vmem:[%s3218_s5 + $0x20] sm:$0xff] %v1541_v34  }
 0x299   :  { %1682 = vst [vmem:[%s3218_s5 + $0x28] sm:$0xff] %v1546_v28  }
 0x29a   :  { %1683 = vst [vmem:[%s3218_s5 + $0x30] sm:$0xff] %v1551_v46  }
 0x29b   :  { %1684 = vst [vmem:[%s3218_s5 + $0x38] sm:$0xff] %v1556_v8  }
 0x29c   :  { %1685 = vst [vmem:[%s3218_s5 + $0x40] sm:$0xff] %v1561_v18  }
 0x29d   :  { %1686 = vst [vmem:[%s3218_s5 + $0x48] sm:$0xff] %v1566_v27  }
 0x29e   :  { %1687 = vst [vmem:[%s3218_s5 + $0x50] sm:$0xff] %v1571_v55  }
 0x29f   :  { %1688 = vst [vmem:[%s3218_s5 + $0x58] sm:$0xff] %v1576_v37  }
 0x2a0   :  { %1689 = vst [vmem:[%s3218_s5 + $0x60] sm:$0xff] %v1581_v32  }
 0x2a1   :  { %1690 = vst [vmem:[%s3218_s5 + $0x68] sm:$0xff] %v1586_v16  }
 0x2a2   :  { %1691 = vst [vmem:[%s3218_s5 + $0x70] sm:$0xff] %v1591_v42  }
 0x2a3   :  { %1692 = vst [vmem:[%s3218_s5 + $0x78] sm:$0xff] %v1596_v63  }
 0x2a4   :  { %1693 = vst [vmem:[%s3218_s5 + $0x80] sm:$0xff] %v1601_v3  }
 0x2a5   :  { %1694 = vst [vmem:[%s3218_s5 + $0x88] sm:$0xff] %v1606_v40  }
 0x2a6   :  { %1695 = vst [vmem:[%s3218_s5 + $0x90] sm:$0xff] %v1611_v59  }
 0x2a7   :  { %1696 = vst [vmem:[%s3218_s5 + $0x98] sm:$0xff] %v1616_v4  }
 0x2a8   :  { %1697 = vst [vmem:[%s3218_s5 + $0xa0] sm:$0xff] %v1621_v39  }
 0x2a9   :  { %1698 = vst [vmem:[%s3218_s5 + $0xa8] sm:$0xff] %v1626_v47  }
 0x2aa   :  { %1699 = vst [vmem:[%s3218_s5 + $0xb0] sm:$0xff] %v1631_v57  }
 0x2ab   :  { %1700 = vst [vmem:[%s3218_s5 + $0xb8] sm:$0xff] %v1636_v38  }
 0x2ac   :  { %1701 = vst [vmem:[%s3218_s5 + $0xc0] sm:$0xff] %v3419_v61  }
 0x2ad   :  { %1702 = vst [vmem:[%s3218_s5 + $0xc8] sm:$0xff] %v1646_v35  }
 0x2ae   :  { %1703 = vst [vmem:[%s3218_s5 + $0xd0] sm:$0xff] %v1651_v33  }
 0x2af   :  { %1704 = vst [vmem:[%s3218_s5 + $0xd8] sm:$0xff] %v1656_v53  }
 0x2b0   :  { %1705 = vst [vmem:[%s3218_s5 + $0xe0] sm:$0xff] %v1661_v15  }
 0x2b1   :  { %1706 = vst [vmem:[%s3218_s5 + $0xe8] sm:$0xff] %v1666_v6  }
 0x2b2   :  { %1707 = vst [vmem:[%s3218_s5 + $0xf0] sm:$0xff] %v1671_v14  }
 0x2b3   :  { %1708 = vst [vmem:[%s3218_s5 + $0xf8] sm:$0xff] %v1676_v43  }

// kernel: convnet_forward.9
= control target key start
LH: loop header
LB: loop body
LE: loop exit
PB: predicated region body
PF: predicated region fallthrough
CT: control target
= control target key end

     0   :  { %s3477_s1 = inlined_call_operand.vmem [shape: bf16[1152,128], index: 1, kind: input, shape index: {}]   ;;  %s3478_s0 = inlined_call_operand.vmem [shape: bf16[128,1152], index: 0, kind: input, shape index: {}]   ;;  %s3479_s2 = inlined_call_operand.vmem [shape: f32[1,128], index: 2, kind: input, shape index: {}]   ;;  %s3480_s3 = inlined_call_operand.vmem [shape: f32[1,128], index: 3, kind: input, shape index: {}]   ;;  %s3481_s4 = inlined_call_operand.vmem [shape: f32[128,128], index: 4, kind: output, shape index: {0}]   ;;  %s3482_s5 = inlined_call_operand.vmem [shape: bf16[128,128], index: 5, kind: output, shape index: {1}]  }
   0x1   :  { %v2373_v0 = vld [vmem:[%s3477_s1 + $0x38] sm:$0xff]  ;;  %v2372_v1 = vld [vmem:[%s3477_s1 + $0x30] sm:$0xff]  ;;  %v2371_v2 = vld [vmem:[%s3477_s1 + $0x28] sm:$0xff] }
   0x2   :  { %2485 = vmatpush.bf16.msra.mxu1 %v2373_v0  ;;  %2486 = vmatpush.bf16.msra.mxu2 %v2373_v0  ;;  %v2370_v3 = vld [vmem:[%s3477_s1 + $0x20] sm:$0xff]  ;;  %v2369_v4 = vld [vmem:[%s3477_s1 + $0x18] sm:$0xff]  ;;  %v2368_v5 = vld [vmem:[%s3477_s1 + $0x10] sm:$0xff] }
   0x3   :  { %2487 = vmatpush.bf16.msra.mxu3 %v2373_v0  ;;  %1043 = vmatpush.bf16.msra.mxu0 %v2373_v0  ;;  %v2367_v6 = vld [vmem:[%s3477_s1 + $0x8] sm:$0xff]  ;;  %v2366_v7 = vld [vmem:[%s3477_s1] sm:$0xff]  ;;  %v1792_v8 = vld [vmem:[%s3478_s0 + $0x90] sm:$0xf] }
   0x4   :  { %v2316_v9 = vld [vmem:[%s3478_s0 + $0xb0] sm:$0xf0]  ;;  %v1864_v10 = vld [vmem:[%s3478_s0 + $0x120] sm:$0xf]  ;;  %v2334_v11 = vld [vmem:[%s3478_s0 + $0x140] sm:$0xf0] }
   0x5   :  { %v1936_v12 = vld [vmem:[%s3478_s0 + $0x1b0] sm:$0xf]  ;;  %v2352_v13 = vld [vmem:[%s3478_s0 + $0x1d0] sm:$0xf0]  ;;  %v1720_v14 = vld [vmem:[%s3478_s0] sm:$0xf]  ;;  %v1793_v18 = vor.u32 %v2316_v9, %v1792_v8  ;;  %v1865_v19 = vor.u32 %v2334_v11, %v1864_v10 }
   0x6   :  { %2488 = vmatpush.bf16.msra.mxu1 %v2372_v1  ;;  %2489 = vmatpush.bf16.msra.mxu2 %v2372_v1  ;;  %v2298_v15 = vld [vmem:[%s3478_s0 + $0x20] sm:$0xf0]  ;;  %v2389_v16 = vld [vmem:[%s3477_s1 + $0xb8] sm:$0xff]  ;;  %v1937_v20 = vor.u32 %v2352_v13, %v1936_v12  ;;  %v2388_v24 = vld [vmem:[%s3477_s1 + $0xb0] sm:$0xff] }
   0x7   :  { %2490 = vmatpush.bf16.msra.mxu3 %v2372_v1  ;;  %1044 = vmatpush.bf16.msra.mxu0 %v2372_v1  ;;  %v2381_v17 = vld [vmem:[%s3477_s1 + $0x78] sm:$0xff]  ;;  %v1721_v21 = vor.u32 %v2298_v15, %v1720_v14  ;;  %v2380_v25 = vld [vmem:[%s3477_s1 + $0x70] sm:$0xff]  ;;  %v2387_v28 = vld [vmem:[%s3477_s1 + $0xa8] sm:$0xff] }
   0x8   :  { %v2397_v22 = vld [vmem:[%s3477_s1 + $0xf8] sm:$0xff]  ;;  %v2396_v26 = vld [vmem:[%s3477_s1 + $0xf0] sm:$0xff]  ;;  %v2379_v29 = vld [vmem:[%s3477_s1 + $0x68] sm:$0xff] }
   0x9   :  { %v2405_v23 = vld [vmem:[%s3477_s1 + $0x138] sm:$0xff]  ;;  %v2404_v27 = vld [vmem:[%s3477_s1 + $0x130] sm:$0xff]  ;;  %v2395_v30 = vld [vmem:[%s3477_s1 + $0xe8] sm:$0xff] }
   0xa   :  { %2491 = vmatpush.bf16.msra.mxu1 %v2371_v2  ;;  %2492 = vmatpush.bf16.msra.mxu2 %v2371_v2  ;;  %v2403_v31 = vld [vmem:[%s3477_s1 + $0x128] sm:$0xff]  ;;  %v2386_v32 = vld [vmem:[%s3477_s1 + $0xa0] sm:$0xff]  ;;  %v1828_v36 = vld [vmem:[%s3478_s0 + $0xd8] sm:$0xf] }
   0xb   :  { %2493 = vmatpush.bf16.msra.mxu3 %v2371_v2  ;;  %1045 = vmatpush.bf16.msra.mxu0 %v2371_v2  ;;  %v2378_v33 = vld [vmem:[%s3477_s1 + $0x60] sm:$0xff]  ;;  %v2325_v37 = vld [vmem:[%s3478_s0 + $0xf8] sm:$0xf0]  ;;  %v1900_v38 = vld [vmem:[%s3478_s0 + $0x168] sm:$0xf] }
   0xc   :  { %v2394_v34 = vld [vmem:[%s3477_s1 + $0xe0] sm:$0xff]  ;;  %v2343_v39 = vld [vmem:[%s3478_s0 + $0x188] sm:$0xf0]  ;;  %v1972_v40 = vld [vmem:[%s3478_s0 + $0x1f8] sm:$0xf]  ;;  %v1829_v46 = vor.u32 %v2325_v37, %v1828_v36 }
   0xd   :  { %v2402_v35 = vld [vmem:[%s3477_s1 + $0x120] sm:$0xff]  ;;  %v2361_v41 = vld [vmem:[%s3478_s0 + $0x218] sm:$0xf0]  ;;  %v1756_v42 = vld [vmem:[%s3478_s0 + $0x48] sm:$0xf]  ;;  %v1901_v47 = vor.u32 %v2343_v39, %v1900_v38 }
   0xe   :  { %2494 = vmatpush.bf16.msra.mxu1 %v2370_v3  ;;  %2495 = vmatpush.bf16.msra.mxu2 %v2370_v3  ;;  %v2307_v43 = vld [vmem:[%s3478_s0 + $0x68] sm:$0xf0]  ;;  %v2385_v44 = vld [vmem:[%s3477_s1 + $0x98] sm:$0xff]  ;;  %v1973_v48 = vor.u32 %v2361_v41, %v1972_v40  ;;  %v2384_v52 = vld [vmem:[%s3477_s1 + $0x90] sm:$0xff] }
   0xf   :  { %2496 = vmatpush.bf16.msra.mxu3 %v2370_v3  ;;  %1046 = vmatpush.bf16.msra.mxu0 %v2370_v3  ;;  %v2377_v45 = vld [vmem:[%s3477_s1 + $0x58] sm:$0xff]  ;;  %v1757_v49 = vor.u32 %v2307_v43, %v1756_v42  ;;  %v2376_v53 = vld [vmem:[%s3477_s1 + $0x50] sm:$0xff]  ;;  %v2383_v56 = vld [vmem:[%s3477_s1 + $0x88] sm:$0xff] }
  0x10   :  { %v2393_v50 = vld [vmem:[%s3477_s1 + $0xd8] sm:$0xff]  ;;  %v2392_v54 = vld [vmem:[%s3477_s1 + $0xd0] sm:$0xff]  ;;  %v2375_v57 = vld [vmem:[%s3477_s1 + $0x48] sm:$0xff] }
  0x11   :  { %v2401_v51 = vld [vmem:[%s3477_s1 + $0x118] sm:$0xff]  ;;  %v2400_v55 = vld [vmem:[%s3477_s1 + $0x110] sm:$0xff]  ;;  %v2391_v58 = vld [vmem:[%s3477_s1 + $0xc8] sm:$0xff] }
  0x12   :  { %2497 = vmatpush.bf16.msra.mxu1 %v2369_v4  ;;  %2498 = vmatpush.bf16.msra.mxu2 %v2369_v4  ;;  %v2399_v59 = vld [vmem:[%s3477_s1 + $0x108] sm:$0xff]  ;;  %v2382_v60 = vld [vmem:[%s3477_s1 + $0x80] sm:$0xff]  ;;  %v2421_v2 = vld [vmem:[%s3477_s1 + $0x1b8] sm:$0xff] }
  0x13   :  { %2499 = vmatpush.bf16.msra.mxu3 %v2369_v4  ;;  %1047 = vmatpush.bf16.msra.mxu0 %v2369_v4  ;;  %v2374_v61 = vld [vmem:[%s3477_s1 + $0x40] sm:$0xff]  ;;  %v1722_v1 = vld [vmem:[%s3478_s0 + $0x24] sm:$0xf0]  ;;  %v2413_v3 = vld [vmem:[%s3477_s1 + $0x178] sm:$0xff] }
  0x14   :  { %v2294_v62 = vld [vmem:[%s3478_s0 + $0x4] sm:$0xf]  ;;  %v1728_v4 = vld [vmem:[%s3478_s0 + $0x8] sm:$0xf]  ;;  %v1736_v8 = vld [vmem:[%s3478_s0 + $0x10] sm:$0xf] }
  0x15   :  { %v2390_v63 = vld [vmem:[%s3477_s1 + $0xc0] sm:$0xff]  ;;  %v2300_v9 = vld [vmem:[%s3478_s0 + $0x30] sm:$0xf0]  ;;  %v2429_v10 = vld [vmem:[%s3477_s1 + $0x1f8] sm:$0xff]  ;;  %v1725_v12 = vor.u32 %v2294_v62, %v1722_v1 }
  0x16   :  { %2500 = vmatpush.bf16.msra.mxu1 %v2368_v5  ;;  %2501 = vmatpush.bf16.msra.mxu2 %v2368_v5  ;;  %v2398_v0 = vld [vmem:[%s3477_s1 + $0x100] sm:$0xff]  ;;  %v2437_v11 = vld [vmem:[%s3477_s1 + $0x238] sm:$0xff]  ;;  %v1737_v15 = vor.u32 %v2300_v9, %v1736_v8  ;;  %v2312_v40 = vld [vmem:[%s3478_s0 + $0x94] sm:$0xf] }
  0x17   :  { %2502 = vmatpush.bf16.msra.mxu3 %v2368_v5  ;;  %1048 = vmatpush.bf16.msra.mxu0 %v2368_v5  ;;  %v2299_v5 = vld [vmem:[%s3478_s0 + $0x28] sm:$0xf0]  ;;  %v2418_v36 = vld [vmem:[%s3477_s1 + $0x1a0] sm:$0xff]  ;;  %v1794_v41 = vld [vmem:[%s3478_s0 + $0xb4] sm:$0xf0] }
  0x18   :  { %v1729_v13 = vor.u32 %v2299_v5, %v1728_v4  ;;  %v2426_v37 = vld [vmem:[%s3477_s1 + $0x1e0] sm:$0xff]  ;;  %v1800_v42 = vld [vmem:[%s3478_s0 + $0x98] sm:$0xf]  ;;  %v2317_v43 = vld [vmem:[%s3478_s0 + $0xb8] sm:$0xf0] }
  0x19   :  { %v2410_v38 = vld [vmem:[%s3477_s1 + $0x160] sm:$0xff]  ;;  %v1844_v62 = vld [vmem:[%s3478_s0 + $0xe8] sm:$0xf]  ;;  %v2416_v4 = vld [vmem:[%s3477_s1 + $0x190] sm:$0xff] }
  0x1a   :  { %2503 = vmatpush.bf16.msra.mxu1 %v2367_v6  ;;  %2504 = vmatpush.bf16.msra.mxu2 %v2367_v6  ;;  %v2434_v39 = vld [vmem:[%s3477_s1 + $0x220] sm:$0xff]  ;;  %v2424_v5 = vld [vmem:[%s3477_s1 + $0x1d0] sm:$0xff]  ;;  %v1866_v9 = vld [vmem:[%s3478_s0 + $0x144] sm:$0xf0] }
  0x1b   :  { %2505 = vmatpush.bf16.msra.mxu3 %v2367_v6  ;;  %1049 = vmatpush.bf16.msra.mxu0 %v2367_v6  ;;  %v2295_v6 = vld [vmem:[%s3478_s0 + $0xc] sm:$0xf]  ;;  %v2330_v8 = vld [vmem:[%s3478_s0 + $0x124] sm:$0xf] }
  0x1e   :  { %2506 = vmatpush.bf16.msra.mxu1 %v2366_v7  ;;  %2507 = vmatpush.bf16.msra.mxu2 %v2366_v7 }
  0x1f   :  { %2508 = vmatpush.bf16.msra.mxu3 %v2366_v7  ;;  %1050 = vmatpush.bf16.msra.mxu0 %v2366_v7  ;;  %v1730_v7 = vld [vmem:[%s3478_s0 + $0x2c] sm:$0xf0] }
  0x20   :  { %v1733_v14 = vor.u32 %v2295_v6, %v1730_v7  ;;  %v2408_v6 = vld [vmem:[%s3477_s1 + $0x150] sm:$0xff] }
  0x21   :  { %1061 = vmatmul.bf16.vlgmr.msra.gmra.mxu1 %v1793_v18  ;;  %1071 = vmatmul.bf16.vlgmr.msra.gmra.mxu2 %v1865_v19  ;;  %v2428_v18 = vld [vmem:[%s3477_s1 + $0x1f0] sm:$0xff] }
  0x22   :  { %1141 = vmatpush.bf16.msrb.mxu2 %v2389_v16  ;;  %1092 = vmatpush.bf16.msrb.mxu1 %v2381_v17  ;;  %v2420_v16 = vld [vmem:[%s3477_s1 + $0x1b0] sm:$0xff] }
  0x23   :  { %1081 = vmatmul.bf16.vlgmr.msra.gmra.mxu3 %v1937_v20  ;;  %1051 = vmatmul.bf16.vlgmr.msra.gmra.mxu0 %v1721_v21  ;;  %v2412_v17 = vld [vmem:[%s3477_s1 + $0x170] sm:$0xff]  ;;  %v2419_v20 = vld [vmem:[%s3477_s1 + $0x1a8] sm:$0xff] }
  0x24   :  { %1190 = vmatpush.bf16.msrb.mxu3 %v2397_v22  ;;  %1239 = vmatpush.bf16.msrb.mxu0 %v2405_v23  ;;  %v2436_v19 = vld [vmem:[%s3477_s1 + $0x230] sm:$0xff]  ;;  %v2411_v21 = vld [vmem:[%s3477_s1 + $0x168] sm:$0xff] }
  0x25   :  { %v2427_v22 = vld [vmem:[%s3477_s1 + $0x1e8] sm:$0xff]  ;;  %v2432_v7 = vld [vmem:[%s3477_s1 + $0x210] sm:$0xff] }
  0x26   :  { %1142 = vmatpush.bf16.msrb.mxu2 %v2388_v24  ;;  %1093 = vmatpush.bf16.msrb.mxu1 %v2380_v25  ;;  %v2435_v23 = vld [vmem:[%s3477_s1 + $0x228] sm:$0xff]  ;;  %v1758_v25 = vld [vmem:[%s3478_s0 + $0x6c] sm:$0xf0] }
  0x27   :  { %v2303_v24 = vld [vmem:[%s3478_s0 + $0x4c] sm:$0xf] }
  0x28   :  { %1191 = vmatpush.bf16.msrb.mxu3 %v2396_v26  ;;  %1240 = vmatpush.bf16.msrb.mxu0 %v2404_v27  ;;  %v1764_v26 = vld [vmem:[%s3478_s0 + $0x50] sm:$0xf]  ;;  %v2308_v27 = vld [vmem:[%s3478_s0 + $0x70] sm:$0xf0] }
  0x2a   :  { %1143 = vmatpush.bf16.msrb.mxu2 %v2387_v28  ;;  %1094 = vmatpush.bf16.msrb.mxu1 %v2379_v29  ;;  %v2304_v28 = vld [vmem:[%s3478_s0 + $0x54] sm:$0xf]  ;;  %v1766_v29 = vld [vmem:[%s3478_s0 + $0x74] sm:$0xf0] }
  0x2c   :  { %1192 = vmatpush.bf16.msrb.mxu3 %v2395_v30  ;;  %1241 = vmatpush.bf16.msrb.mxu0 %v2403_v31  ;;  %v1772_v30 = vld [vmem:[%s3478_s0 + $0x58] sm:$0xf]  ;;  %v2309_v31 = vld [vmem:[%s3478_s0 + $0x78] sm:$0xf0] }
  0x2e   :  { %1144 = vmatpush.bf16.msrb.mxu2 %v2386_v32  ;;  %1095 = vmatpush.bf16.msrb.mxu1 %v2378_v33  ;;  %v1761_v32 = vor.u32 %v2303_v24, %v1758_v25  ;;  %v1765_v33 = vor.u32 %v2308_v27, %v1764_v26  ;;  %v2339_v24 = vld [vmem:[%s3478_s0 + $0x16c] sm:$0xf]  ;;  %v1902_v25 = vld [vmem:[%s3478_s0 + $0x18c] sm:$0xf0]  ;;  %v2344_v27 = vld [vmem:[%s3478_s0 + $0x190] sm:$0xf0] }
  0x2f   :  { %v1908_v26 = vld [vmem:[%s3478_s0 + $0x170] sm:$0xf] }
  0x30   :  { %1193 = vmatpush.bf16.msrb.mxu3 %v2394_v34  ;;  %1242 = vmatpush.bf16.msrb.mxu0 %v2402_v35  ;;  %v1769_v34 = vor.u32 %v2304_v28, %v1766_v29  ;;  %v1773_v35 = vor.u32 %v2309_v31, %v1772_v30  ;;  %v2340_v28 = vld [vmem:[%s3478_s0 + $0x174] sm:$0xf]  ;;  %v1910_v29 = vld [vmem:[%s3478_s0 + $0x194] sm:$0xf0]  ;;  %v2345_v31 = vld [vmem:[%s3478_s0 + $0x198] sm:$0xf0] }
  0x31   :  { %1066 = vmatmul.bf16.gmra.mxu1 %v1829_v46  ;;  %1076 = vmatmul.bf16.gmra.mxu2 %v1901_v47  ;;  %v1808_v46 = vld [vmem:[%s3478_s0 + $0xa0] sm:$0xf]  ;;  %v2318_v47 = vld [vmem:[%s3478_s0 + $0xc0] sm:$0xf0]  ;;  %v1916_v30 = vld [vmem:[%s3478_s0 + $0x178] sm:$0xf] }
  0x32   :  { %1145 = vmatpush.bf16.msrb.mxu2 %v2385_v44  ;;  %1096 = vmatpush.bf16.msrb.mxu1 %v2377_v45  ;;  %v2313_v44 = vld [vmem:[%s3478_s0 + $0x9c] sm:$0xf]  ;;  %v1802_v45 = vld [vmem:[%s3478_s0 + $0xbc] sm:$0xf0] }
  0x33   :  { %1086 = vmatmul.bf16.gmra.mxu3 %v1973_v48  ;;  %1056 = vmatmul.bf16.gmra.mxu0 %v1757_v49  ;;  %v1797_v48 = vor.u32 %v2312_v40, %v1794_v41  ;;  %v1801_v49 = vor.u32 %v2317_v43, %v1800_v42  ;;  %v2348_v40 = vld [vmem:[%s3478_s0 + $0x1b4] sm:$0xf]  ;;  %v1938_v41 = vld [vmem:[%s3478_s0 + $0x1d4] sm:$0xf0]  ;;  %v2353_v43 = vld [vmem:[%s3478_s0 + $0x1d8] sm:$0xf0] }
  0x34   :  { %1194 = vmatpush.bf16.msrb.mxu3 %v2393_v50  ;;  %1243 = vmatpush.bf16.msrb.mxu0 %v2401_v51  ;;  %v1805_v50 = vor.u32 %v2313_v44, %v1802_v45  ;;  %v1809_v51 = vor.u32 %v2318_v47, %v1808_v46  ;;  %v1944_v42 = vld [vmem:[%s3478_s0 + $0x1b8] sm:$0xf]  ;;  %v2349_v44 = vld [vmem:[%s3478_s0 + $0x1bc] sm:$0xf]  ;;  %v1946_v45 = vld [vmem:[%s3478_s0 + $0x1dc] sm:$0xf0] }
  0x35   :  { %v1952_v46 = vld [vmem:[%s3478_s0 + $0x1c0] sm:$0xf]  ;;  %v2354_v47 = vld [vmem:[%s3478_s0 + $0x1e0] sm:$0xf0] }
  0x36   :  { %1146 = vmatpush.bf16.msrb.mxu2 %v2384_v52  ;;  %1097 = vmatpush.bf16.msrb.mxu1 %v2376_v53  ;;  %v2417_v52 = vld [vmem:[%s3477_s1 + $0x198] sm:$0xff] }
  0x37   :  { %v2425_v53 = vld [vmem:[%s3477_s1 + $0x1d8] sm:$0xff] }
  0x38   :  { %1195 = vmatpush.bf16.msrb.mxu3 %v2392_v54  ;;  %1244 = vmatpush.bf16.msrb.mxu0 %v2400_v55  ;;  %v2409_v54 = vld [vmem:[%s3477_s1 + $0x158] sm:$0xff] }
  0x39   :  { %v2433_v55 = vld [vmem:[%s3477_s1 + $0x218] sm:$0xff] }
  0x3a   :  { %1147 = vmatpush.bf16.msrb.mxu2 %v2383_v56  ;;  %1098 = vmatpush.bf16.msrb.mxu1 %v2375_v57  ;;  %v2321_v56 = vld [vmem:[%s3478_s0 + $0xdc] sm:$0xf]  ;;  %v1830_v57 = vld [vmem:[%s3478_s0 + $0xfc] sm:$0xf0] }
  0x3c   :  { %1196 = vmatpush.bf16.msrb.mxu3 %v2391_v58  ;;  %1245 = vmatpush.bf16.msrb.mxu0 %v2399_v59  ;;  %v1836_v58 = vld [vmem:[%s3478_s0 + $0xe0] sm:$0xf]  ;;  %v2326_v59 = vld [vmem:[%s3478_s0 + $0x100] sm:$0xf0] }
  0x3d   :  { %v1837_v1 = vor.u32 %v2326_v59, %v1836_v58  ;;  %v2357_v58 = vld [vmem:[%s3478_s0 + $0x1fc] sm:$0xf]  ;;  %v1974_v59 = vld [vmem:[%s3478_s0 + $0x21c] sm:$0xf0] }
  0x3e   :  { %1148 = vmatpush.bf16.msrb.mxu2 %v2382_v60  ;;  %1099 = vmatpush.bf16.msrb.mxu1 %v2374_v61  ;;  %v2322_v60 = vld [vmem:[%s3478_s0 + $0xe4] sm:$0xf]  ;;  %v1838_v61 = vld [vmem:[%s3478_s0 + $0x104] sm:$0xf0] }
  0x40   :  { %1197 = vmatpush.bf16.msrb.mxu3 %v2390_v63  ;;  %1246 = vmatpush.bf16.msrb.mxu0 %v2398_v0  ;;  %v2327_v63 = vld [vmem:[%s3478_s0 + $0x108] sm:$0xf0]  ;;  %v1833_v0 = vor.u32 %v2321_v56, %v1830_v57 }
  0x41   :  { %1100 = vmatmul.bf16.vlgmr.msrb.gmra.mxu1 %v1725_v12  ;;  %1149 = vmatmul.bf16.vlgmr.msrb.gmra.mxu2 %v1729_v13  ;;  %v2331_v12 = vld [vmem:[%s3478_s0 + $0x12c] sm:$0xf]  ;;  %v1874_v13 = vld [vmem:[%s3478_s0 + $0x14c] sm:$0xf0] }
  0x42   :  { %1337 = vmatpush.bf16.msra.mxu2 %v2421_v2  ;;  %1288 = vmatpush.bf16.msra.mxu1 %v2413_v3  ;;  %v1841_v2 = vor.u32 %v2322_v60, %v1838_v61  ;;  %v1845_v3 = vor.u32 %v2327_v63, %v1844_v62  ;;  %v1980_v60 = vld [vmem:[%s3478_s0 + $0x200] sm:$0xf]  ;;  %v2362_v61 = vld [vmem:[%s3478_s0 + $0x220] sm:$0xf0]  ;;  %v1982_v63 = vld [vmem:[%s3478_s0 + $0x224] sm:$0xf0] }
  0x43   :  { %1198 = vmatmul.bf16.vlgmr.msrb.gmra.mxu3 %v1733_v14  ;;  %1247 = vmatmul.bf16.vlgmr.msrb.gmra.mxu0 %v1737_v15  ;;  %v1880_v14 = vld [vmem:[%s3478_s0 + $0x130] sm:$0xf]  ;;  %v2336_v15 = vld [vmem:[%s3478_s0 + $0x150] sm:$0xf0]  ;;  %v2358_v62 = vld [vmem:[%s3478_s0 + $0x204] sm:$0xf] }
  0x44   :  { %1386 = vmatpush.bf16.msra.mxu3 %v2429_v10  ;;  %1435 = vmatpush.bf16.msra.mxu0 %v2437_v11  ;;  %v1872_v10 = vld [vmem:[%s3478_s0 + $0x128] sm:$0xf]  ;;  %v2335_v11 = vld [vmem:[%s3478_s0 + $0x148] sm:$0xf0] }
  0x46   :  { %1338 = vmatpush.bf16.msra.mxu2 %v2420_v16  ;;  %1289 = vmatpush.bf16.msra.mxu1 %v2412_v17  ;;  %v1869_v16 = vor.u32 %v2330_v8, %v1866_v9  ;;  %v1873_v17 = vor.u32 %v2335_v11, %v1872_v10 }
  0x48   :  { %1387 = vmatpush.bf16.msra.mxu3 %v2428_v18  ;;  %1436 = vmatpush.bf16.msra.mxu0 %v2436_v19  ;;  %v1877_v18 = vor.u32 %v2331_v12, %v1874_v13  ;;  %v1881_v19 = vor.u32 %v2336_v15, %v1880_v14  ;;  %v2296_v14 = vld [vmem:[%s3478_s0 + $0x14] sm:$0xf]  ;;  %v1738_v15 = vld [vmem:[%s3478_s0 + $0x34] sm:$0xf0] }
  0x4a   :  { %1339 = vmatpush.bf16.msra.mxu2 %v2419_v20  ;;  %1290 = vmatpush.bf16.msra.mxu1 %v2411_v21  ;;  %v2415_v20 = vld [vmem:[%s3477_s1 + $0x188] sm:$0xff] }
  0x4b   :  { %v2423_v21 = vld [vmem:[%s3477_s1 + $0x1c8] sm:$0xff] }
  0x4c   :  { %1388 = vmatpush.bf16.msra.mxu3 %v2427_v22  ;;  %1437 = vmatpush.bf16.msra.mxu0 %v2435_v23  ;;  %v2407_v22 = vld [vmem:[%s3477_s1 + $0x148] sm:$0xff] }
  0x4d   :  { %v2431_v23 = vld [vmem:[%s3477_s1 + $0x208] sm:$0xff] }
  0x4e   :  { %1340 = vmatpush.bf16.msra.mxu2 %v2418_v36  ;;  %1291 = vmatpush.bf16.msra.mxu1 %v2410_v38  ;;  %v2414_v36 = vld [vmem:[%s3477_s1 + $0x180] sm:$0xff] }
  0x4f   :  { %v2406_v38 = vld [vmem:[%s3477_s1 + $0x140] sm:$0xff] }
  0x50   :  { %1389 = vmatpush.bf16.msra.mxu3 %v2426_v37  ;;  %1438 = vmatpush.bf16.msra.mxu0 %v2434_v39  ;;  %v2422_v37 = vld [vmem:[%s3477_s1 + $0x1c0] sm:$0xff] }
  0x51   :  { %1105 = vmatmul.bf16.gmra.mxu1 %v1761_v32  ;;  %1154 = vmatmul.bf16.gmra.mxu2 %v1765_v33  ;;  %v1905_v32 = vor.u32 %v2339_v24, %v1902_v25  ;;  %v1909_v33 = vor.u32 %v2344_v27, %v1908_v26  ;;  %v2430_v39 = vld [vmem:[%s3477_s1 + $0x200] sm:$0xff]  ;;  %v1741_v24 = vor.u32 %v2296_v14, %v1738_v15 }
  0x52   :  { %1341 = vmatpush.bf16.msra.mxu2 %v2417_v52  ;;  %1292 = vmatpush.bf16.msra.mxu1 %v2409_v54  ;;  %v1953_v52 = vor.u32 %v2354_v47, %v1952_v46  ;;  %v2311_v46 = vld [vmem:[%s3478_s0 + $0x88] sm:$0xf0]  ;;  %v2314_v14 = vld [vmem:[%s3478_s0 + $0xa4] sm:$0xf] }
  0x53   :  { %1203 = vmatmul.bf16.gmra.mxu3 %v1769_v34  ;;  %1252 = vmatmul.bf16.gmra.mxu0 %v1773_v35  ;;  %v1913_v34 = vor.u32 %v2340_v28, %v1910_v29  ;;  %v1917_v35 = vor.u32 %v2345_v31, %v1916_v30 }
  0x54   :  { %1390 = vmatpush.bf16.msra.mxu3 %v2425_v53  ;;  %1439 = vmatpush.bf16.msra.mxu0 %v2433_v55 }
  0x56   :  { %1342 = vmatpush.bf16.msra.mxu2 %v2416_v4  ;;  %1293 = vmatpush.bf16.msra.mxu1 %v2408_v6  ;;  %v1977_v4 = vor.u32 %v2357_v58, %v1974_v59 }
  0x58   :  { %1391 = vmatpush.bf16.msra.mxu3 %v2424_v5  ;;  %1440 = vmatpush.bf16.msra.mxu0 %v2432_v7  ;;  %v1981_v5 = vor.u32 %v2362_v61, %v1980_v60  ;;  %v1985_v7 = vor.u32 %v2358_v62, %v1982_v63 }
  0x5a   :  { %1343 = vmatpush.bf16.msra.mxu2 %v2415_v20  ;;  %1294 = vmatpush.bf16.msra.mxu1 %v2407_v22  ;;  %v1752_v20 = vld [vmem:[%s3478_s0 + $0x20] sm:$0xf] }
  0x5c   :  { %1392 = vmatpush.bf16.msra.mxu3 %v2423_v21  ;;  %1441 = vmatpush.bf16.msra.mxu0 %v2431_v23  ;;  %v2302_v21 = vld [vmem:[%s3478_s0 + $0x40] sm:$0xf0] }
  0x5d   :  { %v1753_v28 = vor.u32 %v2302_v21, %v1752_v20  ;;  %v2320_v20 = vld [vmem:[%s3478_s0 + $0xd0] sm:$0xf0] }
  0x5e   :  { %1344 = vmatpush.bf16.msra.mxu2 %v2414_v36  ;;  %1295 = vmatpush.bf16.msra.mxu1 %v2406_v38  ;;  %v2305_v38 = vld [vmem:[%s3478_s0 + $0x5c] sm:$0xf] }
  0x60   :  { %1393 = vmatpush.bf16.msra.mxu3 %v2422_v37  ;;  %1442 = vmatpush.bf16.msra.mxu0 %v2430_v39  ;;  %v1774_v39 = vld [vmem:[%s3478_s0 + $0x7c] sm:$0xf0] }
  0x61   :  { %1110 = vmatmul.bf16.gmra.mxu1 %v1797_v48  ;;  %1159 = vmatmul.bf16.gmra.mxu2 %v1801_v49  ;;  %v1941_v48 = vor.u32 %v2348_v40, %v1938_v41  ;;  %v1945_v49 = vor.u32 %v2353_v43, %v1944_v42  ;;  %v1780_v41 = vld [vmem:[%s3478_s0 + $0x60] sm:$0xf]  ;;  %v2310_v42 = vld [vmem:[%s3478_s0 + $0x80] sm:$0xf0] }
  0x62   :  { %v2306_v43 = vld [vmem:[%s3478_s0 + $0x64] sm:$0xf] }
  0x63   :  { %1208 = vmatmul.bf16.gmra.mxu3 %v1805_v50  ;;  %1257 = vmatmul.bf16.gmra.mxu0 %v1809_v51  ;;  %v1949_v51 = vor.u32 %v2349_v44, %v1946_v45  ;;  %v1782_v44 = vld [vmem:[%s3478_s0 + $0x84] sm:$0xf0] }
  0x64   :  { %v1788_v45 = vld [vmem:[%s3478_s0 + $0x68] sm:$0xf] }
  0x65   :  { %v1789_v58 = vor.u32 %v2311_v46, %v1788_v45  ;;  %v1852_v45 = vld [vmem:[%s3478_s0 + $0xf0] sm:$0xf]  ;;  %v2328_v46 = vld [vmem:[%s3478_s0 + $0x110] sm:$0xf0] }
  0x71   :  { %1115 = vmatmul.bf16.gmra.mxu1 %v1833_v0  ;;  %1164 = vmatmul.bf16.gmra.mxu2 %v1837_v1  ;;  %v1988_v0 = vld [vmem:[%s3478_s0 + $0x208] sm:$0xf]  ;;  %v2363_v1 = vld [vmem:[%s3478_s0 + $0x228] sm:$0xf0] }
  0x72   :  { %v1989_v8 = vor.u32 %v2363_v1, %v1988_v0 }
  0x73   :  { %1213 = vmatmul.bf16.gmra.mxu3 %v1841_v2  ;;  %1262 = vmatmul.bf16.gmra.mxu0 %v1845_v3 }
  0x81   :  { %1120 = vmatmul.bf16.gmra.mxu1 %v1869_v16  ;;  %1169 = vmatmul.bf16.gmra.mxu2 %v1873_v17  ;;  %v1744_v16 = vld [vmem:[%s3478_s0 + $0x18] sm:$0xf]  ;;  %v2301_v17 = vld [vmem:[%s3478_s0 + $0x38] sm:$0xf0] }
  0x82   :  { %v1745_v25 = vor.u32 %v2301_v17, %v1744_v16  ;;  %v1816_v16 = vld [vmem:[%s3478_s0 + $0xa8] sm:$0xf]  ;;  %v2319_v17 = vld [vmem:[%s3478_s0 + $0xc8] sm:$0xf0] }
  0x83   :  { %1218 = vmatmul.bf16.gmra.mxu3 %v1877_v18  ;;  %1267 = vmatmul.bf16.gmra.mxu0 %v1881_v19  ;;  %v2297_v18 = vld [vmem:[%s3478_s0 + $0x1c] sm:$0xf]  ;;  %v1746_v19 = vld [vmem:[%s3478_s0 + $0x3c] sm:$0xf0] }
  0x84   :  { %v1749_v27 = vor.u32 %v2297_v18, %v1746_v19  ;;  %v1818_v18 = vld [vmem:[%s3478_s0 + $0xcc] sm:$0xf0] }
  0x85   :  { %v1824_v19 = vld [vmem:[%s3478_s0 + $0xb0] sm:$0xf] }
  0x91   :  { %1125 = vmatmul.bf16.gmra.mxu1 %v1905_v32  ;;  %1174 = vmatmul.bf16.gmra.mxu2 %v1909_v33 }
  0x93   :  { %1223 = vmatmul.bf16.gmra.mxu3 %v1913_v34  ;;  %1272 = vmatmul.bf16.gmra.mxu0 %v1917_v35 }
  0x9e   :  { %v2973_v50 = vpop.f32.mrf.mxu1 }
  0xa0   :  { %v1052_v53 = vpop.f32.mrf.mxu0 }
  0xa1   :  { %1130 = vmatmul.bf16.gmra.mxu1 %v1941_v48  ;;  %1179 = vmatmul.bf16.gmra.mxu2 %v1945_v49 }
  0xa3   :  { %1228 = vmatmul.bf16.gmra.mxu3 %v1949_v51  ;;  %1277 = vmatmul.bf16.gmra.mxu0 %v1953_v52  ;;  %v1777_v51 = vor.u32 %v2305_v38, %v1774_v39  ;;  %v1781_v52 = vor.u32 %v2310_v42, %v1780_v41 }
  0xa4   :  { %v2975_v54 = vpop.f32.mrf.mxu2 }
  0xa6   :  { %v2977_v55 = vpop.f32.mrf.mxu3  ;;  %v2979_v56 = vpop.f32.mrf.mxu1 }
  0xa8   :  { %v1054_v57 = vpop.f32.mrf.mxu0 }
  0xac   :  { %v3005_v2 = vpop.f32.mrf.mxu2 }
  0xae   :  { %v3007_v3 = vpop.f32.mrf.mxu3  ;;  %v3009_v6 = vpop.f32.mrf.mxu1 }
  0xb0   :  { %v1057_v9 = vpop.f32.mrf.mxu0 }
  0xb1   :  { %1135 = vmatmul.bf16.gmra.mxu1 %v1977_v4  ;;  %1184 = vmatmul.bf16.gmra.mxu2 %v1981_v5 }
  0xb3   :  { %1233 = vmatmul.bf16.gmra.mxu3 %v1985_v7  ;;  %1282 = vmatmul.bf16.gmra.mxu0 %v1989_v8 }
  0xb4   :  { %v3011_v10 = vpop.f32.mrf.mxu2 }
  0xb6   :  { %v3013_v11 = vpop.f32.mrf.mxu3  ;;  %v3015_v12 = vpop.f32.mrf.mxu1 }
  0xb8   :  { %v1059_v13 = vpop.f32.mrf.mxu0 }
  0xbc   :  { %v3041_v22 = vpop.f32.mrf.mxu2 }
  0xbe   :  { %v3043_v23 = vpop.f32.mrf.mxu3  ;;  %v1101_v26 = vpop.f32.mrf.mxu1 }
  0xbf   :  { %v1102_v29 = vadd.f32 %v1101_v26, %v1052_v53 }
  0xc0   :  { %v1248_v30 = vpop.f32.mrf.mxu0 }
  0xc1   :  { %1296 = vmatmul.bf16.vlgmr.msra.gmra.mxu1 %v1741_v24  ;;  %1345 = vmatmul.bf16.vlgmr.msra.gmra.mxu2 %v1745_v25 }
  0xc3   :  { %1394 = vmatmul.bf16.vlgmr.msra.gmra.mxu3 %v1749_v27  ;;  %1443 = vmatmul.bf16.vlgmr.msra.gmra.mxu0 %v1753_v28  ;;  %v1817_v27 = vor.u32 %v2319_v17, %v1816_v16 }
  0xc4   :  { %v1150_v31 = vpop.f32.mrf.mxu2 }
  0xc5   :  { %v1151_v32 = vadd.f32 %v1150_v31, %v1102_v29 }
  0xc6   :  { %v1199_v33 = vpop.f32.mrf.mxu3  ;;  %v1103_v34 = vpop.f32.mrf.mxu1 }
  0xc7   :  { %v1200_v35 = vadd.f32 %v1199_v33, %v1151_v32  ;;  %v1104_v36 = vadd.f32 %v1103_v34, %v1054_v57  ;;  %v1785_v57 = vor.u32 %v2306_v43, %v1782_v44  ;;  %v2323_v43 = vld [vmem:[%s3478_s0 + $0xec] sm:$0xf] }
  0xc8   :  { %v1250_v37 = vpop.f32.mrf.mxu0 }
  0xc9   :  { %v3051_v40 = vadd.f32 %v1248_v30, %v1200_v35  ;;  %v1825_v30 = vor.u32 %v2320_v20, %v1824_v19  ;;  %v1888_v19 = vld [vmem:[%s3478_s0 + $0x138] sm:$0xf]  ;;  %v2337_v20 = vld [vmem:[%s3478_s0 + $0x158] sm:$0xf0] }
  0xcc   :  { %v1152_v47 = vpop.f32.mrf.mxu2 }
  0xcd   :  { %v1153_v48 = vadd.f32 %v1152_v47, %v1104_v36  ;;  %v1854_v47 = vld [vmem:[%s3478_s0 + $0x114] sm:$0xf0] }
  0xce   :  { %v1201_v49 = vpop.f32.mrf.mxu3  ;;  %v1106_v53 = vpop.f32.mrf.mxu1 }
  0xcf   :  { %v1202_v59 = vadd.f32 %v1201_v49, %v1153_v48  ;;  %v1107_v60 = vadd.f32 %v1106_v53, %v1057_v9  ;;  %v1810_v9 = vld [vmem:[%s3478_s0 + $0xc4] sm:$0xf0]  ;;  %v1860_v48 = vld [vmem:[%s3478_s0 + $0xf8] sm:$0xf]  ;;  %v2329_v49 = vld [vmem:[%s3478_s0 + $0x118] sm:$0xf0] }
  0xd0   :  { %v1253_v61 = vpop.f32.mrf.mxu0  ;;  %v1813_v26 = vor.u32 %v2314_v14, %v1810_v9 }
  0xd1   :  { %1301 = vmatmul.bf16.gmra.mxu1 %v1777_v51  ;;  %1350 = vmatmul.bf16.gmra.mxu2 %v1781_v52  ;;  %v3071_v62 = vadd.f32 %v1250_v37, %v1202_v59 }
  0xd3   :  { %1399 = vmatmul.bf16.gmra.mxu3 %v1785_v57  ;;  %1448 = vmatmul.bf16.gmra.mxu0 %v1789_v58  ;;  %v1853_v58 = vor.u32 %v2328_v46, %v1852_v45  ;;  %v2341_v46 = vld [vmem:[%s3478_s0 + $0x17c] sm:$0xf] }
  0xd4   :  { %v1155_v63 = vpop.f32.mrf.mxu2 }
  0xd5   :  { %v1156_v0 = vadd.f32 %v1155_v63, %v1107_v60 }
  0xd6   :  { %v1204_v1 = vpop.f32.mrf.mxu3  ;;  %v1108_v4 = vpop.f32.mrf.mxu1 }
  0xd7   :  { %v1205_v5 = vadd.f32 %v1204_v1, %v1156_v0  ;;  %v1109_v7 = vadd.f32 %v1108_v4, %v1059_v13  ;;  %v2315_v13 = vld [vmem:[%s3478_s0 + $0xac] sm:$0xf] }
  0xd8   :  { %v1255_v8 = vpop.f32.mrf.mxu0  ;;  %v1821_v29 = vor.u32 %v2315_v13, %v1818_v18  ;;  %v2332_v13 = vld [vmem:[%s3478_s0 + $0x134] sm:$0xf] }
  0xd9   :  { %v3079_v15 = vadd.f32 %v1253_v61, %v1205_v5  ;;  %v1861_v61 = vor.u32 %v2329_v49, %v1860_v48  ;;  %v2346_v48 = vld [vmem:[%s3478_s0 + $0x1a0] sm:$0xf0] }
  0xda   :  { %v2342_v49 = vld [vmem:[%s3478_s0 + $0x184] sm:$0xf] }
  0xdc   :  { %v1157_v21 = vpop.f32.mrf.mxu2 }
  0xdd   :  { %v1158_v24 = vadd.f32 %v1157_v21, %v1109_v7  ;;  %v1890_v21 = vld [vmem:[%s3478_s0 + $0x15c] sm:$0xf0] }
  0xde   :  { %v1206_v25 = vpop.f32.mrf.mxu3  ;;  %v1111_v28 = vpop.f32.mrf.mxu1 }
  0xdf   :  { %v1207_v31 = vadd.f32 %v1206_v25, %v1158_v24  ;;  %v1112_v32 = vadd.f32 %v1111_v28, %v2973_v50  ;;  %v1846_v50 = vld [vmem:[%s3478_s0 + $0x10c] sm:$0xf0]  ;;  %v1896_v24 = vld [vmem:[%s3478_s0 + $0x140] sm:$0xf]  ;;  %v2338_v25 = vld [vmem:[%s3478_s0 + $0x160] sm:$0xf0] }
  0xe0   :  { %v1258_v33 = vpop.f32.mrf.mxu0  ;;  %v1849_v57 = vor.u32 %v2323_v43, %v1846_v50 }
  0xe1   :  { %1306 = vmatmul.bf16.gmra.mxu1 %v1813_v26  ;;  %1355 = vmatmul.bf16.gmra.mxu2 %v1817_v27  ;;  %v3100_v34 = vadd.f32 %v1255_v8, %v1207_v31 }
  0xe3   :  { %1404 = vmatmul.bf16.gmra.mxu3 %v1821_v29  ;;  %1453 = vmatmul.bf16.gmra.mxu0 %v1825_v30  ;;  %v1889_v30 = vor.u32 %v2337_v20, %v1888_v19  ;;  %v2350_v20 = vld [vmem:[%s3478_s0 + $0x1c4] sm:$0xf] }
  0xe4   :  { %v1160_v35 = vpop.f32.mrf.mxu2 }
  0xe5   :  { %v1161_v36 = vadd.f32 %v1160_v35, %v1112_v32 }
  0xe6   :  { %v1209_v37 = vpop.f32.mrf.mxu3  ;;  %v1113_v38 = vpop.f32.mrf.mxu1 }
  0xe7   :  { %v1210_v39 = vadd.f32 %v1209_v37, %v1161_v36  ;;  %v1114_v41 = vadd.f32 %v1113_v38, %v2979_v56  ;;  %v2324_v56 = vld [vmem:[%s3478_s0 + $0xf4] sm:$0xf] }
  0xe8   :  { %v1260_v42 = vpop.f32.mrf.mxu0  ;;  %v1857_v60 = vor.u32 %v2324_v56, %v1854_v47  ;;  %v1918_v56 = vld [vmem:[%s3478_s0 + $0x19c] sm:$0xf0] }
  0xe9   :  { %v3109_v44 = vadd.f32 %v1258_v33, %v1210_v39  ;;  %v1897_v33 = vor.u32 %v2338_v25, %v1896_v24  ;;  %v2355_v24 = vld [vmem:[%s3478_s0 + $0x1e8] sm:$0xf0] }
  0xea   :  { %v2351_v25 = vld [vmem:[%s3478_s0 + $0x1cc] sm:$0xf] }
  0xec   :  { %v1162_v51 = vpop.f32.mrf.mxu2 }
  0xed   :  { %v1163_v52 = vadd.f32 %v1162_v51, %v1114_v41 }
  0xee   :  { %v1211_v53 = vpop.f32.mrf.mxu3  ;;  %v1116_v59 = vpop.f32.mrf.mxu1 }
  0xef   :  { %v1212_v63 = vadd.f32 %v1211_v53, %v1163_v52  ;;  %v1117_v0 = vadd.f32 %v1116_v59, %v3009_v6  ;;  %v1882_v6 = vld [vmem:[%s3478_s0 + $0x154] sm:$0xf0]  ;;  %v1926_v52 = vld [vmem:[%s3478_s0 + $0x1a4] sm:$0xf0] }
  0xf0   :  { %v1263_v1 = vpop.f32.mrf.mxu0  ;;  %v1885_v29 = vor.u32 %v2332_v13, %v1882_v6  ;;  %v1932_v53 = vld [vmem:[%s3478_s0 + $0x188] sm:$0xf] }
  0xf1   :  { %1311 = vmatmul.bf16.gmra.mxu1 %v1849_v57  ;;  %1360 = vmatmul.bf16.gmra.mxu2 %v1853_v58  ;;  %v3130_v4 = vadd.f32 %v1260_v42, %v1212_v63  ;;  %v2347_v57 = vld [vmem:[%s3478_s0 + $0x1a8] sm:$0xf0] }
  0xf3   :  { %1409 = vmatmul.bf16.gmra.mxu3 %v1857_v60  ;;  %1458 = vmatmul.bf16.gmra.mxu0 %v1861_v61  ;;  %v1921_v61 = vor.u32 %v2341_v46, %v1918_v56 }
  0xf4   :  { %v1165_v5 = vpop.f32.mrf.mxu2 }
  0xf5   :  { %v1166_v7 = vadd.f32 %v1165_v5, %v1117_v0 }
  0xf6   :  { %v1214_v8 = vpop.f32.mrf.mxu3  ;;  %v1118_v14 = vpop.f32.mrf.mxu1 }
  0xf7   :  { %v1215_v9 = vadd.f32 %v1214_v8, %v1166_v7  ;;  %v1119_v16 = vadd.f32 %v1118_v14, %v3015_v12  ;;  %v2333_v12 = vld [vmem:[%s3478_s0 + $0x13c] sm:$0xf] }
  0xf8   :  { %v1265_v17 = vpop.f32.mrf.mxu0  ;;  %v1893_v32 = vor.u32 %v2333_v12, %v1890_v21  ;;  %v1954_v12 = vld [vmem:[%s3478_s0 + $0x1e4] sm:$0xf0] }
  0xf9   :  { %v3139_v18 = vadd.f32 %v1263_v1, %v1215_v9  ;;  %v1929_v1 = vor.u32 %v2342_v49, %v1926_v52  ;;  %v2359_v49 = vld [vmem:[%s3478_s0 + $0x20c] sm:$0xf] }
  0xfc   :  { %v1167_v26 = vpop.f32.mrf.mxu2 }
  0xfd   :  { %v1168_v27 = vadd.f32 %v1167_v26, %v1119_v16 }
  0xfe   :  { %v1216_v28 = vpop.f32.mrf.mxu3  ;;  %v1121_v31 = vpop.f32.mrf.mxu1 }
  0xff   :  { %v1217_v35 = vadd.f32 %v1216_v28, %v1168_v27  ;;  %v1122_v38 = vadd.f32 %v1121_v31, %v2975_v54  ;;  %v1924_v54 = vld [vmem:[%s3478_s0 + $0x180] sm:$0xf]  ;;  %v1962_v27 = vld [vmem:[%s3478_s0 + $0x1ec] sm:$0xf0] }
 0x100   :  { %v1268_v36 = vpop.f32.mrf.mxu0  ;;  %v1925_v63 = vor.u32 %v2346_v48, %v1924_v54  ;;  %v1968_v28 = vld [vmem:[%s3478_s0 + $0x1d0] sm:$0xf] }
 0x101   :  { %1316 = vmatmul.bf16.gmra.mxu1 %v1885_v29  ;;  %1365 = vmatmul.bf16.gmra.mxu2 %v1889_v30  ;;  %v3159_v37 = vadd.f32 %v1265_v17, %v1217_v35  ;;  %v2356_v29 = vld [vmem:[%s3478_s0 + $0x1f0] sm:$0xf0] }
 0x103   :  { %1414 = vmatmul.bf16.gmra.mxu3 %v1893_v32  ;;  %1463 = vmatmul.bf16.gmra.mxu0 %v1897_v33  ;;  %v1957_v33 = vor.u32 %v2350_v20, %v1954_v12 }
 0x104   :  { %v1170_v39 = vpop.f32.mrf.mxu2 }
 0x105   :  { %v1171_v41 = vadd.f32 %v1170_v39, %v1122_v38  ;;  %v1965_v38 = vor.u32 %v2351_v25, %v1962_v27 }
 0x106   :  { %v1219_v42 = vpop.f32.mrf.mxu3  ;;  %v1123_v43 = vpop.f32.mrf.mxu1 }
 0x107   :  { %v1220_v50 = vadd.f32 %v1219_v42, %v1171_v41  ;;  %v1124_v51 = vadd.f32 %v1123_v43, %v3005_v2  ;;  %v1933_v2 = vor.u32 %v2347_v57, %v1932_v53  ;;  %v2364_v53 = vld [vmem:[%s3478_s0 + $0x230] sm:$0xf0] }
 0x108   :  { %v1270_v45 = vpop.f32.mrf.mxu0  ;;  %v2360_v57 = vld [vmem:[%s3478_s0 + $0x214] sm:$0xf] }
 0x109   :  { %v3168_v47 = vadd.f32 %v1268_v36, %v1220_v50 }
 0x10c   :  { %v1172_v58 = vpop.f32.mrf.mxu2 }
 0x10d   :  { %v1173_v59 = vadd.f32 %v1172_v58, %v1124_v51  ;;  %v1990_v51 = vld [vmem:[%s3478_s0 + $0x22c] sm:$0xf0] }
 0x10e   :  { %v1221_v60 = vpop.f32.mrf.mxu3  ;;  %v1126_v0 = vpop.f32.mrf.mxu1 }
 0x10f   :  { %v1222_v5 = vadd.f32 %v1221_v60, %v1173_v59  ;;  %v1127_v14 = vadd.f32 %v1126_v0, %v3011_v10  ;;  %v1960_v10 = vld [vmem:[%s3478_s0 + $0x1c8] sm:$0xf]  ;;  %v1998_v59 = vld [vmem:[%s3478_s0 + $0x234] sm:$0xf0] }
 0x110   :  { %v1273_v7 = vpop.f32.mrf.mxu0  ;;  %v1961_v35 = vor.u32 %v2355_v24, %v1960_v10  ;;  %v2004_v60 = vld [vmem:[%s3478_s0 + $0x218] sm:$0xf] }
 0x111   :  { %1321 = vmatmul.bf16.gmra.mxu1 %v1921_v61  ;;  %1370 = vmatmul.bf16.gmra.mxu2 %v1925_v63  ;;  %v3189_v8 = vadd.f32 %v1270_v45, %v1222_v5  ;;  %v2365_v61 = vld [vmem:[%s3478_s0 + $0x238] sm:$0xf0] }
 0x113   :  { %1419 = vmatmul.bf16.gmra.mxu3 %v1929_v1  ;;  %1468 = vmatmul.bf16.gmra.mxu0 %v1933_v2  ;;  %v1993_v2 = vor.u32 %v2359_v49, %v1990_v51 }
 0x114   :  { %v1175_v9 = vpop.f32.mrf.mxu2 }
 0x115   :  { %v1176_v16 = vadd.f32 %v1175_v9, %v1127_v14  ;;  %v2001_v14 = vor.u32 %v2360_v57, %v1998_v59 }
 0x116   :  { %v1224_v17 = vpop.f32.mrf.mxu3  ;;  %v1128_v13 = vpop.f32.mrf.mxu1 }
 0x117   :  { %v1225_v6 = vadd.f32 %v1224_v17, %v1176_v16  ;;  %v1129_v26 = vadd.f32 %v1128_v13, %v3041_v22  ;;  %v1969_v22 = vor.u32 %v2356_v29, %v1968_v28 }
 0x118   :  { %v1275_v19 = vpop.f32.mrf.mxu0 }
 0x119   :  { %v3198_v21 = vadd.f32 %v1273_v7, %v1225_v6 }
 0x11c   :  { %v1177_v30 = vpop.f32.mrf.mxu2 }
 0x11d   :  { %v1178_v31 = vadd.f32 %v1177_v30, %v1129_v26 }
 0x11e   :  { %v1226_v32 = vpop.f32.mrf.mxu3  ;;  %v1131_v36 = vpop.f32.mrf.mxu1 }
 0x11f   :  { %v1227_v39 = vadd.f32 %v1226_v32, %v1178_v31  ;;  %v1132_v43 = vadd.f32 %v1131_v36, %v2977_v55  ;;  %v1996_v55 = vld [vmem:[%s3478_s0 + $0x210] sm:$0xf] }
 0x120   :  { %v1278_v41 = vpop.f32.mrf.mxu0  ;;  %v1997_v5 = vor.u32 %v2364_v53, %v1996_v55 }
 0x121   :  { %1326 = vmatmul.bf16.gmra.mxu1 %v1957_v33  ;;  %1375 = vmatmul.bf16.gmra.mxu2 %v1961_v35  ;;  %v3219_v42 = vadd.f32 %v1275_v19, %v1227_v39 }
 0x123   :  { %1424 = vmatmul.bf16.gmra.mxu3 %v1965_v38  ;;  %1473 = vmatmul.bf16.gmra.mxu0 %v1969_v22 }
 0x124   :  { %v1180_v50 = vpop.f32.mrf.mxu2 }
 0x125   :  { %v1181_v45 = vadd.f32 %v1180_v50, %v1132_v43 }
 0x126   :  { %v1229_v46 = vpop.f32.mrf.mxu3  ;;  %v1133_v56 = vpop.f32.mrf.mxu1 }
 0x127   :  { %v1230_v54 = vadd.f32 %v1229_v46, %v1181_v45  ;;  %v1134_v58 = vadd.f32 %v1133_v56, %v3007_v3  ;;  %v2005_v3 = vor.u32 %v2365_v61, %v2004_v60 }
 0x128   :  { %v1280_v48 = vpop.f32.mrf.mxu0 }
 0x129   :  { %v3228_v52 = vadd.f32 %v1278_v41, %v1230_v54 }
 0x12c   :  { %v1182_v63 = vpop.f32.mrf.mxu2 }
 0x12d   :  { %v1183_v0 = vadd.f32 %v1182_v63, %v1134_v58 }
 0x12e   :  { %v1231_v1 = vpop.f32.mrf.mxu3  ;;  %v1136_v7 = vpop.f32.mrf.mxu1 }
 0x12f   :  { %v1232_v9 = vadd.f32 %v1231_v1, %v1183_v0  ;;  %v1137_v13 = vadd.f32 %v1136_v7, %v3013_v11 }
 0x130   :  { %v1283_v16 = vpop.f32.mrf.mxu0 }
 0x131   :  { %1331 = vmatmul.bf16.gmra.mxu1 %v1993_v2  ;;  %1380 = vmatmul.bf16.gmra.mxu2 %v1997_v5  ;;  %v3249_v17 = vadd.f32 %v1280_v48, %v1232_v9 }
 0x133   :  { %1429 = vmatmul.bf16.gmra.mxu3 %v2001_v14  ;;  %1478 = vmatmul.bf16.gmra.mxu0 %v2005_v3 }
 0x134   :  { %v1185_v6 = vpop.f32.mrf.mxu2 }
 0x135   :  { %v1186_v19 = vadd.f32 %v1185_v6, %v1137_v13 }
 0x136   :  { %v1234_v20 = vpop.f32.mrf.mxu3  ;;  %v1138_v12 = vpop.f32.mrf.mxu1 }
 0x137   :  { %v1235_v10 = vadd.f32 %v1234_v20, %v1186_v19  ;;  %v1139_v26 = vadd.f32 %v1138_v12, %v3043_v23 }
 0x138   :  { %v1285_v24 = vpop.f32.mrf.mxu0 }
 0x139   :  { %v3252_v25 = vadd.f32 %v1283_v16, %v1235_v10 }
 0x13c   :  { %v1187_v27 = vpop.f32.mrf.mxu2 }
 0x13d   :  { %v1188_v28 = vadd.f32 %v1187_v27, %v1139_v26 }
 0x13e   :  { %v1236_v29 = vpop.f32.mrf.mxu3  ;;  %v1297_v30 = vpop.f32.mrf.mxu1 }
 0x13f   :  { %v1237_v31 = vadd.f32 %v1236_v29, %v1188_v28  ;;  %v1298_v32 = vadd.f32 %v1297_v30, %v3051_v40 }
 0x140   :  { %v1444_v33 = vpop.f32.mrf.mxu0 }
 0x141   :  { %v3256_v35 = vadd.f32 %v1285_v24, %v1237_v31 }
 0x144   :  { %v1346_v11 = vpop.f32.mrf.mxu2 }
 0x145   :  { %v1347_v36 = vadd.f32 %v1346_v11, %v1298_v32 }
 0x146   :  { %v1395_v38 = vpop.f32.mrf.mxu3  ;;  %v1299_v22 = vpop.f32.mrf.mxu1 }
 0x147   :  { %v1396_v39 = vadd.f32 %v1395_v38, %v1347_v36  ;;  %v1300_v41 = vadd.f32 %v1299_v22, %v3071_v62 }
 0x148   :  { %v1446_v43 = vpop.f32.mrf.mxu0 }
 0x149   :  { %v3259_v50 = vadd.f32 %v1444_v33, %v1396_v39 }
 0x14c   :  { %v1348_v23 = vpop.f32.mrf.mxu2 }
 0x14d   :  { %v1349_v45 = vadd.f32 %v1348_v23, %v1300_v41 }
 0x14e   :  { %v1397_v46 = vpop.f32.mrf.mxu3  ;;  %v1302_v56 = vpop.f32.mrf.mxu1 }
 0x14f   :  { %v1398_v54 = vadd.f32 %v1397_v46, %v1349_v45  ;;  %v1303_v40 = vadd.f32 %v1302_v56, %v3079_v15 }
 0x150   :  { %v1449_v48 = vpop.f32.mrf.mxu0 }
 0x151   :  { %v3262_v49 = vadd.f32 %v1446_v43, %v1398_v54 }
 0x154   :  { %v1351_v51 = vpop.f32.mrf.mxu2 }
 0x155   :  { %v1352_v55 = vadd.f32 %v1351_v51, %v1303_v40 }
 0x156   :  { %v1400_v53 = vpop.f32.mrf.mxu3  ;;  %v1304_v57 = vpop.f32.mrf.mxu1 }
 0x157   :  { %v1401_v58 = vadd.f32 %v1400_v53, %v1352_v55  ;;  %v1305_v62 = vadd.f32 %v1304_v57, %v3100_v34 }
 0x158   :  { %v1451_v59 = vpop.f32.mrf.mxu0 }
 0x159   :  { %v3265_v60 = vadd.f32 %v1449_v48, %v1401_v58 }
 0x15c   :  { %v1353_v61 = vpop.f32.mrf.mxu2 }
 0x15d   :  { %v1354_v63 = vadd.f32 %v1353_v61, %v1305_v62  ;;  %v1484_v61 = vadd.f32 %v3262_v49, %v3259_v50 }
 0x15e   :  { %v1402_v0 = vpop.f32.mrf.mxu3  ;;  %v1307_v1 = vpop.f32.mrf.mxu1 }
 0x15f   :  { %v1403_v2 = vadd.f32 %v1402_v0, %v1354_v63  ;;  %v1308_v15 = vadd.f32 %v1307_v1, %v3109_v44 }
 0x160   :  { %v1454_v5 = vpop.f32.mrf.mxu0 }
 0x161   :  { %v3268_v7 = vadd.f32 %v1451_v59, %v1403_v2 }
 0x164   :  { %v1356_v14 = vpop.f32.mrf.mxu2 }
 0x165   :  { %v1357_v3 = vadd.f32 %v1356_v14, %v1308_v15  ;;  %v1485_v15 = vadd.f32 %v1484_v61, %v3265_v60 }
 0x166   :  { %v1405_v9 = vpop.f32.mrf.mxu3  ;;  %v1309_v16 = vpop.f32.mrf.mxu1 }
 0x167   :  { %v1406_v13 = vadd.f32 %v1405_v9, %v1357_v3  ;;  %v1310_v48 = vadd.f32 %v1309_v16, %v3130_v4  ;;  %v1486_v14 = vadd.f32 %v1485_v15, %v3268_v7 }
 0x168   :  { %v1456_v6 = vpop.f32.mrf.mxu0 }
 0x169   :  { %v3270_v34 = vadd.f32 %v1454_v5, %v1406_v13 }
 0x16b   :  { %v1487_v13 = vadd.f32 %v1486_v14, %v3270_v34 }
 0x16c   :  { %v1358_v19 = vpop.f32.mrf.mxu2 }
 0x16d   :  { %v1359_v51 = vadd.f32 %v1358_v19, %v1310_v48 }
 0x16e   :  { %v1407_v20 = vpop.f32.mrf.mxu3  ;;  %v1312_v12 = vpop.f32.mrf.mxu1 }
 0x16f   :  { %v1313_v55 = vadd.f32 %v1312_v12, %v3139_v18  ;;  %v1408_v63 = vadd.f32 %v1407_v20, %v1359_v51 }
 0x170   :  { %v1459_v10 = vpop.f32.mrf.mxu0 }
 0x171   :  { %v3281_v3 = vadd.f32 %v1456_v6, %v1408_v63 }
 0x174   :  { %v1361_v24 = vpop.f32.mrf.mxu2 }
 0x175   :  { %v1362_v57 = vadd.f32 %v1361_v24, %v1313_v55 }
 0x176   :  { %v1410_v26 = vpop.f32.mrf.mxu3  ;;  %v1314_v27 = vpop.f32.mrf.mxu1 }
 0x177   :  { %v1315_v58 = vadd.f32 %v1314_v27, %v3159_v37  ;;  %v1411_v4 = vadd.f32 %v1410_v26, %v1362_v57 }
 0x178   :  { %v1461_v28 = vpop.f32.mrf.mxu0 }
 0x179   :  { %v3285_v19 = vadd.f32 %v1459_v10, %v1411_v4 }
 0x17c   :  { %v1363_v44 = vpop.f32.mrf.mxu2 }
 0x17d   :  { %v1364_v0 = vadd.f32 %v1363_v44, %v1315_v58 }
 0x17e   :  { %v1412_v29 = vpop.f32.mrf.mxu3  ;;  %v1317_v30 = vpop.f32.mrf.mxu1 }
 0x17f   :  { %v1318_v2 = vadd.f32 %v1317_v30, %v3168_v47  ;;  %v1413_v37 = vadd.f32 %v1412_v29, %v1364_v0 }
 0x180   :  { %v1464_v31 = vpop.f32.mrf.mxu0 }
 0x181   :  { %v3289_v44 = vadd.f32 %v1461_v28, %v1413_v37 }
 0x184   :  { %v1366_v32 = vpop.f32.mrf.mxu2 }
 0x185   :  { %v1367_v5 = vadd.f32 %v1366_v32, %v1318_v2 }
 0x186   :  { %v1415_v33 = vpop.f32.mrf.mxu3  ;;  %v1319_v11 = vpop.f32.mrf.mxu1 }
 0x187   :  { %v1320_v18 = vadd.f32 %v1319_v11, %v3189_v8  ;;  %v1416_v12 = vadd.f32 %v1415_v33, %v1367_v5  ;;  %v1488_v8 = vadd.f32 %v1487_v13, %v3281_v3 }
 0x188   :  { %v1466_v36 = vpop.f32.mrf.mxu0 }
 0x189   :  { %v1489_v32 = vadd.f32 %v1488_v8, %v3285_v19  ;;  %v3293_v10 = vadd.f32 %v1464_v31, %v1416_v12 }
 0x18c   :  { %v1368_v38 = vpop.f32.mrf.mxu2 }
 0x18d   :  { %v1369_v9 = vadd.f32 %v1368_v38, %v1320_v18 }
 0x18e   :  { %v1417_v22 = vpop.f32.mrf.mxu3  ;;  %v1322_v39 = vpop.f32.mrf.mxu1 }
 0x18f   :  { %v1323_v16 = vadd.f32 %v1322_v39, %v3198_v21  ;;  %v1418_v29 = vadd.f32 %v1417_v22, %v1369_v9 }
 0x190   :  { %v1469_v41 = vpop.f32.mrf.mxu0 }
 0x191   :  { %v3297_v39 = vadd.f32 %v1466_v36, %v1418_v29 }
 0x194   :  { %v1371_v43 = vpop.f32.mrf.mxu2 }
 0x195   :  { %v1372_v24 = vadd.f32 %v1371_v43, %v1323_v16 }
 0x196   :  { %v1420_v23 = vpop.f32.mrf.mxu3  ;;  %v1324_v45 = vpop.f32.mrf.mxu1 }
 0x197   :  { %v1325_v26 = vadd.f32 %v1324_v45, %v3219_v42  ;;  %v1421_v11 = vadd.f32 %v1420_v23, %v1372_v24  ;;  %v1490_v42 = vadd.f32 %v1489_v32, %v3289_v44 }
 0x198   :  { %v1471_v46 = vpop.f32.mrf.mxu0 }
 0x19c   :  { %v1373_v56 = vpop.f32.mrf.mxu2 }
 0x19d   :  { %v1374_v30 = vadd.f32 %v1373_v56, %v1325_v26  ;;  %v1491_v56 = vadd.f32 %v1490_v42, %v3293_v10 }
 0x19e   :  { %v1422_v54 = vpop.f32.mrf.mxu3  ;;  %v1327_v40 = vpop.f32.mrf.mxu1 }
 0x19f   :  { %v1328_v21 = vadd.f32 %v1327_v40, %v3228_v52  ;;  %v1423_v43 = vadd.f32 %v1422_v54, %v1374_v30  ;;  %v3301_v52 = vadd.f32 %v1469_v41, %v1421_v11  ;;  %v1492_v51 = vadd.f32 %v1491_v56, %v3297_v39 }
 0x1a0   :  { %v1474_v53 = vpop.f32.mrf.mxu0 }
 0x1a1   :  { %v1493_v54 = vadd.f32 %v1492_v51, %v3301_v52 }
 0x1a4   :  { %v1376_v62 = vpop.f32.mrf.mxu2 }
 0x1a5   :  { %v1377_v38 = vadd.f32 %v1376_v62, %v1328_v21 }
 0x1a6   :  { %v1425_v59 = vpop.f32.mrf.mxu3  ;;  %v1329_v1 = vpop.f32.mrf.mxu1 }
 0x1a7   :  { %v1330_v33 = vadd.f32 %v1329_v1, %v3249_v17  ;;  %v1426_v40 = vadd.f32 %v1425_v59, %v1377_v38  ;;  %v3304_v17 = vadd.f32 %v1471_v46, %v1423_v43 }
 0x1a8   :  { %v1476_v20 = vpop.f32.mrf.mxu0 }
 0x1a9   :  { %v3307_v57 = vadd.f32 %v1474_v53, %v1426_v40  ;;  %v1494_v58 = vadd.f32 %v1493_v54, %v3304_v17 }
 0x1ab   :  { %v1495_v61 = vadd.f32 %v1494_v58, %v3307_v57 }
 0x1ac   :  { %v1378_v47 = vpop.f32.mrf.mxu2 }
 0x1ad   :  { %v1379_v28 = vadd.f32 %v1378_v47, %v1330_v33 }
 0x1ae   :  { %v1427_v27 = vpop.f32.mrf.mxu3  ;;  %v1332_v6 = vpop.f32.mrf.mxu1 }
 0x1af   :  { %v1333_v45 = vadd.f32 %v1332_v6, %v3252_v25  ;;  %v1428_v55 = vadd.f32 %v1427_v27, %v1379_v28 }
 0x1b0   :  { %v1479_v23 = vpop.f32.mrf.mxu0 }
 0x1b1   :  { %v3310_v62 = vadd.f32 %v1476_v20, %v1428_v55 }
 0x1b3   :  { %v1496_v1 = vadd.f32 %v1495_v61, %v3310_v62 }
 0x1b4   :  { %v1381_v22 = vpop.f32.mrf.mxu2 }
 0x1b5   :  { %v1382_v31 = vadd.f32 %v1381_v22, %v1333_v45 }
 0x1b6   :  { %v1430_v48 = vpop.f32.mrf.mxu3  ;;  %v1334_v36 = vpop.f32.mrf.mxu1 }
 0x1b7   :  { %v1431_v25 = vadd.f32 %v1430_v48, %v1382_v31  ;;  %v1335_v41 = vadd.f32 %v1334_v36, %v3256_v35 }
 0x1b8   :  { %v1481_v15 = vpop.f32.mrf.mxu0 }
 0x1b9   :  { %v3314_v63 = vadd.f32 %v1479_v23, %v1431_v25 }
 0x1bb   :  { %v1497_v53 = vadd.f32 %v1496_v1, %v3314_v63 }
 0x1bc   :  { %v1383_v59 = vpop.f32.mrf.mxu2 }
 0x1bd   :  { %v1384_v46 = vadd.f32 %v1383_v59, %v1335_v41 }
 0x1be   :  { %v1432_v0 = vpop.f32.mrf.mxu3 }
 0x1bf   :  { %v1433_v2 = vadd.f32 %v1432_v0, %v1384_v46 }
 0x1c1   :  { %v3318_v4 = vadd.f32 %v1481_v15, %v1433_v2 }
 0x1c3   :  { %v1498_v5 = vadd.f32 %v1497_v53, %v3318_v4 }
 0x1c5   :  { %v1499_v18 = vrot.slane %v1498_v5, 4 }
 0x1c7   :  { %v1500_v14 = vadd.f32 %v1499_v18, %v1498_v5 }
 0x1c9   :  { %v1501_v35 = vrot.slane %v1500_v14, 2 }
 0x1cb   :  { %v1502_v37 = vadd.f32 %v1501_v35, %v1500_v14 }
 0x1cd   :  { %v1503_v9 = vrot.slane %v1502_v37, 1 }
 0x1cf   :  { %v1504_v16 = vadd.f32 %v1503_v9, %v1502_v37 }
 0x1d1   :  { %v3321_v13 = vmul.f32 0.0078125, %v1504_v16 }
 0x1d3   :  { %v1506_v20 = vsub.f32 %v3259_v50, %v3321_v13  ;;  %v1507_v47 = vsub.f32 %v3262_v49, %v3321_v13  ;;  %v1508_v12 = vsub.f32 %v3265_v60, %v3321_v13  ;;  %v1509_v27 = vsub.f32 %v3268_v7, %v3321_v13 }
 0x1d4   :  { %v1510_v8 = vsub.f32 %v3270_v34, %v3321_v13  ;;  %v1511_v30 = vsub.f32 %v3281_v3, %v3321_v13  ;;  %v1512_v11 = vsub.f32 %v3285_v19, %v3321_v13  ;;  %v1513_v42 = vsub.f32 %v3289_v44, %v3321_v13 }
 0x1d5   :  { %v1522_v24 = vmul.f32 %v1506_v20, %v1506_v20  ;;  %v1523_v26 = vmul.f32 %v1507_v47, %v1507_v47  ;;  %v1524_v6 = vmul.f32 %v1508_v12, %v1508_v12  ;;  %v1525_v21 = vmul.f32 %v1509_v27, %v1509_v27 }
 0x1d6   :  { %v1526_v38 = vmul.f32 %v1510_v8, %v1510_v8  ;;  %v1527_v43 = vmul.f32 %v1511_v30, %v1511_v30  ;;  %v1514_v45 = vsub.f32 %v3293_v10, %v3321_v13  ;;  %v1528_v22 = vmul.f32 %v1512_v11, %v1512_v11 }
 0x1d7   :  { %v1538_v29 = vadd.f32 %v1523_v26, %v1522_v24  ;;  %v1515_v40 = vsub.f32 %v3297_v39, %v3321_v13  ;;  %v1529_v31 = vmul.f32 %v1513_v42, %v1513_v42  ;;  %v1516_v23 = vsub.f32 %v3301_v52, %v3321_v13 }
 0x1d8   :  { %v1530_v51 = vmul.f32 %v1514_v45, %v1514_v45  ;;  %v1517_v36 = vsub.f32 %v3304_v17, %v3321_v13  ;;  %v1518_v58 = vsub.f32 %v3307_v57, %v3321_v13  ;;  %v1519_v61 = vsub.f32 %v3310_v62, %v3321_v13 }
 0x1d9   :  { %v1539_v32 = vadd.f32 %v1538_v29, %v1524_v6  ;;  %v1531_v54 = vmul.f32 %v1515_v40, %v1515_v40  ;;  %v1532_v41 = vmul.f32 %v1516_v23, %v1516_v23  ;;  %v1520_v1 = vsub.f32 %v3314_v63, %v3321_v13 }
 0x1da   :  { %v1533_v46 = vmul.f32 %v1517_v36, %v1517_v36  ;;  %v1534_v2 = vmul.f32 %v1518_v58, %v1518_v58  ;;  %v1521_v53 = vsub.f32 %v3318_v4, %v3321_v13  ;;  %v1535_v5 = vmul.f32 %v1519_v61, %v1519_v61 }
 0x1db   :  { %v1540_v33 = vadd.f32 %v1539_v32, %v1525_v21  ;;  %v1536_v14 = vmul.f32 %v1520_v1, %v1520_v1 }
 0x1dc   :  { %v1537_v37 = vmul.f32 %v1521_v53, %v1521_v53 }
 0x1dd   :  { %v1541_v28 = vadd.f32 %v1540_v33, %v1526_v38  ;;  %v1571_v33 = vld [vmem:[%s3479_s2] sm:$0x1] }
 0x1df   :  { %v1542_v56 = vadd.f32 %v1541_v28, %v1527_v43  ;;  %v1573_v28 = vld [vmem:[%s3480_s3] sm:$0x1] }
 0x1e1   :  { %v1543_v48 = vadd.f32 %v1542_v56, %v1528_v22 }
 0x1e3   :  { %v1544_v55 = vadd.f32 %v1543_v48, %v1529_v31 }
 0x1e5   :  { %v1545_v25 = vadd.f32 %v1544_v55, %v1530_v51 }
 0x1e7   :  { %v1546_v59 = vadd.f32 %v1545_v25, %v1531_v54 }
 0x1e9   :  { %v1547_v0 = vadd.f32 %v1546_v59, %v1532_v41 }
 0x1eb   :  { %v1548_v15 = vadd.f32 %v1547_v0, %v1533_v46 }
 0x1ed   :  { %v1549_v18 = vadd.f32 %v1548_v15, %v1534_v2 }
 0x1ef   :  { %v1550_v35 = vadd.f32 %v1549_v18, %v1535_v5 }
 0x1f1   :  { %v1551_v9 = vadd.f32 %v1550_v35, %v1536_v14 }
 0x1f3   :  { %v1552_v16 = vadd.f32 %v1551_v9, %v1537_v37 }
 0x1f5   :  { %v1553_v20 = vrot.slane %v1552_v16, 4 }
 0x1f7   :  { %v1554_v47 = vadd.f32 %v1553_v20, %v1552_v16 }
 0x1f9   :  { %v1555_v12 = vrot.slane %v1554_v47, 2 }
 0x1fb   :  { %v1556_v24 = vadd.f32 %v1555_v12, %v1554_v47 }
 0x1fd   :  { %v1557_v26 = vrot.slane %v1556_v24, 1 }
 0x1ff   :  { %v1558_v27 = vadd.f32 %v1557_v26, %v1556_v24 }
 0x201   :  { %v1559_v8 = vmul.f32 0.0078125, %v1558_v27 }
 0x203   :  { %v1560_v6 = vadd.f32 1e-05, %v1559_v8 }
 0x205   :  { %2509 = vrsqrt.f32 %v1560_v6  ;;  %vm1567_vm1 = vweird.f32 %v1560_v6 }
 0x20b   :  { %v2510_v29 = vpop.eup %2509 }
 0x20c   :  { %v1562_v30 = vmul.f32 %v2510_v29, %v1560_v6  ;;  %vm1568_vm0 = vweird.f32 %v2510_v29 }
 0x20d   :  { %vm1569_vm2 = vmor %vm1567_vm1, %vm1568_vm0 }
 0x20e   :  { %v1563_v21 = vmul.f32 %v2510_v29, %v1562_v30 }
 0x210   :  { %v1564_v32 = vmul.f32 0.5, %v1563_v21 }
 0x212   :  { %v1565_v11 = vsub.f32 1.5, %v1564_v32 }
 0x214   :  { %v1566_v38 = vmul.f32 %v2510_v29, %v1565_v11 }
 0x216   :  { %v1570_v42 = vsel %vm1569_vm2, %v2510_v29, %v1566_v38 }
 0x217   :  { %v1572_v43 = vmul.f32 %v1571_v33, %v1570_v42 }
 0x219   :  { %v1574_v45 = vmul.f32 %v1572_v43, %v3321_v13  ;;  %v1577_v56 = vperm.slane %v1572_v43, 0 }
 0x21b   :  { %v1575_v22 = vsub.f32 %v1573_v28, %v1574_v45  ;;  %v1579_v31 = vmul.f32 %v1577_v56, %v3259_v50  ;;  %v1580_v48 = vmul.f32 %v1577_v56, %v3262_v49  ;;  %v1581_v23 = vmul.f32 %v1577_v56, %v3265_v60 }
 0x21c   :  { %v1582_v51 = vmul.f32 %v1577_v56, %v3268_v7  ;;  %v1583_v55 = vmul.f32 %v1577_v56, %v3270_v34  ;;  %v1584_v36 = vmul.f32 %v1577_v56, %v3281_v3  ;;  %v1585_v54 = vmul.f32 %v1577_v56, %v3285_v19 }
 0x21d   :  { %v3362_v40 = vperm.slane %v1575_v22, 0  ;;  %v1586_v13 = vmul.f32 %v1577_v56, %v3289_v44  ;;  %v1587_v25 = vmul.f32 %v1577_v56, %v3293_v10  ;;  %v1588_v49 = vmul.f32 %v1577_v56, %v3297_v39 }
 0x21e   :  { %v1589_v60 = vmul.f32 %v1577_v56, %v3301_v52  ;;  %v1590_v7 = vmul.f32 %v1577_v56, %v3304_v17  ;;  %v1591_v3 = vmul.f32 %v1577_v56, %v3307_v57  ;;  %v1592_v19 = vmul.f32 %v1577_v56, %v3310_v62 }
 0x21f   :  { %v1598_v58 = vadd.f32 %v3362_v40, %v1579_v31  ;;  %v1599_v50 = vadd.f32 %v3362_v40, %v1580_v48  ;;  %v1600_v34 = vadd.f32 %v3362_v40, %v1581_v23  ;;  %v1601_v44 = vadd.f32 %v3362_v40, %v1582_v51 }
 0x220   :  { %v1602_v10 = vadd.f32 %v3362_v40, %v1583_v55  ;;  %v1593_v41 = vmul.f32 %v1577_v56, %v3314_v63  ;;  %v1594_v59 = vmul.f32 %v1577_v56, %v3318_v4  ;;  %v1603_v39 = vadd.f32 %v3362_v40, %v1584_v36 }
 0x221   :  { %v1604_v52 = vadd.f32 %v3362_v40, %v1585_v54  ;;  %v1605_v17 = vadd.f32 %v3362_v40, %v1586_v13  ;;  %v1606_v61 = vadd.f32 %v3362_v40, %v1587_v25  ;;  %vm1614_vm3 = vcmp.ge.f32.partialorder %v1598_v58, 0.0 }
 0x222   :  { %vm1615_vm4 = vcmp.ge.f32.partialorder %v1599_v50, 0.0  ;;  %v1607_v57 = vadd.f32 %v3362_v40, %v1588_v49  ;;  %v1630_v62 = vmul.f32 0.2, %v1598_v58  ;;  %v1631_v46 = vmul.f32 0.2, %v1599_v50 }
 0x223   :  { %v1632_v0 = vmul.f32 0.2, %v1600_v34  ;;  %v1608_v1 = vadd.f32 %v3362_v40, %v1589_v60  ;;  %vm1616_vm5 = vcmp.ge.f32.partialorder %v1600_v34, 0.0  ;;  %v1633_v63 = vmul.f32 0.2, %v1601_v44 }
 0x224   :  { %v1634_v4 = vmul.f32 0.2, %v1602_v10  ;;  %vm1617_vm6 = vcmp.ge.f32.partialorder %v1601_v44, 0.0  ;;  %vm1618_vm7 = vcmp.ge.f32.partialorder %v1602_v10, 0.0  ;;  %v1635_v2 = vmul.f32 0.2, %v1603_v39 }
 0x225   :  { %v3391_v15 = vsel %vm1614_vm3, %v1598_v58, %v1630_v62  ;;  %v1609_v53 = vadd.f32 %v3362_v40, %v1590_v7  ;;  %vm1619_vm8 = vcmp.ge.f32.partialorder %v1603_v39, 0.0  ;;  %v1636_v5 = vmul.f32 0.2, %v1604_v52 }
 0x226   :  { %v1647_v18 = vsel %vm1615_vm4, %v1599_v50, %v1631_v46  ;;  %1662 = vst [vmem:[%s3481_s4] sm:$0xff] %v3391_v15  ;;  %v1610_v14 = vadd.f32 %v3362_v40, %v1591_v3  ;;  %vm1620_vm9 = vcmp.ge.f32.partialorder %v1604_v52, 0.0  ;;  %v1637_v35 = vmul.f32 0.2, %v1605_v17 }
 0x227   :  { %v1648_v37 = vsel %vm1616_vm5, %v1600_v34, %v1632_v0  ;;  %vm1621_vm10 = vcmp.ge.f32.partialorder %v1605_v17, 0.0  ;;  %v1638_v9 = vmul.f32 0.2, %v1606_v61  ;;  %v1649_v16 = vsel %vm1617_vm6, %v1601_v44, %v1633_v63  ;;  %1663 = vst [vmem:[%s3481_s4 + $0x8] sm:$0xff] %v1647_v18 }
 0x228   :  { %v1650_v20 = vsel %vm1618_vm7, %v1602_v10, %v1634_v4  ;;  %v1611_v47 = vadd.f32 %v3362_v40, %v1592_v19  ;;  %vm1622_vm11 = vcmp.ge.f32.partialorder %v1606_v61, 0.0  ;;  %v1639_v12 = vmul.f32 0.2, %v1607_v57  ;;  %1664 = vst [vmem:[%s3481_s4 + $0x10] sm:$0xff] %v1648_v37 }
 0x229   :  { %v1651_v24 = vsel %vm1619_vm8, %v1603_v39, %v1635_v2  ;;  %v1612_v26 = vadd.f32 %v3362_v40, %v1593_v41  ;;  %vm1623_vm12 = vcmp.ge.f32.partialorder %v1607_v57, 0.0  ;;  %v1640_v27 = vmul.f32 0.2, %v1608_v1  ;;  %1665 = vst [vmem:[%s3481_s4 + $0x18] sm:$0xff] %v1649_v16 }
 0x22a   :  { %v1652_v8 = vsel %vm1620_vm9, %v1604_v52, %v1636_v5  ;;  %v1613_v6 = vadd.f32 %v3362_v40, %v1594_v59  ;;  %vm1624_vm13 = vcmp.ge.f32.partialorder %v1608_v1, 0.0  ;;  %v1641_v29 = vmul.f32 0.2, %v1609_v53  ;;  %1666 = vst [vmem:[%s3481_s4 + $0x20] sm:$0xff] %v1650_v20 }
 0x22b   :  { %v1653_v30 = vsel %vm1621_vm10, %v1605_v17, %v1637_v35  ;;  %vm1625_vm14 = vcmp.ge.f32.partialorder %v1609_v53, 0.0  ;;  %v1642_v21 = vmul.f32 0.2, %v1610_v14  ;;  %v1654_v32 = vsel %vm1622_vm11, %v1606_v61, %v1638_v9  ;;  %1667 = vst [vmem:[%s3481_s4 + $0x28] sm:$0xff] %v1651_v24 }
 0x22c   :  { %vm1626_vm15 = vcmp.ge.f32.partialorder %v1610_v14, 0.0  ;;  %v1643_v11 = vmul.f32 0.2, %v1611_v47  ;;  %v1655_v38 = vsel %vm1623_vm12, %v1607_v57, %v1639_v12  ;;  %1668 = vst [vmem:[%s3481_s4 + $0x30] sm:$0xff] %v1652_v8  ;;  %vm1627_vm0 = vcmp.ge.f32.partialorder %v1611_v47, 0.0 }
 0x22d   :  { %v1644_v33 = vmul.f32 0.2, %v1612_v26  ;;  %v1656_v42 = vsel %vm1624_vm13, %v1608_v1, %v1640_v27  ;;  %1669 = vst [vmem:[%s3481_s4 + $0x38] sm:$0xff] %v1653_v30  ;;  %vm1628_vm1 = vcmp.ge.f32.partialorder %v1612_v26, 0.0  ;;  %v1645_v43 = vmul.f32 0.2, %v1613_v6 }
 0x22e   :  { %v1657_v28 = vsel %vm1625_vm14, %v1609_v53, %v1641_v29  ;;  %1670 = vst [vmem:[%s3481_s4 + $0x40] sm:$0xff] %v1654_v32  ;;  %vm1629_vm2 = vcmp.ge.f32.partialorder %v1613_v6, 0.0  ;;  %v1658_v45 = vsel %vm1626_vm15, %v1610_v14, %v1642_v21  ;;  %v1659_v22 = vsel %vm1627_vm0, %v1611_v47, %v1643_v11 }
 0x22f   :  { %1671 = vst [vmem:[%s3481_s4 + $0x48] sm:$0xff] %v1655_v38  ;;  %v1660_v56 = vsel %vm1628_vm1, %v1612_v26, %v1644_v33  ;;  %v1661_v40 = vsel %vm1629_vm2, %v1613_v6, %v1645_v43  ;;  %v2441_v31 = vpack.c.bf16 %v1647_v18, %v3391_v15  ;;  %v2446_v48 = vpack.c.bf16 %v1649_v16, %v1648_v37 }
 0x230   :  { %1672 = vst [vmem:[%s3481_s4 + $0x50] sm:$0xff] %v1656_v42  ;;  %v2451_v23 = vpack.c.bf16 %v1651_v24, %v1650_v20  ;;  %v2456_v51 = vpack.c.bf16 %v1653_v30, %v1652_v8  ;;  %v2461_v55 = vpack.c.bf16 %v1655_v38, %v1654_v32  ;;  %v2466_v36 = vpack.c.bf16 %v1657_v28, %v1656_v42 }
 0x231   :  { %1673 = vst [vmem:[%s3481_s4 + $0x58] sm:$0xff] %v1657_v28  ;;  %v2471_v54 = vpack.c.bf16 %v1659_v22, %v1658_v45  ;;  %v2476_v13 = vpack.c.bf16 %v1661_v40, %v1660_v56 }
 0x232   :  { %1674 = vst [vmem:[%s3481_s4 + $0x60] sm:$0xff] %v1658_v45 }
 0x233   :  { %1675 = vst [vmem:[%s3481_s4 + $0x68] sm:$0xff] %v1659_v22 }
 0x234   :  { %1676 = vst [vmem:[%s3481_s4 + $0x70] sm:$0xff] %v1660_v56 }
 0x235   :  { %1677 = vst [vmem:[%s3481_s4 + $0x78] sm:$0xff] %v1661_v40 }
 0x236   :  { %2442 = vst [vmem:[%s3482_s5] sm:$0xff] %v2441_v31  }
 0x237   :  { %2478 = vst [vmem:[%s3482_s5 + $0x8] sm:$0xff] %v2446_v48  }
 0x238   :  { %2479 = vst [vmem:[%s3482_s5 + $0x10] sm:$0xff] %v2451_v23  }
 0x239   :  { %2480 = vst [vmem:[%s3482_s5 + $0x18] sm:$0xff] %v2456_v51  }
 0x23a   :  { %2481 = vst [vmem:[%s3482_s5 + $0x20] sm:$0xff] %v2461_v55  }
 0x23b   :  { %2482 = vst [vmem:[%s3482_s5 + $0x28] sm:$0xff] %v2466_v36  }
 0x23c   :  { %2483 = vst [vmem:[%s3482_s5 + $0x30] sm:$0xff] %v2471_v54  }
 0x23d   :  { %2484 = vst [vmem:[%s3482_s5 + $0x38] sm:$0xff] %v2476_v13  }

// kernel: convnet_forward.11
= control target key start
LH: loop header
LB: loop body
LE: loop exit
PB: predicated region body
PF: predicated region fallthrough
CT: control target
= control target key end

     0   :  { %s1855_s0 = inlined_call_operand.vmem [shape: bf16[32,1152], index: 0, kind: input, shape index: {}]   ;;  %s1856_s1 = inlined_call_operand.vmem [shape: bf16[1152,128], index: 1, kind: input, shape index: {}]   ;;  %s1857_s2 = inlined_call_operand.vmem [shape: f32[1,128], index: 2, kind: input, shape index: {}]   ;;  %s1858_s3 = inlined_call_operand.vmem [shape: f32[1,128], index: 3, kind: input, shape index: {}]   ;;  %s1859_s4 = inlined_call_operand.hbm [shape: f32[32,128], index: 4, kind: output, shape index: {0}]   ;;  %s1860_s5 = inlined_call_operand.vmem [shape: bf16[32,128], index: 5, kind: output, shape index: {1}]  }
   0x1   :  { %v1368_v0 = vld [vmem:[%s1856_s1 + $0x38] sm:$0xff]  ;;  %v1367_v4 = vld [vmem:[%s1856_s1 + $0x30] sm:$0xff]  ;;  %v1366_v8 = vld [vmem:[%s1856_s1 + $0x28] sm:$0xff] }
   0x2   :  { %v1376_v1 = vld [vmem:[%s1856_s1 + $0x78] sm:$0xff]  ;;  %708 = vmatpush.bf16.msra.mxu0 %v1368_v0  ;;  %v1375_v5 = vld [vmem:[%s1856_s1 + $0x70] sm:$0xff]  ;;  %v1374_v9 = vld [vmem:[%s1856_s1 + $0x68] sm:$0xff] }
   0x3   :  { %v1384_v2 = vld [vmem:[%s1856_s1 + $0xb8] sm:$0xff]  ;;  %727 = vmatpush.bf16.msra.mxu1 %v1376_v1  ;;  %v1383_v6 = vld [vmem:[%s1856_s1 + $0xb0] sm:$0xff]  ;;  %v1382_v10 = vld [vmem:[%s1856_s1 + $0xa8] sm:$0xff] }
   0x4   :  { %v1392_v3 = vld [vmem:[%s1856_s1 + $0xf8] sm:$0xff]  ;;  %746 = vmatpush.bf16.msra.mxu2 %v1384_v2  ;;  %v1391_v7 = vld [vmem:[%s1856_s1 + $0xf0] sm:$0xff]  ;;  %v1390_v11 = vld [vmem:[%s1856_s1 + $0xe8] sm:$0xff] }
   0x5   :  { %765 = vmatpush.bf16.msra.mxu3 %v1392_v3  ;;  %v1365_v12 = vld [vmem:[%s1856_s1 + $0x20] sm:$0xff]  ;;  %v1364_v16 = vld [vmem:[%s1856_s1 + $0x18] sm:$0xff]  ;;  %v1363_v20 = vld [vmem:[%s1856_s1 + $0x10] sm:$0xff] }
   0x6   :  { %709 = vmatpush.bf16.msra.mxu0 %v1367_v4  ;;  %v1373_v13 = vld [vmem:[%s1856_s1 + $0x60] sm:$0xff]  ;;  %v1372_v17 = vld [vmem:[%s1856_s1 + $0x58] sm:$0xff]  ;;  %v1371_v21 = vld [vmem:[%s1856_s1 + $0x50] sm:$0xff] }
   0x7   :  { %728 = vmatpush.bf16.msra.mxu1 %v1375_v5  ;;  %v1381_v14 = vld [vmem:[%s1856_s1 + $0xa0] sm:$0xff]  ;;  %v1380_v18 = vld [vmem:[%s1856_s1 + $0x98] sm:$0xff]  ;;  %v1379_v22 = vld [vmem:[%s1856_s1 + $0x90] sm:$0xff] }
   0x8   :  { %747 = vmatpush.bf16.msra.mxu2 %v1383_v6  ;;  %v1389_v15 = vld [vmem:[%s1856_s1 + $0xe0] sm:$0xff]  ;;  %v1388_v19 = vld [vmem:[%s1856_s1 + $0xd8] sm:$0xff]  ;;  %v1387_v23 = vld [vmem:[%s1856_s1 + $0xd0] sm:$0xff] }
   0x9   :  { %766 = vmatpush.bf16.msra.mxu3 %v1391_v7  ;;  %v1362_v24 = vld [vmem:[%s1856_s1 + $0x8] sm:$0xff]  ;;  %v1361_v28 = vld [vmem:[%s1856_s1] sm:$0xff] }
   0xa   :  { %710 = vmatpush.bf16.msra.mxu0 %v1366_v8  ;;  %v1370_v25 = vld [vmem:[%s1856_s1 + $0x48] sm:$0xff]  ;;  %v1369_v29 = vld [vmem:[%s1856_s1 + $0x40] sm:$0xff] }
   0xb   :  { %729 = vmatpush.bf16.msra.mxu1 %v1374_v9  ;;  %v1378_v26 = vld [vmem:[%s1856_s1 + $0x88] sm:$0xff]  ;;  %v1377_v30 = vld [vmem:[%s1856_s1 + $0x80] sm:$0xff] }
   0xc   :  { %748 = vmatpush.bf16.msra.mxu2 %v1382_v10  ;;  %v1386_v27 = vld [vmem:[%s1856_s1 + $0xc8] sm:$0xff]  ;;  %v1385_v31 = vld [vmem:[%s1856_s1 + $0xc0] sm:$0xff] }
   0xd   :  { %767 = vmatpush.bf16.msra.mxu3 %v1390_v11  ;;  %v985_v32 = vld [vmem:[%s1855_s0] sm:$0xf]  ;;  %v1347_v33 = vld [vmem:[%s1855_s0 + $0x20] sm:$0xf0] }
   0xe   :  { %711 = vmatpush.bf16.msra.mxu0 %v1365_v12 }
   0xf   :  { %730 = vmatpush.bf16.msra.mxu1 %v1373_v13 }
  0x10   :  { %749 = vmatpush.bf16.msra.mxu2 %v1381_v14 }
  0x11   :  { %768 = vmatpush.bf16.msra.mxu3 %v1389_v15 }
  0x12   :  { %712 = vmatpush.bf16.msra.mxu0 %v1364_v16 }
  0x13   :  { %731 = vmatpush.bf16.msra.mxu1 %v1372_v17 }
  0x14   :  { %750 = vmatpush.bf16.msra.mxu2 %v1380_v18 }
  0x15   :  { %769 = vmatpush.bf16.msra.mxu3 %v1388_v19 }
  0x16   :  { %713 = vmatpush.bf16.msra.mxu0 %v1363_v20 }
  0x17   :  { %732 = vmatpush.bf16.msra.mxu1 %v1371_v21 }
  0x18   :  { %751 = vmatpush.bf16.msra.mxu2 %v1379_v22 }
  0x19   :  { %770 = vmatpush.bf16.msra.mxu3 %v1387_v23 }
  0x1a   :  { %11 = vsyncpa [#allocation3], 0  ;;  %714 = vmatpush.bf16.msra.mxu0 %v1362_v24  ;;  %v1343_v34 = vld [vmem:[%s1855_s0 + $0x4] sm:$0xf]  ;;  %v987_v35 = vld [vmem:[%s1855_s0 + $0x24] sm:$0xf0]  ;;  %v986_v42 = vor.u32 %v1347_v33, %v985_v32 }
  0x1b   :  { %733 = vmatpush.bf16.msra.mxu1 %v1370_v25  ;;  %v993_v36 = vld [vmem:[%s1855_s0 + $0x8] sm:$0xf]  ;;  %v1348_v37 = vld [vmem:[%s1855_s0 + $0x28] sm:$0xf0]  ;;  %v995_v39 = vld [vmem:[%s1855_s0 + $0x2c] sm:$0xf0]  ;;  %v990_v43 = vor.u32 %v1343_v34, %v987_v35 }
  0x1c   :  { %752 = vmatpush.bf16.msra.mxu2 %v1378_v26  ;;  %v1344_v38 = vld [vmem:[%s1855_s0 + $0xc] sm:$0xf]  ;;  %v1400_v40 = vld [vmem:[%s1856_s1 + $0x138] sm:$0xff]  ;;  %v994_v44 = vor.u32 %v1348_v37, %v993_v36  ;;  %v1399_v48 = vld [vmem:[%s1856_s1 + $0x130] sm:$0xff]  ;;  %s967_s13 = sshll.u32 %s1859_s4, 4  ;;  %s1484_s18 = smov 128   ;;  %s968_s13 = int_to_ptr.hbm [resolvable:$true] %s967_s13 }
  0x1d   :  { %771 = vmatpush.bf16.msra.mxu3 %v1386_v27  ;;  %v1408_v41 = vld [vmem:[%s1856_s1 + $0x178] sm:$0xff]  ;;  %v998_v45 = vor.u32 %v1344_v38, %v995_v39  ;;  %v1407_v49 = vld [vmem:[%s1856_s1 + $0x170] sm:$0xff]  ;;  %v1398_v52 = vld [vmem:[%s1856_s1 + $0x128] sm:$0xff]  ;;  %s1485_s4 = smov 8  }
  0x1e   :  { %715 = vmatpush.bf16.msra.mxu0 %v1361_v28  ;;  %v1416_v46 = vld [vmem:[%s1856_s1 + $0x1b8] sm:$0xff]  ;;  %v1415_v50 = vld [vmem:[%s1856_s1 + $0x1b0] sm:$0xff]  ;;  %v1406_v53 = vld [vmem:[%s1856_s1 + $0x168] sm:$0xff] }
  0x1f   :  { %734 = vmatpush.bf16.msra.mxu1 %v1369_v29  ;;  %v1424_v47 = vld [vmem:[%s1856_s1 + $0x1f8] sm:$0xff]  ;;  %v1423_v51 = vld [vmem:[%s1856_s1 + $0x1f0] sm:$0xff]  ;;  %v1414_v54 = vld [vmem:[%s1856_s1 + $0x1a8] sm:$0xff] }
  0x20   :  { %753 = vmatpush.bf16.msra.mxu2 %v1377_v30  ;;  %v1422_v55 = vld [vmem:[%s1856_s1 + $0x1e8] sm:$0xff]  ;;  %v1397_v56 = vld [vmem:[%s1856_s1 + $0x120] sm:$0xff]  ;;  %v1023_v63 = vld [vmem:[%s1855_s0 + $0x6c] sm:$0xf0] }
  0x21   :  { %772 = vmatpush.bf16.msra.mxu3 %v1385_v31  ;;  %716 = vmatmul.bf16.vlgmr.msra.gmra.mxu0 %v986_v42  ;;  %v1405_v57 = vld [vmem:[%s1856_s1 + $0x160] sm:$0xff]  ;;  %v1021_v60 = vld [vmem:[%s1855_s0 + $0x48] sm:$0xf]  ;;  %v1356_v61 = vld [vmem:[%s1855_s0 + $0x68] sm:$0xf0] }
  0x22   :  { %784 = vmatpush.bf16.msrb.mxu0 %v1400_v40  ;;  %735 = vmatmul.bf16.vlgmr.msra.gmra.mxu1 %v990_v43  ;;  %v1413_v58 = vld [vmem:[%s1856_s1 + $0x1a0] sm:$0xff]  ;;  %v1352_v62 = vld [vmem:[%s1855_s0 + $0x4c] sm:$0xf]  ;;  %v1029_v0 = vld [vmem:[%s1855_s0 + $0x50] sm:$0xf]  ;;  %v1022_v6 = vor.u32 %v1356_v61, %v1021_v60 }
  0x23   :  { %803 = vmatpush.bf16.msrb.mxu1 %v1408_v41  ;;  %754 = vmatmul.bf16.vlgmr.msra.gmra.mxu2 %v994_v44  ;;  %v1421_v59 = vld [vmem:[%s1856_s1 + $0x1e0] sm:$0xff]  ;;  %v1357_v1 = vld [vmem:[%s1855_s0 + $0x70] sm:$0xf0]  ;;  %v1031_v3 = vld [vmem:[%s1855_s0 + $0x74] sm:$0xf0]  ;;  %v1026_v7 = vor.u32 %v1352_v62, %v1023_v63 }
  0x24   :  { %773 = vmatmul.bf16.vlgmr.msra.gmra.mxu3 %v998_v45  ;;  %822 = vmatpush.bf16.msrb.mxu2 %v1416_v46  ;;  %v1353_v2 = vld [vmem:[%s1855_s0 + $0x54] sm:$0xf]  ;;  %v1396_v4 = vld [vmem:[%s1856_s1 + $0x118] sm:$0xff]  ;;  %v1030_v8 = vor.u32 %v1357_v1, %v1029_v0  ;;  %v1394_v16 = vld [vmem:[%s1856_s1 + $0x108] sm:$0xff] }
  0x25   :  { %841 = vmatpush.bf16.msrb.mxu3 %v1424_v47  ;;  %v1404_v5 = vld [vmem:[%s1856_s1 + $0x158] sm:$0xff]  ;;  %v1034_v9 = vor.u32 %v1353_v2, %v1031_v3  ;;  %v1395_v12 = vld [vmem:[%s1856_s1 + $0x110] sm:$0xff]  ;;  %v1402_v17 = vld [vmem:[%s1856_s1 + $0x148] sm:$0xff] }
  0x26   :  { %785 = vmatpush.bf16.msrb.mxu0 %v1399_v48  ;;  %v1412_v10 = vld [vmem:[%s1856_s1 + $0x198] sm:$0xff]  ;;  %v1403_v13 = vld [vmem:[%s1856_s1 + $0x150] sm:$0xff]  ;;  %v1410_v18 = vld [vmem:[%s1856_s1 + $0x188] sm:$0xff] }
  0x27   :  { %804 = vmatpush.bf16.msrb.mxu1 %v1407_v49  ;;  %v1420_v11 = vld [vmem:[%s1856_s1 + $0x1d8] sm:$0xff]  ;;  %v1411_v14 = vld [vmem:[%s1856_s1 + $0x190] sm:$0xff]  ;;  %v1418_v19 = vld [vmem:[%s1856_s1 + $0x1c8] sm:$0xff] }
  0x28   :  { %823 = vmatpush.bf16.msrb.mxu2 %v1415_v50  ;;  %v1419_v15 = vld [vmem:[%s1856_s1 + $0x1d0] sm:$0xff]  ;;  %v1393_v20 = vld [vmem:[%s1856_s1 + $0x100] sm:$0xff]  ;;  %v1432_v26 = vld [vmem:[%s1856_s1 + $0x238] sm:$0xff] }
  0x29   :  { %842 = vmatpush.bf16.msrb.mxu3 %v1423_v51  ;;  %v1401_v21 = vld [vmem:[%s1856_s1 + $0x140] sm:$0xff]  ;;  %v1001_v24 = vld [vmem:[%s1855_s0 + $0x10] sm:$0xf]  ;;  %v1349_v25 = vld [vmem:[%s1855_s0 + $0x30] sm:$0xf0] }
  0x2a   :  { %786 = vmatpush.bf16.msrb.mxu0 %v1398_v52  ;;  %v1409_v22 = vld [vmem:[%s1856_s1 + $0x180] sm:$0xff]  ;;  %v1345_v27 = vld [vmem:[%s1855_s0 + $0x14] sm:$0xf]  ;;  %v1003_v28 = vld [vmem:[%s1855_s0 + $0x34] sm:$0xf0]  ;;  %v1002_v33 = vor.u32 %v1349_v25, %v1001_v24 }
  0x2b   :  { %805 = vmatpush.bf16.msrb.mxu1 %v1406_v53  ;;  %v1417_v23 = vld [vmem:[%s1856_s1 + $0x1c0] sm:$0xff]  ;;  %v1009_v29 = vld [vmem:[%s1855_s0 + $0x18] sm:$0xf]  ;;  %v1350_v30 = vld [vmem:[%s1855_s0 + $0x38] sm:$0xf0]  ;;  %v1006_v34 = vor.u32 %v1345_v27, %v1003_v28 }
  0x2c   :  { %824 = vmatpush.bf16.msrb.mxu2 %v1414_v54  ;;  %v1346_v31 = vld [vmem:[%s1855_s0 + $0x1c] sm:$0xf]  ;;  %v1011_v32 = vld [vmem:[%s1855_s0 + $0x3c] sm:$0xf0]  ;;  %v1010_v35 = vor.u32 %v1350_v30, %v1009_v29  ;;  %v1431_v37 = vld [vmem:[%s1856_s1 + $0x230] sm:$0xff] }
  0x2d   :  { %843 = vmatpush.bf16.msrb.mxu3 %v1422_v55  ;;  %v1014_v36 = vor.u32 %v1346_v31, %v1011_v32  ;;  %v1430_v38 = vld [vmem:[%s1856_s1 + $0x228] sm:$0xff]  ;;  %v1429_v39 = vld [vmem:[%s1856_s1 + $0x220] sm:$0xff]  ;;  %v1037_v40 = vld [vmem:[%s1855_s0 + $0x58] sm:$0xf] }
  0x2e   :  { %787 = vmatpush.bf16.msrb.mxu0 %v1397_v56  ;;  %v1358_v41 = vld [vmem:[%s1855_s0 + $0x78] sm:$0xf0]  ;;  %v1039_v43 = vld [vmem:[%s1855_s0 + $0x7c] sm:$0xf0]  ;;  %v1359_v45 = vld [vmem:[%s1855_s0 + $0x80] sm:$0xf0] }
  0x2f   :  { %806 = vmatpush.bf16.msrb.mxu1 %v1405_v57  ;;  %v1354_v42 = vld [vmem:[%s1855_s0 + $0x5c] sm:$0xf]  ;;  %v1045_v44 = vld [vmem:[%s1855_s0 + $0x60] sm:$0xf]  ;;  %v1355_v47 = vld [vmem:[%s1855_s0 + $0x64] sm:$0xf]  ;;  %v1038_v49 = vor.u32 %v1358_v41, %v1037_v40 }
  0x30   :  { %825 = vmatpush.bf16.msrb.mxu2 %v1413_v58  ;;  %v1428_v46 = vld [vmem:[%s1856_s1 + $0x218] sm:$0xff]  ;;  %v1047_v48 = vld [vmem:[%s1855_s0 + $0x84] sm:$0xf0]  ;;  %v1042_v50 = vor.u32 %v1354_v42, %v1039_v43  ;;  %v1046_v51 = vor.u32 %v1359_v45, %v1045_v44  ;;  %v1427_v53 = vld [vmem:[%s1856_s1 + $0x210] sm:$0xff] }
  0x31   :  { %844 = vmatpush.bf16.msrb.mxu3 %v1421_v59  ;;  %721 = vmatmul.bf16.gmra.mxu0 %v1022_v6  ;;  %v1050_v52 = vor.u32 %v1355_v47, %v1047_v48  ;;  %v1426_v54 = vld [vmem:[%s1856_s1 + $0x208] sm:$0xff]  ;;  %v1425_v55 = vld [vmem:[%s1856_s1 + $0x200] sm:$0xff] }
  0x32   :  { %788 = vmatpush.bf16.msrb.mxu0 %v1396_v4  ;;  %740 = vmatmul.bf16.gmra.mxu1 %v1026_v7  ;;  %v1017_v56 = vld [vmem:[%s1855_s0 + $0x20] sm:$0xf]  ;;  %v1351_v57 = vld [vmem:[%s1855_s0 + $0x40] sm:$0xf0]  ;;  %v1053_v58 = vld [vmem:[%s1855_s0 + $0x68] sm:$0xf] }
  0x33   :  { %807 = vmatpush.bf16.msrb.mxu1 %v1404_v5  ;;  %759 = vmatmul.bf16.gmra.mxu2 %v1030_v8  ;;  %v1360_v59 = vld [vmem:[%s1855_s0 + $0x88] sm:$0xf0]  ;;  %v1018_v60 = vor.u32 %v1351_v57, %v1017_v56 }
  0x34   :  { %778 = vmatmul.bf16.gmra.mxu3 %v1034_v9  ;;  %826 = vmatpush.bf16.msrb.mxu2 %v1412_v10  ;;  %v1054_v61 = vor.u32 %v1360_v59, %v1053_v58 }
  0x35   :  { %845 = vmatpush.bf16.msrb.mxu3 %v1420_v11 }
  0x36   :  { %789 = vmatpush.bf16.msrb.mxu0 %v1395_v12 }
  0x37   :  { %808 = vmatpush.bf16.msrb.mxu1 %v1403_v13 }
  0x38   :  { %827 = vmatpush.bf16.msrb.mxu2 %v1411_v14 }
  0x39   :  { %846 = vmatpush.bf16.msrb.mxu3 %v1419_v15 }
  0x3a   :  { %790 = vmatpush.bf16.msrb.mxu0 %v1394_v16 }
  0x3b   :  { %809 = vmatpush.bf16.msrb.mxu1 %v1402_v17 }
  0x3c   :  { %828 = vmatpush.bf16.msrb.mxu2 %v1410_v18 }
  0x3d   :  { %847 = vmatpush.bf16.msrb.mxu3 %v1418_v19 }
  0x3e   :  { %791 = vmatpush.bf16.msrb.mxu0 %v1393_v20 }
  0x3f   :  { %810 = vmatpush.bf16.msrb.mxu1 %v1401_v21 }
  0x40   :  { %829 = vmatpush.bf16.msrb.mxu2 %v1409_v22 }
  0x41   :  { %848 = vmatpush.bf16.msrb.mxu3 %v1417_v23  ;;  %792 = vmatmul.bf16.vlgmr.msrb.gmra.mxu0 %v1002_v33 }
  0x42   :  { %860 = vmatpush.bf16.msra.mxu0 %v1432_v26  ;;  %811 = vmatmul.bf16.vlgmr.msrb.gmra.mxu1 %v1006_v34 }
  0x43   :  { %1444 = vmatpush.bf16.msra.mxu1 %v1432_v26  ;;  %830 = vmatmul.bf16.vlgmr.msrb.gmra.mxu2 %v1010_v35 }
  0x44   :  { %849 = vmatmul.bf16.vlgmr.msrb.gmra.mxu3 %v1014_v36 }
  0x46   :  { %861 = vmatpush.bf16.msra.mxu0 %v1431_v37 }
  0x47   :  { %1445 = vmatpush.bf16.msra.mxu1 %v1431_v37 }
  0x4a   :  { %862 = vmatpush.bf16.msra.mxu0 %v1430_v38 }
  0x4b   :  { %1446 = vmatpush.bf16.msra.mxu1 %v1430_v38 }
  0x4e   :  { %863 = vmatpush.bf16.msra.mxu0 %v1429_v39 }
  0x4f   :  { %1447 = vmatpush.bf16.msra.mxu1 %v1429_v39 }
  0x51   :  { %797 = vmatmul.bf16.gmra.mxu0 %v1038_v49 }
  0x52   :  { %864 = vmatpush.bf16.msra.mxu0 %v1428_v46  ;;  %816 = vmatmul.bf16.gmra.mxu1 %v1042_v50 }
  0x53   :  { %1448 = vmatpush.bf16.msra.mxu1 %v1428_v46  ;;  %835 = vmatmul.bf16.gmra.mxu2 %v1046_v51 }
  0x54   :  { %854 = vmatmul.bf16.gmra.mxu3 %v1050_v52 }
  0x56   :  { %865 = vmatpush.bf16.msra.mxu0 %v1427_v53 }
  0x57   :  { %1449 = vmatpush.bf16.msra.mxu1 %v1427_v53 }
  0x5a   :  { %866 = vmatpush.bf16.msra.mxu0 %v1426_v54 }
  0x5b   :  { %1450 = vmatpush.bf16.msra.mxu1 %v1426_v54 }
  0x5e   :  { %867 = vmatpush.bf16.msra.mxu0 %v1425_v55 }
  0x5f   :  { %1451 = vmatpush.bf16.msra.mxu1 %v1425_v55 }
  0x61   :  { %868 = vmatmul.bf16.vlgmr.msra.gmra.mxu0 %v1018_v60 }
  0x62   :  { %873 = vmatmul.bf16.vlgmr.msra.gmra.mxu1 %v1054_v61 }
  0x9e   :  { %v717_v62 = vpop.f32.mrf.mxu0 }
  0x9f   :  { %v736_v63 = vpop.f32.mrf.mxu1 }
  0xa0   :  { %v737_v24 = vadd.f32 %v736_v63, %v717_v62 }
  0xa6   :  { %v755_v0 = vpop.f32.mrf.mxu2  ;;  %v719_v2 = vpop.f32.mrf.mxu0 }
  0xa7   :  { %v774_v1 = vpop.f32.mrf.mxu3  ;;  %v738_v3 = vpop.f32.mrf.mxu1  ;;  %v756_v26 = vadd.f32 %v755_v0, %v737_v24 }
  0xa8   :  { %v739_v25 = vadd.f32 %v738_v3, %v719_v2 }
  0xa9   :  { %v775_v34 = vadd.f32 %v774_v1, %v756_v26 }
  0xae   :  { %v757_v4 = vpop.f32.mrf.mxu2  ;;  %v722_v6 = vpop.f32.mrf.mxu0 }
  0xaf   :  { %v776_v5 = vpop.f32.mrf.mxu3  ;;  %v741_v7 = vpop.f32.mrf.mxu1  ;;  %v758_v27 = vadd.f32 %v757_v4, %v739_v25 }
  0xb0   :  { %v742_v28 = vadd.f32 %v741_v7, %v722_v6 }
  0xb1   :  { %v777_v35 = vadd.f32 %v776_v5, %v758_v27 }
  0xb6   :  { %v760_v8 = vpop.f32.mrf.mxu2  ;;  %v724_v10 = vpop.f32.mrf.mxu0 }
  0xb7   :  { %v779_v9 = vpop.f32.mrf.mxu3  ;;  %v743_v11 = vpop.f32.mrf.mxu1  ;;  %v761_v31 = vadd.f32 %v760_v8, %v742_v28 }
  0xb8   :  { %v744_v32 = vadd.f32 %v743_v11, %v724_v10 }
  0xb9   :  { %v780_v37 = vadd.f32 %v779_v9, %v761_v31 }
  0xbe   :  { %v762_v12 = vpop.f32.mrf.mxu2  ;;  %v793_v14 = vpop.f32.mrf.mxu0 }
  0xbf   :  { %v781_v13 = vpop.f32.mrf.mxu3  ;;  %v812_v15 = vpop.f32.mrf.mxu1  ;;  %v763_v36 = vadd.f32 %v762_v12, %v744_v32  ;;  %v794_v38 = vadd.f32 %v793_v14, %v775_v34 }
  0xc1   :  { %v782_v41 = vadd.f32 %v781_v13, %v763_v36  ;;  %v813_v45 = vadd.f32 %v812_v15, %v794_v38 }
  0xc6   :  { %v831_v16 = vpop.f32.mrf.mxu2  ;;  %v795_v17 = vpop.f32.mrf.mxu0 }
  0xc7   :  { %v814_v18 = vpop.f32.mrf.mxu1  ;;  %v850_v19 = vpop.f32.mrf.mxu3  ;;  %v796_v39 = vadd.f32 %v795_v17, %v777_v35  ;;  %v832_v48 = vadd.f32 %v831_v16, %v813_v45 }
  0xc9   :  { %v815_v46 = vadd.f32 %v814_v18, %v796_v39  ;;  %v851_v54 = vadd.f32 %v850_v19, %v832_v48 }
  0xce   :  { %v833_v20 = vpop.f32.mrf.mxu2  ;;  %v798_v21 = vpop.f32.mrf.mxu0 }
  0xcf   :  { %v817_v22 = vpop.f32.mrf.mxu1  ;;  %v852_v23 = vpop.f32.mrf.mxu3  ;;  %v799_v42 = vadd.f32 %v798_v21, %v780_v37  ;;  %v834_v49 = vadd.f32 %v833_v20, %v815_v46  ;;  %v918_v37 = vld [vmem:[%s1857_s2] sm:$0x1]  ;;  %s1483_s2 = smov [#allocation2]  }
  0xd1   :  { %v818_v50 = vadd.f32 %v817_v22, %v799_v42  ;;  %v853_v55 = vadd.f32 %v852_v23, %v834_v49 }
  0xd6   :  { %v800_v29 = vpop.f32.mrf.mxu0  ;;  %v836_v33 = vpop.f32.mrf.mxu2 }
  0xd7   :  { %v819_v30 = vpop.f32.mrf.mxu1  ;;  %v855_v40 = vpop.f32.mrf.mxu3  ;;  %v801_v47 = vadd.f32 %v800_v29, %v782_v41  ;;  %v837_v52 = vadd.f32 %v836_v33, %v818_v50 }
  0xd9   :  { %v820_v53 = vadd.f32 %v819_v30, %v801_v47  ;;  %v856_v59 = vadd.f32 %v855_v40, %v837_v52  ;;  %v920_v40 = vld [vmem:[%s1858_s3] sm:$0x1]  ;;  %s965_s3 = sshll.u32 %s1483_s2, 4  ;;  %s966_s3 = int_to_ptr.vmem [resolvable:$true] %s965_s3 }
  0xde   :  { %v869_v43 = vpop.f32.mrf.mxu0  ;;  %v838_v51 = vpop.f32.mrf.mxu2 }
  0xdf   :  { %v874_v44 = vpop.f32.mrf.mxu1  ;;  %v839_v56 = vadd.f32 %v838_v51, %v820_v53  ;;  %v857_v57 = vpop.f32.mrf.mxu3  ;;  %v870_v60 = vadd.f32 %v869_v43, %v851_v54 }
  0xe0   :  { %v875_v0 = vadd.f32 %v874_v44, %v856_v59 }
  0xe1   :  { %v858_v63 = vadd.f32 %v857_v57, %v839_v56 }
  0xe6   :  { %v871_v58 = vpop.f32.mrf.mxu0 }
  0xe7   :  { %v872_v61 = vadd.f32 %v871_v58, %v853_v55  ;;  %v876_v62 = vpop.f32.mrf.mxu1 }
  0xe8   :  { %v877_v2 = vadd.f32 %v876_v62, %v858_v63 }
  0xe9   :  { %v879_v1 = vadd.f32 %v872_v61, %v870_v60 }
  0xeb   :  { %v880_v3 = vadd.f32 %v879_v1, %v875_v0 }
  0xed   :  { %v881_v4 = vadd.f32 %v880_v3, %v877_v2 }
  0xef   :  { %v882_v5 = vrot.slane %v881_v4, 4 }
  0xf1   :  { %v883_v6 = vadd.f32 %v882_v5, %v881_v4 }
  0xf3   :  { %v884_v7 = vrot.slane %v883_v6, 2 }
  0xf5   :  { %v885_v8 = vadd.f32 %v884_v7, %v883_v6 }
  0xf7   :  { %v886_v9 = vrot.slane %v885_v8, 1 }
  0xf9   :  { %v887_v10 = vadd.f32 %v886_v9, %v885_v8 }
  0xfb   :  { %v888_v11 = vmul.f32 0.03125, %v887_v10 }
  0xfd   :  { %v889_v12 = vsub.f32 %v870_v60, %v888_v11  ;;  %v890_v13 = vsub.f32 %v872_v61, %v888_v11  ;;  %v891_v14 = vsub.f32 %v875_v0, %v888_v11  ;;  %v892_v15 = vsub.f32 %v877_v2, %v888_v11 }
  0xff   :  { %v893_v16 = vmul.f32 %v889_v12, %v889_v12  ;;  %v894_v17 = vmul.f32 %v890_v13, %v890_v13  ;;  %v895_v18 = vmul.f32 %v891_v14, %v891_v14  ;;  %v896_v20 = vmul.f32 %v892_v15, %v892_v15 }
 0x101   :  { %v897_v19 = vadd.f32 %v894_v17, %v893_v16 }
 0x103   :  { %v898_v21 = vadd.f32 %v897_v19, %v895_v18 }
 0x105   :  { %v899_v22 = vadd.f32 %v898_v21, %v896_v20 }
 0x107   :  { %v900_v23 = vrot.slane %v899_v22, 4 }
 0x109   :  { %v901_v24 = vadd.f32 %v900_v23, %v899_v22 }
 0x10b   :  { %v902_v25 = vrot.slane %v901_v24, 2 }
 0x10d   :  { %v903_v26 = vadd.f32 %v902_v25, %v901_v24 }
 0x10f   :  { %v904_v27 = vrot.slane %v903_v26, 1 }
 0x111   :  { %v905_v28 = vadd.f32 %v904_v27, %v903_v26 }
 0x113   :  { %v906_v29 = vmul.f32 0.03125, %v905_v28 }
 0x115   :  { %v907_v30 = vadd.f32 1e-05, %v906_v29 }
 0x117   :  { %1455 = vrsqrt.f32 %v907_v30  ;;  %vm914_vm1 = vweird.f32 %v907_v30 }
 0x11d   :  { %v1456_v31 = vpop.eup %1455 }
 0x11e   :  { %v909_v32 = vmul.f32 %v1456_v31, %v907_v30  ;;  %vm915_vm0 = vweird.f32 %v1456_v31 }
 0x11f   :  { %vm916_vm2 = vmor %vm914_vm1, %vm915_vm0 }
 0x120   :  { %v910_v33 = vmul.f32 %v1456_v31, %v909_v32 }
 0x122   :  { %v911_v34 = vmul.f32 0.5, %v910_v33 }
 0x124   :  { %v912_v35 = vsub.f32 1.5, %v911_v34 }
 0x126   :  { %v913_v36 = vmul.f32 %v1456_v31, %v912_v35 }
 0x128   :  { %v917_v38 = vsel %vm916_vm2, %v1456_v31, %v913_v36 }
 0x129   :  { %v919_v39 = vmul.f32 %v918_v37, %v917_v38 }
 0x12b   :  { %v921_v41 = vmul.f32 %v919_v39, %v888_v11  ;;  %v924_v42 = vperm.slane %v919_v39, 0 }
 0x12d   :  { %v922_v43 = vsub.f32 %v920_v40, %v921_v41  ;;  %v926_v44 = vmul.f32 %v924_v42, %v870_v60  ;;  %v927_v45 = vmul.f32 %v924_v42, %v872_v61  ;;  %v928_v46 = vmul.f32 %v924_v42, %v875_v0 }
 0x12e   :  { %v929_v47 = vmul.f32 %v924_v42, %v877_v2 }
 0x12f   :  { %v931_v48 = vperm.slane %v922_v43, 0 }
 0x131   :  { %v933_v49 = vadd.f32 %v931_v48, %v926_v44  ;;  %v934_v50 = vadd.f32 %v931_v48, %v927_v45  ;;  %v935_v51 = vadd.f32 %v931_v48, %v928_v46  ;;  %v936_v52 = vadd.f32 %v931_v48, %v929_v47 }
 0x133   :  { %vm939_vm3 = vcmp.ge.f32.partialorder %v935_v51, 0.0  ;;  %vm940_vm4 = vcmp.ge.f32.partialorder %v936_v52, 0.0  ;;  %v943_v53 = vmul.f32 0.2, %v935_v51  ;;  %v944_v54 = vmul.f32 0.2, %v936_v52 }
 0x134   :  { %vm937_vm5 = vcmp.ge.f32.partialorder %v933_v49, 0.0  ;;  %vm938_vm6 = vcmp.ge.f32.partialorder %v934_v50, 0.0  ;;  %v941_v55 = vmul.f32 0.2, %v933_v49  ;;  %v942_v56 = vmul.f32 0.2, %v934_v50 }
 0x135   :  { %v947_v57 = vsel %vm939_vm3, %v935_v51, %v943_v53  ;;  %v948_v58 = vsel %vm940_vm4, %v936_v52, %v944_v54 }
 0x136   :  { %951 = vst [vmem:[#allocation2 + $0x10] sm:$0xff] %v947_v57  ;;  %v1441_v59 = vpack.c.bf16 %v948_v58, %v947_v57  ;;  %v945_v60 = vsel %vm937_vm5, %v933_v49, %v941_v55  ;;  %v946_v61 = vsel %vm938_vm6, %v934_v50, %v942_v56 }
 0x137   :  { %952 = vst [vmem:[#allocation2 + $0x18] sm:$0xff] %v948_v58  ;;  %v1436_v62 = vpack.c.bf16 %v946_v61, %v945_v60 }
 0x138   :  { %1443 = vst [vmem:[%s1860_s5 + $0x8] sm:$0xff] %v1441_v59  }
 0x139   :  { %949 = vst [vmem:[#allocation2] sm:$0xff] %v945_v60 }
 0x13a   :  { %950 = vst [vmem:[#allocation2 + $0x8] sm:$0xff] %v946_v61 }
 0x13b   :  { %1437 = vst [vmem:[%s1860_s5] sm:$0xff] %v1436_v62  }
 0x13c   :  { %973 = dma.vmem_to_hbm [thread:$0]  %s966_s3, 512, %s968_s13, [#allocation3], %s1484_s18, %s1484_s18, %s1485_s4  }
 0x13d   :  { %1481 = dma.done.wait [#allocation3], 512  }
 0x13e   :  { %1482 = vsyncadd [#allocation3], 4294966784 }
 0x13f   :  { %982 = vsyncpa [#allocation3], 1 }

// kernel: convnet_forward.13
= control target key start
LH: loop header
LB: loop body
LE: loop exit
PB: predicated region body
PF: predicated region fallthrough
CT: control target
= control target key end

     0   :  { %s2213_s18 = smov 0   ;;  %s2215_s19 = smov 0   ;;  %s2657_s0 = inlined_call_operand.vmem [shape: bf16[8,1152], index: 0, kind: input, shape index: {}]   ;;  %s2658_s1 = inlined_call_operand.vmem [shape: bf16[1152,256], index: 1, kind: input, shape index: {}]   ;;  %s2659_s2 = inlined_call_operand.vmem [shape: f32[1,256], index: 2, kind: input, shape index: {}]   ;;  %s2660_s3 = inlined_call_operand.vmem [shape: f32[1,256], index: 3, kind: input, shape index: {}]   ;;  %s2661_s4 = inlined_call_operand.vmem [shape: f32[8,256], index: 4, kind: output, shape index: {0}]   ;;  %s2662_s5 = inlined_call_operand.vmem [shape: bf16[8,256], index: 5, kind: output, shape index: {1}]  }
   0x1   :  { %s2217_s20 = smov 0  }
   0x2 LB: > { %s1761_s21 = sadd.s32 4294967295, %s2181_s20   ;;  %s2230_s22 = sadd.s32 1, %s2181_s20   ;;  %s2181_s20 = sphi %s2217_s20, %s2665_s20   ;;  %s2177_s19 = sphi %s2215_s19, %s2664_s19   ;;  %s2173_s18 = sphi %s2213_s18, %s2663_s18  }
   0x3   : > { %s41_s23 = ssub.s32 %s2181_s20, %s2230_s22  ;;  %s44_s24 = sadd.s32 1, %s2177_s19 }
   0x4   : > { %p42_p0 = scmp.eq.s32.totalorder %s41_s23, 0  ;;  %p51_p1 = scmp.ne.s32.totalorder %s2177_s19, %s2173_s18 }
   0x5   : > { %p52_p2 = scmp.eq.s32.totalorder %s2181_s20, 0  ;;  %p1764_p4 = scmp.ge.s32.totalorder %s2181_s20, 2 }
   0x6   : > { %s2239_s25 = scalar_select %p42_p0, %s2177_s19, %s44_s24  }
   0x7   : > { %p53_p3 = por %p52_p2, %p51_p1  ;;  %184 = sbr.rel (%p1764_p4) target bundleno = 161 (0xa1), region = 20 }
   0xc   : > { %187 = sbr.rel (!%p53_p3) target bundleno = 161 (0xa1), region = 24  ;;  %s189_s26 = sand.u32 (%p53_p3), 1, %s2177_s19  }
   0xd   : > { %s1765_s27 = sshll.u32 (%p53_p3), %s2181_s20, 2  ;;  %s2131_s28 = smul.u32 (%p53_p3), 576, %s189_s26 }
   0xe   : > { %s2247_s6 = scalar_lea.vmem (%p53_p3), %s2658_s1, %s1765_s27 }
   0xf   : > { %v210_v0 = vld [vmem:[%s2247_s6] sm:$0xf] (%p53_p3)  ;;  %v212_v1 = vld [vmem:[%s2247_s6 + $0x8] sm:$0xf] (%p53_p3)  ;;  %v214_v2 = vld [vmem:[%s2247_s6 + $0x10] sm:$0xf] (%p53_p3) }
  0x10   : > { %s2252_s7 = scalar_lea.vmem (%p53_p3), [#allocation2], %s2131_s28  ;;  %v216_v3 = vld [vmem:[%s2247_s6 + $0x18] sm:$0xf] (%p53_p3)  ;;  %v218_v4 = vld [vmem:[%s2247_s6 + $0x20] sm:$0xf] (%p53_p3) }
  0x11   : > { %211 = vst [vmem:[%s2252_s7] sm:$0xf] %v210_v0  ;;  %v220_v5 = vld [vmem:[%s2247_s6 + $0x28] sm:$0xf]  ;;  %v222_v6 = vld [vmem:[%s2247_s6 + $0x30] sm:$0xf] }
  0x12   : > { %213 = vst [vmem:[%s2252_s7 + $0x4] sm:$0xf] %v212_v1  ;;  %v224_v7 = vld [vmem:[%s2247_s6 + $0x38] sm:$0xf]  ;;  %v226_v8 = vld [vmem:[%s2247_s6 + $0x40] sm:$0xf] }
  0x13   : > { %215 = vst [vmem:[%s2252_s7 + $0x8] sm:$0xf] %v214_v2  ;;  %v228_v9 = vld [vmem:[%s2247_s6 + $0x48] sm:$0xf]  ;;  %v230_v10 = vld [vmem:[%s2247_s6 + $0x50] sm:$0xf] }
  0x14   : > { %217 = vst [vmem:[%s2252_s7 + $0xc] sm:$0xf] %v216_v3  ;;  %v232_v11 = vld [vmem:[%s2247_s6 + $0x58] sm:$0xf]  ;;  %v234_v12 = vld [vmem:[%s2247_s6 + $0x60] sm:$0xf] }
  0x15   : > { %219 = vst [vmem:[%s2252_s7 + $0x10] sm:$0xf] %v218_v4  ;;  %v236_v13 = vld [vmem:[%s2247_s6 + $0x68] sm:$0xf]  ;;  %v238_v14 = vld [vmem:[%s2247_s6 + $0x70] sm:$0xf] }
  0x16   : > { %221 = vst [vmem:[%s2252_s7 + $0x14] sm:$0xf] %v220_v5  ;;  %v240_v15 = vld [vmem:[%s2247_s6 + $0x78] sm:$0xf]  ;;  %v242_v16 = vld [vmem:[%s2247_s6 + $0x80] sm:$0xf] }
  0x17   : > { %223 = vst [vmem:[%s2252_s7 + $0x18] sm:$0xf] %v222_v6  ;;  %v244_v17 = vld [vmem:[%s2247_s6 + $0x88] sm:$0xf]  ;;  %v246_v18 = vld [vmem:[%s2247_s6 + $0x90] sm:$0xf] }
  0x18   : > { %225 = vst [vmem:[%s2252_s7 + $0x1c] sm:$0xf] %v224_v7  ;;  %v248_v19 = vld [vmem:[%s2247_s6 + $0x98] sm:$0xf]  ;;  %v250_v20 = vld [vmem:[%s2247_s6 + $0xa0] sm:$0xf] }
  0x19   : > { %227 = vst [vmem:[%s2252_s7 + $0x20] sm:$0xf] %v226_v8  ;;  %v252_v21 = vld [vmem:[%s2247_s6 + $0xa8] sm:$0xf]  ;;  %v254_v22 = vld [vmem:[%s2247_s6 + $0xb0] sm:$0xf] }
  0x1a   : > { %229 = vst [vmem:[%s2252_s7 + $0x24] sm:$0xf] %v228_v9  ;;  %v256_v23 = vld [vmem:[%s2247_s6 + $0xb8] sm:$0xf]  ;;  %v258_v24 = vld [vmem:[%s2247_s6 + $0xc0] sm:$0xf] }
  0x1b   : > { %231 = vst [vmem:[%s2252_s7 + $0x28] sm:$0xf] %v230_v10  ;;  %v260_v25 = vld [vmem:[%s2247_s6 + $0xc8] sm:$0xf]  ;;  %v262_v26 = vld [vmem:[%s2247_s6 + $0xd0] sm:$0xf] }
  0x1c   : > { %233 = vst [vmem:[%s2252_s7 + $0x2c] sm:$0xf] %v232_v11  ;;  %v264_v27 = vld [vmem:[%s2247_s6 + $0xd8] sm:$0xf]  ;;  %v266_v28 = vld [vmem:[%s2247_s6 + $0xe0] sm:$0xf] }
  0x1d   : > { %235 = vst [vmem:[%s2252_s7 + $0x30] sm:$0xf] %v234_v12  ;;  %v268_v29 = vld [vmem:[%s2247_s6 + $0xe8] sm:$0xf]  ;;  %v270_v30 = vld [vmem:[%s2247_s6 + $0xf0] sm:$0xf] }
  0x1e   : > { %237 = vst [vmem:[%s2252_s7 + $0x34] sm:$0xf] %v236_v13  ;;  %v272_v31 = vld [vmem:[%s2247_s6 + $0xf8] sm:$0xf]  ;;  %v274_v32 = vld [vmem:[%s2247_s6 + $0x100] sm:$0xf] }
  0x1f   : > { %239 = vst [vmem:[%s2252_s7 + $0x38] sm:$0xf] %v238_v14  ;;  %v276_v33 = vld [vmem:[%s2247_s6 + $0x108] sm:$0xf]  ;;  %v278_v34 = vld [vmem:[%s2247_s6 + $0x110] sm:$0xf] }
  0x20   : > { %241 = vst [vmem:[%s2252_s7 + $0x3c] sm:$0xf] %v240_v15  ;;  %v280_v35 = vld [vmem:[%s2247_s6 + $0x118] sm:$0xf]  ;;  %v282_v36 = vld [vmem:[%s2247_s6 + $0x120] sm:$0xf] }
  0x21   : > { %243 = vst [vmem:[%s2252_s7 + $0x40] sm:$0xf] %v242_v16  ;;  %v284_v37 = vld [vmem:[%s2247_s6 + $0x128] sm:$0xf]  ;;  %v286_v38 = vld [vmem:[%s2247_s6 + $0x130] sm:$0xf] }
  0x22   : > { %245 = vst [vmem:[%s2252_s7 + $0x44] sm:$0xf] %v244_v17  ;;  %v288_v39 = vld [vmem:[%s2247_s6 + $0x138] sm:$0xf]  ;;  %v290_v40 = vld [vmem:[%s2247_s6 + $0x140] sm:$0xf] }
  0x23   : > { %247 = vst [vmem:[%s2252_s7 + $0x48] sm:$0xf] %v246_v18  ;;  %v292_v41 = vld [vmem:[%s2247_s6 + $0x148] sm:$0xf]  ;;  %v294_v42 = vld [vmem:[%s2247_s6 + $0x150] sm:$0xf] }
  0x24   : > { %249 = vst [vmem:[%s2252_s7 + $0x4c] sm:$0xf] %v248_v19  ;;  %v296_v43 = vld [vmem:[%s2247_s6 + $0x158] sm:$0xf]  ;;  %v298_v44 = vld [vmem:[%s2247_s6 + $0x160] sm:$0xf] }
  0x25   : > { %251 = vst [vmem:[%s2252_s7 + $0x50] sm:$0xf] %v250_v20  ;;  %v300_v45 = vld [vmem:[%s2247_s6 + $0x168] sm:$0xf]  ;;  %v302_v46 = vld [vmem:[%s2247_s6 + $0x170] sm:$0xf] }
  0x26   : > { %253 = vst [vmem:[%s2252_s7 + $0x54] sm:$0xf] %v252_v21  ;;  %v304_v47 = vld [vmem:[%s2247_s6 + $0x178] sm:$0xf]  ;;  %v306_v48 = vld [vmem:[%s2247_s6 + $0x180] sm:$0xf] }
  0x27   : > { %255 = vst [vmem:[%s2252_s7 + $0x58] sm:$0xf] %v254_v22  ;;  %v308_v49 = vld [vmem:[%s2247_s6 + $0x188] sm:$0xf]  ;;  %v310_v50 = vld [vmem:[%s2247_s6 + $0x190] sm:$0xf] }
  0x28   : > { %257 = vst [vmem:[%s2252_s7 + $0x5c] sm:$0xf] %v256_v23  ;;  %v312_v51 = vld [vmem:[%s2247_s6 + $0x198] sm:$0xf]  ;;  %v314_v52 = vld [vmem:[%s2247_s6 + $0x1a0] sm:$0xf] }
  0x29   : > { %259 = vst [vmem:[%s2252_s7 + $0x60] sm:$0xf] %v258_v24  ;;  %v316_v53 = vld [vmem:[%s2247_s6 + $0x1a8] sm:$0xf]  ;;  %v318_v54 = vld [vmem:[%s2247_s6 + $0x1b0] sm:$0xf] }
  0x2a   : > { %261 = vst [vmem:[%s2252_s7 + $0x64] sm:$0xf] %v260_v25  ;;  %v320_v55 = vld [vmem:[%s2247_s6 + $0x1b8] sm:$0xf]  ;;  %v322_v56 = vld [vmem:[%s2247_s6 + $0x1c0] sm:$0xf] }
  0x2b   : > { %263 = vst [vmem:[%s2252_s7 + $0x68] sm:$0xf] %v262_v26  ;;  %v324_v57 = vld [vmem:[%s2247_s6 + $0x1c8] sm:$0xf]  ;;  %v326_v58 = vld [vmem:[%s2247_s6 + $0x1d0] sm:$0xf] }
  0x2c   : > { %265 = vst [vmem:[%s2252_s7 + $0x6c] sm:$0xf] %v264_v27  ;;  %v328_v59 = vld [vmem:[%s2247_s6 + $0x1d8] sm:$0xf]  ;;  %v330_v60 = vld [vmem:[%s2247_s6 + $0x1e0] sm:$0xf] }
  0x2d   : > { %267 = vst [vmem:[%s2252_s7 + $0x70] sm:$0xf] %v266_v28  ;;  %v332_v61 = vld [vmem:[%s2247_s6 + $0x1e8] sm:$0xf]  ;;  %v334_v62 = vld [vmem:[%s2247_s6 + $0x1f0] sm:$0xf] }
  0x2e   : > { %269 = vst [vmem:[%s2252_s7 + $0x74] sm:$0xf] %v268_v29  ;;  %v336_v63 = vld [vmem:[%s2247_s6 + $0x1f8] sm:$0xf]  ;;  %v338_v0 = vld [vmem:[%s2247_s6 + $0x200] sm:$0xf] }
  0x2f   : > { %271 = vst [vmem:[%s2252_s7 + $0x78] sm:$0xf] %v270_v30  ;;  %v340_v1 = vld [vmem:[%s2247_s6 + $0x208] sm:$0xf]  ;;  %v342_v2 = vld [vmem:[%s2247_s6 + $0x210] sm:$0xf] }
  0x30   : > { %273 = vst [vmem:[%s2252_s7 + $0x7c] sm:$0xf] %v272_v31  ;;  %v344_v3 = vld [vmem:[%s2247_s6 + $0x218] sm:$0xf]  ;;  %v346_v4 = vld [vmem:[%s2247_s6 + $0x220] sm:$0xf] }
  0x31   : > { %275 = vst [vmem:[%s2252_s7 + $0x80] sm:$0xf] %v274_v32  ;;  %v348_v5 = vld [vmem:[%s2247_s6 + $0x228] sm:$0xf]  ;;  %v350_v6 = vld [vmem:[%s2247_s6 + $0x230] sm:$0xf] }
  0x32   : > { %277 = vst [vmem:[%s2252_s7 + $0x84] sm:$0xf] %v276_v33  ;;  %v352_v7 = vld [vmem:[%s2247_s6 + $0x238] sm:$0xf]  ;;  %v354_v8 = vld [vmem:[%s2247_s6 + $0x240] sm:$0xf] }
  0x33   : > { %279 = vst [vmem:[%s2252_s7 + $0x88] sm:$0xf] %v278_v34  ;;  %v356_v9 = vld [vmem:[%s2247_s6 + $0x248] sm:$0xf]  ;;  %v358_v10 = vld [vmem:[%s2247_s6 + $0x250] sm:$0xf] }
  0x34   : > { %281 = vst [vmem:[%s2252_s7 + $0x8c] sm:$0xf] %v280_v35  ;;  %v360_v11 = vld [vmem:[%s2247_s6 + $0x258] sm:$0xf]  ;;  %v362_v12 = vld [vmem:[%s2247_s6 + $0x260] sm:$0xf] }
  0x35   : > { %283 = vst [vmem:[%s2252_s7 + $0x90] sm:$0xf] %v282_v36  ;;  %v364_v13 = vld [vmem:[%s2247_s6 + $0x268] sm:$0xf]  ;;  %v366_v14 = vld [vmem:[%s2247_s6 + $0x270] sm:$0xf] }
  0x36   : > { %285 = vst [vmem:[%s2252_s7 + $0x94] sm:$0xf] %v284_v37  ;;  %v368_v15 = vld [vmem:[%s2247_s6 + $0x278] sm:$0xf]  ;;  %v370_v16 = vld [vmem:[%s2247_s6 + $0x280] sm:$0xf] }
  0x37   : > { %287 = vst [vmem:[%s2252_s7 + $0x98] sm:$0xf] %v286_v38  ;;  %v372_v17 = vld [vmem:[%s2247_s6 + $0x288] sm:$0xf]  ;;  %v374_v18 = vld [vmem:[%s2247_s6 + $0x290] sm:$0xf] }
  0x38   : > { %289 = vst [vmem:[%s2252_s7 + $0x9c] sm:$0xf] %v288_v39  ;;  %v376_v19 = vld [vmem:[%s2247_s6 + $0x298] sm:$0xf]  ;;  %v378_v20 = vld [vmem:[%s2247_s6 + $0x2a0] sm:$0xf] }
  0x39   : > { %291 = vst [vmem:[%s2252_s7 + $0xa0] sm:$0xf] %v290_v40  ;;  %v380_v21 = vld [vmem:[%s2247_s6 + $0x2a8] sm:$0xf]  ;;  %v382_v22 = vld [vmem:[%s2247_s6 + $0x2b0] sm:$0xf] }
  0x3a   : > { %293 = vst [vmem:[%s2252_s7 + $0xa4] sm:$0xf] %v292_v41  ;;  %v384_v23 = vld [vmem:[%s2247_s6 + $0x2b8] sm:$0xf]  ;;  %v386_v24 = vld [vmem:[%s2247_s6 + $0x2c0] sm:$0xf] }
  0x3b   : > { %295 = vst [vmem:[%s2252_s7 + $0xa8] sm:$0xf] %v294_v42  ;;  %v388_v25 = vld [vmem:[%s2247_s6 + $0x2c8] sm:$0xf]  ;;  %v390_v26 = vld [vmem:[%s2247_s6 + $0x2d0] sm:$0xf] }
  0x3c   : > { %297 = vst [vmem:[%s2252_s7 + $0xac] sm:$0xf] %v296_v43  ;;  %v392_v27 = vld [vmem:[%s2247_s6 + $0x2d8] sm:$0xf]  ;;  %v394_v28 = vld [vmem:[%s2247_s6 + $0x2e0] sm:$0xf] }
  0x3d   : > { %299 = vst [vmem:[%s2252_s7 + $0xb0] sm:$0xf] %v298_v44  ;;  %v396_v29 = vld [vmem:[%s2247_s6 + $0x2e8] sm:$0xf]  ;;  %v398_v30 = vld [vmem:[%s2247_s6 + $0x2f0] sm:$0xf] }
  0x3e   : > { %301 = vst [vmem:[%s2252_s7 + $0xb4] sm:$0xf] %v300_v45  ;;  %v400_v31 = vld [vmem:[%s2247_s6 + $0x2f8] sm:$0xf]  ;;  %v402_v32 = vld [vmem:[%s2247_s6 + $0x300] sm:$0xf] }
  0x3f   : > { %303 = vst [vmem:[%s2252_s7 + $0xb8] sm:$0xf] %v302_v46  ;;  %v404_v33 = vld [vmem:[%s2247_s6 + $0x308] sm:$0xf]  ;;  %v406_v34 = vld [vmem:[%s2247_s6 + $0x310] sm:$0xf] }
  0x40   : > { %305 = vst [vmem:[%s2252_s7 + $0xbc] sm:$0xf] %v304_v47  ;;  %v408_v35 = vld [vmem:[%s2247_s6 + $0x318] sm:$0xf]  ;;  %v410_v36 = vld [vmem:[%s2247_s6 + $0x320] sm:$0xf] }
  0x41   : > { %307 = vst [vmem:[%s2252_s7 + $0xc0] sm:$0xf] %v306_v48  ;;  %v412_v37 = vld [vmem:[%s2247_s6 + $0x328] sm:$0xf]  ;;  %v414_v38 = vld [vmem:[%s2247_s6 + $0x330] sm:$0xf] }
  0x42   : > { %309 = vst [vmem:[%s2252_s7 + $0xc4] sm:$0xf] %v308_v49  ;;  %v416_v39 = vld [vmem:[%s2247_s6 + $0x338] sm:$0xf]  ;;  %v418_v40 = vld [vmem:[%s2247_s6 + $0x340] sm:$0xf] }
  0x43   : > { %311 = vst [vmem:[%s2252_s7 + $0xc8] sm:$0xf] %v310_v50  ;;  %v420_v41 = vld [vmem:[%s2247_s6 + $0x348] sm:$0xf]  ;;  %v422_v42 = vld [vmem:[%s2247_s6 + $0x350] sm:$0xf] }
  0x44   : > { %313 = vst [vmem:[%s2252_s7 + $0xcc] sm:$0xf] %v312_v51  ;;  %v424_v43 = vld [vmem:[%s2247_s6 + $0x358] sm:$0xf]  ;;  %v426_v44 = vld [vmem:[%s2247_s6 + $0x360] sm:$0xf] }
  0x45   : > { %315 = vst [vmem:[%s2252_s7 + $0xd0] sm:$0xf] %v314_v52  ;;  %v428_v45 = vld [vmem:[%s2247_s6 + $0x368] sm:$0xf]  ;;  %v430_v46 = vld [vmem:[%s2247_s6 + $0x370] sm:$0xf] }
  0x46   : > { %317 = vst [vmem:[%s2252_s7 + $0xd4] sm:$0xf] %v316_v53  ;;  %v432_v47 = vld [vmem:[%s2247_s6 + $0x378] sm:$0xf]  ;;  %v434_v48 = vld [vmem:[%s2247_s6 + $0x380] sm:$0xf] }
  0x47   : > { %319 = vst [vmem:[%s2252_s7 + $0xd8] sm:$0xf] %v318_v54  ;;  %v436_v49 = vld [vmem:[%s2247_s6 + $0x388] sm:$0xf]  ;;  %v438_v50 = vld [vmem:[%s2247_s6 + $0x390] sm:$0xf] }
  0x48   : > { %321 = vst [vmem:[%s2252_s7 + $0xdc] sm:$0xf] %v320_v55  ;;  %v440_v51 = vld [vmem:[%s2247_s6 + $0x398] sm:$0xf]  ;;  %v442_v52 = vld [vmem:[%s2247_s6 + $0x3a0] sm:$0xf] }
  0x49   : > { %323 = vst [vmem:[%s2252_s7 + $0xe0] sm:$0xf] %v322_v56  ;;  %v444_v53 = vld [vmem:[%s2247_s6 + $0x3a8] sm:$0xf]  ;;  %v446_v54 = vld [vmem:[%s2247_s6 + $0x3b0] sm:$0xf] }
  0x4a   : > { %325 = vst [vmem:[%s2252_s7 + $0xe4] sm:$0xf] %v324_v57  ;;  %v448_v55 = vld [vmem:[%s2247_s6 + $0x3b8] sm:$0xf]  ;;  %v450_v56 = vld [vmem:[%s2247_s6 + $0x3c0] sm:$0xf] }
  0x4b   : > { %327 = vst [vmem:[%s2252_s7 + $0xe8] sm:$0xf] %v326_v58  ;;  %v452_v57 = vld [vmem:[%s2247_s6 + $0x3c8] sm:$0xf]  ;;  %v454_v58 = vld [vmem:[%s2247_s6 + $0x3d0] sm:$0xf] }
  0x4c   : > { %329 = vst [vmem:[%s2252_s7 + $0xec] sm:$0xf] %v328_v59  ;;  %v456_v59 = vld [vmem:[%s2247_s6 + $0x3d8] sm:$0xf] }
  0x4d   : > { %331 = vst [vmem:[%s2252_s7 + $0xf0] sm:$0xf] %v330_v60  ;;  %v458_v60 = vld [vmem:[%s2247_s6 + $0x3e0] sm:$0xf] }
  0x4e   : > { %333 = vst [vmem:[%s2252_s7 + $0xf4] sm:$0xf] %v332_v61  ;;  %v460_v61 = vld [vmem:[%s2247_s6 + $0x3e8] sm:$0xf] }
  0x4f   : > { %335 = vst [vmem:[%s2252_s7 + $0xf8] sm:$0xf] %v334_v62  ;;  %v462_v62 = vld [vmem:[%s2247_s6 + $0x3f0] sm:$0xf] }
  0x50   : > { %337 = vst [vmem:[%s2252_s7 + $0xfc] sm:$0xf] %v336_v63  ;;  %v464_v63 = vld [vmem:[%s2247_s6 + $0x3f8] sm:$0xf] }
  0x51   : > { %339 = vst [vmem:[%s2252_s7 + $0x100] sm:$0xf] %v338_v0  ;;  %v466_v0 = vld [vmem:[%s2247_s6 + $0x400] sm:$0xf] }
  0x52   : > { %341 = vst [vmem:[%s2252_s7 + $0x104] sm:$0xf] %v340_v1  ;;  %v468_v1 = vld [vmem:[%s2247_s6 + $0x408] sm:$0xf] }
  0x53   : > { %343 = vst [vmem:[%s2252_s7 + $0x108] sm:$0xf] %v342_v2  ;;  %v470_v2 = vld [vmem:[%s2247_s6 + $0x410] sm:$0xf] }
  0x54   : > { %345 = vst [vmem:[%s2252_s7 + $0x10c] sm:$0xf] %v344_v3  ;;  %v472_v3 = vld [vmem:[%s2247_s6 + $0x418] sm:$0xf] }
  0x55   : > { %347 = vst [vmem:[%s2252_s7 + $0x110] sm:$0xf] %v346_v4  ;;  %v474_v4 = vld [vmem:[%s2247_s6 + $0x420] sm:$0xf] }
  0x56   : > { %349 = vst [vmem:[%s2252_s7 + $0x114] sm:$0xf] %v348_v5  ;;  %v476_v5 = vld [vmem:[%s2247_s6 + $0x428] sm:$0xf] }
  0x57   : > { %351 = vst [vmem:[%s2252_s7 + $0x118] sm:$0xf] %v350_v6  ;;  %v478_v6 = vld [vmem:[%s2247_s6 + $0x430] sm:$0xf] }
  0x58   : > { %353 = vst [vmem:[%s2252_s7 + $0x11c] sm:$0xf] %v352_v7  ;;  %v480_v7 = vld [vmem:[%s2247_s6 + $0x438] sm:$0xf] }
  0x59   : > { %355 = vst [vmem:[%s2252_s7 + $0x120] sm:$0xf] %v354_v8  ;;  %v482_v8 = vld [vmem:[%s2247_s6 + $0x440] sm:$0xf] }
  0x5a   : > { %357 = vst [vmem:[%s2252_s7 + $0x124] sm:$0xf] %v356_v9  ;;  %v484_v9 = vld [vmem:[%s2247_s6 + $0x448] sm:$0xf] }
  0x5b   : > { %359 = vst [vmem:[%s2252_s7 + $0x128] sm:$0xf] %v358_v10  ;;  %v486_v10 = vld [vmem:[%s2247_s6 + $0x450] sm:$0xf] }
  0x5c   : > { %361 = vst [vmem:[%s2252_s7 + $0x12c] sm:$0xf] %v360_v11  ;;  %v488_v11 = vld [vmem:[%s2247_s6 + $0x458] sm:$0xf] }
  0x5d   : > { %363 = vst [vmem:[%s2252_s7 + $0x130] sm:$0xf] %v362_v12  ;;  %v490_v12 = vld [vmem:[%s2247_s6 + $0x460] sm:$0xf] }
  0x5e   : > { %365 = vst [vmem:[%s2252_s7 + $0x134] sm:$0xf] %v364_v13  ;;  %v492_v13 = vld [vmem:[%s2247_s6 + $0x468] sm:$0xf] }
  0x5f   : > { %367 = vst [vmem:[%s2252_s7 + $0x138] sm:$0xf] %v366_v14  ;;  %v494_v14 = vld [vmem:[%s2247_s6 + $0x470] sm:$0xf] }
  0x60   : > { %369 = vst [vmem:[%s2252_s7 + $0x13c] sm:$0xf] %v368_v15  ;;  %v496_v15 = vld [vmem:[%s2247_s6 + $0x478] sm:$0xf] }
  0x61   : > { %371 = vst [vmem:[%s2252_s7 + $0x140] sm:$0xf] %v370_v16 }
  0x62   : > { %373 = vst [vmem:[%s2252_s7 + $0x144] sm:$0xf] %v372_v17 }
  0x63   : > { %375 = vst [vmem:[%s2252_s7 + $0x148] sm:$0xf] %v374_v18 }
  0x64   : > { %377 = vst [vmem:[%s2252_s7 + $0x14c] sm:$0xf] %v376_v19 }
  0x65   : > { %379 = vst [vmem:[%s2252_s7 + $0x150] sm:$0xf] %v378_v20 }
  0x66   : > { %381 = vst [vmem:[%s2252_s7 + $0x154] sm:$0xf] %v380_v21 }
  0x67   : > { %383 = vst [vmem:[%s2252_s7 + $0x158] sm:$0xf] %v382_v22 }
  0x68   : > { %385 = vst [vmem:[%s2252_s7 + $0x15c] sm:$0xf] %v384_v23 }
  0x69   : > { %387 = vst [vmem:[%s2252_s7 + $0x160] sm:$0xf] %v386_v24 }
  0x6a   : > { %389 = vst [vmem:[%s2252_s7 + $0x164] sm:$0xf] %v388_v25 }
  0x6b   : > { %391 = vst [vmem:[%s2252_s7 + $0x168] sm:$0xf] %v390_v26 }
  0x6c   : > { %393 = vst [vmem:[%s2252_s7 + $0x16c] sm:$0xf] %v392_v27 }
  0x6d   : > { %395 = vst [vmem:[%s2252_s7 + $0x170] sm:$0xf] %v394_v28 }
  0x6e   : > { %397 = vst [vmem:[%s2252_s7 + $0x174] sm:$0xf] %v396_v29 }
  0x6f   : > { %399 = vst [vmem:[%s2252_s7 + $0x178] sm:$0xf] %v398_v30 }
  0x70   : > { %401 = vst [vmem:[%s2252_s7 + $0x17c] sm:$0xf] %v400_v31 }
  0x71   : > { %403 = vst [vmem:[%s2252_s7 + $0x180] sm:$0xf] %v402_v32 }
  0x72   : > { %405 = vst [vmem:[%s2252_s7 + $0x184] sm:$0xf] %v404_v33 }
  0x73   : > { %407 = vst [vmem:[%s2252_s7 + $0x188] sm:$0xf] %v406_v34 }
  0x74   : > { %409 = vst [vmem:[%s2252_s7 + $0x18c] sm:$0xf] %v408_v35 }
  0x75   : > { %411 = vst [vmem:[%s2252_s7 + $0x190] sm:$0xf] %v410_v36 }
  0x76   : > { %413 = vst [vmem:[%s2252_s7 + $0x194] sm:$0xf] %v412_v37 }
  0x77   : > { %415 = vst [vmem:[%s2252_s7 + $0x198] sm:$0xf] %v414_v38 }
  0x78   : > { %417 = vst [vmem:[%s2252_s7 + $0x19c] sm:$0xf] %v416_v39 }
  0x79   : > { %419 = vst [vmem:[%s2252_s7 + $0x1a0] sm:$0xf] %v418_v40 }
  0x7a   : > { %421 = vst [vmem:[%s2252_s7 + $0x1a4] sm:$0xf] %v420_v41 }
  0x7b   : > { %423 = vst [vmem:[%s2252_s7 + $0x1a8] sm:$0xf] %v422_v42 }
  0x7c   : > { %425 = vst [vmem:[%s2252_s7 + $0x1ac] sm:$0xf] %v424_v43 }
  0x7d   : > { %427 = vst [vmem:[%s2252_s7 + $0x1b0] sm:$0xf] %v426_v44 }
  0x7e   : > { %429 = vst [vmem:[%s2252_s7 + $0x1b4] sm:$0xf] %v428_v45 }
  0x7f   : > { %431 = vst [vmem:[%s2252_s7 + $0x1b8] sm:$0xf] %v430_v46 }
  0x80   : > { %433 = vst [vmem:[%s2252_s7 + $0x1bc] sm:$0xf] %v432_v47 }
  0x81   : > { %435 = vst [vmem:[%s2252_s7 + $0x1c0] sm:$0xf] %v434_v48 }
  0x82   : > { %437 = vst [vmem:[%s2252_s7 + $0x1c4] sm:$0xf] %v436_v49 }
  0x83   : > { %439 = vst [vmem:[%s2252_s7 + $0x1c8] sm:$0xf] %v438_v50 }
  0x84   : > { %441 = vst [vmem:[%s2252_s7 + $0x1cc] sm:$0xf] %v440_v51 }
  0x85   : > { %443 = vst [vmem:[%s2252_s7 + $0x1d0] sm:$0xf] %v442_v52 }
  0x86   : > { %445 = vst [vmem:[%s2252_s7 + $0x1d4] sm:$0xf] %v444_v53 }
  0x87   : > { %447 = vst [vmem:[%s2252_s7 + $0x1d8] sm:$0xf] %v446_v54 }
  0x88   : > { %449 = vst [vmem:[%s2252_s7 + $0x1dc] sm:$0xf] %v448_v55 }
  0x89   : > { %451 = vst [vmem:[%s2252_s7 + $0x1e0] sm:$0xf] %v450_v56 }
  0x8a   : > { %453 = vst [vmem:[%s2252_s7 + $0x1e4] sm:$0xf] %v452_v57 }
  0x8b   : > { %455 = vst [vmem:[%s2252_s7 + $0x1e8] sm:$0xf] %v454_v58 }
  0x8c   : > { %457 = vst [vmem:[%s2252_s7 + $0x1ec] sm:$0xf] %v456_v59 }
  0x8d   : > { %459 = vst [vmem:[%s2252_s7 + $0x1f0] sm:$0xf] %v458_v60 }
  0x8e   : > { %461 = vst [vmem:[%s2252_s7 + $0x1f4] sm:$0xf] %v460_v61 }
  0x8f   : > { %463 = vst [vmem:[%s2252_s7 + $0x1f8] sm:$0xf] %v462_v62 }
  0x90   : > { %465 = vst [vmem:[%s2252_s7 + $0x1fc] sm:$0xf] %v464_v63 }
  0x91   : > { %467 = vst [vmem:[%s2252_s7 + $0x200] sm:$0xf] %v466_v0 }
  0x92   : > { %469 = vst [vmem:[%s2252_s7 + $0x204] sm:$0xf] %v468_v1 }
  0x93   : > { %471 = vst [vmem:[%s2252_s7 + $0x208] sm:$0xf] %v470_v2 }
  0x94   : > { %473 = vst [vmem:[%s2252_s7 + $0x20c] sm:$0xf] %v472_v3 }
  0x95   : > { %475 = vst [vmem:[%s2252_s7 + $0x210] sm:$0xf] %v474_v4 }
  0x96   : > { %477 = vst [vmem:[%s2252_s7 + $0x214] sm:$0xf] %v476_v5 }
  0x97   : > { %479 = vst [vmem:[%s2252_s7 + $0x218] sm:$0xf] %v478_v6 }
  0x98   : > { %481 = vst [vmem:[%s2252_s7 + $0x21c] sm:$0xf] %v480_v7 }
  0x99   : > { %483 = vst [vmem:[%s2252_s7 + $0x220] sm:$0xf] %v482_v8 }
  0x9a   : > { %485 = vst [vmem:[%s2252_s7 + $0x224] sm:$0xf] %v484_v9 }
  0x9b   : > { %487 = vst [vmem:[%s2252_s7 + $0x228] sm:$0xf] %v486_v10 }
  0x9c   : > { %489 = vst [vmem:[%s2252_s7 + $0x22c] sm:$0xf] %v488_v11 }
  0x9d   : > { %491 = vst [vmem:[%s2252_s7 + $0x230] sm:$0xf] %v490_v12 }
  0x9e   : > { %493 = vst [vmem:[%s2252_s7 + $0x234] sm:$0xf] %v492_v13 }
  0x9f   : > { %495 = vst [vmem:[%s2252_s7 + $0x238] sm:$0xf] %v494_v14 }
  0xa0   : > { %497 = vst [vmem:[%s2252_s7 + $0x23c] sm:$0xf] %v496_v15 }
  0xa1 PF: > { %p1766_p5 = scmp.ge.s32.totalorder %s2181_s20, 1  ;;  %p820_p6 = scmp.lt.s32.totalorder %s2181_s20, 3 }
  0xa3   : > { %p821_p7 = pnand %p1766_p5, %p820_p6 }
  0xa4   : > { %s827_s8 = sand.u32 (!%p821_p7), 1, %s2173_s18   ;;  %p863_p8 = scmp.lt.s32.totalorder (!%p821_p7), %s1761_s21, 1 }
  0xa5   : > { %824 = sbr.rel (%p821_p7) target bundleno = 462 (0x1ce), region = 73 }
  0xa6   : > { %s2132_s9 = smul.u32 (!%p821_p7), 576, %s827_s8 }
  0xa8   : > { %s2542_s10 = scalar_lea.vmem (!%p821_p7), [#allocation2], %s2132_s9 }
  0xaa   : > { %v2066_v16 = vld [vmem:[%s2542_s10 + $0x38] sm:$0xff]  ;;  %v2065_v20 = vld [vmem:[%s2542_s10 + $0x30] sm:$0xff]  ;;  %v2064_v24 = vld [vmem:[%s2542_s10 + $0x28] sm:$0xff]  ;;  %s2667_s21 = smov (!%p863_p8, %s1761_s21), 1 }
  0xab   : > { %v2082_v17 = vld [vmem:[%s2542_s10 + $0xb8] sm:$0xff]  ;;  %1490 = vmatpush.bf16.msra.mxu0 %v2066_v16  ;;  %v2081_v21 = vld [vmem:[%s2542_s10 + $0xb0] sm:$0xff]  ;;  %v2080_v25 = vld [vmem:[%s2542_s10 + $0xa8] sm:$0xff]  ;;  %s865_s28 = scalar_lea.vmem %s2659_s2, %s2667_s21  ;;  %s868_s6 = scalar_lea.vmem %s2660_s3, %s2667_s21 }
  0xac   : > { %v2090_v18 = vld [vmem:[%s2542_s10 + $0xf8] sm:$0xff]  ;;  %1516 = vmatpush.bf16.msra.mxu2 %v2082_v17  ;;  %v2089_v22 = vld [vmem:[%s2542_s10 + $0xf0] sm:$0xff]  ;;  %v2088_v26 = vld [vmem:[%s2542_s10 + $0xe8] sm:$0xff]  ;;  %s1767_s20 = sshll.u32 %s2667_s21, 3  ;;  %s1768_s7 = sshll.u32 %s2667_s21, 2 }
  0xad   : > { %v2074_v19 = vld [vmem:[%s2542_s10 + $0x78] sm:$0xff]  ;;  %1529 = vmatpush.bf16.msra.mxu3 %v2090_v18  ;;  %v2073_v23 = vld [vmem:[%s2542_s10 + $0x70] sm:$0xff]  ;;  %v2072_v27 = vld [vmem:[%s2542_s10 + $0x68] sm:$0xff]  ;;  %s876_s13 = scalar_lea.vmem %s2662_s5, %s1768_s7 }
  0xae   : > { %1503 = vmatpush.bf16.msra.mxu1 %v2074_v19  ;;  %v2063_v28 = vld [vmem:[%s2542_s10 + $0x20] sm:$0xff]  ;;  %v2062_v32 = vld [vmem:[%s2542_s10 + $0x18] sm:$0xff]  ;;  %v2061_v36 = vld [vmem:[%s2542_s10 + $0x10] sm:$0xff] }
  0xaf   : > { %1491 = vmatpush.bf16.msra.mxu0 %v2065_v20  ;;  %v2079_v29 = vld [vmem:[%s2542_s10 + $0xa0] sm:$0xff]  ;;  %v2078_v33 = vld [vmem:[%s2542_s10 + $0x98] sm:$0xff]  ;;  %v2077_v37 = vld [vmem:[%s2542_s10 + $0x90] sm:$0xff] }
  0xb0   : > { %1517 = vmatpush.bf16.msra.mxu2 %v2081_v21  ;;  %v2087_v30 = vld [vmem:[%s2542_s10 + $0xe0] sm:$0xff]  ;;  %v2086_v34 = vld [vmem:[%s2542_s10 + $0xd8] sm:$0xff]  ;;  %v2085_v38 = vld [vmem:[%s2542_s10 + $0xd0] sm:$0xff] }
  0xb1   : > { %1530 = vmatpush.bf16.msra.mxu3 %v2089_v22  ;;  %v2071_v31 = vld [vmem:[%s2542_s10 + $0x60] sm:$0xff]  ;;  %v2070_v35 = vld [vmem:[%s2542_s10 + $0x58] sm:$0xff]  ;;  %v2069_v39 = vld [vmem:[%s2542_s10 + $0x50] sm:$0xff] }
  0xb2   : > { %1504 = vmatpush.bf16.msra.mxu1 %v2073_v23  ;;  %v2060_v40 = vld [vmem:[%s2542_s10 + $0x8] sm:$0xff]  ;;  %v877_v45 = vld [vmem:[%s2657_s0] sm:$0xff]  ;;  %v2098_v50 = vld [vmem:[%s2542_s10 + $0x138] sm:$0xff] }
  0xb3   : > { %1492 = vmatpush.bf16.msra.mxu0 %v2064_v24  ;;  %v2076_v41 = vld [vmem:[%s2542_s10 + $0x88] sm:$0xff]  ;;  %v2059_v46 = vld [vmem:[%s2542_s10] sm:$0xff]  ;;  %v1031_v49 = vunpack.c.l.b16 %v877_v45  ;;  %v2114_v51 = vld [vmem:[%s2542_s10 + $0x1b8] sm:$0xff]  ;;  %v1032_v55 = vunpack.c.h.b16 %v877_v45 }
  0xb4   : > { %1518 = vmatpush.bf16.msra.mxu2 %v2080_v25  ;;  %v2084_v42 = vld [vmem:[%s2542_s10 + $0xc8] sm:$0xff]  ;;  %v2075_v47 = vld [vmem:[%s2542_s10 + $0x80] sm:$0xff]  ;;  %v2122_v56 = vld [vmem:[%s2542_s10 + $0x1f8] sm:$0xff] }
  0xb5   : > { %1531 = vmatpush.bf16.msra.mxu3 %v2088_v26  ;;  %v2068_v43 = vld [vmem:[%s2542_s10 + $0x48] sm:$0xff]  ;;  %v2083_v52 = vld [vmem:[%s2542_s10 + $0xc0] sm:$0xff]  ;;  %v2106_v57 = vld [vmem:[%s2542_s10 + $0x178] sm:$0xff]  ;;  %v1040_v59 = vpack.c.b16 %v1031_v49, %v1031_v49  ;;  %v1041_v63 = vpack.c.b16 %v1032_v55, %v1032_v55 }
  0xb6   : > { %1505 = vmatpush.bf16.msra.mxu1 %v2072_v27  ;;  %v878_v44 = vld [vmem:[%s2657_s0 + $0x8] sm:$0xff]  ;;  %v2067_v53 = vld [vmem:[%s2542_s10 + $0x40] sm:$0xff]  ;;  %v2097_v60 = vld [vmem:[%s2542_s10 + $0x130] sm:$0xff] }
  0xb7   : > { %1493 = vmatpush.bf16.msra.mxu0 %v2063_v28  ;;  %v1033_v48 = vunpack.c.l.b16 %v878_v44  ;;  %v1034_v54 = vunpack.c.h.b16 %v878_v44  ;;  %v2113_v61 = vld [vmem:[%s2542_s10 + $0x1b0] sm:$0xff]  ;;  %v2096_v2 = vld [vmem:[%s2542_s10 + $0x128] sm:$0xff]  ;;  %v2095_v6 = vld [vmem:[%s2542_s10 + $0x120] sm:$0xff] }
  0xb8   : > { %1519 = vmatpush.bf16.msra.mxu2 %v2079_v29  ;;  %v2121_v0 = vld [vmem:[%s2542_s10 + $0x1f0] sm:$0xff]  ;;  %v2112_v3 = vld [vmem:[%s2542_s10 + $0x1a8] sm:$0xff]  ;;  %v2111_v7 = vld [vmem:[%s2542_s10 + $0x1a0] sm:$0xff] }
  0xb9   : > { %1532 = vmatpush.bf16.msra.mxu3 %v2087_v30  ;;  %v1042_v58 = vpack.c.b16 %v1033_v48, %v1033_v48  ;;  %v1043_v62 = vpack.c.b16 %v1034_v54, %v1034_v54  ;;  %v2105_v1 = vld [vmem:[%s2542_s10 + $0x170] sm:$0xff]  ;;  %v2120_v4 = vld [vmem:[%s2542_s10 + $0x1e8] sm:$0xff]  ;;  %v2119_v8 = vld [vmem:[%s2542_s10 + $0x1e0] sm:$0xff] }
  0xba   : > { %1506 = vmatpush.bf16.msra.mxu1 %v2071_v31  ;;  %v2104_v5 = vld [vmem:[%s2542_s10 + $0x168] sm:$0xff]  ;;  %v2103_v9 = vld [vmem:[%s2542_s10 + $0x160] sm:$0xff]  ;;  %v2094_v10 = vld [vmem:[%s2542_s10 + $0x118] sm:$0xff] }
  0xbb   : > { %1494 = vmatpush.bf16.msra.mxu0 %v2062_v32  ;;  %v2110_v11 = vld [vmem:[%s2542_s10 + $0x198] sm:$0xff]  ;;  %v2093_v14 = vld [vmem:[%s2542_s10 + $0x110] sm:$0xff]  ;;  %v2092_v18 = vld [vmem:[%s2542_s10 + $0x108] sm:$0xff] }
  0xbc   : > { %1520 = vmatpush.bf16.msra.mxu2 %v2078_v33  ;;  %v2118_v12 = vld [vmem:[%s2542_s10 + $0x1d8] sm:$0xff]  ;;  %v2109_v15 = vld [vmem:[%s2542_s10 + $0x190] sm:$0xff]  ;;  %v2108_v19 = vld [vmem:[%s2542_s10 + $0x188] sm:$0xff] }
  0xbd   : > { %1533 = vmatpush.bf16.msra.mxu3 %v2086_v34  ;;  %v2102_v13 = vld [vmem:[%s2542_s10 + $0x158] sm:$0xff]  ;;  %v2117_v16 = vld [vmem:[%s2542_s10 + $0x1d0] sm:$0xff]  ;;  %v2116_v22 = vld [vmem:[%s2542_s10 + $0x1c8] sm:$0xff] }
  0xbe   : > { %1507 = vmatpush.bf16.msra.mxu1 %v2070_v35  ;;  %v2101_v17 = vld [vmem:[%s2542_s10 + $0x150] sm:$0xff]  ;;  %v880_v20 = vld [vmem:[%s2657_s0 + $0x18] sm:$0xff]  ;;  %v2100_v23 = vld [vmem:[%s2542_s10 + $0x148] sm:$0xff] }
  0xbf   : > { %1495 = vmatpush.bf16.msra.mxu0 %v2061_v36  ;;  %v879_v21 = vld [vmem:[%s2657_s0 + $0x10] sm:$0xff]  ;;  %v1037_v24 = vunpack.c.l.b16 %v880_v20  ;;  %v2091_v26 = vld [vmem:[%s2542_s10 + $0x100] sm:$0xff]  ;;  %v2130_v28 = vld [vmem:[%s2542_s10 + $0x238] sm:$0xff]  ;;  %v1038_v29 = vunpack.c.h.b16 %v880_v20 }
  0xc0   : > { %1521 = vmatpush.bf16.msra.mxu2 %v2077_v37  ;;  %v1035_v25 = vunpack.c.l.b16 %v879_v21  ;;  %v2107_v27 = vld [vmem:[%s2542_s10 + $0x180] sm:$0xff]  ;;  %v1036_v32 = vunpack.c.h.b16 %v879_v21  ;;  %v2129_v35 = vld [vmem:[%s2542_s10 + $0x230] sm:$0xff] }
  0xc1   : > { %1534 = vmatpush.bf16.msra.mxu3 %v2085_v38  ;;  %v2115_v30 = vld [vmem:[%s2542_s10 + $0x1c0] sm:$0xff]  ;;  %v1046_v33 = vpack.c.b16 %v1037_v24, %v1037_v24  ;;  %v1047_v36 = vpack.c.b16 %v1038_v29, %v1038_v29  ;;  %v2128_v38 = vld [vmem:[%s2542_s10 + $0x228] sm:$0xff] }
  0xc2   : > { %1508 = vmatpush.bf16.msra.mxu1 %v2069_v39  ;;  %v2099_v31 = vld [vmem:[%s2542_s10 + $0x140] sm:$0xff]  ;;  %v1044_v34 = vpack.c.b16 %v1035_v25, %v1035_v25  ;;  %v1045_v37 = vpack.c.b16 %v1036_v32, %v1036_v32 }
  0xc3   : > { %1496 = vmatpush.bf16.msra.mxu0 %v2060_v40  ;;  %v2127_v39 = vld [vmem:[%s2542_s10 + $0x220] sm:$0xff]  ;;  %v2126_v40 = vld [vmem:[%s2542_s10 + $0x218] sm:$0xff] }
  0xc4   : > { %1522 = vmatpush.bf16.msra.mxu2 %v2076_v41  ;;  %v2125_v41 = vld [vmem:[%s2542_s10 + $0x210] sm:$0xff]  ;;  %v2123_v45 = vld [vmem:[%s2542_s10 + $0x200] sm:$0xff] }
  0xc5   : > { %1535 = vmatpush.bf16.msra.mxu3 %v2084_v42  ;;  %v2124_v42 = vld [vmem:[%s2542_s10 + $0x208] sm:$0xff]  ;;  %v1634_v32 = vld [vmem:[%s865_s28] sm:$0x1]  ;;  %s872_s10 = scalar_lea.vmem %s2661_s4, %s1767_s20 }
  0xc6   : > { %1509 = vmatpush.bf16.msra.mxu1 %v2068_v43  ;;  %v881_v43 = vld [vmem:[%s2657_s0 + $0x20] sm:$0xf] }
  0xc7   : > { %1497 = vmatpush.bf16.msra.mxu0 %v2059_v46  ;;  %v1039_v44 = vunpack.c.l.b16 %v881_v43 }
  0xc8   : > { %1523 = vmatpush.bf16.msra.mxu2 %v2075_v47 }
  0xc9   : > { %1536 = vmatpush.bf16.msra.mxu3 %v2083_v52  ;;  %v1048_v46 = vpack.c.b16 %v1039_v44, %v1039_v44 }
  0xca   : > { %1510 = vmatpush.bf16.msra.mxu1 %v2067_v53  ;;  %1498 = vmatmul.bf16.vlgmr.msra.gmra.mxu0 %v1040_v59 }
  0xcb   : > { %1542 = vmatpush.bf16.msrb.mxu0 %v2098_v50  ;;  %1524 = vmatmul.bf16.vlgmr.msra.gmra.mxu2 %v1042_v58 }
  0xcc   : > { %1568 = vmatpush.bf16.msrb.mxu2 %v2114_v51  ;;  %1537 = vmatmul.bf16.vlgmr.msra.gmra.mxu3 %v1043_v62 }
  0xcd   : > { %1581 = vmatpush.bf16.msrb.mxu3 %v2122_v56  ;;  %1511 = vmatmul.bf16.vlgmr.msra.gmra.mxu1 %v1041_v63 }
  0xce   : > { %1555 = vmatpush.bf16.msrb.mxu1 %v2106_v57 }
  0xcf   : > { %1543 = vmatpush.bf16.msrb.mxu0 %v2097_v60 }
  0xd0   : > { %1569 = vmatpush.bf16.msrb.mxu2 %v2113_v61 }
  0xd1   : > { %1582 = vmatpush.bf16.msrb.mxu3 %v2121_v0 }
  0xd2   : > { %1556 = vmatpush.bf16.msrb.mxu1 %v2105_v1 }
  0xd3   : > { %1544 = vmatpush.bf16.msrb.mxu0 %v2096_v2 }
  0xd4   : > { %1570 = vmatpush.bf16.msrb.mxu2 %v2112_v3 }
  0xd5   : > { %1583 = vmatpush.bf16.msrb.mxu3 %v2120_v4 }
  0xd6   : > { %1557 = vmatpush.bf16.msrb.mxu1 %v2104_v5 }
  0xd7   : > { %1545 = vmatpush.bf16.msrb.mxu0 %v2095_v6 }
  0xd8   : > { %1571 = vmatpush.bf16.msrb.mxu2 %v2111_v7 }
  0xd9   : > { %1584 = vmatpush.bf16.msrb.mxu3 %v2119_v8 }
  0xda   : > { %1558 = vmatpush.bf16.msrb.mxu1 %v2103_v9 }
  0xdb   : > { %1546 = vmatpush.bf16.msrb.mxu0 %v2094_v10 }
  0xdc   : > { %1572 = vmatpush.bf16.msrb.mxu2 %v2110_v11 }
  0xdd   : > { %1585 = vmatpush.bf16.msrb.mxu3 %v2118_v12 }
  0xde   : > { %1559 = vmatpush.bf16.msrb.mxu1 %v2102_v13 }
  0xdf   : > { %1547 = vmatpush.bf16.msrb.mxu0 %v2093_v14 }
  0xe0   : > { %1573 = vmatpush.bf16.msrb.mxu2 %v2109_v15 }
  0xe1   : > { %1586 = vmatpush.bf16.msrb.mxu3 %v2117_v16 }
  0xe2   : > { %1560 = vmatpush.bf16.msrb.mxu1 %v2101_v17 }
  0xe3   : > { %1548 = vmatpush.bf16.msrb.mxu0 %v2092_v18 }
  0xe4   : > { %1574 = vmatpush.bf16.msrb.mxu2 %v2108_v19 }
  0xe5   : > { %1587 = vmatpush.bf16.msrb.mxu3 %v2116_v22 }
  0xe6   : > { %1561 = vmatpush.bf16.msrb.mxu1 %v2100_v23 }
  0xe7   : > { %1549 = vmatpush.bf16.msrb.mxu0 %v2091_v26 }
  0xe8   : > { %1575 = vmatpush.bf16.msrb.mxu2 %v2107_v27 }
  0xe9   : > { %1588 = vmatpush.bf16.msrb.mxu3 %v2115_v30 }
  0xea   : > { %1562 = vmatpush.bf16.msrb.mxu1 %v2099_v31  ;;  %1550 = vmatmul.bf16.vlgmr.msrb.gmra.mxu0 %v1044_v34 }
  0xeb   : > { %1594 = vmatpush.bf16.msra.mxu0 %v2130_v28  ;;  %1576 = vmatmul.bf16.vlgmr.msrb.gmra.mxu2 %v1046_v33 }
  0xec   : > { %1589 = vmatmul.bf16.vlgmr.msrb.gmra.mxu3 %v1047_v36 }
  0xed   : > { %1563 = vmatmul.bf16.vlgmr.msrb.gmra.mxu1 %v1045_v37 }
  0xef   : > { %1595 = vmatpush.bf16.msra.mxu0 %v2129_v35  ;;  %v1636_v35 = vld [vmem:[%s868_s6] sm:$0x1] }
  0xf3   : > { %1596 = vmatpush.bf16.msra.mxu0 %v2128_v38 }
  0xf7   : > { %1597 = vmatpush.bf16.msra.mxu0 %v2127_v39 }
  0xfb   : > { %1598 = vmatpush.bf16.msra.mxu0 %v2126_v40 }
  0xff   : > { %1599 = vmatpush.bf16.msra.mxu0 %v2125_v41 }
 0x103   : > { %1600 = vmatpush.bf16.msra.mxu0 %v2124_v42 }
 0x107   : > { %1601 = vmatpush.bf16.msra.mxu0 %v2123_v45 }
 0x10a   : > { %1602 = vmatmul.bf16.vlgmr.msra.gmra.mxu0 %v1048_v46 }
 0x147   : > { %v1499_v47 = vpop.f32.mrf.mxu0 }
 0x14a   : > { %v1512_v48 = vpop.f32.mrf.mxu1 }
 0x14b   : > { %v1513_v57 = vadd.f32 %v1512_v48, %v1499_v47 }
 0x14e   : > { %v1525_v49 = vpop.f32.mrf.mxu2 }
 0x14f   : > { %v1538_v50 = vpop.f32.mrf.mxu3  ;;  %v1501_v51 = vpop.f32.mrf.mxu0  ;;  %v1526_v59 = vadd.f32 %v1525_v49, %v1513_v57 }
 0x151   : > { %v1539_v63 = vadd.f32 %v1538_v50, %v1526_v59 }
 0x152   : > { %v1514_v52 = vpop.f32.mrf.mxu1 }
 0x156   : > { %v1527_v53 = vpop.f32.mrf.mxu2 }
 0x157   : > { %v1540_v54 = vpop.f32.mrf.mxu3 }
 0x167   : > { %v1551_v55 = vpop.f32.mrf.mxu0 }
 0x168   : > { %v1552_v1 = vadd.f32 %v1551_v55, %v1539_v63 }
 0x16a   : > { %v1564_v56 = vpop.f32.mrf.mxu1 }
 0x16b   : > { %v1565_v3 = vadd.f32 %v1564_v56, %v1552_v1 }
 0x16e   : > { %v1577_v58 = vpop.f32.mrf.mxu2 }
 0x16f   : > { %v1590_v60 = vpop.f32.mrf.mxu3  ;;  %v1553_v61 = vpop.f32.mrf.mxu0  ;;  %v1578_v4 = vadd.f32 %v1577_v58, %v1565_v3 }
 0x171   : > { %v1591_v5 = vadd.f32 %v1590_v60, %v1578_v4 }
 0x172   : > { %v1566_v62 = vpop.f32.mrf.mxu1 }
 0x176   : > { %v1579_v0 = vpop.f32.mrf.mxu2 }
 0x177   : > { %v1592_v2 = vpop.f32.mrf.mxu3 }
 0x187   : > { %v1603_v6 = vpop.f32.mrf.mxu0 }
 0x188   : > { %v1604_v7 = vadd.f32 %v1603_v6, %v1591_v5 }
 0x18a   : > { %v1607_v8 = vrot.slane %v1604_v7, 4 }
 0x18c   : > { %v1608_v9 = vadd.f32 %v1607_v8, %v1604_v7 }
 0x18e   : > { %v1609_v10 = vrot.slane %v1608_v9, 2 }
 0x18f   : > { %v1605_v11 = vpop.f32.mrf.mxu0 }
 0x190   : > { %v1610_v12 = vadd.f32 %v1609_v10, %v1608_v9 }
 0x192   : > { %v1611_v13 = vrot.slane %v1610_v12, 1 }
 0x194   : > { %v1612_v14 = vadd.f32 %v1611_v13, %v1610_v12 }
 0x196   : > { %v1613_v15 = vmul.f32 0.125, %v1612_v14 }
 0x198   : > { %v1614_v16 = vsub.f32 %v1604_v7, %v1613_v15 }
 0x19a   : > { %v1615_v17 = vmul.f32 %v1614_v16, %v1614_v16 }
 0x19c   : > { %v1616_v18 = vrot.slane %v1615_v17, 4 }
 0x19e   : > { %v1617_v19 = vadd.f32 %v1616_v18, %v1615_v17 }
 0x1a0   : > { %v1618_v20 = vrot.slane %v1617_v19, 2 }
 0x1a2   : > { %v1619_v21 = vadd.f32 %v1618_v20, %v1617_v19 }
 0x1a4   : > { %v1620_v22 = vrot.slane %v1619_v21, 1 }
 0x1a6   : > { %v1621_v23 = vadd.f32 %v1620_v22, %v1619_v21 }
 0x1a8   : > { %v1622_v24 = vmul.f32 0.125, %v1621_v23 }
 0x1aa   : > { %v1623_v25 = vadd.f32 1e-05, %v1622_v24 }
 0x1ac   : > { %2157 = vrsqrt.f32 %v1623_v25  ;;  %vm1630_vm1 = vweird.f32 %v1623_v25 }
 0x1b2   : > { %v2158_v26 = vpop.eup %2157 }
 0x1b3   : > { %v1625_v27 = vmul.f32 %v2158_v26, %v1623_v25  ;;  %vm1631_vm0 = vweird.f32 %v2158_v26 }
 0x1b4   : > { %vm1632_vm2 = vmor %vm1630_vm1, %vm1631_vm0 }
 0x1b5   : > { %v1626_v28 = vmul.f32 %v2158_v26, %v1625_v27 }
 0x1b7   : > { %v1627_v29 = vmul.f32 0.5, %v1626_v28 }
 0x1b9   : > { %v1628_v30 = vsub.f32 1.5, %v1627_v29 }
 0x1bb   : > { %v1629_v31 = vmul.f32 %v2158_v26, %v1628_v30 }
 0x1bd   : > { %v1633_v33 = vsel %vm1632_vm2, %v2158_v26, %v1629_v31 }
 0x1be   : > { %v1635_v34 = vmul.f32 %v1634_v32, %v1633_v33 }
 0x1c0   : > { %v1637_v36 = vmul.f32 %v1635_v34, %v1613_v15  ;;  %v1640_v37 = vperm.slane %v1635_v34, 0 }
 0x1c2   : > { %v1638_v38 = vsub.f32 %v1636_v35, %v1637_v36  ;;  %v1642_v39 = vmul.f32 %v1640_v37, %v1604_v7 }
 0x1c4   : > { %v1644_v40 = vperm.slane %v1638_v38, 0 }
 0x1c6   : > { %v1646_v41 = vadd.f32 %v1644_v40, %v1642_v39 }
 0x1c8   : > { %vm1647_vm3 = vcmp.ge.f32.partialorder %v1646_v41, 0.0  ;;  %v1648_v42 = vmul.f32 0.2, %v1646_v41 }
 0x1ca   : > { %v1649_v43 = vsel %vm1647_vm3, %v1646_v41, %v1648_v42 }
 0x1cb   : > { %1650 = vst [vmem:[%s872_s10] sm:$0xff] %v1649_v43  ;;  %v1651_v44 = vpack.c.bf16 %v1649_v43, %v1649_v43 }
 0x1cd   : > { %1652 = vst [vmem:[%s876_s13] sm:$0xf] %v1651_v44 }
 0x1ce PF: > { %p13_p9 = scmp.ge.s32.totalorder %s2230_s22, 4   ;;  %s2663_s18 = smov %s2177_s19 }
 0x1cf   : > { %s2664_s19 = smov %s2239_s25  ;;  %s2665_s20 = smov %s2230_s22 }
 0x1d0   :  { %15 = sbr.rel (!%p13_p9) target bundleno = 2 (0x2), region = 130 }

// kernel: convnet_forward.15
= control target key start
LH: loop header
LB: loop body
LE: loop exit
PB: predicated region body
PF: predicated region fallthrough
CT: control target
= control target key end

     0   :  { %vm264_vm0 = vcmask 1041409   ;;  %vm266_vm1 = vcmask 1042434   ;;  %vm268_vm2 = vcmask 1043459   ;;  %vm270_vm3 = vcmask 1044484   ;;  %s1612_s1 = inlined_call_operand.vmem [shape: bf16[256,512], index: 1, kind: input, shape index: {}]   ;;  %s1613_s0 = inlined_call_operand.vmem [shape: f32[8,8,256], index: 0, kind: input, shape index: {}]   ;;  %s1614_s2 = inlined_call_operand.vmem [shape: f32[1,512], index: 2, kind: input, shape index: {}]   ;;  %s1615_s3 = inlined_call_operand.vmem [shape: f32[8,512], index: 3, kind: output, shape index: {}]  }
   0x1   :  { %v835_v0 = vld [vmem:[%s1612_s1 + $0xe0] sm:$0xf]  ;;  %v1007_v1 = vld [vmem:[%s1612_s1 + $0xec] sm:$0xf0]  ;;  %v1005_v5 = vld [vmem:[%s1612_s1 + $0xe4] sm:$0xf] }
   0x2   :  { %v963_v2 = vld [vmem:[%s1612_s1 + $0x1e0] sm:$0xf]  ;;  %v836_v3 = vor.u32 %v1007_v1, %v835_v0  ;;  %v1039_v4 = vld [vmem:[%s1612_s1 + $0x1ec] sm:$0xf0]  ;;  %v837_v6 = vld [vmem:[%s1612_s1 + $0xf0] sm:$0xf0] }
   0x3   :  { %v964_v7 = vor.u32 %v1039_v4, %v963_v2  ;;  %v840_v8 = vor.u32 %v1005_v5, %v837_v6  ;;  %v1037_v9 = vld [vmem:[%s1612_s1 + $0x1e4] sm:$0xf]  ;;  %v965_v10 = vld [vmem:[%s1612_s1 + $0x1f0] sm:$0xf0]  ;;  %v819_v11 = vld [vmem:[%s1612_s1 + $0xc0] sm:$0xf] }
   0x4   :  { %609 = vmatpush.bf16.msra.mxu0 %v836_v3  ;;  %v968_v12 = vor.u32 %v1037_v9, %v965_v10  ;;  %v1003_v13 = vld [vmem:[%s1612_s1 + $0xcc] sm:$0xf0]  ;;  %v947_v14 = vld [vmem:[%s1612_s1 + $0x1c0] sm:$0xf]  ;;  %v1001_v18 = vld [vmem:[%s1612_s1 + $0xc4] sm:$0xf] }
   0x5   :  { %v1035_v15 = vld [vmem:[%s1612_s1 + $0x1cc] sm:$0xf0]  ;;  %622 = vmatpush.bf16.msra.mxu1 %v964_v7  ;;  %635 = vmatpush.bf16.msra.mxu2 %v840_v8  ;;  %v820_v16 = vor.u32 %v1003_v13, %v819_v11  ;;  %v821_v19 = vld [vmem:[%s1612_s1 + $0xd0] sm:$0xf0]  ;;  %v1033_v20 = vld [vmem:[%s1612_s1 + $0x1c4] sm:$0xf] }
   0x6   :  { %v948_v17 = vor.u32 %v1035_v15, %v947_v14  ;;  %648 = vmatpush.bf16.msra.mxu3 %v968_v12  ;;  %v824_v21 = vor.u32 %v1001_v18, %v821_v19  ;;  %v949_v22 = vld [vmem:[%s1612_s1 + $0x1d0] sm:$0xf0]  ;;  %v803_v23 = vld [vmem:[%s1612_s1 + $0xa0] sm:$0xf]  ;;  %v999_v24 = vld [vmem:[%s1612_s1 + $0xac] sm:$0xf0] }
   0x7   :  { %v952_v25 = vor.u32 %v1033_v20, %v949_v22  ;;  %v931_v26 = vld [vmem:[%s1612_s1 + $0x1a0] sm:$0xf]  ;;  %v1031_v27 = vld [vmem:[%s1612_s1 + $0x1ac] sm:$0xf0]  ;;  %v997_v28 = vld [vmem:[%s1612_s1 + $0xa4] sm:$0xf]  ;;  %v804_v29 = vor.u32 %v999_v24, %v803_v23 }
   0x8   :  { %610 = vmatpush.bf16.msra.mxu0 %v820_v16  ;;  %v805_v30 = vld [vmem:[%s1612_s1 + $0xb0] sm:$0xf0]  ;;  %v1029_v31 = vld [vmem:[%s1612_s1 + $0x1a4] sm:$0xf]  ;;  %v932_v33 = vor.u32 %v1031_v27, %v931_v26  ;;  %v787_v35 = vld [vmem:[%s1612_s1 + $0x80] sm:$0xf] }
   0x9   :  { %v933_v32 = vld [vmem:[%s1612_s1 + $0x1b0] sm:$0xf0]  ;;  %623 = vmatpush.bf16.msra.mxu1 %v948_v17  ;;  %636 = vmatpush.bf16.msra.mxu2 %v824_v21  ;;  %v808_v34 = vor.u32 %v997_v28, %v805_v30  ;;  %v995_v36 = vld [vmem:[%s1612_s1 + $0x8c] sm:$0xf0]  ;;  %v915_v37 = vld [vmem:[%s1612_s1 + $0x180] sm:$0xf] }
   0xa   :  { %649 = vmatpush.bf16.msra.mxu3 %v952_v25  ;;  %v936_v38 = vor.u32 %v1029_v31, %v933_v32  ;;  %v1027_v39 = vld [vmem:[%s1612_s1 + $0x18c] sm:$0xf0]  ;;  %v993_v40 = vld [vmem:[%s1612_s1 + $0x84] sm:$0xf]  ;;  %v789_v41 = vld [vmem:[%s1612_s1 + $0x90] sm:$0xf0]  ;;  %v788_v44 = vor.u32 %v995_v36, %v787_v35 }
   0xb   :  { %v1025_v42 = vld [vmem:[%s1612_s1 + $0x184] sm:$0xf]  ;;  %v917_v43 = vld [vmem:[%s1612_s1 + $0x190] sm:$0xf0]  ;;  %v916_v45 = vor.u32 %v1027_v39, %v915_v37  ;;  %v792_v46 = vor.u32 %v993_v40, %v789_v41  ;;  %v771_v47 = vld [vmem:[%s1612_s1 + $0x60] sm:$0xf] }
   0xc   :  { %611 = vmatpush.bf16.msra.mxu0 %v804_v29  ;;  %v991_v48 = vld [vmem:[%s1612_s1 + $0x6c] sm:$0xf0]  ;;  %v899_v49 = vld [vmem:[%s1612_s1 + $0x160] sm:$0xf]  ;;  %v920_v50 = vor.u32 %v1025_v42, %v917_v43  ;;  %v989_v52 = vld [vmem:[%s1612_s1 + $0x64] sm:$0xf] }
   0xd   :  { %624 = vmatpush.bf16.msra.mxu1 %v932_v33  ;;  %637 = vmatpush.bf16.msra.mxu2 %v808_v34  ;;  %v1023_v51 = vld [vmem:[%s1612_s1 + $0x16c] sm:$0xf0]  ;;  %v773_v53 = vld [vmem:[%s1612_s1 + $0x70] sm:$0xf0]  ;;  %v1021_v54 = vld [vmem:[%s1612_s1 + $0x164] sm:$0xf]  ;;  %v772_v56 = vor.u32 %v991_v48, %v771_v47 }
   0xe   :  { %650 = vmatpush.bf16.msra.mxu3 %v936_v38  ;;  %v901_v55 = vld [vmem:[%s1612_s1 + $0x170] sm:$0xf0]  ;;  %v755_v57 = vld [vmem:[%s1612_s1 + $0x40] sm:$0xf]  ;;  %v900_v58 = vor.u32 %v1023_v51, %v899_v49  ;;  %v776_v59 = vor.u32 %v989_v52, %v773_v53  ;;  %v987_v60 = vld [vmem:[%s1612_s1 + $0x4c] sm:$0xf0] }
   0xf   :  { %v883_v61 = vld [vmem:[%s1612_s1 + $0x140] sm:$0xf]  ;;  %v1019_v62 = vld [vmem:[%s1612_s1 + $0x14c] sm:$0xf0]  ;;  %v904_v63 = vor.u32 %v1021_v54, %v901_v55  ;;  %v985_v0 = vld [vmem:[%s1612_s1 + $0x44] sm:$0xf]  ;;  %v756_v6 = vor.u32 %v987_v60, %v755_v57 }
  0x10   :  { %612 = vmatpush.bf16.msra.mxu0 %v788_v44  ;;  %v757_v1 = vld [vmem:[%s1612_s1 + $0x50] sm:$0xf0]  ;;  %v1017_v2 = vld [vmem:[%s1612_s1 + $0x144] sm:$0xf]  ;;  %v739_v4 = vld [vmem:[%s1612_s1 + $0x20] sm:$0xf]  ;;  %v884_v13 = vor.u32 %v1019_v62, %v883_v61 }
  0x11   :  { %625 = vmatpush.bf16.msra.mxu1 %v916_v45  ;;  %638 = vmatpush.bf16.msra.mxu2 %v792_v46  ;;  %v885_v3 = vld [vmem:[%s1612_s1 + $0x150] sm:$0xf0]  ;;  %v983_v5 = vld [vmem:[%s1612_s1 + $0x2c] sm:$0xf0]  ;;  %v867_v7 = vld [vmem:[%s1612_s1 + $0x120] sm:$0xf]  ;;  %v760_v14 = vor.u32 %v985_v0, %v757_v1 }
  0x12   :  { %651 = vmatpush.bf16.msra.mxu3 %v920_v50  ;;  %v1015_v8 = vld [vmem:[%s1612_s1 + $0x12c] sm:$0xf0]  ;;  %v981_v9 = vld [vmem:[%s1612_s1 + $0x24] sm:$0xf]  ;;  %v741_v10 = vld [vmem:[%s1612_s1 + $0x30] sm:$0xf0]  ;;  %v888_v22 = vor.u32 %v1017_v2, %v885_v3  ;;  %v740_v29 = vor.u32 %v983_v5, %v739_v4 }
  0x13   :  { %v1226_v11 = vld [vmem:[%s1612_s1 + $0x124] sm:$0xf]  ;;  %v1231_v12 = vld [vmem:[%s1612_s1 + $0x130] sm:$0xf0]  ;;  %v1236_v15 = vld [vmem:[%s1612_s1] sm:$0xf]  ;;  %v868_v33 = vor.u32 %v1015_v8, %v867_v7  ;;  %v744_v34 = vor.u32 %v981_v9, %v741_v10 }
  0x14   :  { %613 = vmatpush.bf16.msra.mxu0 %v772_v56  ;;  %v1241_v16 = vld [vmem:[%s1612_s1 + $0xc] sm:$0xf0]  ;;  %v1246_v17 = vld [vmem:[%s1612_s1 + $0x100] sm:$0xf]  ;;  %v1256_v19 = vld [vmem:[%s1612_s1 + $0x4] sm:$0xf]  ;;  %v872_v35 = vor.u32 %v1226_v11, %v1231_v12 }
  0x15   :  { %626 = vmatpush.bf16.msra.mxu1 %v900_v58  ;;  %639 = vmatpush.bf16.msra.mxu2 %v776_v59  ;;  %v1251_v18 = vld [vmem:[%s1612_s1 + $0x10c] sm:$0xf0]  ;;  %v1261_v20 = vld [vmem:[%s1612_s1 + $0x10] sm:$0xf0]  ;;  %v1266_v21 = vld [vmem:[%s1612_s1 + $0x104] sm:$0xf]  ;;  %v724_v39 = vor.u32 %v1241_v16, %v1236_v15 }
  0x16   :  { %652 = vmatpush.bf16.msra.mxu3 %v904_v63  ;;  %v1271_v23 = vld [vmem:[%s1612_s1 + $0x110] sm:$0xf0]  ;;  %v1276_v24 = vld [vmem:[%s1612_s1 + $0xe8] sm:$0xf]  ;;  %v1281_v25 = vld [vmem:[%s1612_s1 + $0xf4] sm:$0xf0]  ;;  %v852_v40 = vor.u32 %v1251_v18, %v1246_v17  ;;  %v728_v41 = vor.u32 %v1256_v19, %v1261_v20 }
  0x17   :  { %v1286_v26 = vld [vmem:[%s1612_s1 + $0x1e8] sm:$0xf]  ;;  %v1291_v27 = vld [vmem:[%s1612_s1 + $0x1f4] sm:$0xf0]  ;;  %v1296_v28 = vld [vmem:[%s1612_s1 + $0xec] sm:$0xf]  ;;  %v856_v42 = vor.u32 %v1266_v21, %v1271_v23  ;;  %v844_v46 = vor.u32 %v1281_v25, %v1276_v24 }
  0x18   :  { %614 = vmatpush.bf16.msra.mxu0 %v756_v6  ;;  %v1301_v30 = vld [vmem:[%s1612_s1 + $0xf8] sm:$0xf0]  ;;  %v1306_v31 = vld [vmem:[%s1612_s1 + $0x1ec] sm:$0xf]  ;;  %v1318_v36 = vld [vmem:[%s1612_s1 + $0xc8] sm:$0xf]  ;;  %v972_v47 = vor.u32 %v1291_v27, %v1286_v26 }
  0x19   :  { %v1311_v32 = vld [vmem:[%s1612_s1 + $0x1f8] sm:$0xf0]  ;;  %627 = vmatpush.bf16.msra.mxu1 %v884_v13  ;;  %640 = vmatpush.bf16.msra.mxu2 %v760_v14  ;;  %v1323_v37 = vld [vmem:[%s1612_s1 + $0xd4] sm:$0xf0]  ;;  %v1328_v38 = vld [vmem:[%s1612_s1 + $0x1c8] sm:$0xf]  ;;  %v848_v48 = vor.u32 %v1296_v28, %v1301_v30 }
  0x1a   :  { %653 = vmatpush.bf16.msra.mxu3 %v888_v22  ;;  %v1341_v43 = vld [vmem:[%s1612_s1 + $0x1d4] sm:$0xf0]  ;;  %v1346_v44 = vld [vmem:[%s1612_s1 + $0xcc] sm:$0xf]  ;;  %v1351_v45 = vld [vmem:[%s1612_s1 + $0xd8] sm:$0xf0]  ;;  %v976_v49 = vor.u32 %v1306_v31, %v1311_v32  ;;  %v828_v53 = vor.u32 %v1323_v37, %v1318_v36 }
  0x1b   :  { %v1364_v50 = vld [vmem:[%s1612_s1 + $0x1cc] sm:$0xf]  ;;  %v1369_v51 = vld [vmem:[%s1612_s1 + $0x1d8] sm:$0xf0]  ;;  %v14_v52 = vld [vmem:[%s1613_s0] sm:$0xff]  ;;  %v956_v54 = vor.u32 %v1341_v43, %v1328_v38  ;;  %v832_v55 = vor.u32 %v1346_v44, %v1351_v45  ;;  %vm272_vm4 = vcmask 1045509  }
  0x1c   :  { %615 = vmatpush.bf16.msra.mxu0 %v740_v29  ;;  %v16_v56 = vld [vmem:[%s1613_s0 + $0x10] sm:$0xff]  ;;  %v18_v57 = vld [vmem:[%s1613_s0 + $0x20] sm:$0xff]  ;;  %v30_v59 = vrot.slane %v14_v52, 4  ;;  %v960_v60 = vor.u32 %v1364_v50, %v1369_v51  ;;  %vm274_vm5 = vcmask 1046534   ;;  %vm276_vm6 = vcmask 1047559  }
  0x1d   :  { %v20_v58 = vld [vmem:[%s1613_s0 + $0x30] sm:$0xff]  ;;  %628 = vmatpush.bf16.msra.mxu1 %v868_v33  ;;  %641 = vmatpush.bf16.msra.mxu2 %v744_v34  ;;  %v22_v61 = vld [vmem:[%s1613_s0 + $0x40] sm:$0xff]  ;;  %v42_v0 = vrot.slane %v16_v56, 4  ;;  %v54_v1 = vrot.slane %v18_v57, 4 }
  0x1e   :  { %v24_v62 = vld [vmem:[%s1613_s0 + $0x50] sm:$0xff]  ;;  %v26_v63 = vld [vmem:[%s1613_s0 + $0x60] sm:$0xff]  ;;  %v66_v2 = vrot.slane %v20_v58, 4  ;;  %654 = vmatpush.bf16.msra.mxu3 %v872_v35  ;;  %v31_v4 = vadd.f32 %v30_v59, %v14_v52  ;;  %v78_v5 = vrot.slane %v22_v61, 4 }
  0x1f   :  { %v28_v3 = vld [vmem:[%s1613_s0 + $0x70] sm:$0xff]  ;;  %v90_v6 = vrot.slane %v24_v62, 4  ;;  %v102_v7 = vrot.slane %v26_v63, 4  ;;  %v43_v8 = vadd.f32 %v42_v0, %v16_v56  ;;  %v55_v9 = vadd.f32 %v54_v1, %v18_v57 }
  0x20   :  { %v67_v10 = vadd.f32 %v66_v2, %v20_v58  ;;  %v114_v11 = vrot.slane %v28_v3, 4  ;;  %616 = vmatpush.bf16.msra.mxu0 %v724_v39  ;;  %v32_v12 = vrot.slane %v31_v4, 2  ;;  %v79_v13 = vadd.f32 %v78_v5, %v22_v61  ;;  %v17_v5 = vld [vmem:[%s1613_s0 + $0x18] sm:$0xff] }
  0x21   :  { %v91_v14 = vadd.f32 %v90_v6, %v24_v62  ;;  %v103_v15 = vadd.f32 %v102_v7, %v26_v63  ;;  %629 = vmatpush.bf16.msra.mxu1 %v852_v40  ;;  %642 = vmatpush.bf16.msra.mxu2 %v728_v41  ;;  %v44_v16 = vrot.slane %v43_v8, 2  ;;  %v56_v17 = vrot.slane %v55_v9, 2 }
  0x22   :  { %v68_v18 = vrot.slane %v67_v10, 2  ;;  %v115_v19 = vadd.f32 %v114_v11, %v28_v3  ;;  %655 = vmatpush.bf16.msra.mxu3 %v856_v42  ;;  %v33_v20 = vadd.f32 %v32_v12, %v31_v4  ;;  %v80_v21 = vrot.slane %v79_v13, 2  ;;  %v15_v4 = vld [vmem:[%s1613_s0 + $0x8] sm:$0xff] }
  0x23   :  { %v92_v22 = vrot.slane %v91_v14, 2  ;;  %v104_v23 = vrot.slane %v103_v15, 2  ;;  %v45_v24 = vadd.f32 %v44_v16, %v43_v8  ;;  %v57_v25 = vadd.f32 %v56_v17, %v55_v9  ;;  %v19_v9 = vld [vmem:[%s1613_s0 + $0x28] sm:$0xff] }
  0x24   :  { %661 = vmatpush.bf16.msrb.mxu0 %v844_v46  ;;  %v69_v26 = vadd.f32 %v68_v18, %v67_v10  ;;  %v116_v27 = vrot.slane %v115_v19, 2  ;;  %v34_v28 = vrot.slane %v33_v20, 1  ;;  %v81_v29 = vadd.f32 %v80_v21, %v79_v13  ;;  %v21_v10 = vld [vmem:[%s1613_s0 + $0x38] sm:$0xff]  ;;  %v23_v11 = vld [vmem:[%s1613_s0 + $0x48] sm:$0xff] }
  0x25   :  { %674 = vmatpush.bf16.msrb.mxu1 %v972_v47  ;;  %687 = vmatpush.bf16.msrb.mxu2 %v848_v48  ;;  %v93_v30 = vadd.f32 %v92_v22, %v91_v14  ;;  %v105_v31 = vadd.f32 %v104_v23, %v103_v15  ;;  %v46_v32 = vrot.slane %v45_v24, 1  ;;  %v58_v33 = vrot.slane %v57_v25, 1  ;;  %v25_v14 = vld [vmem:[%s1613_s0 + $0x58] sm:$0xff] }
  0x26   :  { %700 = vmatpush.bf16.msrb.mxu3 %v976_v49  ;;  %v70_v34 = vrot.slane %v69_v26, 1  ;;  %v117_v35 = vadd.f32 %v116_v27, %v115_v19  ;;  %v35_v36 = vadd.f32 %v34_v28, %v33_v20  ;;  %v82_v37 = vrot.slane %v81_v29, 1 }
  0x27   :  { %v94_v39 = vrot.slane %v93_v30, 1  ;;  %v106_v40 = vrot.slane %v105_v31, 1  ;;  %v47_v41 = vadd.f32 %v46_v32, %v45_v24  ;;  %v59_v42 = vadd.f32 %v58_v33, %v57_v25 }
  0x28   :  { %662 = vmatpush.bf16.msrb.mxu0 %v828_v53  ;;  %v71_v46 = vadd.f32 %v70_v34, %v69_v26  ;;  %v118_v47 = vrot.slane %v117_v35, 1  ;;  %v83_v48 = vadd.f32 %v82_v37, %v81_v29  ;;  %v126_v51 = vmul.f32 0.25, %v35_v36  ;;  %v29_v36 = vld [vmem:[%s1613_s0 + $0x78] sm:$0xff] }
  0x29   :  { %675 = vmatpush.bf16.msrb.mxu1 %v956_v54  ;;  %688 = vmatpush.bf16.msrb.mxu2 %v832_v55  ;;  %v95_v49 = vadd.f32 %v94_v39, %v93_v30  ;;  %v107_v50 = vadd.f32 %v106_v40, %v105_v31  ;;  %v128_v53 = vmul.f32 0.25, %v47_v41  ;;  %v130_v56 = vmul.f32 0.25, %v59_v42  ;;  %v27_v31 = vld [vmem:[%s1613_s0 + $0x68] sm:$0xff] }
  0x2a   :  { %701 = vmatpush.bf16.msrb.mxu3 %v960_v60  ;;  %v119_v52 = vadd.f32 %v118_v47, %v117_v35  ;;  %v132_v57 = vmul.f32 0.25, %v71_v46  ;;  %v134_v58 = vmul.f32 0.25, %v83_v48  ;;  %v142_v54 = vpack.c.bf16 %v126_v51, %v126_v51 }
  0x2b   :  { %v136_v38 = vmul.f32 0.25, %v95_v49  ;;  %v138_v43 = vmul.f32 0.25, %v107_v50  ;;  %v144_v44 = vpack.c.bf16 %v128_v53, %v128_v53  ;;  %v146_v45 = vpack.c.bf16 %v130_v56, %v130_v56 }
  0x2c   :  { %v140_v59 = vmul.f32 0.25, %v119_v52  ;;  %v148_v55 = vpack.c.bf16 %v132_v57, %v132_v57  ;;  %v150_v61 = vpack.c.bf16 %v134_v58, %v134_v58  ;;  %v248_v60 = vunpack.c.l.b16 %v142_v54 }
  0x2d   :  { %v152_v62 = vpack.c.bf16 %v136_v38, %v136_v38  ;;  %v154_v63 = vpack.c.bf16 %v138_v43, %v138_v43  ;;  %v250_v1 = vunpack.c.l.b16 %v144_v44  ;;  %v252_v2 = vunpack.c.l.b16 %v146_v45 }
  0x2e   :  { %v156_v0 = vpack.c.bf16 %v140_v59, %v140_v59  ;;  %v254_v3 = vunpack.c.l.b16 %v148_v55  ;;  %v256_v6 = vunpack.c.l.b16 %v150_v61  ;;  %v36_v16 = vrot.slane %v15_v4, 4 }
  0x2f   :  { %v258_v7 = vunpack.c.l.b16 %v152_v62  ;;  %v260_v8 = vunpack.c.l.b16 %v154_v63  ;;  %v265_v13 = vsel %vm264_vm0, %v250_v1, %v248_v60  ;;  %v48_v17 = vrot.slane %v17_v5, 4 }
  0x30   :  { %v262_v12 = vunpack.c.l.b16 %v156_v0  ;;  %v267_v15 = vsel %vm266_vm1, %v252_v2, %v265_v13  ;;  %v60_v19 = vrot.slane %v19_v9, 4  ;;  %v72_v20 = vrot.slane %v21_v10, 4 }
  0x31   :  { %v269_v18 = vsel %vm268_vm2, %v254_v3, %v267_v15  ;;  %v84_v21 = vrot.slane %v23_v11, 4  ;;  %v37_v23 = vadd.f32 %v36_v16, %v15_v4  ;;  %v49_v24 = vadd.f32 %v48_v17, %v17_v5  ;;  %v1032_v15 = vld [vmem:[%s1612_s1 + $0x1b4] sm:$0xf0] }
  0x32   :  { %v271_v22 = vsel %vm270_vm3, %v256_v6, %v269_v18  ;;  %v96_v25 = vrot.slane %v25_v14, 4  ;;  %v61_v27 = vadd.f32 %v60_v19, %v19_v9  ;;  %v73_v28 = vadd.f32 %v72_v20, %v21_v10  ;;  %v1000_v9 = vld [vmem:[%s1612_s1 + $0xb4] sm:$0xf0]  ;;  %v998_v20 = vld [vmem:[%s1612_s1 + $0xac] sm:$0xf] }
  0x33   :  { %v273_v26 = vsel %vm272_vm4, %v258_v7, %v271_v22  ;;  %v85_v29 = vadd.f32 %v84_v21, %v23_v11  ;;  %v38_v32 = vrot.slane %v37_v23, 2  ;;  %v50_v33 = vrot.slane %v49_v24, 2  ;;  %v813_v21 = vld [vmem:[%s1612_s1 + $0xb8] sm:$0xf0] }
  0x34   :  { %v275_v30 = vsel %vm274_vm5, %v260_v8, %v273_v26  ;;  %v97_v34 = vadd.f32 %v96_v25, %v25_v14  ;;  %v62_v37 = vrot.slane %v61_v27, 2  ;;  %v74_v39 = vrot.slane %v73_v28, 2  ;;  %v811_v8 = vld [vmem:[%s1612_s1 + $0xa8] sm:$0xf]  ;;  %v1030_v26 = vld [vmem:[%s1612_s1 + $0x1ac] sm:$0xf] }
  0x35   :  { %v277_v35 = vsel %vm276_vm6, %v262_v12, %v275_v30  ;;  %v86_v40 = vrot.slane %v85_v29, 2  ;;  %v39_v42 = vadd.f32 %v38_v32, %v37_v23  ;;  %v51_v46 = vadd.f32 %v50_v33, %v49_v24  ;;  %v939_v14 = vld [vmem:[%s1612_s1 + $0x1a8] sm:$0xf]  ;;  %v996_v33 = vld [vmem:[%s1612_s1 + $0x94] sm:$0xf0] }
  0x36   :  { %v1440_v41 = vpack.c.b16 %v277_v35, %v277_v35  ;;  %v98_v47 = vrot.slane %v97_v34, 2  ;;  %v63_v48 = vadd.f32 %v62_v37, %v61_v27  ;;  %v75_v49 = vadd.f32 %v74_v39, %v73_v28  ;;  %v941_v27 = vld [vmem:[%s1612_s1 + $0x1b8] sm:$0xf0]  ;;  %v795_v32 = vld [vmem:[%s1612_s1 + $0x88] sm:$0xf] }
  0x37   :  { %v87_v50 = vadd.f32 %v86_v40, %v85_v29  ;;  %v108_v51 = vrot.slane %v27_v31, 4  ;;  %v40_v52 = vrot.slane %v39_v42, 1  ;;  %v52_v53 = vrot.slane %v51_v46, 1  ;;  %v1028_v40 = vld [vmem:[%s1612_s1 + $0x194] sm:$0xf0] }
  0x38   :  { %643 = vmatmul.bf16.vlgmr.msra.gmra.mxu2 %v1440_v41  ;;  %v99_v56 = vadd.f32 %v98_v47, %v97_v34  ;;  %v120_v57 = vrot.slane %v29_v36, 4  ;;  %617 = vmatmul.bf16.vlgmr.msra.gmra.mxu0 %v1440_v41  ;;  %v64_v58 = vrot.slane %v63_v48, 1  ;;  %v76_v38 = vrot.slane %v75_v49, 1  ;;  %v923_v34 = vld [vmem:[%s1612_s1 + $0x188] sm:$0xf] }
  0x39   :  { %v88_v43 = vrot.slane %v87_v50, 1  ;;  %v109_v54 = vadd.f32 %v108_v51, %v27_v31  ;;  %v41_v59 = vadd.f32 %v40_v52, %v39_v42  ;;  %v53_v44 = vadd.f32 %v52_v53, %v51_v46  ;;  %v994_v42 = vld [vmem:[%s1612_s1 + $0x8c] sm:$0xf]  ;;  %v797_v46 = vld [vmem:[%s1612_s1 + $0x98] sm:$0xf0] }
  0x3a   :  { %v100_v45 = vrot.slane %v99_v56, 1  ;;  %v121_v55 = vadd.f32 %v120_v57, %v29_v36  ;;  %v65_v61 = vadd.f32 %v64_v58, %v63_v48  ;;  %v77_v62 = vadd.f32 %v76_v38, %v75_v49  ;;  %v1026_v51 = vld [vmem:[%s1612_s1 + $0x18c] sm:$0xf]  ;;  %v925_v52 = vld [vmem:[%s1612_s1 + $0x198] sm:$0xf0] }
  0x3b   :  { %v89_v63 = vadd.f32 %v88_v43, %v87_v50  ;;  %v110_v60 = vrot.slane %v109_v54, 2  ;;  %v127_v2 = vmul.f32 0.25, %v41_v59  ;;  %v129_v3 = vmul.f32 0.25, %v53_v44  ;;  %v779_v59 = vld [vmem:[%s1612_s1 + $0x68] sm:$0xf] }
  0x3c   :  { %v101_v0 = vadd.f32 %v100_v45, %v99_v56  ;;  %v122_v1 = vrot.slane %v121_v55, 2  ;;  %v131_v5 = vmul.f32 0.25, %v65_v61  ;;  %v133_v6 = vmul.f32 0.25, %v77_v62  ;;  %v992_v44 = vld [vmem:[%s1612_s1 + $0x74] sm:$0xf0] }
  0x3d   :  { %v111_v4 = vadd.f32 %v110_v60, %v109_v54  ;;  %v135_v7 = vmul.f32 0.25, %v89_v63  ;;  %v143_v12 = vpack.c.bf16 %v127_v2, %v127_v2  ;;  %v145_v13 = vpack.c.bf16 %v129_v3, %v129_v3  ;;  %v907_v63 = vld [vmem:[%s1612_s1 + $0x168] sm:$0xf]  ;;  %v781_v2 = vld [vmem:[%s1612_s1 + $0x78] sm:$0xf0] }
  0x3e   :  { %v123_v10 = vadd.f32 %v122_v1, %v121_v55  ;;  %v137_v11 = vmul.f32 0.25, %v101_v0  ;;  %v147_v17 = vpack.c.bf16 %v131_v5, %v131_v5  ;;  %v149_v18 = vpack.c.bf16 %v133_v6, %v133_v6  ;;  %v1024_v0 = vld [vmem:[%s1612_s1 + $0x174] sm:$0xf0]  ;;  %v990_v1 = vld [vmem:[%s1612_s1 + $0x6c] sm:$0xf] }
  0x3f   :  { %v112_v16 = vrot.slane %v111_v4, 1  ;;  %v151_v19 = vpack.c.bf16 %v135_v7, %v135_v7  ;;  %v249_v24 = vunpack.c.l.b16 %v143_v12  ;;  %v251_v25 = vunpack.c.l.b16 %v145_v13  ;;  %v1022_v5 = vld [vmem:[%s1612_s1 + $0x16c] sm:$0xf]  ;;  %v909_v6 = vld [vmem:[%s1612_s1 + $0x178] sm:$0xf0] }
  0x40   :  { %v124_v22 = vrot.slane %v123_v10, 1  ;;  %v153_v23 = vpack.c.bf16 %v137_v11, %v137_v11  ;;  %v253_v29 = vunpack.c.l.b16 %v147_v17  ;;  %v255_v30 = vunpack.c.l.b16 %v149_v18  ;;  %v891_v13 = vld [vmem:[%s1612_s1 + $0x148] sm:$0xf]  ;;  %v986_v17 = vld [vmem:[%s1612_s1 + $0x4c] sm:$0xf] }
  0x41   :  { %v113_v28 = vadd.f32 %v112_v16, %v111_v4  ;;  %v257_v31 = vunpack.c.l.b16 %v151_v19  ;;  %v278_v37 = vsel %vm264_vm0, %v251_v25, %v249_v24  ;;  %v812_v39 = vor.u32 %v1000_v9, %v811_v8  ;;  %v763_v8 = vld [vmem:[%s1612_s1 + $0x48] sm:$0xf]  ;;  %v988_v9 = vld [vmem:[%s1612_s1 + $0x54] sm:$0xf0]  ;;  %v765_v18 = vld [vmem:[%s1612_s1 + $0x58] sm:$0xf0] }
  0x42   :  { %v125_v35 = vadd.f32 %v124_v22, %v123_v10  ;;  %v259_v36 = vunpack.c.l.b16 %v153_v23  ;;  %v279_v48 = vsel %vm266_vm1, %v253_v29, %v278_v37  ;;  %v940_v49 = vor.u32 %v1032_v15, %v939_v14  ;;  %v1020_v16 = vld [vmem:[%s1612_s1 + $0x154] sm:$0xf0]  ;;  %v747_v22 = vld [vmem:[%s1612_s1 + $0x28] sm:$0xf]  ;;  %v982_v29 = vld [vmem:[%s1612_s1 + $0x2c] sm:$0xf] }
  0x43   :  { %v139_v47 = vmul.f32 0.25, %v113_v28  ;;  %v816_v50 = vor.u32 %v998_v20, %v813_v21  ;;  %v280_v56 = vsel %vm268_vm2, %v255_v30, %v279_v48  ;;  %663 = vmatpush.bf16.msrb.mxu0 %v812_v39  ;;  %v944_v57 = vor.u32 %v1030_v26, %v941_v27  ;;  %v1018_v20 = vld [vmem:[%s1612_s1 + $0x14c] sm:$0xf]  ;;  %v893_v21 = vld [vmem:[%s1612_s1 + $0x158] sm:$0xf0] }
  0x44   :  { %v141_v53 = vmul.f32 0.25, %v125_v35  ;;  %v796_v58 = vor.u32 %v996_v33, %v795_v32  ;;  %v281_v43 = vsel %vm270_vm3, %v257_v31, %v280_v56  ;;  %676 = vmatpush.bf16.msrb.mxu1 %v940_v49  ;;  %v924_v54 = vor.u32 %v1028_v40, %v923_v34  ;;  %v984_v23 = vld [vmem:[%s1612_s1 + $0x34] sm:$0xf0]  ;;  %v875_v26 = vld [vmem:[%s1612_s1 + $0x128] sm:$0xf] }
  0x45   :  { %v155_v38 = vpack.c.bf16 %v139_v47, %v139_v47  ;;  %689 = vmatpush.bf16.msrb.mxu2 %v816_v50  ;;  %v282_v55 = vsel %vm272_vm4, %v259_v36, %v281_v43  ;;  %702 = vmatpush.bf16.msrb.mxu3 %v944_v57  ;;  %v800_v61 = vor.u32 %v994_v42, %v797_v46  ;;  %v1016_v28 = vld [vmem:[%s1612_s1 + $0x134] sm:$0xf0]  ;;  %v749_v30 = vld [vmem:[%s1612_s1 + $0x38] sm:$0xf0]  ;;  %v1014_v32 = vld [vmem:[%s1612_s1 + $0x12c] sm:$0xf] }
  0x46   :  { %v157_v45 = vpack.c.bf16 %v141_v53, %v141_v53  ;;  %v928_v62 = vor.u32 %v1026_v51, %v925_v52  ;;  %v780_v4 = vor.u32 %v992_v44, %v779_v59  ;;  %v908_v11 = vor.u32 %v1024_v0, %v907_v63  ;;  %v877_v33 = vld [vmem:[%s1612_s1 + $0x138] sm:$0xf0]  ;;  %v731_v34 = vld [vmem:[%s1612_s1 + $0x8] sm:$0xf]  ;;  %v980_v35 = vld [vmem:[%s1612_s1 + $0x14] sm:$0xf0] }
  0x47   :  { %v261_v60 = vunpack.c.l.b16 %v155_v38  ;;  %664 = vmatpush.bf16.msrb.mxu0 %v796_v58  ;;  %v784_v12 = vor.u32 %v990_v1, %v781_v2  ;;  %v912_v15 = vor.u32 %v1022_v5, %v909_v6  ;;  %v764_v19 = vor.u32 %v988_v9, %v763_v8  ;;  %v859_v39 = vld [vmem:[%s1612_s1 + $0x108] sm:$0xf]  ;;  %v1012_v42 = vld [vmem:[%s1612_s1 + $0x114] sm:$0xf0]  ;;  %v978_v46 = vld [vmem:[%s1612_s1 + $0xc] sm:$0xf] }
  0x48   :  { %v263_v3 = vunpack.c.l.b16 %v157_v45  ;;  %677 = vmatpush.bf16.msrb.mxu1 %v924_v54  ;;  %v892_v24 = vor.u32 %v1020_v16, %v891_v13  ;;  %v768_v25 = vor.u32 %v986_v17, %v765_v18  ;;  %v896_v27 = vor.u32 %v1018_v20, %v893_v21  ;;  %v733_v47 = vld [vmem:[%s1612_s1 + $0x18] sm:$0xf0]  ;;  %v1010_v49 = vld [vmem:[%s1612_s1 + $0x10c] sm:$0xf]  ;;  %v222_v38 = vld [vmem:[%s1614_s2] sm:$0xf] }
  0x49   :  { %v283_v7 = vsel %vm274_vm5, %v261_v60, %v282_v55  ;;  %690 = vmatpush.bf16.msrb.mxu2 %v800_v61  ;;  %703 = vmatpush.bf16.msrb.mxu3 %v928_v62  ;;  %v748_v31 = vor.u32 %v984_v23, %v747_v22  ;;  %v876_v36 = vor.u32 %v1016_v28, %v875_v26  ;;  %v861_v50 = vld [vmem:[%s1612_s1 + $0x118] sm:$0xf0]  ;;  %v224_v43 = vperm.slane %v222_v38, 0 }
  0x4a   :  { %v284_v10 = vsel %vm276_vm6, %v263_v3, %v283_v7  ;;  %v752_v37 = vor.u32 %v982_v29, %v749_v30  ;;  %v880_v40 = vor.u32 %v1014_v32, %v877_v33  ;;  %v732_v48 = vor.u32 %v980_v35, %v731_v34 }
  0x4b   :  { %v286_v14 = vpack.c.b16 %v284_v10, %v284_v10  ;;  %665 = vmatpush.bf16.msrb.mxu0 %v780_v4  ;;  %v860_v51 = vor.u32 %v1012_v42, %v859_v39  ;;  %v736_v52 = vor.u32 %v978_v46, %v733_v47  ;;  %v864_v53 = vor.u32 %v1010_v49, %v861_v50 }
  0x4c   :  { %678 = vmatpush.bf16.msrb.mxu1 %v908_v11  ;;  %v225_v44 = vperm.slane %v222_v38, 1  ;;  %v226_v60 = vperm.slane %v222_v38, 2  ;;  %v227_v5 = vperm.slane %v222_v38, 3 }
  0x4d   :  { %656 = vmatmul.bf16.vlgmr.msra.gmra.mxu3 %v286_v14  ;;  %630 = vmatmul.bf16.vlgmr.msra.gmra.mxu1 %v286_v14 }
  0x4e   :  { %691 = vmatpush.bf16.msrb.mxu2 %v784_v12  ;;  %704 = vmatpush.bf16.msrb.mxu3 %v912_v15 }
  0x4f   :  { %666 = vmatpush.bf16.msrb.mxu0 %v764_v19 }
  0x50   :  { %679 = vmatpush.bf16.msrb.mxu1 %v892_v24 }
  0x52   :  { %692 = vmatpush.bf16.msrb.mxu2 %v768_v25  ;;  %705 = vmatpush.bf16.msrb.mxu3 %v896_v27 }
  0x53   :  { %667 = vmatpush.bf16.msrb.mxu0 %v748_v31 }
  0x54   :  { %680 = vmatpush.bf16.msrb.mxu1 %v876_v36 }
  0x56   :  { %693 = vmatpush.bf16.msrb.mxu2 %v752_v37  ;;  %706 = vmatpush.bf16.msrb.mxu3 %v880_v40 }
  0x57   :  { %668 = vmatpush.bf16.msrb.mxu0 %v732_v48 }
  0x58   :  { %681 = vmatpush.bf16.msrb.mxu1 %v860_v51 }
  0x5a   :  { %694 = vmatpush.bf16.msrb.mxu2 %v736_v52  ;;  %707 = vmatpush.bf16.msrb.mxu3 %v864_v53 }
  0x5b   :  { %669 = vmatmul.bf16.vlgmr.msrb.gmra.mxu0 %v1440_v41 }
  0x5d   :  { %682 = vmatmul.bf16.vlgmr.msrb.gmra.mxu1 %v286_v14  ;;  %695 = vmatmul.bf16.vlgmr.msrb.gmra.mxu2 %v1440_v41 }
  0x5e   :  { %708 = vmatmul.bf16.vlgmr.msrb.gmra.mxu3 %v286_v14 }
  0xb5   :  { %v618_v56 = vpop.f32.mrf.mxu0 }
  0xb6   :  { %v619_v59 = vadd.f32 %v618_v56, %v224_v43 }
  0xbb   :  { %v644_v57 = vpop.f32.mrf.mxu2 }
  0xbc   :  { %v645_v61 = vadd.f32 %v644_v57, %v225_v44 }
  0xbd   :  { %v620_v58 = vpop.f32.mrf.mxu0 }
  0xc3   :  { %v646_v54 = vpop.f32.mrf.mxu2 }
  0xca   :  { %v631_v45 = vpop.f32.mrf.mxu1 }
  0xcb   :  { %v632_v55 = vadd.f32 %v631_v45, %v619_v59 }
  0xcd   :  { %713 = vst [vmem:[%s1615_s3] sm:$0xff] %v632_v55 }
  0xd0   :  { %v657_v41 = vpop.f32.mrf.mxu3 }
  0xd1   :  { %v658_v62 = vadd.f32 %v657_v41, %v645_v61 }
  0xd2   :  { %v633_v63 = vpop.f32.mrf.mxu1 }
  0xd3   :  { %714 = vst [vmem:[%s1615_s3 + $0x8] sm:$0xff] %v658_v62 }
  0xd8   :  { %v659_v0 = vpop.f32.mrf.mxu3  ;;  %v670_v1 = vpop.f32.mrf.mxu0 }
  0xd9   :  { %v671_v2 = vadd.f32 %v670_v1, %v226_v60 }
  0xda   :  { %v683_v3 = vpop.f32.mrf.mxu1 }
  0xdb   :  { %v684_v4 = vadd.f32 %v683_v3, %v671_v2 }
  0xdd   :  { %715 = vst [vmem:[%s1615_s3 + $0x10] sm:$0xff] %v684_v4 }
  0xe0   :  { %v696_v6 = vpop.f32.mrf.mxu2  ;;  %v672_v7 = vpop.f32.mrf.mxu0 }
  0xe1   :  { %v697_v8 = vadd.f32 %v696_v6, %v227_v5  ;;  %v709_v9 = vpop.f32.mrf.mxu3 }
  0xe2   :  { %v685_v10 = vpop.f32.mrf.mxu1 }
  0xe3   :  { %v710_v11 = vadd.f32 %v709_v9, %v697_v8 }
  0xe5   :  { %716 = vst [vmem:[%s1615_s3 + $0x18] sm:$0xff] %v710_v11 }
  0xe8   :  { %v698_v12 = vpop.f32.mrf.mxu2 }
  0xe9   :  { %v711_v13 = vpop.f32.mrf.mxu3 }

// kernel: convnet_forward.14
= control target key start
LH: loop header
LB: loop body
LE: loop exit
PB: predicated region body
PF: predicated region fallthrough
CT: control target
= control target key end

     0   :  { %11 = vsyncpa [#allocation4], 0  ;;  %s6000_s0 = inlined_call_operand.vmem [shape: bf16[8,2304], index: 0, kind: input, shape index: {}]   ;;  %s6001_s1 = inlined_call_operand.vmem [shape: bf16[2304,256], index: 1, kind: input, shape index: {}]   ;;  %s6002_s2 = inlined_call_operand.vmem [shape: f32[1,256], index: 2, kind: input, shape index: {}]   ;;  %s6003_s3 = inlined_call_operand.vmem [shape: f32[1,256], index: 3, kind: input, shape index: {}]   ;;  %s6004_s4 = inlined_call_operand.vmem [shape: f32[8,256], index: 4, kind: output, shape index: {0}]   ;;  %s6005_s5 = inlined_call_operand.hbm [shape: bf16[8,256], index: 5, kind: output, shape index: {1}]  }
   0x1   :  { %13 = vsyncpa [#allocation4 + $0x1], 0  ;;  %s5141_s18 = smov 0   ;;  %s5143_s19 = smov 0  }
   0x2   :  { %s5145_s20 = smov 0   ;;  %s5147_s21 = smov 0  }
   0x3 LB: > { %s5162_s22 = sadd.s32 4294967295, %s5109_s21   ;;  %s4273_s23 = sadd.s32 4294967294, %s5109_s21   ;;  %s5109_s21 = sphi %s5147_s21, %s6011_s21   ;;  %s5105_s20 = sphi %s5145_s20, %s6010_s20   ;;  %s5101_s19 = sphi %s5143_s19, %s6009_s19   ;;  %s5097_s18 = sphi %s5141_s18, %s6008_s18  }
   0x4   : > { %s5166_s24 = sadd.s32 1, %s5109_s21   ;;  %s47_s25 = sadd.s32 1, %s5105_s20 }
   0x5   : > { %s44_s26 = ssub.s32 %s5109_s21, %s5166_s24  ;;  %p54_p0 = scmp.ne.s32.totalorder %s5105_s20, %s5101_s19 }
   0x6   : > { %p45_p1 = scmp.eq.s32.totalorder %s44_s26, 0  ;;  %p55_p2 = scmp.eq.s32.totalorder %s5109_s21, 0 }
   0x7   : > { %p162_p3 = scmp.eq.s32.totalorder %s5162_s22, 1  ;;  %p167_p4 = scmp.ne.s32.totalorder %s5101_s19, %s5097_s18 }
   0x8   : > { %s5178_s27 = scalar_select %p45_p1, %s5105_s20, %s47_s25  }
   0x9   : > { %p56_p5 = por %p55_p2, %p54_p0  ;;  %p5180_p6 = por %p162_p3, %p54_p0 }
   0xa   : > { %p168_p7 = scmp.eq.s32.totalorder %s4273_s23, 1  ;;  %p4275_p9 = scmp.ge.s32.totalorder %s5109_s21, 2 }
   0xc   : > { %p5184_p8 = por %p168_p7, %p167_p4  ;;  %187 = sbr.rel (%p4275_p9) target bundleno = 310 (0x136), region = 20 }
  0x11   : > { %190 = sbr.rel (!%p56_p5) target bundleno = 310 (0x136), region = 24  ;;  %s192_s30 = sand.u32 (%p56_p5), 1, %s5105_s20  }
  0x12   : > { %s4276_s6 = sshll.u32 (%p56_p5), %s5109_s21, 2  ;;  %s5004_s7 = smul.u32 (%p56_p5), 1152, %s192_s30 }
  0x13   : > { %s5196_s10 = scalar_lea.vmem (%p56_p5), %s6001_s1, %s4276_s6 }
  0x14   : > { %v213_v0 = vld [vmem:[%s5196_s10] sm:$0xf] (%p56_p5)  ;;  %v215_v1 = vld [vmem:[%s5196_s10 + $0x8] sm:$0xf] (%p56_p5)  ;;  %v217_v2 = vld [vmem:[%s5196_s10 + $0x10] sm:$0xf] (%p56_p5) }
  0x15   : > { %s5201_s11 = scalar_lea.vmem (%p56_p5), [#allocation2], %s5004_s7  ;;  %v219_v3 = vld [vmem:[%s5196_s10 + $0x18] sm:$0xf] (%p56_p5)  ;;  %v221_v4 = vld [vmem:[%s5196_s10 + $0x20] sm:$0xf] (%p56_p5) }
  0x16   : > { %214 = vst [vmem:[%s5201_s11] sm:$0xf] %v213_v0  ;;  %v223_v5 = vld [vmem:[%s5196_s10 + $0x28] sm:$0xf]  ;;  %v225_v6 = vld [vmem:[%s5196_s10 + $0x30] sm:$0xf] }
  0x17   : > { %216 = vst [vmem:[%s5201_s11 + $0x4] sm:$0xf] %v215_v1  ;;  %v227_v7 = vld [vmem:[%s5196_s10 + $0x38] sm:$0xf]  ;;  %v229_v8 = vld [vmem:[%s5196_s10 + $0x40] sm:$0xf] }
  0x18   : > { %218 = vst [vmem:[%s5201_s11 + $0x8] sm:$0xf] %v217_v2  ;;  %v231_v9 = vld [vmem:[%s5196_s10 + $0x48] sm:$0xf]  ;;  %v233_v10 = vld [vmem:[%s5196_s10 + $0x50] sm:$0xf] }
  0x19   : > { %220 = vst [vmem:[%s5201_s11 + $0xc] sm:$0xf] %v219_v3  ;;  %v235_v11 = vld [vmem:[%s5196_s10 + $0x58] sm:$0xf]  ;;  %v237_v12 = vld [vmem:[%s5196_s10 + $0x60] sm:$0xf] }
  0x1a   : > { %222 = vst [vmem:[%s5201_s11 + $0x10] sm:$0xf] %v221_v4  ;;  %v239_v13 = vld [vmem:[%s5196_s10 + $0x68] sm:$0xf]  ;;  %v241_v14 = vld [vmem:[%s5196_s10 + $0x70] sm:$0xf] }
  0x1b   : > { %224 = vst [vmem:[%s5201_s11 + $0x14] sm:$0xf] %v223_v5  ;;  %v243_v15 = vld [vmem:[%s5196_s10 + $0x78] sm:$0xf]  ;;  %v245_v16 = vld [vmem:[%s5196_s10 + $0x80] sm:$0xf] }
  0x1c   : > { %226 = vst [vmem:[%s5201_s11 + $0x18] sm:$0xf] %v225_v6  ;;  %v247_v17 = vld [vmem:[%s5196_s10 + $0x88] sm:$0xf]  ;;  %v249_v18 = vld [vmem:[%s5196_s10 + $0x90] sm:$0xf] }
  0x1d   : > { %228 = vst [vmem:[%s5201_s11 + $0x1c] sm:$0xf] %v227_v7  ;;  %v251_v19 = vld [vmem:[%s5196_s10 + $0x98] sm:$0xf]  ;;  %v253_v20 = vld [vmem:[%s5196_s10 + $0xa0] sm:$0xf] }
  0x1e   : > { %230 = vst [vmem:[%s5201_s11 + $0x20] sm:$0xf] %v229_v8  ;;  %v255_v21 = vld [vmem:[%s5196_s10 + $0xa8] sm:$0xf]  ;;  %v257_v22 = vld [vmem:[%s5196_s10 + $0xb0] sm:$0xf] }
  0x1f   : > { %232 = vst [vmem:[%s5201_s11 + $0x24] sm:$0xf] %v231_v9  ;;  %v259_v23 = vld [vmem:[%s5196_s10 + $0xb8] sm:$0xf]  ;;  %v261_v24 = vld [vmem:[%s5196_s10 + $0xc0] sm:$0xf] }
  0x20   : > { %234 = vst [vmem:[%s5201_s11 + $0x28] sm:$0xf] %v233_v10  ;;  %v263_v25 = vld [vmem:[%s5196_s10 + $0xc8] sm:$0xf]  ;;  %v265_v26 = vld [vmem:[%s5196_s10 + $0xd0] sm:$0xf] }
  0x21   : > { %236 = vst [vmem:[%s5201_s11 + $0x2c] sm:$0xf] %v235_v11  ;;  %v267_v27 = vld [vmem:[%s5196_s10 + $0xd8] sm:$0xf]  ;;  %v269_v28 = vld [vmem:[%s5196_s10 + $0xe0] sm:$0xf] }
  0x22   : > { %238 = vst [vmem:[%s5201_s11 + $0x30] sm:$0xf] %v237_v12  ;;  %v271_v29 = vld [vmem:[%s5196_s10 + $0xe8] sm:$0xf]  ;;  %v273_v30 = vld [vmem:[%s5196_s10 + $0xf0] sm:$0xf] }
  0x23   : > { %240 = vst [vmem:[%s5201_s11 + $0x34] sm:$0xf] %v239_v13  ;;  %v275_v31 = vld [vmem:[%s5196_s10 + $0xf8] sm:$0xf]  ;;  %v277_v32 = vld [vmem:[%s5196_s10 + $0x100] sm:$0xf] }
  0x24   : > { %242 = vst [vmem:[%s5201_s11 + $0x38] sm:$0xf] %v241_v14  ;;  %v279_v33 = vld [vmem:[%s5196_s10 + $0x108] sm:$0xf]  ;;  %v281_v34 = vld [vmem:[%s5196_s10 + $0x110] sm:$0xf] }
  0x25   : > { %244 = vst [vmem:[%s5201_s11 + $0x3c] sm:$0xf] %v243_v15  ;;  %v283_v35 = vld [vmem:[%s5196_s10 + $0x118] sm:$0xf]  ;;  %v285_v36 = vld [vmem:[%s5196_s10 + $0x120] sm:$0xf] }
  0x26   : > { %246 = vst [vmem:[%s5201_s11 + $0x40] sm:$0xf] %v245_v16  ;;  %v287_v37 = vld [vmem:[%s5196_s10 + $0x128] sm:$0xf]  ;;  %v289_v38 = vld [vmem:[%s5196_s10 + $0x130] sm:$0xf] }
  0x27   : > { %248 = vst [vmem:[%s5201_s11 + $0x44] sm:$0xf] %v247_v17  ;;  %v291_v39 = vld [vmem:[%s5196_s10 + $0x138] sm:$0xf]  ;;  %v293_v40 = vld [vmem:[%s5196_s10 + $0x140] sm:$0xf] }
  0x28   : > { %250 = vst [vmem:[%s5201_s11 + $0x48] sm:$0xf] %v249_v18  ;;  %v295_v41 = vld [vmem:[%s5196_s10 + $0x148] sm:$0xf]  ;;  %v297_v42 = vld [vmem:[%s5196_s10 + $0x150] sm:$0xf] }
  0x29   : > { %252 = vst [vmem:[%s5201_s11 + $0x4c] sm:$0xf] %v251_v19  ;;  %v299_v43 = vld [vmem:[%s5196_s10 + $0x158] sm:$0xf]  ;;  %v301_v44 = vld [vmem:[%s5196_s10 + $0x160] sm:$0xf] }
  0x2a   : > { %254 = vst [vmem:[%s5201_s11 + $0x50] sm:$0xf] %v253_v20  ;;  %v303_v45 = vld [vmem:[%s5196_s10 + $0x168] sm:$0xf]  ;;  %v305_v46 = vld [vmem:[%s5196_s10 + $0x170] sm:$0xf] }
  0x2b   : > { %256 = vst [vmem:[%s5201_s11 + $0x54] sm:$0xf] %v255_v21  ;;  %v307_v47 = vld [vmem:[%s5196_s10 + $0x178] sm:$0xf]  ;;  %v309_v48 = vld [vmem:[%s5196_s10 + $0x180] sm:$0xf] }
  0x2c   : > { %258 = vst [vmem:[%s5201_s11 + $0x58] sm:$0xf] %v257_v22  ;;  %v311_v49 = vld [vmem:[%s5196_s10 + $0x188] sm:$0xf]  ;;  %v313_v50 = vld [vmem:[%s5196_s10 + $0x190] sm:$0xf] }
  0x2d   : > { %260 = vst [vmem:[%s5201_s11 + $0x5c] sm:$0xf] %v259_v23  ;;  %v315_v51 = vld [vmem:[%s5196_s10 + $0x198] sm:$0xf]  ;;  %v317_v52 = vld [vmem:[%s5196_s10 + $0x1a0] sm:$0xf] }
  0x2e   : > { %262 = vst [vmem:[%s5201_s11 + $0x60] sm:$0xf] %v261_v24  ;;  %v319_v53 = vld [vmem:[%s5196_s10 + $0x1a8] sm:$0xf]  ;;  %v321_v54 = vld [vmem:[%s5196_s10 + $0x1b0] sm:$0xf] }
  0x2f   : > { %264 = vst [vmem:[%s5201_s11 + $0x64] sm:$0xf] %v263_v25  ;;  %v323_v55 = vld [vmem:[%s5196_s10 + $0x1b8] sm:$0xf]  ;;  %v325_v56 = vld [vmem:[%s5196_s10 + $0x1c0] sm:$0xf] }
  0x30   : > { %266 = vst [vmem:[%s5201_s11 + $0x68] sm:$0xf] %v265_v26  ;;  %v327_v57 = vld [vmem:[%s5196_s10 + $0x1c8] sm:$0xf]  ;;  %v329_v58 = vld [vmem:[%s5196_s10 + $0x1d0] sm:$0xf] }
  0x31   : > { %268 = vst [vmem:[%s5201_s11 + $0x6c] sm:$0xf] %v267_v27  ;;  %v331_v59 = vld [vmem:[%s5196_s10 + $0x1d8] sm:$0xf]  ;;  %v333_v60 = vld [vmem:[%s5196_s10 + $0x1e0] sm:$0xf] }
  0x32   : > { %270 = vst [vmem:[%s5201_s11 + $0x70] sm:$0xf] %v269_v28  ;;  %v335_v61 = vld [vmem:[%s5196_s10 + $0x1e8] sm:$0xf]  ;;  %v337_v62 = vld [vmem:[%s5196_s10 + $0x1f0] sm:$0xf] }
  0x33   : > { %272 = vst [vmem:[%s5201_s11 + $0x74] sm:$0xf] %v271_v29  ;;  %v339_v63 = vld [vmem:[%s5196_s10 + $0x1f8] sm:$0xf]  ;;  %v341_v0 = vld [vmem:[%s5196_s10 + $0x200] sm:$0xf] }
  0x34   : > { %274 = vst [vmem:[%s5201_s11 + $0x78] sm:$0xf] %v273_v30  ;;  %v343_v1 = vld [vmem:[%s5196_s10 + $0x208] sm:$0xf]  ;;  %v345_v2 = vld [vmem:[%s5196_s10 + $0x210] sm:$0xf] }
  0x35   : > { %276 = vst [vmem:[%s5201_s11 + $0x7c] sm:$0xf] %v275_v31  ;;  %v347_v3 = vld [vmem:[%s5196_s10 + $0x218] sm:$0xf]  ;;  %v349_v4 = vld [vmem:[%s5196_s10 + $0x220] sm:$0xf] }
  0x36   : > { %278 = vst [vmem:[%s5201_s11 + $0x80] sm:$0xf] %v277_v32  ;;  %v351_v5 = vld [vmem:[%s5196_s10 + $0x228] sm:$0xf]  ;;  %v353_v6 = vld [vmem:[%s5196_s10 + $0x230] sm:$0xf] }
  0x37   : > { %280 = vst [vmem:[%s5201_s11 + $0x84] sm:$0xf] %v279_v33  ;;  %v355_v7 = vld [vmem:[%s5196_s10 + $0x238] sm:$0xf]  ;;  %v357_v8 = vld [vmem:[%s5196_s10 + $0x240] sm:$0xf] }
  0x38   : > { %282 = vst [vmem:[%s5201_s11 + $0x88] sm:$0xf] %v281_v34  ;;  %v359_v9 = vld [vmem:[%s5196_s10 + $0x248] sm:$0xf]  ;;  %v361_v10 = vld [vmem:[%s5196_s10 + $0x250] sm:$0xf] }
  0x39   : > { %284 = vst [vmem:[%s5201_s11 + $0x8c] sm:$0xf] %v283_v35  ;;  %v363_v11 = vld [vmem:[%s5196_s10 + $0x258] sm:$0xf]  ;;  %v365_v12 = vld [vmem:[%s5196_s10 + $0x260] sm:$0xf] }
  0x3a   : > { %286 = vst [vmem:[%s5201_s11 + $0x90] sm:$0xf] %v285_v36  ;;  %v367_v13 = vld [vmem:[%s5196_s10 + $0x268] sm:$0xf]  ;;  %v369_v14 = vld [vmem:[%s5196_s10 + $0x270] sm:$0xf] }
  0x3b   : > { %288 = vst [vmem:[%s5201_s11 + $0x94] sm:$0xf] %v287_v37  ;;  %v371_v15 = vld [vmem:[%s5196_s10 + $0x278] sm:$0xf]  ;;  %v373_v16 = vld [vmem:[%s5196_s10 + $0x280] sm:$0xf] }
  0x3c   : > { %290 = vst [vmem:[%s5201_s11 + $0x98] sm:$0xf] %v289_v38  ;;  %v375_v17 = vld [vmem:[%s5196_s10 + $0x288] sm:$0xf]  ;;  %v377_v18 = vld [vmem:[%s5196_s10 + $0x290] sm:$0xf] }
  0x3d   : > { %292 = vst [vmem:[%s5201_s11 + $0x9c] sm:$0xf] %v291_v39  ;;  %v379_v19 = vld [vmem:[%s5196_s10 + $0x298] sm:$0xf]  ;;  %v381_v20 = vld [vmem:[%s5196_s10 + $0x2a0] sm:$0xf] }
  0x3e   : > { %294 = vst [vmem:[%s5201_s11 + $0xa0] sm:$0xf] %v293_v40  ;;  %v383_v21 = vld [vmem:[%s5196_s10 + $0x2a8] sm:$0xf]  ;;  %v385_v22 = vld [vmem:[%s5196_s10 + $0x2b0] sm:$0xf] }
  0x3f   : > { %296 = vst [vmem:[%s5201_s11 + $0xa4] sm:$0xf] %v295_v41  ;;  %v387_v23 = vld [vmem:[%s5196_s10 + $0x2b8] sm:$0xf]  ;;  %v389_v24 = vld [vmem:[%s5196_s10 + $0x2c0] sm:$0xf] }
  0x40   : > { %298 = vst [vmem:[%s5201_s11 + $0xa8] sm:$0xf] %v297_v42  ;;  %v391_v25 = vld [vmem:[%s5196_s10 + $0x2c8] sm:$0xf]  ;;  %v393_v26 = vld [vmem:[%s5196_s10 + $0x2d0] sm:$0xf] }
  0x41   : > { %300 = vst [vmem:[%s5201_s11 + $0xac] sm:$0xf] %v299_v43  ;;  %v395_v27 = vld [vmem:[%s5196_s10 + $0x2d8] sm:$0xf]  ;;  %v397_v28 = vld [vmem:[%s5196_s10 + $0x2e0] sm:$0xf] }
  0x42   : > { %302 = vst [vmem:[%s5201_s11 + $0xb0] sm:$0xf] %v301_v44  ;;  %v399_v29 = vld [vmem:[%s5196_s10 + $0x2e8] sm:$0xf]  ;;  %v401_v30 = vld [vmem:[%s5196_s10 + $0x2f0] sm:$0xf] }
  0x43   : > { %304 = vst [vmem:[%s5201_s11 + $0xb4] sm:$0xf] %v303_v45  ;;  %v403_v31 = vld [vmem:[%s5196_s10 + $0x2f8] sm:$0xf]  ;;  %v405_v32 = vld [vmem:[%s5196_s10 + $0x300] sm:$0xf] }
  0x44   : > { %306 = vst [vmem:[%s5201_s11 + $0xb8] sm:$0xf] %v305_v46  ;;  %v407_v33 = vld [vmem:[%s5196_s10 + $0x308] sm:$0xf]  ;;  %v409_v34 = vld [vmem:[%s5196_s10 + $0x310] sm:$0xf] }
  0x45   : > { %308 = vst [vmem:[%s5201_s11 + $0xbc] sm:$0xf] %v307_v47  ;;  %v411_v35 = vld [vmem:[%s5196_s10 + $0x318] sm:$0xf]  ;;  %v413_v36 = vld [vmem:[%s5196_s10 + $0x320] sm:$0xf] }
  0x46   : > { %310 = vst [vmem:[%s5201_s11 + $0xc0] sm:$0xf] %v309_v48  ;;  %v415_v37 = vld [vmem:[%s5196_s10 + $0x328] sm:$0xf]  ;;  %v417_v38 = vld [vmem:[%s5196_s10 + $0x330] sm:$0xf] }
  0x47   : > { %312 = vst [vmem:[%s5201_s11 + $0xc4] sm:$0xf] %v311_v49  ;;  %v419_v39 = vld [vmem:[%s5196_s10 + $0x338] sm:$0xf]  ;;  %v421_v40 = vld [vmem:[%s5196_s10 + $0x340] sm:$0xf] }
  0x48   : > { %314 = vst [vmem:[%s5201_s11 + $0xc8] sm:$0xf] %v313_v50  ;;  %v423_v41 = vld [vmem:[%s5196_s10 + $0x348] sm:$0xf]  ;;  %v425_v42 = vld [vmem:[%s5196_s10 + $0x350] sm:$0xf] }
  0x49   : > { %316 = vst [vmem:[%s5201_s11 + $0xcc] sm:$0xf] %v315_v51  ;;  %v427_v43 = vld [vmem:[%s5196_s10 + $0x358] sm:$0xf]  ;;  %v429_v44 = vld [vmem:[%s5196_s10 + $0x360] sm:$0xf] }
  0x4a   : > { %318 = vst [vmem:[%s5201_s11 + $0xd0] sm:$0xf] %v317_v52  ;;  %v431_v45 = vld [vmem:[%s5196_s10 + $0x368] sm:$0xf]  ;;  %v433_v46 = vld [vmem:[%s5196_s10 + $0x370] sm:$0xf] }
  0x4b   : > { %320 = vst [vmem:[%s5201_s11 + $0xd4] sm:$0xf] %v319_v53  ;;  %v435_v47 = vld [vmem:[%s5196_s10 + $0x378] sm:$0xf]  ;;  %v437_v48 = vld [vmem:[%s5196_s10 + $0x380] sm:$0xf] }
  0x4c   : > { %322 = vst [vmem:[%s5201_s11 + $0xd8] sm:$0xf] %v321_v54  ;;  %v439_v49 = vld [vmem:[%s5196_s10 + $0x388] sm:$0xf]  ;;  %v441_v50 = vld [vmem:[%s5196_s10 + $0x390] sm:$0xf] }
  0x4d   : > { %324 = vst [vmem:[%s5201_s11 + $0xdc] sm:$0xf] %v323_v55  ;;  %v443_v51 = vld [vmem:[%s5196_s10 + $0x398] sm:$0xf]  ;;  %v445_v52 = vld [vmem:[%s5196_s10 + $0x3a0] sm:$0xf] }
  0x4e   : > { %326 = vst [vmem:[%s5201_s11 + $0xe0] sm:$0xf] %v325_v56  ;;  %v447_v53 = vld [vmem:[%s5196_s10 + $0x3a8] sm:$0xf]  ;;  %v449_v54 = vld [vmem:[%s5196_s10 + $0x3b0] sm:$0xf] }
  0x4f   : > { %328 = vst [vmem:[%s5201_s11 + $0xe4] sm:$0xf] %v327_v57  ;;  %v451_v55 = vld [vmem:[%s5196_s10 + $0x3b8] sm:$0xf]  ;;  %v453_v56 = vld [vmem:[%s5196_s10 + $0x3c0] sm:$0xf] }
  0x50   : > { %330 = vst [vmem:[%s5201_s11 + $0xe8] sm:$0xf] %v329_v58  ;;  %v455_v57 = vld [vmem:[%s5196_s10 + $0x3c8] sm:$0xf]  ;;  %v457_v58 = vld [vmem:[%s5196_s10 + $0x3d0] sm:$0xf] }
  0x51   : > { %332 = vst [vmem:[%s5201_s11 + $0xec] sm:$0xf] %v331_v59  ;;  %v459_v59 = vld [vmem:[%s5196_s10 + $0x3d8] sm:$0xf] }
  0x52   : > { %334 = vst [vmem:[%s5201_s11 + $0xf0] sm:$0xf] %v333_v60  ;;  %v461_v60 = vld [vmem:[%s5196_s10 + $0x3e0] sm:$0xf] }
  0x53   : > { %336 = vst [vmem:[%s5201_s11 + $0xf4] sm:$0xf] %v335_v61  ;;  %v463_v61 = vld [vmem:[%s5196_s10 + $0x3e8] sm:$0xf] }
  0x54   : > { %338 = vst [vmem:[%s5201_s11 + $0xf8] sm:$0xf] %v337_v62  ;;  %v465_v62 = vld [vmem:[%s5196_s10 + $0x3f0] sm:$0xf] }
  0x55   : > { %340 = vst [vmem:[%s5201_s11 + $0xfc] sm:$0xf] %v339_v63  ;;  %v467_v63 = vld [vmem:[%s5196_s10 + $0x3f8] sm:$0xf] }
  0x56   : > { %342 = vst [vmem:[%s5201_s11 + $0x100] sm:$0xf] %v341_v0  ;;  %v469_v0 = vld [vmem:[%s5196_s10 + $0x400] sm:$0xf] }
  0x57   : > { %344 = vst [vmem:[%s5201_s11 + $0x104] sm:$0xf] %v343_v1  ;;  %v471_v1 = vld [vmem:[%s5196_s10 + $0x408] sm:$0xf] }
  0x58   : > { %346 = vst [vmem:[%s5201_s11 + $0x108] sm:$0xf] %v345_v2  ;;  %v473_v2 = vld [vmem:[%s5196_s10 + $0x410] sm:$0xf] }
  0x59   : > { %348 = vst [vmem:[%s5201_s11 + $0x10c] sm:$0xf] %v347_v3  ;;  %v475_v3 = vld [vmem:[%s5196_s10 + $0x418] sm:$0xf] }
  0x5a   : > { %350 = vst [vmem:[%s5201_s11 + $0x110] sm:$0xf] %v349_v4  ;;  %v477_v4 = vld [vmem:[%s5196_s10 + $0x420] sm:$0xf] }
  0x5b   : > { %352 = vst [vmem:[%s5201_s11 + $0x114] sm:$0xf] %v351_v5  ;;  %v479_v5 = vld [vmem:[%s5196_s10 + $0x428] sm:$0xf] }
  0x5c   : > { %354 = vst [vmem:[%s5201_s11 + $0x118] sm:$0xf] %v353_v6  ;;  %v481_v6 = vld [vmem:[%s5196_s10 + $0x430] sm:$0xf] }
  0x5d   : > { %356 = vst [vmem:[%s5201_s11 + $0x11c] sm:$0xf] %v355_v7  ;;  %v483_v7 = vld [vmem:[%s5196_s10 + $0x438] sm:$0xf] }
  0x5e   : > { %358 = vst [vmem:[%s5201_s11 + $0x120] sm:$0xf] %v357_v8  ;;  %v485_v8 = vld [vmem:[%s5196_s10 + $0x440] sm:$0xf] }
  0x5f   : > { %360 = vst [vmem:[%s5201_s11 + $0x124] sm:$0xf] %v359_v9  ;;  %v487_v9 = vld [vmem:[%s5196_s10 + $0x448] sm:$0xf] }
  0x60   : > { %362 = vst [vmem:[%s5201_s11 + $0x128] sm:$0xf] %v361_v10  ;;  %v489_v10 = vld [vmem:[%s5196_s10 + $0x450] sm:$0xf] }
  0x61   : > { %364 = vst [vmem:[%s5201_s11 + $0x12c] sm:$0xf] %v363_v11  ;;  %v491_v11 = vld [vmem:[%s5196_s10 + $0x458] sm:$0xf] }
  0x62   : > { %366 = vst [vmem:[%s5201_s11 + $0x130] sm:$0xf] %v365_v12  ;;  %v493_v12 = vld [vmem:[%s5196_s10 + $0x460] sm:$0xf] }
  0x63   : > { %368 = vst [vmem:[%s5201_s11 + $0x134] sm:$0xf] %v367_v13  ;;  %v495_v13 = vld [vmem:[%s5196_s10 + $0x468] sm:$0xf] }
  0x64   : > { %370 = vst [vmem:[%s5201_s11 + $0x138] sm:$0xf] %v369_v14  ;;  %v497_v14 = vld [vmem:[%s5196_s10 + $0x470] sm:$0xf] }
  0x65   : > { %372 = vst [vmem:[%s5201_s11 + $0x13c] sm:$0xf] %v371_v15  ;;  %v499_v15 = vld [vmem:[%s5196_s10 + $0x478] sm:$0xf] }
  0x66   : > { %374 = vst [vmem:[%s5201_s11 + $0x140] sm:$0xf] %v373_v16  ;;  %v501_v16 = vld [vmem:[%s5196_s10 + $0x480] sm:$0xf] }
  0x67   : > { %376 = vst [vmem:[%s5201_s11 + $0x144] sm:$0xf] %v375_v17  ;;  %v503_v17 = vld [vmem:[%s5196_s10 + $0x488] sm:$0xf] }
  0x68   : > { %378 = vst [vmem:[%s5201_s11 + $0x148] sm:$0xf] %v377_v18  ;;  %v505_v18 = vld [vmem:[%s5196_s10 + $0x490] sm:$0xf] }
  0x69   : > { %380 = vst [vmem:[%s5201_s11 + $0x14c] sm:$0xf] %v379_v19  ;;  %v507_v19 = vld [vmem:[%s5196_s10 + $0x498] sm:$0xf] }
  0x6a   : > { %382 = vst [vmem:[%s5201_s11 + $0x150] sm:$0xf] %v381_v20  ;;  %v509_v20 = vld [vmem:[%s5196_s10 + $0x4a0] sm:$0xf] }
  0x6b   : > { %384 = vst [vmem:[%s5201_s11 + $0x154] sm:$0xf] %v383_v21  ;;  %v511_v21 = vld [vmem:[%s5196_s10 + $0x4a8] sm:$0xf] }
  0x6c   : > { %386 = vst [vmem:[%s5201_s11 + $0x158] sm:$0xf] %v385_v22  ;;  %v513_v22 = vld [vmem:[%s5196_s10 + $0x4b0] sm:$0xf] }
  0x6d   : > { %388 = vst [vmem:[%s5201_s11 + $0x15c] sm:$0xf] %v387_v23  ;;  %v515_v23 = vld [vmem:[%s5196_s10 + $0x4b8] sm:$0xf] }
  0x6e   : > { %390 = vst [vmem:[%s5201_s11 + $0x160] sm:$0xf] %v389_v24  ;;  %v517_v24 = vld [vmem:[%s5196_s10 + $0x4c0] sm:$0xf] }
  0x6f   : > { %392 = vst [vmem:[%s5201_s11 + $0x164] sm:$0xf] %v391_v25  ;;  %v519_v25 = vld [vmem:[%s5196_s10 + $0x4c8] sm:$0xf] }
  0x70   : > { %394 = vst [vmem:[%s5201_s11 + $0x168] sm:$0xf] %v393_v26  ;;  %v521_v26 = vld [vmem:[%s5196_s10 + $0x4d0] sm:$0xf] }
  0x71   : > { %396 = vst [vmem:[%s5201_s11 + $0x16c] sm:$0xf] %v395_v27  ;;  %v523_v27 = vld [vmem:[%s5196_s10 + $0x4d8] sm:$0xf] }
  0x72   : > { %398 = vst [vmem:[%s5201_s11 + $0x170] sm:$0xf] %v397_v28  ;;  %v525_v28 = vld [vmem:[%s5196_s10 + $0x4e0] sm:$0xf] }
  0x73   : > { %400 = vst [vmem:[%s5201_s11 + $0x174] sm:$0xf] %v399_v29  ;;  %v527_v29 = vld [vmem:[%s5196_s10 + $0x4e8] sm:$0xf] }
  0x74   : > { %402 = vst [vmem:[%s5201_s11 + $0x178] sm:$0xf] %v401_v30  ;;  %v529_v30 = vld [vmem:[%s5196_s10 + $0x4f0] sm:$0xf] }
  0x75   : > { %404 = vst [vmem:[%s5201_s11 + $0x17c] sm:$0xf] %v403_v31  ;;  %v531_v31 = vld [vmem:[%s5196_s10 + $0x4f8] sm:$0xf] }
  0x76   : > { %406 = vst [vmem:[%s5201_s11 + $0x180] sm:$0xf] %v405_v32  ;;  %v533_v32 = vld [vmem:[%s5196_s10 + $0x500] sm:$0xf] }
  0x77   : > { %408 = vst [vmem:[%s5201_s11 + $0x184] sm:$0xf] %v407_v33  ;;  %v535_v33 = vld [vmem:[%s5196_s10 + $0x508] sm:$0xf] }
  0x78   : > { %410 = vst [vmem:[%s5201_s11 + $0x188] sm:$0xf] %v409_v34  ;;  %v537_v34 = vld [vmem:[%s5196_s10 + $0x510] sm:$0xf] }
  0x79   : > { %412 = vst [vmem:[%s5201_s11 + $0x18c] sm:$0xf] %v411_v35  ;;  %v539_v35 = vld [vmem:[%s5196_s10 + $0x518] sm:$0xf] }
  0x7a   : > { %414 = vst [vmem:[%s5201_s11 + $0x190] sm:$0xf] %v413_v36  ;;  %v541_v36 = vld [vmem:[%s5196_s10 + $0x520] sm:$0xf] }
  0x7b   : > { %416 = vst [vmem:[%s5201_s11 + $0x194] sm:$0xf] %v415_v37  ;;  %v543_v37 = vld [vmem:[%s5196_s10 + $0x528] sm:$0xf] }
  0x7c   : > { %418 = vst [vmem:[%s5201_s11 + $0x198] sm:$0xf] %v417_v38  ;;  %v545_v38 = vld [vmem:[%s5196_s10 + $0x530] sm:$0xf] }
  0x7d   : > { %420 = vst [vmem:[%s5201_s11 + $0x19c] sm:$0xf] %v419_v39  ;;  %v547_v39 = vld [vmem:[%s5196_s10 + $0x538] sm:$0xf] }
  0x7e   : > { %422 = vst [vmem:[%s5201_s11 + $0x1a0] sm:$0xf] %v421_v40  ;;  %v549_v40 = vld [vmem:[%s5196_s10 + $0x540] sm:$0xf] }
  0x7f   : > { %424 = vst [vmem:[%s5201_s11 + $0x1a4] sm:$0xf] %v423_v41  ;;  %v551_v41 = vld [vmem:[%s5196_s10 + $0x548] sm:$0xf] }
  0x80   : > { %426 = vst [vmem:[%s5201_s11 + $0x1a8] sm:$0xf] %v425_v42  ;;  %v553_v42 = vld [vmem:[%s5196_s10 + $0x550] sm:$0xf] }
  0x81   : > { %428 = vst [vmem:[%s5201_s11 + $0x1ac] sm:$0xf] %v427_v43  ;;  %v555_v43 = vld [vmem:[%s5196_s10 + $0x558] sm:$0xf] }
  0x82   : > { %430 = vst [vmem:[%s5201_s11 + $0x1b0] sm:$0xf] %v429_v44  ;;  %v557_v44 = vld [vmem:[%s5196_s10 + $0x560] sm:$0xf] }
  0x83   : > { %432 = vst [vmem:[%s5201_s11 + $0x1b4] sm:$0xf] %v431_v45  ;;  %v559_v45 = vld [vmem:[%s5196_s10 + $0x568] sm:$0xf] }
  0x84   : > { %434 = vst [vmem:[%s5201_s11 + $0x1b8] sm:$0xf] %v433_v46  ;;  %v561_v46 = vld [vmem:[%s5196_s10 + $0x570] sm:$0xf] }
  0x85   : > { %436 = vst [vmem:[%s5201_s11 + $0x1bc] sm:$0xf] %v435_v47  ;;  %v563_v47 = vld [vmem:[%s5196_s10 + $0x578] sm:$0xf] }
  0x86   : > { %438 = vst [vmem:[%s5201_s11 + $0x1c0] sm:$0xf] %v437_v48  ;;  %v565_v48 = vld [vmem:[%s5196_s10 + $0x580] sm:$0xf] }
  0x87   : > { %440 = vst [vmem:[%s5201_s11 + $0x1c4] sm:$0xf] %v439_v49  ;;  %v567_v49 = vld [vmem:[%s5196_s10 + $0x588] sm:$0xf] }
  0x88   : > { %442 = vst [vmem:[%s5201_s11 + $0x1c8] sm:$0xf] %v441_v50  ;;  %v569_v50 = vld [vmem:[%s5196_s10 + $0x590] sm:$0xf] }
  0x89   : > { %444 = vst [vmem:[%s5201_s11 + $0x1cc] sm:$0xf] %v443_v51  ;;  %v571_v51 = vld [vmem:[%s5196_s10 + $0x598] sm:$0xf] }
  0x8a   : > { %446 = vst [vmem:[%s5201_s11 + $0x1d0] sm:$0xf] %v445_v52  ;;  %v573_v52 = vld [vmem:[%s5196_s10 + $0x5a0] sm:$0xf] }
  0x8b   : > { %448 = vst [vmem:[%s5201_s11 + $0x1d4] sm:$0xf] %v447_v53  ;;  %v575_v53 = vld [vmem:[%s5196_s10 + $0x5a8] sm:$0xf] }
  0x8c   : > { %450 = vst [vmem:[%s5201_s11 + $0x1d8] sm:$0xf] %v449_v54  ;;  %v577_v54 = vld [vmem:[%s5196_s10 + $0x5b0] sm:$0xf] }
  0x8d   : > { %452 = vst [vmem:[%s5201_s11 + $0x1dc] sm:$0xf] %v451_v55  ;;  %v579_v55 = vld [vmem:[%s5196_s10 + $0x5b8] sm:$0xf] }
  0x8e   : > { %454 = vst [vmem:[%s5201_s11 + $0x1e0] sm:$0xf] %v453_v56  ;;  %v581_v56 = vld [vmem:[%s5196_s10 + $0x5c0] sm:$0xf] }
  0x8f   : > { %456 = vst [vmem:[%s5201_s11 + $0x1e4] sm:$0xf] %v455_v57  ;;  %v583_v57 = vld [vmem:[%s5196_s10 + $0x5c8] sm:$0xf] }
  0x90   : > { %458 = vst [vmem:[%s5201_s11 + $0x1e8] sm:$0xf] %v457_v58  ;;  %v585_v58 = vld [vmem:[%s5196_s10 + $0x5d0] sm:$0xf] }
  0x91   : > { %460 = vst [vmem:[%s5201_s11 + $0x1ec] sm:$0xf] %v459_v59  ;;  %v587_v59 = vld [vmem:[%s5196_s10 + $0x5d8] sm:$0xf] }
  0x92   : > { %462 = vst [vmem:[%s5201_s11 + $0x1f0] sm:$0xf] %v461_v60  ;;  %v589_v60 = vld [vmem:[%s5196_s10 + $0x5e0] sm:$0xf] }
  0x93   : > { %464 = vst [vmem:[%s5201_s11 + $0x1f4] sm:$0xf] %v463_v61  ;;  %v591_v61 = vld [vmem:[%s5196_s10 + $0x5e8] sm:$0xf] }
  0x94   : > { %466 = vst [vmem:[%s5201_s11 + $0x1f8] sm:$0xf] %v465_v62  ;;  %v593_v62 = vld [vmem:[%s5196_s10 + $0x5f0] sm:$0xf] }
  0x95   : > { %468 = vst [vmem:[%s5201_s11 + $0x1fc] sm:$0xf] %v467_v63  ;;  %v595_v63 = vld [vmem:[%s5196_s10 + $0x5f8] sm:$0xf] }
  0x96   : > { %470 = vst [vmem:[%s5201_s11 + $0x200] sm:$0xf] %v469_v0  ;;  %v597_v0 = vld [vmem:[%s5196_s10 + $0x600] sm:$0xf] }
  0x97   : > { %472 = vst [vmem:[%s5201_s11 + $0x204] sm:$0xf] %v471_v1  ;;  %v599_v1 = vld [vmem:[%s5196_s10 + $0x608] sm:$0xf] }
  0x98   : > { %474 = vst [vmem:[%s5201_s11 + $0x208] sm:$0xf] %v473_v2  ;;  %v601_v2 = vld [vmem:[%s5196_s10 + $0x610] sm:$0xf] }
  0x99   : > { %476 = vst [vmem:[%s5201_s11 + $0x20c] sm:$0xf] %v475_v3  ;;  %v603_v3 = vld [vmem:[%s5196_s10 + $0x618] sm:$0xf] }
  0x9a   : > { %478 = vst [vmem:[%s5201_s11 + $0x210] sm:$0xf] %v477_v4  ;;  %v605_v4 = vld [vmem:[%s5196_s10 + $0x620] sm:$0xf] }
  0x9b   : > { %480 = vst [vmem:[%s5201_s11 + $0x214] sm:$0xf] %v479_v5  ;;  %v607_v5 = vld [vmem:[%s5196_s10 + $0x628] sm:$0xf] }
  0x9c   : > { %482 = vst [vmem:[%s5201_s11 + $0x218] sm:$0xf] %v481_v6  ;;  %v609_v6 = vld [vmem:[%s5196_s10 + $0x630] sm:$0xf] }
  0x9d   : > { %484 = vst [vmem:[%s5201_s11 + $0x21c] sm:$0xf] %v483_v7  ;;  %v611_v7 = vld [vmem:[%s5196_s10 + $0x638] sm:$0xf] }
  0x9e   : > { %486 = vst [vmem:[%s5201_s11 + $0x220] sm:$0xf] %v485_v8  ;;  %v613_v8 = vld [vmem:[%s5196_s10 + $0x640] sm:$0xf] }
  0x9f   : > { %488 = vst [vmem:[%s5201_s11 + $0x224] sm:$0xf] %v487_v9  ;;  %v615_v9 = vld [vmem:[%s5196_s10 + $0x648] sm:$0xf] }
  0xa0   : > { %490 = vst [vmem:[%s5201_s11 + $0x228] sm:$0xf] %v489_v10  ;;  %v617_v10 = vld [vmem:[%s5196_s10 + $0x650] sm:$0xf] }
  0xa1   : > { %492 = vst [vmem:[%s5201_s11 + $0x22c] sm:$0xf] %v491_v11  ;;  %v619_v11 = vld [vmem:[%s5196_s10 + $0x658] sm:$0xf] }
  0xa2   : > { %494 = vst [vmem:[%s5201_s11 + $0x230] sm:$0xf] %v493_v12  ;;  %v621_v12 = vld [vmem:[%s5196_s10 + $0x660] sm:$0xf] }
  0xa3   : > { %496 = vst [vmem:[%s5201_s11 + $0x234] sm:$0xf] %v495_v13  ;;  %v623_v13 = vld [vmem:[%s5196_s10 + $0x668] sm:$0xf] }
  0xa4   : > { %498 = vst [vmem:[%s5201_s11 + $0x238] sm:$0xf] %v497_v14  ;;  %v625_v14 = vld [vmem:[%s5196_s10 + $0x670] sm:$0xf] }
  0xa5   : > { %500 = vst [vmem:[%s5201_s11 + $0x23c] sm:$0xf] %v499_v15  ;;  %v627_v15 = vld [vmem:[%s5196_s10 + $0x678] sm:$0xf] }
  0xa6   : > { %502 = vst [vmem:[%s5201_s11 + $0x240] sm:$0xf] %v501_v16  ;;  %v629_v16 = vld [vmem:[%s5196_s10 + $0x680] sm:$0xf] }
  0xa7   : > { %504 = vst [vmem:[%s5201_s11 + $0x244] sm:$0xf] %v503_v17  ;;  %v631_v17 = vld [vmem:[%s5196_s10 + $0x688] sm:$0xf] }
  0xa8   : > { %506 = vst [vmem:[%s5201_s11 + $0x248] sm:$0xf] %v505_v18  ;;  %v633_v18 = vld [vmem:[%s5196_s10 + $0x690] sm:$0xf] }
  0xa9   : > { %508 = vst [vmem:[%s5201_s11 + $0x24c] sm:$0xf] %v507_v19  ;;  %v635_v19 = vld [vmem:[%s5196_s10 + $0x698] sm:$0xf] }
  0xaa   : > { %510 = vst [vmem:[%s5201_s11 + $0x250] sm:$0xf] %v509_v20  ;;  %v637_v20 = vld [vmem:[%s5196_s10 + $0x6a0] sm:$0xf] }
  0xab   : > { %512 = vst [vmem:[%s5201_s11 + $0x254] sm:$0xf] %v511_v21  ;;  %v639_v21 = vld [vmem:[%s5196_s10 + $0x6a8] sm:$0xf] }
  0xac   : > { %514 = vst [vmem:[%s5201_s11 + $0x258] sm:$0xf] %v513_v22  ;;  %v641_v22 = vld [vmem:[%s5196_s10 + $0x6b0] sm:$0xf] }
  0xad   : > { %516 = vst [vmem:[%s5201_s11 + $0x25c] sm:$0xf] %v515_v23  ;;  %v643_v23 = vld [vmem:[%s5196_s10 + $0x6b8] sm:$0xf] }
  0xae   : > { %518 = vst [vmem:[%s5201_s11 + $0x260] sm:$0xf] %v517_v24  ;;  %v645_v24 = vld [vmem:[%s5196_s10 + $0x6c0] sm:$0xf] }
  0xaf   : > { %520 = vst [vmem:[%s5201_s11 + $0x264] sm:$0xf] %v519_v25  ;;  %v647_v25 = vld [vmem:[%s5196_s10 + $0x6c8] sm:$0xf] }
  0xb0   : > { %522 = vst [vmem:[%s5201_s11 + $0x268] sm:$0xf] %v521_v26  ;;  %v649_v26 = vld [vmem:[%s5196_s10 + $0x6d0] sm:$0xf] }
  0xb1   : > { %524 = vst [vmem:[%s5201_s11 + $0x26c] sm:$0xf] %v523_v27  ;;  %v651_v27 = vld [vmem:[%s5196_s10 + $0x6d8] sm:$0xf] }
  0xb2   : > { %526 = vst [vmem:[%s5201_s11 + $0x270] sm:$0xf] %v525_v28  ;;  %v653_v28 = vld [vmem:[%s5196_s10 + $0x6e0] sm:$0xf] }
  0xb3   : > { %528 = vst [vmem:[%s5201_s11 + $0x274] sm:$0xf] %v527_v29  ;;  %v655_v29 = vld [vmem:[%s5196_s10 + $0x6e8] sm:$0xf] }
  0xb4   : > { %530 = vst [vmem:[%s5201_s11 + $0x278] sm:$0xf] %v529_v30  ;;  %v657_v30 = vld [vmem:[%s5196_s10 + $0x6f0] sm:$0xf] }
  0xb5   : > { %532 = vst [vmem:[%s5201_s11 + $0x27c] sm:$0xf] %v531_v31  ;;  %v659_v31 = vld [vmem:[%s5196_s10 + $0x6f8] sm:$0xf] }
  0xb6   : > { %534 = vst [vmem:[%s5201_s11 + $0x280] sm:$0xf] %v533_v32  ;;  %v661_v32 = vld [vmem:[%s5196_s10 + $0x700] sm:$0xf] }
  0xb7   : > { %536 = vst [vmem:[%s5201_s11 + $0x284] sm:$0xf] %v535_v33  ;;  %v663_v33 = vld [vmem:[%s5196_s10 + $0x708] sm:$0xf] }
  0xb8   : > { %538 = vst [vmem:[%s5201_s11 + $0x288] sm:$0xf] %v537_v34  ;;  %v665_v34 = vld [vmem:[%s5196_s10 + $0x710] sm:$0xf] }
  0xb9   : > { %540 = vst [vmem:[%s5201_s11 + $0x28c] sm:$0xf] %v539_v35  ;;  %v667_v35 = vld [vmem:[%s5196_s10 + $0x718] sm:$0xf] }
  0xba   : > { %542 = vst [vmem:[%s5201_s11 + $0x290] sm:$0xf] %v541_v36  ;;  %v669_v36 = vld [vmem:[%s5196_s10 + $0x720] sm:$0xf] }
  0xbb   : > { %544 = vst [vmem:[%s5201_s11 + $0x294] sm:$0xf] %v543_v37  ;;  %v671_v37 = vld [vmem:[%s5196_s10 + $0x728] sm:$0xf] }
  0xbc   : > { %546 = vst [vmem:[%s5201_s11 + $0x298] sm:$0xf] %v545_v38  ;;  %v673_v38 = vld [vmem:[%s5196_s10 + $0x730] sm:$0xf] }
  0xbd   : > { %548 = vst [vmem:[%s5201_s11 + $0x29c] sm:$0xf] %v547_v39  ;;  %v675_v39 = vld [vmem:[%s5196_s10 + $0x738] sm:$0xf] }
  0xbe   : > { %550 = vst [vmem:[%s5201_s11 + $0x2a0] sm:$0xf] %v549_v40  ;;  %v677_v40 = vld [vmem:[%s5196_s10 + $0x740] sm:$0xf] }
  0xbf   : > { %552 = vst [vmem:[%s5201_s11 + $0x2a4] sm:$0xf] %v551_v41  ;;  %v679_v41 = vld [vmem:[%s5196_s10 + $0x748] sm:$0xf] }
  0xc0   : > { %554 = vst [vmem:[%s5201_s11 + $0x2a8] sm:$0xf] %v553_v42  ;;  %v681_v42 = vld [vmem:[%s5196_s10 + $0x750] sm:$0xf] }
  0xc1   : > { %556 = vst [vmem:[%s5201_s11 + $0x2ac] sm:$0xf] %v555_v43  ;;  %v683_v43 = vld [vmem:[%s5196_s10 + $0x758] sm:$0xf] }
  0xc2   : > { %558 = vst [vmem:[%s5201_s11 + $0x2b0] sm:$0xf] %v557_v44  ;;  %v685_v44 = vld [vmem:[%s5196_s10 + $0x760] sm:$0xf] }
  0xc3   : > { %560 = vst [vmem:[%s5201_s11 + $0x2b4] sm:$0xf] %v559_v45  ;;  %v687_v45 = vld [vmem:[%s5196_s10 + $0x768] sm:$0xf] }
  0xc4   : > { %562 = vst [vmem:[%s5201_s11 + $0x2b8] sm:$0xf] %v561_v46  ;;  %v689_v46 = vld [vmem:[%s5196_s10 + $0x770] sm:$0xf] }
  0xc5   : > { %564 = vst [vmem:[%s5201_s11 + $0x2bc] sm:$0xf] %v563_v47  ;;  %v691_v47 = vld [vmem:[%s5196_s10 + $0x778] sm:$0xf] }
  0xc6   : > { %566 = vst [vmem:[%s5201_s11 + $0x2c0] sm:$0xf] %v565_v48  ;;  %v693_v48 = vld [vmem:[%s5196_s10 + $0x780] sm:$0xf] }
  0xc7   : > { %568 = vst [vmem:[%s5201_s11 + $0x2c4] sm:$0xf] %v567_v49  ;;  %v695_v49 = vld [vmem:[%s5196_s10 + $0x788] sm:$0xf] }
  0xc8   : > { %570 = vst [vmem:[%s5201_s11 + $0x2c8] sm:$0xf] %v569_v50  ;;  %v697_v50 = vld [vmem:[%s5196_s10 + $0x790] sm:$0xf] }
  0xc9   : > { %572 = vst [vmem:[%s5201_s11 + $0x2cc] sm:$0xf] %v571_v51  ;;  %v699_v51 = vld [vmem:[%s5196_s10 + $0x798] sm:$0xf] }
  0xca   : > { %574 = vst [vmem:[%s5201_s11 + $0x2d0] sm:$0xf] %v573_v52  ;;  %v701_v52 = vld [vmem:[%s5196_s10 + $0x7a0] sm:$0xf] }
  0xcb   : > { %576 = vst [vmem:[%s5201_s11 + $0x2d4] sm:$0xf] %v575_v53  ;;  %v703_v53 = vld [vmem:[%s5196_s10 + $0x7a8] sm:$0xf] }
  0xcc   : > { %578 = vst [vmem:[%s5201_s11 + $0x2d8] sm:$0xf] %v577_v54  ;;  %v705_v54 = vld [vmem:[%s5196_s10 + $0x7b0] sm:$0xf] }
  0xcd   : > { %580 = vst [vmem:[%s5201_s11 + $0x2dc] sm:$0xf] %v579_v55  ;;  %v707_v55 = vld [vmem:[%s5196_s10 + $0x7b8] sm:$0xf] }
  0xce   : > { %582 = vst [vmem:[%s5201_s11 + $0x2e0] sm:$0xf] %v581_v56  ;;  %v709_v56 = vld [vmem:[%s5196_s10 + $0x7c0] sm:$0xf] }
  0xcf   : > { %584 = vst [vmem:[%s5201_s11 + $0x2e4] sm:$0xf] %v583_v57  ;;  %v711_v57 = vld [vmem:[%s5196_s10 + $0x7c8] sm:$0xf] }
  0xd0   : > { %586 = vst [vmem:[%s5201_s11 + $0x2e8] sm:$0xf] %v585_v58  ;;  %v713_v58 = vld [vmem:[%s5196_s10 + $0x7d0] sm:$0xf] }
  0xd1   : > { %588 = vst [vmem:[%s5201_s11 + $0x2ec] sm:$0xf] %v587_v59  ;;  %v715_v59 = vld [vmem:[%s5196_s10 + $0x7d8] sm:$0xf] }
  0xd2   : > { %590 = vst [vmem:[%s5201_s11 + $0x2f0] sm:$0xf] %v589_v60  ;;  %v717_v60 = vld [vmem:[%s5196_s10 + $0x7e0] sm:$0xf] }
  0xd3   : > { %592 = vst [vmem:[%s5201_s11 + $0x2f4] sm:$0xf] %v591_v61  ;;  %v719_v61 = vld [vmem:[%s5196_s10 + $0x7e8] sm:$0xf] }
  0xd4   : > { %594 = vst [vmem:[%s5201_s11 + $0x2f8] sm:$0xf] %v593_v62  ;;  %v721_v62 = vld [vmem:[%s5196_s10 + $0x7f0] sm:$0xf] }
  0xd5   : > { %596 = vst [vmem:[%s5201_s11 + $0x2fc] sm:$0xf] %v595_v63  ;;  %v723_v63 = vld [vmem:[%s5196_s10 + $0x7f8] sm:$0xf] }
  0xd6   : > { %598 = vst [vmem:[%s5201_s11 + $0x300] sm:$0xf] %v597_v0  ;;  %v725_v0 = vld [vmem:[%s5196_s10 + $0x800] sm:$0xf] }
  0xd7   : > { %600 = vst [vmem:[%s5201_s11 + $0x304] sm:$0xf] %v599_v1  ;;  %v727_v1 = vld [vmem:[%s5196_s10 + $0x808] sm:$0xf] }
  0xd8   : > { %602 = vst [vmem:[%s5201_s11 + $0x308] sm:$0xf] %v601_v2  ;;  %v729_v2 = vld [vmem:[%s5196_s10 + $0x810] sm:$0xf] }
  0xd9   : > { %604 = vst [vmem:[%s5201_s11 + $0x30c] sm:$0xf] %v603_v3  ;;  %v731_v3 = vld [vmem:[%s5196_s10 + $0x818] sm:$0xf] }
  0xda   : > { %606 = vst [vmem:[%s5201_s11 + $0x310] sm:$0xf] %v605_v4  ;;  %v733_v4 = vld [vmem:[%s5196_s10 + $0x820] sm:$0xf] }
  0xdb   : > { %608 = vst [vmem:[%s5201_s11 + $0x314] sm:$0xf] %v607_v5  ;;  %v735_v5 = vld [vmem:[%s5196_s10 + $0x828] sm:$0xf] }
  0xdc   : > { %610 = vst [vmem:[%s5201_s11 + $0x318] sm:$0xf] %v609_v6  ;;  %v737_v6 = vld [vmem:[%s5196_s10 + $0x830] sm:$0xf] }
  0xdd   : > { %612 = vst [vmem:[%s5201_s11 + $0x31c] sm:$0xf] %v611_v7  ;;  %v739_v7 = vld [vmem:[%s5196_s10 + $0x838] sm:$0xf] }
  0xde   : > { %614 = vst [vmem:[%s5201_s11 + $0x320] sm:$0xf] %v613_v8  ;;  %v741_v8 = vld [vmem:[%s5196_s10 + $0x840] sm:$0xf] }
  0xdf   : > { %616 = vst [vmem:[%s5201_s11 + $0x324] sm:$0xf] %v615_v9  ;;  %v743_v9 = vld [vmem:[%s5196_s10 + $0x848] sm:$0xf] }
  0xe0   : > { %618 = vst [vmem:[%s5201_s11 + $0x328] sm:$0xf] %v617_v10  ;;  %v745_v10 = vld [vmem:[%s5196_s10 + $0x850] sm:$0xf] }
  0xe1   : > { %620 = vst [vmem:[%s5201_s11 + $0x32c] sm:$0xf] %v619_v11  ;;  %v747_v11 = vld [vmem:[%s5196_s10 + $0x858] sm:$0xf] }
  0xe2   : > { %622 = vst [vmem:[%s5201_s11 + $0x330] sm:$0xf] %v621_v12  ;;  %v749_v12 = vld [vmem:[%s5196_s10 + $0x860] sm:$0xf] }
  0xe3   : > { %624 = vst [vmem:[%s5201_s11 + $0x334] sm:$0xf] %v623_v13  ;;  %v751_v13 = vld [vmem:[%s5196_s10 + $0x868] sm:$0xf] }
  0xe4   : > { %626 = vst [vmem:[%s5201_s11 + $0x338] sm:$0xf] %v625_v14  ;;  %v753_v14 = vld [vmem:[%s5196_s10 + $0x870] sm:$0xf] }
  0xe5   : > { %628 = vst [vmem:[%s5201_s11 + $0x33c] sm:$0xf] %v627_v15  ;;  %v755_v15 = vld [vmem:[%s5196_s10 + $0x878] sm:$0xf] }
  0xe6   : > { %630 = vst [vmem:[%s5201_s11 + $0x340] sm:$0xf] %v629_v16  ;;  %v757_v16 = vld [vmem:[%s5196_s10 + $0x880] sm:$0xf] }
  0xe7   : > { %632 = vst [vmem:[%s5201_s11 + $0x344] sm:$0xf] %v631_v17  ;;  %v759_v17 = vld [vmem:[%s5196_s10 + $0x888] sm:$0xf] }
  0xe8   : > { %634 = vst [vmem:[%s5201_s11 + $0x348] sm:$0xf] %v633_v18  ;;  %v761_v18 = vld [vmem:[%s5196_s10 + $0x890] sm:$0xf] }
  0xe9   : > { %636 = vst [vmem:[%s5201_s11 + $0x34c] sm:$0xf] %v635_v19  ;;  %v763_v19 = vld [vmem:[%s5196_s10 + $0x898] sm:$0xf] }
  0xea   : > { %638 = vst [vmem:[%s5201_s11 + $0x350] sm:$0xf] %v637_v20  ;;  %v765_v20 = vld [vmem:[%s5196_s10 + $0x8a0] sm:$0xf] }
  0xeb   : > { %640 = vst [vmem:[%s5201_s11 + $0x354] sm:$0xf] %v639_v21  ;;  %v767_v21 = vld [vmem:[%s5196_s10 + $0x8a8] sm:$0xf] }
  0xec   : > { %642 = vst [vmem:[%s5201_s11 + $0x358] sm:$0xf] %v641_v22  ;;  %v769_v22 = vld [vmem:[%s5196_s10 + $0x8b0] sm:$0xf] }
  0xed   : > { %644 = vst [vmem:[%s5201_s11 + $0x35c] sm:$0xf] %v643_v23  ;;  %v771_v23 = vld [vmem:[%s5196_s10 + $0x8b8] sm:$0xf] }
  0xee   : > { %646 = vst [vmem:[%s5201_s11 + $0x360] sm:$0xf] %v645_v24  ;;  %v773_v24 = vld [vmem:[%s5196_s10 + $0x8c0] sm:$0xf] }
  0xef   : > { %648 = vst [vmem:[%s5201_s11 + $0x364] sm:$0xf] %v647_v25  ;;  %v775_v25 = vld [vmem:[%s5196_s10 + $0x8c8] sm:$0xf] }
  0xf0   : > { %650 = vst [vmem:[%s5201_s11 + $0x368] sm:$0xf] %v649_v26  ;;  %v777_v26 = vld [vmem:[%s5196_s10 + $0x8d0] sm:$0xf] }
  0xf1   : > { %652 = vst [vmem:[%s5201_s11 + $0x36c] sm:$0xf] %v651_v27  ;;  %v779_v27 = vld [vmem:[%s5196_s10 + $0x8d8] sm:$0xf] }
  0xf2   : > { %654 = vst [vmem:[%s5201_s11 + $0x370] sm:$0xf] %v653_v28  ;;  %v781_v28 = vld [vmem:[%s5196_s10 + $0x8e0] sm:$0xf] }
  0xf3   : > { %656 = vst [vmem:[%s5201_s11 + $0x374] sm:$0xf] %v655_v29  ;;  %v783_v29 = vld [vmem:[%s5196_s10 + $0x8e8] sm:$0xf] }
  0xf4   : > { %658 = vst [vmem:[%s5201_s11 + $0x378] sm:$0xf] %v657_v30  ;;  %v785_v30 = vld [vmem:[%s5196_s10 + $0x8f0] sm:$0xf] }
  0xf5   : > { %660 = vst [vmem:[%s5201_s11 + $0x37c] sm:$0xf] %v659_v31  ;;  %v787_v31 = vld [vmem:[%s5196_s10 + $0x8f8] sm:$0xf] }
  0xf6   : > { %662 = vst [vmem:[%s5201_s11 + $0x380] sm:$0xf] %v661_v32 }
  0xf7   : > { %664 = vst [vmem:[%s5201_s11 + $0x384] sm:$0xf] %v663_v33 }
  0xf8   : > { %666 = vst [vmem:[%s5201_s11 + $0x388] sm:$0xf] %v665_v34 }
  0xf9   : > { %668 = vst [vmem:[%s5201_s11 + $0x38c] sm:$0xf] %v667_v35 }
  0xfa   : > { %670 = vst [vmem:[%s5201_s11 + $0x390] sm:$0xf] %v669_v36 }
  0xfb   : > { %672 = vst [vmem:[%s5201_s11 + $0x394] sm:$0xf] %v671_v37 }
  0xfc   : > { %674 = vst [vmem:[%s5201_s11 + $0x398] sm:$0xf] %v673_v38 }
  0xfd   : > { %676 = vst [vmem:[%s5201_s11 + $0x39c] sm:$0xf] %v675_v39 }
  0xfe   : > { %678 = vst [vmem:[%s5201_s11 + $0x3a0] sm:$0xf] %v677_v40 }
  0xff   : > { %680 = vst [vmem:[%s5201_s11 + $0x3a4] sm:$0xf] %v679_v41 }
 0x100   : > { %682 = vst [vmem:[%s5201_s11 + $0x3a8] sm:$0xf] %v681_v42 }
 0x101   : > { %684 = vst [vmem:[%s5201_s11 + $0x3ac] sm:$0xf] %v683_v43 }
 0x102   : > { %686 = vst [vmem:[%s5201_s11 + $0x3b0] sm:$0xf] %v685_v44 }
 0x103   : > { %688 = vst [vmem:[%s5201_s11 + $0x3b4] sm:$0xf] %v687_v45 }
 0x104   : > { %690 = vst [vmem:[%s5201_s11 + $0x3b8] sm:$0xf] %v689_v46 }
 0x105   : > { %692 = vst [vmem:[%s5201_s11 + $0x3bc] sm:$0xf] %v691_v47 }
 0x106   : > { %694 = vst [vmem:[%s5201_s11 + $0x3c0] sm:$0xf] %v693_v48 }
 0x107   : > { %696 = vst [vmem:[%s5201_s11 + $0x3c4] sm:$0xf] %v695_v49 }
 0x108   : > { %698 = vst [vmem:[%s5201_s11 + $0x3c8] sm:$0xf] %v697_v50 }
 0x109   : > { %700 = vst [vmem:[%s5201_s11 + $0x3cc] sm:$0xf] %v699_v51 }
 0x10a   : > { %702 = vst [vmem:[%s5201_s11 + $0x3d0] sm:$0xf] %v701_v52 }
 0x10b   : > { %704 = vst [vmem:[%s5201_s11 + $0x3d4] sm:$0xf] %v703_v53 }
 0x10c   : > { %706 = vst [vmem:[%s5201_s11 + $0x3d8] sm:$0xf] %v705_v54 }
 0x10d   : > { %708 = vst [vmem:[%s5201_s11 + $0x3dc] sm:$0xf] %v707_v55 }
 0x10e   : > { %710 = vst [vmem:[%s5201_s11 + $0x3e0] sm:$0xf] %v709_v56 }
 0x10f   : > { %712 = vst [vmem:[%s5201_s11 + $0x3e4] sm:$0xf] %v711_v57 }
 0x110   : > { %714 = vst [vmem:[%s5201_s11 + $0x3e8] sm:$0xf] %v713_v58 }
 0x111   : > { %716 = vst [vmem:[%s5201_s11 + $0x3ec] sm:$0xf] %v715_v59 }
 0x112   : > { %718 = vst [vmem:[%s5201_s11 + $0x3f0] sm:$0xf] %v717_v60 }
 0x113   : > { %720 = vst [vmem:[%s5201_s11 + $0x3f4] sm:$0xf] %v719_v61 }
 0x114   : > { %722 = vst [vmem:[%s5201_s11 + $0x3f8] sm:$0xf] %v721_v62 }
 0x115   : > { %724 = vst [vmem:[%s5201_s11 + $0x3fc] sm:$0xf] %v723_v63 }
 0x116   : > { %726 = vst [vmem:[%s5201_s11 + $0x400] sm:$0xf] %v725_v0 }
 0x117   : > { %728 = vst [vmem:[%s5201_s11 + $0x404] sm:$0xf] %v727_v1 }
 0x118   : > { %730 = vst [vmem:[%s5201_s11 + $0x408] sm:$0xf] %v729_v2 }
 0x119   : > { %732 = vst [vmem:[%s5201_s11 + $0x40c] sm:$0xf] %v731_v3 }
 0x11a   : > { %734 = vst [vmem:[%s5201_s11 + $0x410] sm:$0xf] %v733_v4 }
 0x11b   : > { %736 = vst [vmem:[%s5201_s11 + $0x414] sm:$0xf] %v735_v5 }
 0x11c   : > { %738 = vst [vmem:[%s5201_s11 + $0x418] sm:$0xf] %v737_v6 }
 0x11d   : > { %740 = vst [vmem:[%s5201_s11 + $0x41c] sm:$0xf] %v739_v7 }
 0x11e   : > { %742 = vst [vmem:[%s5201_s11 + $0x420] sm:$0xf] %v741_v8 }
 0x11f   : > { %744 = vst [vmem:[%s5201_s11 + $0x424] sm:$0xf] %v743_v9 }
 0x120   : > { %746 = vst [vmem:[%s5201_s11 + $0x428] sm:$0xf] %v745_v10 }
 0x121   : > { %748 = vst [vmem:[%s5201_s11 + $0x42c] sm:$0xf] %v747_v11 }
 0x122   : > { %750 = vst [vmem:[%s5201_s11 + $0x430] sm:$0xf] %v749_v12 }
 0x123   : > { %752 = vst [vmem:[%s5201_s11 + $0x434] sm:$0xf] %v751_v13 }
 0x124   : > { %754 = vst [vmem:[%s5201_s11 + $0x438] sm:$0xf] %v753_v14 }
 0x125   : > { %756 = vst [vmem:[%s5201_s11 + $0x43c] sm:$0xf] %v755_v15 }
 0x126   : > { %758 = vst [vmem:[%s5201_s11 + $0x440] sm:$0xf] %v757_v16 }
 0x127   : > { %760 = vst [vmem:[%s5201_s11 + $0x444] sm:$0xf] %v759_v17 }
 0x128   : > { %762 = vst [vmem:[%s5201_s11 + $0x448] sm:$0xf] %v761_v18 }
 0x129   : > { %764 = vst [vmem:[%s5201_s11 + $0x44c] sm:$0xf] %v763_v19 }
 0x12a   : > { %766 = vst [vmem:[%s5201_s11 + $0x450] sm:$0xf] %v765_v20 }
 0x12b   : > { %768 = vst [vmem:[%s5201_s11 + $0x454] sm:$0xf] %v767_v21 }
 0x12c   : > { %770 = vst [vmem:[%s5201_s11 + $0x458] sm:$0xf] %v769_v22 }
 0x12d   : > { %772 = vst [vmem:[%s5201_s11 + $0x45c] sm:$0xf] %v771_v23 }
 0x12e   : > { %774 = vst [vmem:[%s5201_s11 + $0x460] sm:$0xf] %v773_v24 }
 0x12f   : > { %776 = vst [vmem:[%s5201_s11 + $0x464] sm:$0xf] %v775_v25 }
 0x130   : > { %778 = vst [vmem:[%s5201_s11 + $0x468] sm:$0xf] %v777_v26 }
 0x131   : > { %780 = vst [vmem:[%s5201_s11 + $0x46c] sm:$0xf] %v779_v27 }
 0x132   : > { %782 = vst [vmem:[%s5201_s11 + $0x470] sm:$0xf] %v781_v28 }
 0x133   : > { %784 = vst [vmem:[%s5201_s11 + $0x474] sm:$0xf] %v783_v29 }
 0x134   : > { %786 = vst [vmem:[%s5201_s11 + $0x478] sm:$0xf] %v785_v30 }
 0x135   : > { %788 = vst [vmem:[%s5201_s11 + $0x47c] sm:$0xf] %v787_v31 }
 0x136 PF: > { %p4277_p10 = scmp.ge.s32.totalorder %s5109_s21, 1  ;;  %p2577_p11 = scmp.lt.s32.totalorder %s5109_s21, 3 }
 0x138   : > { %p2578_p12 = pnand %p4277_p10, %p2577_p11 }
 0x139   : > { %s5779_s12 = sand.u32 (!%p2578_p12), 1, %s5101_s19   ;;  %p2621_p13 = scmp.lt.s32.totalorder (!%p2578_p12), %s5162_s22, 1 }
 0x13a   : > { %2581 = sbr.rel (%p2578_p12) target bundleno = 679 (0x2a7), region = 84  ;;  %s4278_s9 = sshll.u32 (!%p2578_p12), %s5779_s12, 2 }
 0x13b   : > { %s5005_s13 = smul.u32 (!%p2578_p12), 1152, %s5779_s12  ;;  %s4857_s10 = sshll.u32 (!%p2578_p12), %s5162_s22, 2 }
 0x13c   : > { %s4153_s16 = scalar_lea.hbm (!%p2578_p12), %s6005_s5, %s4857_s10  ;;  %s2620_s26 = scalar_lea.vmem (!%p2578_p12), [#allocation3], %s4278_s9 }
 0x13d   : > { %s5782_s14 = scalar_lea.vmem (!%p2578_p12), [#allocation2], %s5005_s13  ;;  %s4157_s6 = sshll.u32 (!%p2578_p12), %s4153_s16, 4  ;;  %s4158_s6 = int_to_ptr.hbm [resolvable:$true] %s4157_s6 }
 0x13e   : > { %s5067_s9 = scalar_lea.hbm (!%p2578_p12), %s6005_s5, 8 }
 0x13f   : > { %v4867_v32 = vld [vmem:[%s5782_s14 + $0x38] sm:$0xff]  ;;  %v4866_v36 = vld [vmem:[%s5782_s14 + $0x30] sm:$0xff]  ;;  %v4865_v40 = vld [vmem:[%s5782_s14 + $0x28] sm:$0xff] }
 0x140   : > { %v4875_v33 = vld [vmem:[%s5782_s14 + $0x78] sm:$0xff]  ;;  %3855 = vmatpush.bf16.msra.mxu0 %v4867_v32  ;;  %v4874_v37 = vld [vmem:[%s5782_s14 + $0x70] sm:$0xff]  ;;  %v4873_v41 = vld [vmem:[%s5782_s14 + $0x68] sm:$0xff] }
 0x141   : > { %v4883_v34 = vld [vmem:[%s5782_s14 + $0xb8] sm:$0xff]  ;;  %3868 = vmatpush.bf16.msra.mxu1 %v4875_v33  ;;  %v4882_v38 = vld [vmem:[%s5782_s14 + $0xb0] sm:$0xff]  ;;  %v4881_v42 = vld [vmem:[%s5782_s14 + $0xa8] sm:$0xff] }
 0x142   : > { %v4891_v35 = vld [vmem:[%s5782_s14 + $0xf8] sm:$0xff]  ;;  %3881 = vmatpush.bf16.msra.mxu2 %v4883_v34  ;;  %v4890_v39 = vld [vmem:[%s5782_s14 + $0xf0] sm:$0xff]  ;;  %v4889_v43 = vld [vmem:[%s5782_s14 + $0xe8] sm:$0xff] }
 0x143   : > { %3894 = vmatpush.bf16.msra.mxu3 %v4891_v35  ;;  %v4864_v44 = vld [vmem:[%s5782_s14 + $0x20] sm:$0xff]  ;;  %v4863_v48 = vld [vmem:[%s5782_s14 + $0x18] sm:$0xff]  ;;  %v4862_v52 = vld [vmem:[%s5782_s14 + $0x10] sm:$0xff] }
 0x144   : > { %3856 = vmatpush.bf16.msra.mxu0 %v4866_v36  ;;  %v4872_v45 = vld [vmem:[%s5782_s14 + $0x60] sm:$0xff]  ;;  %v4871_v49 = vld [vmem:[%s5782_s14 + $0x58] sm:$0xff]  ;;  %v4870_v53 = vld [vmem:[%s5782_s14 + $0x50] sm:$0xff] }
 0x145   : > { %3869 = vmatpush.bf16.msra.mxu1 %v4874_v37  ;;  %v4880_v46 = vld [vmem:[%s5782_s14 + $0xa0] sm:$0xff]  ;;  %v4879_v50 = vld [vmem:[%s5782_s14 + $0x98] sm:$0xff]  ;;  %v4878_v54 = vld [vmem:[%s5782_s14 + $0x90] sm:$0xff] }
 0x146   : > { %3882 = vmatpush.bf16.msra.mxu2 %v4882_v38  ;;  %v4888_v47 = vld [vmem:[%s5782_s14 + $0xe0] sm:$0xff]  ;;  %v4887_v51 = vld [vmem:[%s5782_s14 + $0xd8] sm:$0xff]  ;;  %v4886_v55 = vld [vmem:[%s5782_s14 + $0xd0] sm:$0xff] }
 0x147   : > { %3895 = vmatpush.bf16.msra.mxu3 %v4890_v39  ;;  %v4861_v56 = vld [vmem:[%s5782_s14 + $0x8] sm:$0xff]  ;;  %v2631_v58 = vld [vmem:[%s6000_s0] sm:$0xff]  ;;  %v4899_v3 = vld [vmem:[%s5782_s14 + $0x138] sm:$0xff] }
 0x148   : > { %3857 = vmatpush.bf16.msra.mxu0 %v4865_v40  ;;  %v4869_v57 = vld [vmem:[%s5782_s14 + $0x48] sm:$0xff]  ;;  %v2937_v62 = vunpack.c.l.b16 %v2631_v58  ;;  %v4860_v63 = vld [vmem:[%s5782_s14] sm:$0xff]  ;;  %v2938_v4 = vunpack.c.h.b16 %v2631_v58  ;;  %v4907_v5 = vld [vmem:[%s5782_s14 + $0x178] sm:$0xff] }
 0x149   : > { %3870 = vmatpush.bf16.msra.mxu1 %v4873_v41  ;;  %v4877_v59 = vld [vmem:[%s5782_s14 + $0x88] sm:$0xff]  ;;  %v4868_v0 = vld [vmem:[%s5782_s14 + $0x40] sm:$0xff]  ;;  %v4915_v6 = vld [vmem:[%s5782_s14 + $0x1b8] sm:$0xff] }
 0x14a   : > { %3883 = vmatpush.bf16.msra.mxu2 %v4881_v42  ;;  %v4885_v60 = vld [vmem:[%s5782_s14 + $0xc8] sm:$0xff]  ;;  %v4876_v2 = vld [vmem:[%s5782_s14 + $0x80] sm:$0xff]  ;;  %v2955_v8 = vpack.c.b16 %v2937_v62, %v2937_v62  ;;  %v4923_v10 = vld [vmem:[%s5782_s14 + $0x1f8] sm:$0xff]  ;;  %v2956_v13 = vpack.c.b16 %v2938_v4, %v2938_v4 }
 0x14b   : > { %3896 = vmatpush.bf16.msra.mxu3 %v4889_v43  ;;  %v2632_v61 = vld [vmem:[%s6000_s0 + $0x8] sm:$0xff]  ;;  %v4884_v7 = vld [vmem:[%s5782_s14 + $0xc0] sm:$0xff]  ;;  %v4898_v12 = vld [vmem:[%s5782_s14 + $0x130] sm:$0xff] }
 0x14c   : > { %3858 = vmatpush.bf16.msra.mxu0 %v4864_v44  ;;  %v2939_v1 = vunpack.c.l.b16 %v2632_v61  ;;  %v2940_v9 = vunpack.c.h.b16 %v2632_v61  ;;  %v4906_v14 = vld [vmem:[%s5782_s14 + $0x170] sm:$0xff]  ;;  %v4897_v18 = vld [vmem:[%s5782_s14 + $0x128] sm:$0xff]  ;;  %v4896_v22 = vld [vmem:[%s5782_s14 + $0x120] sm:$0xff] }
 0x14d   : > { %3871 = vmatpush.bf16.msra.mxu1 %v4872_v45  ;;  %v4914_v15 = vld [vmem:[%s5782_s14 + $0x1b0] sm:$0xff]  ;;  %v4905_v19 = vld [vmem:[%s5782_s14 + $0x168] sm:$0xff]  ;;  %v4904_v23 = vld [vmem:[%s5782_s14 + $0x160] sm:$0xff] }
 0x14e   : > { %3884 = vmatpush.bf16.msra.mxu2 %v4880_v46  ;;  %v2957_v11 = vpack.c.b16 %v2939_v1, %v2939_v1  ;;  %v2958_v16 = vpack.c.b16 %v2940_v9, %v2940_v9  ;;  %v4922_v17 = vld [vmem:[%s5782_s14 + $0x1f0] sm:$0xff]  ;;  %v4913_v20 = vld [vmem:[%s5782_s14 + $0x1a8] sm:$0xff]  ;;  %v4912_v24 = vld [vmem:[%s5782_s14 + $0x1a0] sm:$0xff] }
 0x14f   : > { %3897 = vmatpush.bf16.msra.mxu3 %v4888_v47  ;;  %v4921_v21 = vld [vmem:[%s5782_s14 + $0x1e8] sm:$0xff]  ;;  %v4920_v25 = vld [vmem:[%s5782_s14 + $0x1e0] sm:$0xff]  ;;  %v4895_v26 = vld [vmem:[%s5782_s14 + $0x118] sm:$0xff] }
 0x150   : > { %3859 = vmatpush.bf16.msra.mxu0 %v4863_v48  ;;  %v4903_v27 = vld [vmem:[%s5782_s14 + $0x158] sm:$0xff]  ;;  %v4894_v30 = vld [vmem:[%s5782_s14 + $0x110] sm:$0xff]  ;;  %v4893_v34 = vld [vmem:[%s5782_s14 + $0x108] sm:$0xff] }
 0x151   : > { %3872 = vmatpush.bf16.msra.mxu1 %v4871_v49  ;;  %v4911_v28 = vld [vmem:[%s5782_s14 + $0x198] sm:$0xff]  ;;  %v4902_v31 = vld [vmem:[%s5782_s14 + $0x150] sm:$0xff]  ;;  %v4901_v35 = vld [vmem:[%s5782_s14 + $0x148] sm:$0xff] }
 0x152   : > { %3885 = vmatpush.bf16.msra.mxu2 %v4879_v50  ;;  %v4919_v29 = vld [vmem:[%s5782_s14 + $0x1d8] sm:$0xff]  ;;  %v4910_v32 = vld [vmem:[%s5782_s14 + $0x190] sm:$0xff]  ;;  %v4909_v36 = vld [vmem:[%s5782_s14 + $0x188] sm:$0xff] }
 0x153   : > { %3898 = vmatpush.bf16.msra.mxu3 %v4887_v51  ;;  %v4918_v33 = vld [vmem:[%s5782_s14 + $0x1d0] sm:$0xff]  ;;  %v2634_v37 = vld [vmem:[%s6000_s0 + $0x18] sm:$0xff]  ;;  %v4917_v39 = vld [vmem:[%s5782_s14 + $0x1c8] sm:$0xff] }
 0x154   : > { %3860 = vmatpush.bf16.msra.mxu0 %v4862_v52  ;;  %v2633_v38 = vld [vmem:[%s6000_s0 + $0x10] sm:$0xff]  ;;  %v4892_v40 = vld [vmem:[%s5782_s14 + $0x100] sm:$0xff]  ;;  %v2943_v41 = vunpack.c.l.b16 %v2634_v37  ;;  %v4931_v46 = vld [vmem:[%s5782_s14 + $0x238] sm:$0xff]  ;;  %v2944_v50 = vunpack.c.h.b16 %v2634_v37 }
 0x155   : > { %3873 = vmatpush.bf16.msra.mxu1 %v4870_v53  ;;  %v4900_v42 = vld [vmem:[%s5782_s14 + $0x140] sm:$0xff]  ;;  %v2941_v44 = vunpack.c.l.b16 %v2633_v38  ;;  %v2942_v45 = vunpack.c.h.b16 %v2633_v38  ;;  %v4939_v47 = vld [vmem:[%s5782_s14 + $0x278] sm:$0xff]  ;;  %v4937_v61 = vld [vmem:[%s5782_s14 + $0x268] sm:$0xff] }
 0x156   : > { %3886 = vmatpush.bf16.msra.mxu2 %v4878_v54  ;;  %v4908_v43 = vld [vmem:[%s5782_s14 + $0x180] sm:$0xff]  ;;  %v4947_v48 = vld [vmem:[%s5782_s14 + $0x2b8] sm:$0xff]  ;;  %v2961_v52 = vpack.c.b16 %v2943_v41, %v2943_v41  ;;  %v2962_v58 = vpack.c.b16 %v2944_v50, %v2944_v50  ;;  %v4945_v62 = vld [vmem:[%s5782_s14 + $0x2a8] sm:$0xff] }
 0x157   : > { %3899 = vmatpush.bf16.msra.mxu3 %v4886_v55  ;;  %v4916_v49 = vld [vmem:[%s5782_s14 + $0x1c0] sm:$0xff]  ;;  %v4955_v51 = vld [vmem:[%s5782_s14 + $0x2f8] sm:$0xff]  ;;  %v2959_v53 = vpack.c.b16 %v2941_v44, %v2941_v44  ;;  %v2960_v54 = vpack.c.b16 %v2942_v45, %v2942_v45  ;;  %v4930_v55 = vld [vmem:[%s5782_s14 + $0x230] sm:$0xff] }
 0x158   : > { %3861 = vmatpush.bf16.msra.mxu0 %v4861_v56  ;;  %v4938_v56 = vld [vmem:[%s5782_s14 + $0x270] sm:$0xff]  ;;  %v4936_v1 = vld [vmem:[%s5782_s14 + $0x260] sm:$0xff]  ;;  %v4927_v4 = vld [vmem:[%s5782_s14 + $0x218] sm:$0xff] }
 0x159   : > { %3874 = vmatpush.bf16.msra.mxu1 %v4869_v57  ;;  %v4946_v57 = vld [vmem:[%s5782_s14 + $0x2b0] sm:$0xff]  ;;  %v4961_v38 = vld [vmem:[%s5782_s14 + $0x328] sm:$0xff]  ;;  %v4976_v44 = vld [vmem:[%s5782_s14 + $0x3a0] sm:$0xff] }
 0x15a   : > { %3887 = vmatpush.bf16.msra.mxu2 %v4877_v59  ;;  %v4954_v59 = vld [vmem:[%s5782_s14 + $0x2f0] sm:$0xff]  ;;  %v4985_v41 = vld [vmem:[%s5782_s14 + $0x3e8] sm:$0xff]  ;;  %v4984_v45 = vld [vmem:[%s5782_s14 + $0x3e0] sm:$0xff] }
 0x15b   : > { %3900 = vmatpush.bf16.msra.mxu3 %v4885_v60  ;;  %v4929_v60 = vld [vmem:[%s5782_s14 + $0x228] sm:$0xff]  ;;  %v4934_v9 = vld [vmem:[%s5782_s14 + $0x250] sm:$0xff] }
 0x15c   : > { %3862 = vmatpush.bf16.msra.mxu0 %v4860_v63  ;;  %v4953_v63 = vld [vmem:[%s5782_s14 + $0x2e8] sm:$0xff]  ;;  %v4986_v37 = vld [vmem:[%s5782_s14 + $0x3f0] sm:$0xff] }
 0x15d   : > { %3875 = vmatpush.bf16.msra.mxu1 %v4868_v0  ;;  %v4928_v0 = vld [vmem:[%s5782_s14 + $0x220] sm:$0xff]  ;;  %v4958_v50 = vld [vmem:[%s5782_s14 + $0x310] sm:$0xff] }
 0x15e   : > { %3888 = vmatpush.bf16.msra.mxu2 %v4876_v2  ;;  %v4944_v2 = vld [vmem:[%s5782_s14 + $0x2a0] sm:$0xff] }
 0x15f   : > { %3901 = vmatpush.bf16.msra.mxu3 %v4884_v7  ;;  %3863 = vmatmul.bf16.vlgmr.msra.gmra.mxu0 %v2955_v8  ;;  %v4951_v7 = vld [vmem:[%s5782_s14 + $0x2d8] sm:$0xff]  ;;  %v4926_v8 = vld [vmem:[%s5782_s14 + $0x210] sm:$0xff] }
 0x160   : > { %3907 = vmatpush.bf16.msrb.mxu0 %v4899_v3  ;;  %3876 = vmatmul.bf16.vlgmr.msra.gmra.mxu1 %v2956_v13  ;;  %v4952_v3 = vld [vmem:[%s5782_s14 + $0x2e0] sm:$0xff]  ;;  %v4933_v13 = vld [vmem:[%s5782_s14 + $0x248] sm:$0xff] }
 0x161   : > { %3920 = vmatpush.bf16.msrb.mxu1 %v4907_v5  ;;  %3889 = vmatmul.bf16.vlgmr.msra.gmra.mxu2 %v2957_v11  ;;  %v4935_v5 = vld [vmem:[%s5782_s14 + $0x258] sm:$0xff]  ;;  %v4950_v11 = vld [vmem:[%s5782_s14 + $0x2d0] sm:$0xff] }
 0x162   : > { %3933 = vmatpush.bf16.msrb.mxu2 %v4915_v6  ;;  %3902 = vmatmul.bf16.vlgmr.msra.gmra.mxu3 %v2958_v16  ;;  %v4943_v6 = vld [vmem:[%s5782_s14 + $0x298] sm:$0xff]  ;;  %v2636_v16 = vld [vmem:[%s6000_s0 + $0x28] sm:$0xff] }
 0x163   : > { %3946 = vmatpush.bf16.msrb.mxu3 %v4923_v10  ;;  %v4942_v10 = vld [vmem:[%s5782_s14 + $0x290] sm:$0xff] }
 0x164   : > { %3908 = vmatpush.bf16.msrb.mxu0 %v4898_v12  ;;  %v4925_v12 = vld [vmem:[%s5782_s14 + $0x208] sm:$0xff] }
 0x165   : > { %3921 = vmatpush.bf16.msrb.mxu1 %v4906_v14  ;;  %v2635_v14 = vld [vmem:[%s6000_s0 + $0x20] sm:$0xff] }
 0x166   : > { %3934 = vmatpush.bf16.msrb.mxu2 %v4914_v15  ;;  %v4941_v15 = vld [vmem:[%s5782_s14 + $0x288] sm:$0xff] }
 0x167   : > { %3947 = vmatpush.bf16.msrb.mxu3 %v4922_v17  ;;  %v4949_v17 = vld [vmem:[%s5782_s14 + $0x2c8] sm:$0xff] }
 0x168   : > { %3909 = vmatpush.bf16.msrb.mxu0 %v4897_v18  ;;  %v2945_v18 = vunpack.c.l.b16 %v2635_v14 }
 0x169   : > { %3922 = vmatpush.bf16.msrb.mxu1 %v4905_v19  ;;  %v4924_v19 = vld [vmem:[%s5782_s14 + $0x200] sm:$0xff] }
 0x16a   : > { %3935 = vmatpush.bf16.msrb.mxu2 %v4913_v20  ;;  %v4932_v20 = vld [vmem:[%s5782_s14 + $0x240] sm:$0xff] }
 0x16b   : > { %3948 = vmatpush.bf16.msrb.mxu3 %v4921_v21  ;;  %v2947_v21 = vunpack.c.l.b16 %v2636_v16 }
 0x16c   : > { %3910 = vmatpush.bf16.msrb.mxu0 %v4896_v22  ;;  %v4940_v22 = vld [vmem:[%s5782_s14 + $0x280] sm:$0xff] }
 0x16d   : > { %3923 = vmatpush.bf16.msrb.mxu1 %v4904_v23  ;;  %v4963_v23 = vld [vmem:[%s5782_s14 + $0x338] sm:$0xff] }
 0x16e   : > { %3936 = vmatpush.bf16.msrb.mxu2 %v4912_v24  ;;  %v2946_v24 = vunpack.c.h.b16 %v2635_v14  ;;  %v4992_v14 = vld [vmem:[%s5782_s14 + $0x420] sm:$0xff] }
 0x16f   : > { %3949 = vmatpush.bf16.msrb.mxu3 %v4920_v25  ;;  %v4971_v25 = vld [vmem:[%s5782_s14 + $0x378] sm:$0xff] }
 0x170   : > { %3911 = vmatpush.bf16.msrb.mxu0 %v4895_v26  ;;  %v4979_v26 = vld [vmem:[%s5782_s14 + $0x3b8] sm:$0xff] }
 0x171   : > { %3924 = vmatpush.bf16.msrb.mxu1 %v4903_v27  ;;  %v2948_v27 = vunpack.c.h.b16 %v2636_v16  ;;  %v4991_v16 = vld [vmem:[%s5782_s14 + $0x418] sm:$0xff] }
 0x172   : > { %3937 = vmatpush.bf16.msrb.mxu2 %v4911_v28  ;;  %v4948_v28 = vld [vmem:[%s5782_s14 + $0x2c0] sm:$0xff] }
 0x173   : > { %3950 = vmatpush.bf16.msrb.mxu3 %v4919_v29  ;;  %v2963_v29 = vpack.c.b16 %v2945_v18, %v2945_v18  ;;  %v4990_v18 = vld [vmem:[%s5782_s14 + $0x410] sm:$0xff] }
 0x174   : > { %3912 = vmatpush.bf16.msrb.mxu0 %v4894_v30  ;;  %v2965_v30 = vpack.c.b16 %v2947_v21, %v2947_v21  ;;  %v2639_v21 = vld [vmem:[%s6000_s0 + $0x40] sm:$0xff] }
 0x175   : > { %3925 = vmatpush.bf16.msrb.mxu1 %v4902_v31  ;;  %v4987_v31 = vld [vmem:[%s5782_s14 + $0x3f8] sm:$0xff] }
 0x176   : > { %3938 = vmatpush.bf16.msrb.mxu2 %v4910_v32  ;;  %v2964_v32 = vpack.c.b16 %v2946_v24, %v2946_v24  ;;  %v4988_v24 = vld [vmem:[%s5782_s14 + $0x400] sm:$0xff] }
 0x177   : > { %3951 = vmatpush.bf16.msrb.mxu3 %v4918_v33  ;;  %v4962_v33 = vld [vmem:[%s5782_s14 + $0x330] sm:$0xff] }
 0x178   : > { %3913 = vmatpush.bf16.msrb.mxu0 %v4893_v34  ;;  %v2966_v34 = vpack.c.b16 %v2948_v27, %v2948_v27 }
 0x179   : > { %3926 = vmatpush.bf16.msrb.mxu1 %v4901_v35  ;;  %v4970_v35 = vld [vmem:[%s5782_s14 + $0x370] sm:$0xff] }
 0x17a   : > { %3939 = vmatpush.bf16.msrb.mxu2 %v4909_v36  ;;  %v4978_v36 = vld [vmem:[%s5782_s14 + $0x3b0] sm:$0xff] }
 0x17b   : > { %3952 = vmatpush.bf16.msrb.mxu3 %v4917_v39  ;;  %v4969_v39 = vld [vmem:[%s5782_s14 + $0x368] sm:$0xff] }
 0x17c   : > { %3914 = vmatpush.bf16.msrb.mxu0 %v4892_v40  ;;  %v4977_v40 = vld [vmem:[%s5782_s14 + $0x3a8] sm:$0xff] }
 0x17d   : > { %3927 = vmatpush.bf16.msrb.mxu1 %v4900_v42  ;;  %v4960_v42 = vld [vmem:[%s5782_s14 + $0x320] sm:$0xff] }
 0x17e   : > { %3940 = vmatpush.bf16.msrb.mxu2 %v4908_v43  ;;  %v4968_v43 = vld [vmem:[%s5782_s14 + $0x360] sm:$0xff] }
 0x17f   : > { %3953 = vmatpush.bf16.msrb.mxu3 %v4916_v49  ;;  %3915 = vmatmul.bf16.vlgmr.msrb.gmra.mxu0 %v2959_v53  ;;  %v4983_v49 = vld [vmem:[%s5782_s14 + $0x3d8] sm:$0xff]  ;;  %v4982_v53 = vld [vmem:[%s5782_s14 + $0x3d0] sm:$0xff] }
 0x180   : > { %3959 = vmatpush.bf16.msra.mxu0 %v4931_v46  ;;  %3928 = vmatmul.bf16.vlgmr.msrb.gmra.mxu1 %v2960_v54  ;;  %v4959_v46 = vld [vmem:[%s5782_s14 + $0x318] sm:$0xff]  ;;  %v4957_v54 = vld [vmem:[%s5782_s14 + $0x308] sm:$0xff] }
 0x181   : > { %3972 = vmatpush.bf16.msra.mxu1 %v4939_v47  ;;  %3941 = vmatmul.bf16.vlgmr.msrb.gmra.mxu2 %v2961_v52  ;;  %v4967_v47 = vld [vmem:[%s5782_s14 + $0x358] sm:$0xff]  ;;  %v4974_v52 = vld [vmem:[%s5782_s14 + $0x390] sm:$0xff] }
 0x182   : > { %3985 = vmatpush.bf16.msra.mxu2 %v4947_v48  ;;  %3954 = vmatmul.bf16.vlgmr.msrb.gmra.mxu3 %v2962_v58  ;;  %v4975_v48 = vld [vmem:[%s5782_s14 + $0x398] sm:$0xff] }
 0x183   : > { %3998 = vmatpush.bf16.msra.mxu3 %v4955_v51  ;;  %v4966_v51 = vld [vmem:[%s5782_s14 + $0x350] sm:$0xff]  ;;  %v2638_v58 = vld [vmem:[%s6000_s0 + $0x38] sm:$0xff] }
 0x184   : > { %3960 = vmatpush.bf16.msra.mxu0 %v4930_v55  ;;  %v2637_v55 = vld [vmem:[%s6000_s0 + $0x30] sm:$0xff] }
 0x185   : > { %3973 = vmatpush.bf16.msra.mxu1 %v4938_v56  ;;  %v4965_v56 = vld [vmem:[%s5782_s14 + $0x348] sm:$0xff] }
 0x186   : > { %3986 = vmatpush.bf16.msra.mxu2 %v4946_v57  ;;  %v4973_v57 = vld [vmem:[%s5782_s14 + $0x388] sm:$0xff] }
 0x187   : > { %3999 = vmatpush.bf16.msra.mxu3 %v4954_v59  ;;  %v4981_v59 = vld [vmem:[%s5782_s14 + $0x3c8] sm:$0xff] }
 0x188   : > { %3961 = vmatpush.bf16.msra.mxu0 %v4929_v60  ;;  %v2949_v60 = vunpack.c.l.b16 %v2637_v55 }
 0x189   : > { %3974 = vmatpush.bf16.msra.mxu1 %v4937_v61  ;;  %v4956_v61 = vld [vmem:[%s5782_s14 + $0x300] sm:$0xff] }
 0x18a   : > { %3987 = vmatpush.bf16.msra.mxu2 %v4945_v62  ;;  %v2950_v62 = vunpack.c.h.b16 %v2637_v55 }
 0x18b   : > { %4000 = vmatpush.bf16.msra.mxu3 %v4953_v63  ;;  %v4964_v63 = vld [vmem:[%s5782_s14 + $0x340] sm:$0xff] }
 0x18c   : > { %3962 = vmatpush.bf16.msra.mxu0 %v4928_v0  ;;  %v4995_v0 = vld [vmem:[%s5782_s14 + $0x438] sm:$0xff] }
 0x18d   : > { %3975 = vmatpush.bf16.msra.mxu1 %v4936_v1  ;;  %v2951_v1 = vunpack.c.l.b16 %v2638_v58 }
 0x18e   : > { %3988 = vmatpush.bf16.msra.mxu2 %v4944_v2  ;;  %v4972_v2 = vld [vmem:[%s5782_s14 + $0x380] sm:$0xff] }
 0x18f   : > { %4001 = vmatpush.bf16.msra.mxu3 %v4952_v3  ;;  %v5003_v3 = vld [vmem:[%s5782_s14 + $0x478] sm:$0xff] }
 0x190   : > { %3963 = vmatpush.bf16.msra.mxu0 %v4927_v4  ;;  %v2952_v4 = vunpack.c.h.b16 %v2638_v58 }
 0x191   : > { %3976 = vmatpush.bf16.msra.mxu1 %v4935_v5  ;;  %v4980_v5 = vld [vmem:[%s5782_s14 + $0x3c0] sm:$0xff] }
 0x192   : > { %3989 = vmatpush.bf16.msra.mxu2 %v4943_v6  ;;  %v2967_v6 = vpack.c.b16 %v2949_v60, %v2949_v60 }
 0x193   : > { %4002 = vmatpush.bf16.msra.mxu3 %v4951_v7  ;;  %v2968_v7 = vpack.c.b16 %v2950_v62, %v2950_v62 }
 0x194   : > { %3964 = vmatpush.bf16.msra.mxu0 %v4926_v8  ;;  %v2969_v8 = vpack.c.b16 %v2951_v1, %v2951_v1 }
 0x195   : > { %3977 = vmatpush.bf16.msra.mxu1 %v4934_v9  ;;  %v4994_v9 = vld [vmem:[%s5782_s14 + $0x430] sm:$0xff] }
 0x196   : > { %3990 = vmatpush.bf16.msra.mxu2 %v4942_v10  ;;  %v2970_v10 = vpack.c.b16 %v2952_v4, %v2952_v4 }
 0x197   : > { %4003 = vmatpush.bf16.msra.mxu3 %v4950_v11  ;;  %v5002_v11 = vld [vmem:[%s5782_s14 + $0x470] sm:$0xff] }
 0x198   : > { %3965 = vmatpush.bf16.msra.mxu0 %v4925_v12  ;;  %v4993_v12 = vld [vmem:[%s5782_s14 + $0x428] sm:$0xff] }
 0x199   : > { %3978 = vmatpush.bf16.msra.mxu1 %v4933_v13  ;;  %v5001_v13 = vld [vmem:[%s5782_s14 + $0x468] sm:$0xff] }
 0x19a   : > { %3991 = vmatpush.bf16.msra.mxu2 %v4941_v15  ;;  %v5000_v15 = vld [vmem:[%s5782_s14 + $0x460] sm:$0xff] }
 0x19b   : > { %4004 = vmatpush.bf16.msra.mxu3 %v4949_v17  ;;  %v4999_v17 = vld [vmem:[%s5782_s14 + $0x458] sm:$0xff] }
 0x19c   : > { %3966 = vmatpush.bf16.msra.mxu0 %v4924_v19  ;;  %v4998_v19 = vld [vmem:[%s5782_s14 + $0x450] sm:$0xff] }
 0x19d   : > { %3979 = vmatpush.bf16.msra.mxu1 %v4932_v20  ;;  %v4989_v20 = vld [vmem:[%s5782_s14 + $0x408] sm:$0xff] }
 0x19e   : > { %3992 = vmatpush.bf16.msra.mxu2 %v4940_v22  ;;  %v4997_v22 = vld [vmem:[%s5782_s14 + $0x448] sm:$0xff] }
 0x19f   : > { %4005 = vmatpush.bf16.msra.mxu3 %v4948_v28  ;;  %3967 = vmatmul.bf16.vlgmr.msra.gmra.mxu0 %v2963_v29 }
 0x1a0   : > { %4011 = vmatpush.bf16.msrb.mxu0 %v4963_v23  ;;  %3980 = vmatmul.bf16.vlgmr.msra.gmra.mxu1 %v2964_v32  ;;  %v2953_v23 = vunpack.c.l.b16 %v2639_v21 }
 0x1a1   : > { %4024 = vmatpush.bf16.msrb.mxu1 %v4971_v25  ;;  %3993 = vmatmul.bf16.vlgmr.msra.gmra.mxu2 %v2965_v30  ;;  %v2954_v25 = vunpack.c.h.b16 %v2639_v21 }
 0x1a2   : > { %4037 = vmatpush.bf16.msrb.mxu2 %v4979_v26  ;;  %4006 = vmatmul.bf16.vlgmr.msra.gmra.mxu3 %v2966_v34  ;;  %v4996_v26 = vld [vmem:[%s5782_s14 + $0x440] sm:$0xff]  ;;  %v2971_v27 = vpack.c.b16 %v2953_v23, %v2953_v23  ;;  %s2622_s14 = scalar_select %p2621_p13, %s5162_s22, 1 }
 0x1a3   : > { %4050 = vmatpush.bf16.msrb.mxu3 %v4987_v31  ;;  %v2972_v28 = vpack.c.b16 %v2954_v25, %v2954_v25  ;;  %s4140_s22 = scalar_lea.sflag [#allocation4], %s5779_s12 }
 0x1a4   : > { %4012 = vmatpush.bf16.msrb.mxu0 %v4962_v33  ;;  %s2623_s30 = scalar_lea.vmem %s6002_s2, %s2622_s14  ;;  %s2626_s8 = scalar_lea.vmem %s6003_s3, %s2622_s14 }
 0x1a5   : > { %4025 = vmatpush.bf16.msrb.mxu1 %v4970_v35  ;;  %s4279_s11 = sshll.u32 %s2622_s14, 3  ;;  %s5061_s14 = sshra.s32 %s4158_s6, 4  ;;  %s5062_s14 = int_to_ptr.hbm [resolvable:$true] %s5061_s14 }
 0x1a6   : > { %4038 = vmatpush.bf16.msrb.mxu2 %v4978_v36  ;;  %s2630_s25 = scalar_lea.vmem %s6004_s4, %s4279_s11  ;;  %s5063_s7 = scalar_lea.hbm %s5062_s14, 4 }
 0x1a7   : > { %4051 = vmatpush.bf16.msrb.mxu3 %v4986_v37  ;;  %p5064_p0 = scmp.ne.s32.totalorder %s5062_s14, %s5063_s7  ;;  %p5068_p3 = scmp.lt.s32.totalorder %s5062_s14, %s6005_s5 }
 0x1a8   : > { %4013 = vmatpush.bf16.msrb.mxu0 %v4961_v38  ;;  %p5069_p4 = scmp.lt.s32.totalorder %s5067_s9, %s5063_s7 }
 0x1a9   : > { %4026 = vmatpush.bf16.msrb.mxu1 %v4969_v39  ;;  %p5065_p1 = pnand %p5064_p0, %p5180_p6 }
 0x1aa   : > { %4039 = vmatpush.bf16.msrb.mxu2 %v4977_v40  ;;  %p5070_p5 = por %p5069_p4, %p5068_p3 }
 0x1ab   : > { %4052 = vmatpush.bf16.msrb.mxu3 %v4985_v41  ;;  %p5066_p2 = pneg %p5065_p1 }
 0x1ac   : > { %4014 = vmatpush.bf16.msrb.mxu0 %v4960_v42 }
 0x1ad   : > { %4027 = vmatpush.bf16.msrb.mxu1 %v4968_v43  ;;  %p5071_p7 = pnand %p5070_p5, %p5066_p2 }
 0x1ae   : > { %4040 = vmatpush.bf16.msrb.mxu2 %v4976_v44 }
 0x1af   : > { %4053 = vmatpush.bf16.msrb.mxu3 %v4984_v45 }
 0x1b0   : > { %4015 = vmatpush.bf16.msrb.mxu0 %v4959_v46 }
 0x1b1   : > { %4028 = vmatpush.bf16.msrb.mxu1 %v4967_v47 }
 0x1b2   : > { %4041 = vmatpush.bf16.msrb.mxu2 %v4975_v48 }
 0x1b3   : > { %4054 = vmatpush.bf16.msrb.mxu3 %v4983_v49 }
 0x1b4   : > { %4016 = vmatpush.bf16.msrb.mxu0 %v4958_v50 }
 0x1b5   : > { %4029 = vmatpush.bf16.msrb.mxu1 %v4966_v51 }
 0x1b6   : > { %4042 = vmatpush.bf16.msrb.mxu2 %v4974_v52 }
 0x1b7   : > { %4055 = vmatpush.bf16.msrb.mxu3 %v4982_v53 }
 0x1b8   : > { %4017 = vmatpush.bf16.msrb.mxu0 %v4957_v54 }
 0x1b9   : > { %4030 = vmatpush.bf16.msrb.mxu1 %v4965_v56 }
 0x1ba   : > { %4043 = vmatpush.bf16.msrb.mxu2 %v4973_v57 }
 0x1bb   : > { %4056 = vmatpush.bf16.msrb.mxu3 %v4981_v59 }
 0x1bc   : > { %4018 = vmatpush.bf16.msrb.mxu0 %v4956_v61 }
 0x1bd   : > { %4031 = vmatpush.bf16.msrb.mxu1 %v4964_v63 }
 0x1be   : > { %4044 = vmatpush.bf16.msrb.mxu2 %v4972_v2 }
 0x1bf   : > { %4057 = vmatpush.bf16.msrb.mxu3 %v4980_v5  ;;  %4019 = vmatmul.bf16.vlgmr.msrb.gmra.mxu0 %v2967_v6 }
 0x1c0   : > { %4063 = vmatpush.bf16.msra.mxu0 %v4995_v0  ;;  %4032 = vmatmul.bf16.vlgmr.msrb.gmra.mxu1 %v2968_v7 }
 0x1c1   : > { %4076 = vmatpush.bf16.msra.mxu1 %v5003_v3  ;;  %4045 = vmatmul.bf16.vlgmr.msrb.gmra.mxu2 %v2969_v8 }
 0x1c2   : > { %4058 = vmatmul.bf16.vlgmr.msrb.gmra.mxu3 %v2970_v10 }
 0x1c4   : > { %4064 = vmatpush.bf16.msra.mxu0 %v4994_v9 }
 0x1c5   : > { %4077 = vmatpush.bf16.msra.mxu1 %v5002_v11 }
 0x1c8   : > { %4065 = vmatpush.bf16.msra.mxu0 %v4993_v12 }
 0x1c9   : > { %4078 = vmatpush.bf16.msra.mxu1 %v5001_v13 }
 0x1cc   : > { %4066 = vmatpush.bf16.msra.mxu0 %v4992_v14 }
 0x1cd   : > { %4079 = vmatpush.bf16.msra.mxu1 %v5000_v15 }
 0x1d0   : > { %4067 = vmatpush.bf16.msra.mxu0 %v4991_v16 }
 0x1d1   : > { %4080 = vmatpush.bf16.msra.mxu1 %v4999_v17 }
 0x1d4   : > { %4068 = vmatpush.bf16.msra.mxu0 %v4990_v18 }
 0x1d5   : > { %4081 = vmatpush.bf16.msra.mxu1 %v4998_v19 }
 0x1d8   : > { %4069 = vmatpush.bf16.msra.mxu0 %v4989_v20 }
 0x1d9   : > { %4082 = vmatpush.bf16.msra.mxu1 %v4997_v22 }
 0x1dc   : > { %4070 = vmatpush.bf16.msra.mxu0 %v4988_v24  ;;  %v3864_v29 = vpop.f32.mrf.mxu0 }
 0x1dd   : > { %4083 = vmatpush.bf16.msra.mxu1 %v4996_v26  ;;  %v3877_v30 = vpop.f32.mrf.mxu1 }
 0x1de   : > { %v3878_v31 = vadd.f32 %v3877_v30, %v3864_v29 }
 0x1df   : > { %4071 = vmatmul.bf16.vlgmr.msra.gmra.mxu0 %v2971_v27 }
 0x1e0   : > { %4084 = vmatmul.bf16.vlgmr.msra.gmra.mxu1 %v2972_v28 }
 0x1e4   : > { %v3890_v32 = vpop.f32.mrf.mxu2  ;;  %v3866_v34 = vpop.f32.mrf.mxu0 }
 0x1e5   : > { %v3891_v33 = vadd.f32 %v3890_v32, %v3878_v31  ;;  %v3903_v35 = vpop.f32.mrf.mxu3  ;;  %v3879_v36 = vpop.f32.mrf.mxu1 }
 0x1e7   : > { %v3904_v37 = vadd.f32 %v3903_v35, %v3891_v33 }
 0x1ec   : > { %v3892_v38 = vpop.f32.mrf.mxu2 }
 0x1ed   : > { %v3905_v39 = vpop.f32.mrf.mxu3 }
 0x1fc   : > { %v3916_v40 = vpop.f32.mrf.mxu0 }
 0x1fd   : > { %v3929_v41 = vpop.f32.mrf.mxu1  ;;  %v3917_v56 = vadd.f32 %v3916_v40, %v3904_v37 }
 0x1ff   : > { %v3930_v57 = vadd.f32 %v3929_v41, %v3917_v56  ;;  %v4116_v41 = vld [vmem:[%s2623_s30] sm:$0x1]  ;;  %s4155_s30 = sshll.u32 %s2620_s26, 4  ;;  %s4156_s30 = int_to_ptr.vmem [resolvable:$true] %s4155_s30 }
 0x204   : > { %v3942_v42 = vpop.f32.mrf.mxu2  ;;  %v3918_v44 = vpop.f32.mrf.mxu0 }
 0x205   : > { %v3955_v43 = vpop.f32.mrf.mxu3  ;;  %v3931_v45 = vpop.f32.mrf.mxu1  ;;  %v3943_v58 = vadd.f32 %v3942_v42, %v3930_v57  ;;  %v4118_v44 = vld [vmem:[%s2626_s8] sm:$0x1] }
 0x207   : > { %v3956_v61 = vadd.f32 %v3955_v43, %v3943_v58 }
 0x20c   : > { %v3944_v46 = vpop.f32.mrf.mxu2 }
 0x20d   : > { %v3957_v47 = vpop.f32.mrf.mxu3 }
 0x21c   : > { %v3968_v48 = vpop.f32.mrf.mxu0 }
 0x21d   : > { %v3981_v49 = vpop.f32.mrf.mxu1  ;;  %v3969_v62 = vadd.f32 %v3968_v48, %v3956_v61 }
 0x21f   : > { %v3982_v3 = vadd.f32 %v3981_v49, %v3969_v62 }
 0x224   : > { %v3994_v50 = vpop.f32.mrf.mxu2  ;;  %v3970_v51 = vpop.f32.mrf.mxu0 }
 0x225   : > { %v4007_v52 = vpop.f32.mrf.mxu3  ;;  %v3983_v53 = vpop.f32.mrf.mxu1  ;;  %v3995_v4 = vadd.f32 %v3994_v50, %v3982_v3 }
 0x227   : > { %v4008_v5 = vadd.f32 %v4007_v52, %v3995_v4 }
 0x22c   : > { %v3996_v54 = vpop.f32.mrf.mxu2 }
 0x22d   : > { %v4009_v55 = vpop.f32.mrf.mxu3 }
 0x23c   : > { %v4020_v59 = vpop.f32.mrf.mxu0 }
 0x23d   : > { %v4033_v60 = vpop.f32.mrf.mxu1  ;;  %v4021_v8 = vadd.f32 %v4020_v59, %v4008_v5 }
 0x23f   : > { %v4034_v9 = vadd.f32 %v4033_v60, %v4021_v8 }
 0x244   : > { %v4046_v63 = vpop.f32.mrf.mxu2  ;;  %v4022_v0 = vpop.f32.mrf.mxu0 }
 0x245   : > { %v4059_v1 = vpop.f32.mrf.mxu3  ;;  %v4035_v2 = vpop.f32.mrf.mxu1  ;;  %v4047_v10 = vadd.f32 %v4046_v63, %v4034_v9 }
 0x247   : > { %v4060_v11 = vadd.f32 %v4059_v1, %v4047_v10 }
 0x24c   : > { %v4048_v6 = vpop.f32.mrf.mxu2 }
 0x24d   : > { %v4061_v7 = vpop.f32.mrf.mxu3 }
 0x25c   : > { %v4072_v12 = vpop.f32.mrf.mxu0 }
 0x25d   : > { %v4073_v13 = vadd.f32 %v4072_v12, %v4060_v11  ;;  %v4085_v14 = vpop.f32.mrf.mxu1 }
 0x25f   : > { %v4086_v15 = vadd.f32 %v4085_v14, %v4073_v13 }
 0x261   : > { %v4089_v16 = vrot.slane %v4086_v15, 4 }
 0x263   : > { %v4090_v17 = vadd.f32 %v4089_v16, %v4086_v15 }
 0x264   : > { %v4074_v18 = vpop.f32.mrf.mxu0 }
 0x265   : > { %v4091_v19 = vrot.slane %v4090_v17, 2  ;;  %v4087_v20 = vpop.f32.mrf.mxu1 }
 0x267   : > { %v4092_v21 = vadd.f32 %v4091_v19, %v4090_v17 }
 0x269   : > { %v4093_v22 = vrot.slane %v4092_v21, 1 }
 0x26b   : > { %v4094_v23 = vadd.f32 %v4093_v22, %v4092_v21 }
 0x26d   : > { %v4095_v24 = vmul.f32 0.125, %v4094_v23 }
 0x26f   : > { %v4096_v25 = vsub.f32 %v4086_v15, %v4095_v24 }
 0x271   : > { %v4097_v26 = vmul.f32 %v4096_v25, %v4096_v25 }
 0x273   : > { %v4098_v27 = vrot.slane %v4097_v26, 4 }
 0x275   : > { %v4099_v28 = vadd.f32 %v4098_v27, %v4097_v26 }
 0x277   : > { %v4100_v29 = vrot.slane %v4099_v28, 2 }
 0x279   : > { %v4101_v30 = vadd.f32 %v4100_v29, %v4099_v28 }
 0x27b   : > { %v4102_v31 = vrot.slane %v4101_v30, 1 }
 0x27d   : > { %v4103_v32 = vadd.f32 %v4102_v31, %v4101_v30 }
 0x27f   : > { %v4104_v33 = vmul.f32 0.125, %v4103_v32 }
 0x281   : > { %v4105_v34 = vadd.f32 1e-05, %v4104_v33 }
 0x283   : > { %5045 = vrsqrt.f32 %v4105_v34  ;;  %vm4112_vm1 = vweird.f32 %v4105_v34 }
 0x289   : > { %v5046_v35 = vpop.eup %5045 }
 0x28a   : > { %v4107_v36 = vmul.f32 %v5046_v35, %v4105_v34  ;;  %vm4113_vm0 = vweird.f32 %v5046_v35 }
 0x28b   : > { %vm4114_vm2 = vmor %vm4112_vm1, %vm4113_vm0 }
 0x28c   : > { %v4108_v37 = vmul.f32 %v5046_v35, %v4107_v36 }
 0x28e   : > { %v4109_v38 = vmul.f32 0.5, %v4108_v37 }
 0x290   : > { %v4110_v39 = vsub.f32 1.5, %v4109_v38 }
 0x292   : > { %v4111_v40 = vmul.f32 %v5046_v35, %v4110_v39 }
 0x294   : > { %v4115_v42 = vsel %vm4114_vm2, %v5046_v35, %v4111_v40 }
 0x295   : > { %v4117_v43 = vmul.f32 %v4116_v41, %v4115_v42 }
 0x297   : > { %v4119_v45 = vmul.f32 %v4117_v43, %v4095_v24  ;;  %v4122_v46 = vperm.slane %v4117_v43, 0 }
 0x299   : > { %v4120_v47 = vsub.f32 %v4118_v44, %v4119_v45  ;;  %v4124_v48 = vmul.f32 %v4122_v46, %v4086_v15 }
 0x29b   : > { %v4126_v49 = vperm.slane %v4120_v47, 0 }
 0x29d   : > { %v4128_v50 = vadd.f32 %v4126_v49, %v4124_v48 }
 0x29f   : > { %vm4129_vm3 = vcmp.ge.f32.partialorder %v4128_v50, 0.0  ;;  %v4130_v51 = vmul.f32 0.2, %v4128_v50 }
 0x2a1   : > { %v4131_v52 = vsel %vm4129_vm3, %v4128_v50, %v4130_v51 }
 0x2a2   : > { %4132 = vst [vmem:[%s2630_s25] sm:$0xff] %v4131_v52  ;;  %v4133_v53 = vpack.c.bf16 %v4131_v52, %v4131_v52 }
 0x2a4   : > { %4134 = vst [vmem:[%s2620_s26] sm:$0xf] %v4133_v53 }
 0x2a5   : > { %5074 = shalt.err (!%p5071_p7)
}
 0x2a6   : > { %5006 = dma.vmem_to_hbm [thread:$0]  (%p5180_p6), %s4156_s30, 64, %s4158_s6, %s4140_s22  }
 0x2a7 PF: > { %s4176_s12 = sand.u32 1, %s5097_s18   ;;  %p5009_p10 = pnand %p4275_p9, %p5184_p8 }
 0x2a8   : > { %s4177_s15 = scalar_lea.sflag [#allocation4], %s4176_s12 }
 0x2a9   : > { %p5010_p11 = pneg %p5009_p10 }
 0x2ab   : > { %5092 = dma.done.wait (%p5010_p11), %s4177_s15, 64  }
 0x2ac   : > { %5094 = vsyncadd (%p5010_p11), %s4177_s15, 4294967232  ;;  %p16_p12 = scmp.ge.s32.totalorder %s5166_s24, 4   ;;  %s6008_s18 = smov %s5101_s19 }
 0x2ad   : > { %s6009_s19 = smov %s5105_s20  ;;  %s6010_s20 = smov %s5178_s27 }
 0x2ae   : > { %s6011_s21 = smov %s5166_s24  ;;  %18 = sbr.rel (!%p16_p12) target bundleno = 3 (0x3), region = 150 }
 0x2b3   :  { %4183 = vsyncpa [#allocation4], 1 }
 0x2b4   :  { %4185 = vsyncpa [#allocation4 + $0x1], 1 }

</bundles_post_ra>
